<compile_context>
chip_gen: v5e
topology: v5e:2x2
jax: 0.10.0
libtpu: 0.0.40
codegen_flags: <defaults>
</compile_context>

<pallas_src>
import math
from functools import partial

import jax
import jax.numpy as jnp
from jax import lax
from jax.experimental import pallas as pl
from jax.experimental.pallas import tpu as pltpu


# ----------------------------- Pallas kernels ------------------------------

def _conv0_bn_relu_kernel(p_ref, w_ref, s_ref, b_ref, o_ref):
    # fused: (im2col patches) @ W  -> BN -> ReLU
    acc = jnp.dot(p_ref[...], w_ref[...], preferred_element_type=jnp.float32)
    o_ref[...] = jnp.maximum(acc * s_ref[...] + b_ref[...], 0.0)


def _transition_kernel(x_ref, s_ref, b_ref, w_ref, o_ref, *, H, W):
    # fused: BN -> ReLU -> 1x1 conv, one batch element per grid step
    cin = x_ref.shape[-1]
    cout = o_ref.shape[-1]
    xf = x_ref[...].reshape(H * W, cin)
    h = jnp.maximum(xf * s_ref[...] + b_ref[...], 0.0)
    o = jnp.dot(h.astype(jnp.bfloat16), w_ref[...],
                preferred_element_type=jnp.float32)
    o_ref[...] = o.reshape(H, W, cout)


def _bn_kernel(x_ref, s_ref, b_ref, o_ref):
    # inference BatchNorm, no ReLU (norm5)
    o_ref[...] = x_ref[...] * s_ref[...] + b_ref[...]


def _dense_block_kernel(x_ref, *refs, H, W, c0, growth, cmid, nlayers, dilation):
    """Whole dense block fused: each layer reads the (growing) channel prefix of the
    output buffer and writes its `growth` new channels into the next channel slice.
    refs = [6 * nlayers param refs ..., out_ref, hp_scratch_ref]."""
    params = refs[:6 * nlayers]
    out_ref = refs[6 * nlayers]
    hp_ref = refs[6 * nlayers + 1]      # (H+2d, W+2d, cmid) f32, zero-padded scratch

    d = dilation
    hw = H * W

    # zero the padded scratch once; only the interior gets overwritten per layer,
    # the halo stays zero (implements the conv's zero padding).
    hp_ref[...] = jnp.zeros(hp_ref.shape, hp_ref.dtype)

    # copy the block input channels into the wide output buffer (acts as the concat).
    out_ref[:, :, :c0] = x_ref[...]

    for l in range(nlayers):
        s1, b1, w1, s2, b2, w2 = params[6 * l:6 * l + 6]
        cin = c0 + l * growth

        # BN1 + ReLU + 1x1 conv (reads all previously produced channels)
        x = out_ref[:, :, :cin].reshape(hw, cin)
        h = jnp.maximum(x * s1[...] + b1[...], 0.0)
        h = jnp.dot(h.astype(jnp.bfloat16), w1[...],
                    preferred_element_type=jnp.float32)          # (hw, cmid)
        # BN2 + ReLU
        h = jnp.maximum(h * s2[...] + b2[...], 0.0)

        # 3x3 dilated conv: 9 shifted-slice taps of the zero-padded intermediate.
        hp_ref[d:d + H, d:d + W, :] = h.reshape(H, W, cmid)
        acc = jnp.zeros((hw, growth), jnp.float32)
        for ky in range(3):
            for kx in range(3):
                tap = hp_ref[ky * d:ky * d + H, kx * d:kx * d + W, :]
                acc = acc + jnp.dot(tap.reshape(hw, cmid).astype(jnp.bfloat16),
                                    w2[ky * 3 + kx],
                                    preferred_element_type=jnp.float32)

        out_ref[:, :, cin:cin + growth] = acc.reshape(H, W, growth)


# ----------------------------- small helpers -------------------------------

def _full_spec(shape):
    nd = len(shape)
    return pl.BlockSpec(shape, lambda i: (0,) * nd)


def bn_scale_bias(bn, eps=1e-5):
    scale = bn["gamma"] / jnp.sqrt(bn["var"] + eps)
    bias = bn["beta"] - bn["mean"] * scale
    return scale.reshape(1, -1), bias.reshape(1, -1)


def _extract_patches(x, kh, kw, stride, dilation, padding, pad_value=0.0):
    # only used once, for the 7x7 stride-2 conv0 on the 3-channel input (tiny).
    n, h, w, c = x.shape
    xp = jnp.pad(x, ((0, 0), (padding, padding), (padding, padding), (0, 0)),
                 constant_values=pad_value)
    hp, wp = h + 2 * padding, w + 2 * padding
    ho = (hp - dilation * (kh - 1) - 1) // stride + 1
    wo = (wp - dilation * (kw - 1) - 1) // stride + 1
    taps = []
    for ky in range(kh):
        for kx in range(kw):
            sl = xp[:, ky * dilation: ky * dilation + (ho - 1) * stride + 1: stride,
                       kx * dilation: kx * dilation + (wo - 1) * stride + 1: stride, :]
            taps.append(sl)
    return jnp.stack(taps, axis=3), ho, wo


# ----------------------------- Pallas wrappers ------------------------------

def conv0_bn_relu(x_nhwc, w4d, bn):
    n = x_nhwc.shape[0]
    kh, kw, cin, cout = w4d.shape
    patches, ho, wo = _extract_patches(x_nhwc, kh, kw, 2, 1, 3)
    m = n * ho * wo
    pm = patches.reshape(m, kh * kw * cin).astype(jnp.bfloat16)
    wm = w4d.reshape(kh * kw * cin, cout).astype(jnp.bfloat16)
    s, b = bn_scale_bias(bn)
    tm = m // 2 if (m % 2 == 0 and (m // 2) % 8 == 0) else m   # >=2 parallel steps (v7x)
    out = pl.pallas_call(
        _conv0_bn_relu_kernel,
        out_shape=jax.ShapeDtypeStruct((m, cout), jnp.float32),
        grid=(m // tm,),
        in_specs=[pl.BlockSpec((tm, kh * kw * cin), lambda i: (i, 0)),
                  _full_spec(wm.shape), _full_spec(s.shape), _full_spec(b.shape)],
        out_specs=pl.BlockSpec((tm, cout), lambda i: (i, 0)),
        compiler_params=pltpu.CompilerParams(dimension_semantics=("parallel",)),
    )(pm, wm, s, b)
    return out.reshape(n, ho, wo, cout)


def transition(x, bn, w4d):
    n, h, w, cin = x.shape
    cout = w4d.shape[3]
    s, b = bn_scale_bias(bn)
    wm = w4d.reshape(cin, cout).astype(jnp.bfloat16)
    return pl.pallas_call(
        partial(_transition_kernel, H=h, W=w),
        out_shape=jax.ShapeDtypeStruct((n, h, w, cout), jnp.float32),
        grid=(n,),
        in_specs=[pl.BlockSpec((None, h, w, cin), lambda i: (i, 0, 0, 0)),
                  _full_spec(s.shape), _full_spec(b.shape), _full_spec(wm.shape)],
        out_specs=pl.BlockSpec((None, h, w, cout), lambda i: (i, 0, 0, 0)),
        compiler_params=pltpu.CompilerParams(dimension_semantics=("parallel",)),
    )(x, s, b, wm)


def batchnorm(x, bn):
    n, h, w, c = x.shape
    m = n * h * w
    s, b = bn_scale_bias(bn)
    tm = m // 2 if (m % 2 == 0 and (m // 2) % 8 == 0) else m
    out = pl.pallas_call(
        _bn_kernel,
        out_shape=jax.ShapeDtypeStruct((m, c), jnp.float32),
        grid=(m // tm,),
        in_specs=[pl.BlockSpec((tm, c), lambda i: (i, 0)),
                  _full_spec(s.shape), _full_spec(b.shape)],
        out_specs=pl.BlockSpec((tm, c), lambda i: (i, 0)),
        compiler_params=pltpu.CompilerParams(dimension_semantics=("parallel",)),
    )(x.reshape(m, c), s, b)
    return out.reshape(n, h, w, c)


def dense_block(x, layers, dilation, growth, cmid):
    n, h, w, c0 = x.shape
    nl = len(layers)
    ctot = c0 + nl * growth

    flat_params = []
    in_specs = [pl.BlockSpec((None, h, w, c0), lambda i: (i, 0, 0, 0))]
    for lp in layers:
        s1, b1 = bn_scale_bias(lp["bn1"])
        s2, b2 = bn_scale_bias(lp["bn2"])
        w1 = lp["conv1"].reshape(lp["conv1"].shape[2],
                                 lp["conv1"].shape[3]).astype(jnp.bfloat16)
        w2 = lp["conv2"].reshape(9, cmid, growth).astype(jnp.bfloat16)
        for a in (s1, b1, w1, s2, b2, w2):
            flat_params.append(a)
            in_specs.append(_full_spec(a.shape))

    kernel = partial(_dense_block_kernel, H=h, W=w, c0=c0, growth=growth,
                     cmid=cmid, nlayers=nl, dilation=dilation)
    return pl.pallas_call(
        kernel,
        out_shape=jax.ShapeDtypeStruct((n, h, w, ctot), jnp.float32),
        grid=(n,),
        in_specs=in_specs,
        out_specs=pl.BlockSpec((None, h, w, ctot), lambda i: (i, 0, 0, 0)),
        scratch_shapes=[pltpu.VMEM((h + 2 * dilation, w + 2 * dilation, cmid),
                                   jnp.float32)],
        compiler_params=pltpu.CompilerParams(dimension_semantics=("parallel",)),
    )(x, *flat_params)


# ----------------------------- plain-JAX glue (pools, layout) ---------------

# TODO(synk): pool0 / 2x2 avg pools stay in plain JAX (reduce_window / reshape-mean)
# per reviewer guidance -- they are trivial memory-bound ops with no patch blowup.
def maxpool_3x3_s2(x):
    return lax.reduce_window(x, -jnp.inf, lax.max,
                             window_dimensions=(1, 3, 3, 1),
                             window_strides=(1, 2, 2, 1),
                             padding=((0, 0), (1, 1), (1, 1), (0, 0)))


def avgpool_2x2(x):
    n, h, w, c = x.shape
    return x.reshape(n, h // 2, 2, w // 2, 2, c).mean(axis=(2, 4))


# ----------------------------- backbone forward -----------------------------

def backbone_forward(x_nchw, params, dilate_scale=8, growth=8, bn_size=2):
    cmid = bn_size * growth
    x = jnp.transpose(x_nchw.astype(jnp.float32), (0, 2, 3, 1))        # -> NHWC

    x = conv0_bn_relu(x, params["conv0"], params["norm0"])             # conv0+norm0+relu0
    x = maxpool_3x3_s2(x)                                              # pool0

    if dilate_scale == 8:
        d3, d4 = 2, 4
    elif dilate_scale == 16:
        d3, d4 = 1, 2
    else:
        d3, d4 = 1, 1

    feats = []
    x = dense_block(x, params["block1"], 1, growth, cmid)
    x = transition(x, params["trans1_bn"], params["trans1_conv"])
    feats.append(x)
    x = avgpool_2x2(x)

    x = dense_block(x, params["block2"], 1, growth, cmid)
    x = transition(x, params["trans2_bn"], params["trans2_conv"])
    feats.append(x)
    if dilate_scale > 8:
        x = avgpool_2x2(x)

    x = dense_block(x, params["block3"], d3, growth, cmid)
    x = transition(x, params["trans3_bn"], params["trans3_conv"])
    feats.append(x)
    if dilate_scale > 16:
        x = avgpool_2x2(x)

    x = dense_block(x, params["block4"], d4, growth, cmid)
    x = batchnorm(x, params["norm5"])                                  # norm5 (no relu)
    feats.append(x)

    return [jnp.transpose(f, (0, 3, 1, 2)) for f in feats]             # -> NCHW


# ----------------------------- deterministic params -------------------------

def init_params(key, growth=8, bn_size=2, init_feat=16, block_config=(2, 2, 2, 2)):
    keys = iter(jax.random.split(key, 256))

    def conv(kh, kw, cin, cout):
        return jax.random.normal(next(keys), (kh, kw, cin, cout),
                                 jnp.float32) / math.sqrt(kh * kw * cin)

    def bn(c):
        return dict(
            gamma=1.0 + 0.1 * jax.random.normal(next(keys), (c,), jnp.float32),
            beta=0.1 * jax.random.normal(next(keys), (c,), jnp.float32),
            mean=0.1 * jax.random.normal(next(keys), (c,), jnp.float32),
            var=1.0 + 0.1 * jnp.abs(jax.random.normal(next(keys), (c,), jnp.float32)),
        )

    p = {"conv0": conv(7, 7, 3, init_feat), "norm0": bn(init_feat)}
    c = init_feat
    for b, nlayers in enumerate(block_config, start=1):
        layers = []
        for _ in range(nlayers):
            layers.append(dict(
                bn1=bn(c),
                conv1=conv(1, 1, c, bn_size * growth),
                bn2=bn(bn_size * growth),
                conv2=conv(3, 3, bn_size * growth, growth),
            ))
            c += growth
        p[f"block{b}"] = layers
        if b < 4:
            p[f"trans{b}_bn"] = bn(c)
            cout = c // 2
            p[f"trans{b}_conv"] = conv(1, 1, c, cout)
            c = cout
    p["norm5"] = bn(c)
    return p


# ----------------------------- main -----------------------------------------

if __name__ == "__main__":
    key = jax.random.PRNGKey(0)
    pkey, xkey = jax.random.split(key)
    params = init_params(pkey)
    # small input consistent with the module (NCHW, 3 channels)
    x = jax.random.normal(xkey, (2, 3, 32, 32), jnp.float32)

    fwd = jax.jit(backbone_forward)
    feats = fwd(x, params)
    for f in feats:
        jax.block_until_ready(f)

    expected = [(2, 16, 8, 8), (2, 16, 4, 4), (2, 16, 4, 4), (2, 32, 4, 4)]
    assert [tuple(f.shape) for f in feats] == expected, \
        f"unexpected shapes: {[f.shape for f in feats]}"
    assert all(bool(jnp.isfinite(f).all()) for f in feats)

    print("KERNEL_OK")
</pallas_src>

<mosaic_0001>
module attributes {stable_mosaic.version = 11 : i64} {
  func.func @_conv0_bn_relu_kernel(%arg0: i32, %arg1: memref<256x147xbf16, #tpu.memory_space<vmem>>, %arg2: memref<147x16xbf16, #tpu.memory_space<vmem>>, %arg3: memref<1x16xf32, #tpu.memory_space<vmem>>, %arg4: memref<1x16xf32, #tpu.memory_space<vmem>>, %arg5: memref<256x16xf32, #tpu.memory_space<vmem>>) attributes {dimension_semantics = [#tpu.dimension_semantics<parallel>], iteration_bounds = array<i64: 2>, scalar_prefetch = 0 : i64, scratch_operands = 0 : i64, tpu.core_type = #tpu.core_type<tc>, window_params = [{transform_indices = @transform_0, window_bounds = array<i64: 256, 147>}, {pipeline_mode = #tpu.pipeline_mode<synchronous>, transform_indices = @transform_1, window_bounds = array<i64: 147, 16>}, {pipeline_mode = #tpu.pipeline_mode<synchronous>, transform_indices = @transform_2, window_bounds = array<i64: 1, 16>}, {pipeline_mode = #tpu.pipeline_mode<synchronous>, transform_indices = @transform_3, window_bounds = array<i64: 1, 16>}, {transform_indices = @transform_4, window_bounds = array<i64: 256, 16>}]} {
    %c0 = arith.constant 0 : index
    %c0_0 = arith.constant 0 : index
    %0 = vector.load %arg1[%c0, %c0_0] : memref<256x147xbf16, #tpu.memory_space<vmem>>, vector<256x147xbf16>
    %c0_1 = arith.constant 0 : index
    %c0_2 = arith.constant 0 : index
    %1 = vector.load %arg2[%c0_1, %c0_2] : memref<147x16xbf16, #tpu.memory_space<vmem>>, vector<147x16xbf16>
    %cst = arith.constant dense<0.000000e+00> : vector<256x16xf32>
    %2 = tpu.matmul %0, %1, %cst {dimension_numbers = #tpu.dot_dimension_numbers<[1], [0], [0], [1], [0, 0, 1, 1], [], []>} : vector<256x147xbf16>, vector<147x16xbf16>, vector<256x16xf32> -> vector<256x16xf32>
    %c0_3 = arith.constant 0 : index
    %c0_4 = arith.constant 0 : index
    %3 = vector.load %arg3[%c0_3, %c0_4] : memref<1x16xf32, #tpu.memory_space<vmem>>, vector<1x16xf32>
    %4 = vector.broadcast %3 : vector<1x16xf32> to vector<256x16xf32>
    %5 = arith.mulf %2, %4 : vector<256x16xf32>
    %c0_5 = arith.constant 0 : index
    %c0_6 = arith.constant 0 : index
    %6 = vector.load %arg4[%c0_5, %c0_6] : memref<1x16xf32, #tpu.memory_space<vmem>>, vector<1x16xf32>
    %7 = vector.broadcast %6 : vector<1x16xf32> to vector<256x16xf32>
    %8 = arith.addf %5, %7 : vector<256x16xf32>
    %cst_7 = arith.constant 0.000000e+00 : f32
    %9 = vector.broadcast %cst_7 : f32 to vector<256x16xf32>
    %10 = arith.maximumf %8, %9 : vector<256x16xf32>
    %c0_8 = arith.constant 0 : index
    %c0_9 = arith.constant 0 : index
    %11 = vector.load %arg5[%c0_8, %c0_9] : memref<256x16xf32, #tpu.memory_space<vmem>>, vector<256x16xf32>
    tpu.vector_store %arg5[%c0_8, %c0_9], %10 {strides = array<i32>} : memref<256x16xf32, #tpu.memory_space<vmem>>, vector<256x16xf32>,
    return
  }
  func.func @transform_0(%arg0: i32) -> (i32, i32) {
    %c0_i32 = arith.constant 0 : i32
    %c0_i32_0 = arith.constant 0 : i32
    return %arg0, %c0_i32 : i32, i32
  }
  func.func @transform_1(%arg0: i32) -> (i32, i32) {
    %c0_i32 = arith.constant 0 : i32
    %c0_i32_0 = arith.constant 0 : i32
    %c0_i32_1 = arith.constant 0 : i32
    return %c0_i32, %c0_i32_0 : i32, i32
  }
  func.func @transform_2(%arg0: i32) -> (i32, i32) {
    %c0_i32 = arith.constant 0 : i32
    %c0_i32_0 = arith.constant 0 : i32
    %c0_i32_1 = arith.constant 0 : i32
    return %c0_i32, %c0_i32_0 : i32, i32
  }
  func.func @transform_3(%arg0: i32) -> (i32, i32) {
    %c0_i32 = arith.constant 0 : i32
    %c0_i32_0 = arith.constant 0 : i32
    %c0_i32_1 = arith.constant 0 : i32
    return %c0_i32, %c0_i32_0 : i32, i32
  }
  func.func @transform_4(%arg0: i32) -> (i32, i32) {
    %c0_i32 = arith.constant 0 : i32
    %c0_i32_0 = arith.constant 0 : i32
    return %arg0, %c0_i32 : i32, i32
  }
}

module attributes {stable_mosaic.version = 11 : i64} {
  func.func @_dense_block_kernel(%arg0: i32, %arg1: memref<1x8x8x16xf32, #tpu.memory_space<vmem>>, %arg2: memref<1x16xf32, #tpu.memory_space<vmem>>, %arg3: memref<1x16xf32, #tpu.memory_space<vmem>>, %arg4: memref<16x16xbf16, #tpu.memory_space<vmem>>, %arg5: memref<1x16xf32, #tpu.memory_space<vmem>>, %arg6: memref<1x16xf32, #tpu.memory_space<vmem>>, %arg7: memref<9x16x8xbf16, #tpu.memory_space<vmem>>, %arg8: memref<1x24xf32, #tpu.memory_space<vmem>>, %arg9: memref<1x24xf32, #tpu.memory_space<vmem>>, %arg10: memref<24x16xbf16, #tpu.memory_space<vmem>>, %arg11: memref<1x16xf32, #tpu.memory_space<vmem>>, %arg12: memref<1x16xf32, #tpu.memory_space<vmem>>, %arg13: memref<9x16x8xbf16, #tpu.memory_space<vmem>>, %arg14: memref<1x8x8x32xf32, #tpu.memory_space<vmem>>, %arg15: memref<10x10x16xf32, #tpu.memory_space<vmem>>) attributes {dimension_semantics = [#tpu.dimension_semantics<parallel>], iteration_bounds = array<i64: 2>, scalar_prefetch = 0 : i64, scratch_operands = 1 : i64, tpu.core_type = #tpu.core_type<tc>, window_params = [{transform_indices = @transform_0, window_bounds = array<i64: 1, 8, 8, 16>}, {pipeline_mode = #tpu.pipeline_mode<synchronous>, transform_indices = @transform_1, window_bounds = array<i64: 1, 16>}, {pipeline_mode = #tpu.pipeline_mode<synchronous>, transform_indices = @transform_2, window_bounds = array<i64: 1, 16>}, {pipeline_mode = #tpu.pipeline_mode<synchronous>, transform_indices = @transform_3, window_bounds = array<i64: 16, 16>}, {pipeline_mode = #tpu.pipeline_mode<synchronous>, transform_indices = @transform_4, window_bounds = array<i64: 1, 16>}, {pipeline_mode = #tpu.pipeline_mode<synchronous>, transform_indices = @transform_5, window_bounds = array<i64: 1, 16>}, {pipeline_mode = #tpu.pipeline_mode<synchronous>, transform_indices = @transform_6, window_bounds = array<i64: 9, 16, 8>}, {pipeline_mode = #tpu.pipeline_mode<synchronous>, transform_indices = @transform_7, window_bounds = array<i64: 1, 24>}, {pipeline_mode = #tpu.pipeline_mode<synchronous>, transform_indices = @transform_8, window_bounds = array<i64: 1, 24>}, {pipeline_mode = #tpu.pipeline_mode<synchronous>, transform_indices = @transform_9, window_bounds = array<i64: 24, 16>}, {pipeline_mode = #tpu.pipeline_mode<synchronous>, transform_indices = @transform_10, window_bounds = array<i64: 1, 16>}, {pipeline_mode = #tpu.pipeline_mode<synchronous>, transform_indices = @transform_11, window_bounds = array<i64: 1, 16>}, {pipeline_mode = #tpu.pipeline_mode<synchronous>, transform_indices = @transform_12, window_bounds = array<i64: 9, 16, 8>}, {transform_indices = @transform_13, window_bounds = array<i64: 1, 8, 8, 32>}]} {
    %cst = arith.constant 0.000000e+00 : f32
    %0 = vector.broadcast %cst : f32 to vector<10x10x16xf32>
    %c0 = arith.constant 0 : index
    %c0_0 = arith.constant 0 : index
    %c0_1 = arith.constant 0 : index
    %1 = vector.load %arg15[%c0, %c0_0, %c0_1] : memref<10x10x16xf32, #tpu.memory_space<vmem>>, vector<10x10x16xf32>
    tpu.vector_store %arg15[%c0, %c0_0, %c0_1], %0 {strides = array<i32>} : memref<10x10x16xf32, #tpu.memory_space<vmem>>, vector<10x10x16xf32>,
    %c0_2 = arith.constant 0 : index
    %c0_3 = arith.constant 0 : index
    %c0_4 = arith.constant 0 : index
    %c0_5 = arith.constant 0 : index
    %2 = vector.load %arg1[%c0_2, %c0_3, %c0_4, %c0_5] : memref<1x8x8x16xf32, #tpu.memory_space<vmem>>, vector<1x8x8x16xf32>
    %3 = vector.shape_cast %2 : vector<1x8x8x16xf32> to vector<8x8x16xf32>
    %c0_6 = arith.constant 0 : index
    %c0_7 = arith.constant 0 : index
    %c0_8 = arith.constant 0 : index
    %c0_9 = arith.constant 0 : index
    %4 = vector.load %arg14[%c0_6, %c0_7, %c0_8, %c0_9] : memref<1x8x8x32xf32, #tpu.memory_space<vmem>>, vector<1x8x8x16xf32>
    %5 = vector.shape_cast %4 : vector<1x8x8x16xf32> to vector<8x8x16xf32>
    %6 = vector.shape_cast %3 : vector<8x8x16xf32> to vector<1x8x8x16xf32>
    tpu.vector_store %arg14[%c0_6, %c0_7, %c0_8, %c0_9], %6 {strides = array<i32>} : memref<1x8x8x32xf32, #tpu.memory_space<vmem>>, vector<1x8x8x16xf32>,
    %c0_10 = arith.constant 0 : index
    %c0_11 = arith.constant 0 : index
    %c0_12 = arith.constant 0 : index
    %c0_13 = arith.constant 0 : index
    %7 = vector.load %arg14[%c0_10, %c0_11, %c0_12, %c0_13] : memref<1x8x8x32xf32, #tpu.memory_space<vmem>>, vector<1x8x8x16xf32>
    %8 = vector.shape_cast %7 : vector<1x8x8x16xf32> to vector<8x8x16xf32>
    %9 = vector.shape_cast %8 : vector<8x8x16xf32> to vector<64x16xf32>
    %c0_14 = arith.constant 0 : index
    %c0_15 = arith.constant 0 : index
    %10 = vector.load %arg2[%c0_14, %c0_15] : memref<1x16xf32, #tpu.memory_space<vmem>>, vector<1x16xf32>
    %11 = vector.broadcast %10 : vector<1x16xf32> to vector<64x16xf32>
    %12 = arith.mulf %9, %11 : vector<64x16xf32>
    %c0_16 = arith.constant 0 : index
    %c0_17 = arith.constant 0 : index
    %13 = vector.load %arg3[%c0_16, %c0_17] : memref<1x16xf32, #tpu.memory_space<vmem>>, vector<1x16xf32>
    %14 = vector.broadcast %13 : vector<1x16xf32> to vector<64x16xf32>
    %15 = arith.addf %12, %14 : vector<64x16xf32>
    %cst_18 = arith.constant 0.000000e+00 : f32
    %16 = vector.broadcast %cst_18 : f32 to vector<64x16xf32>
    %17 = arith.maximumf %15, %16 : vector<64x16xf32>
    %18 = arith.truncf %17 : vector<64x16xf32> to vector<64x16xbf16>
    %c0_19 = arith.constant 0 : index
    %c0_20 = arith.constant 0 : index
    %19 = vector.load %arg4[%c0_19, %c0_20] : memref<16x16xbf16, #tpu.memory_space<vmem>>, vector<16x16xbf16>
    %cst_21 = arith.constant dense<0.000000e+00> : vector<64x16xf32>
    %20 = tpu.matmul %18, %19, %cst_21 {dimension_numbers = #tpu.dot_dimension_numbers<[1], [0], [0], [1], [0, 0, 1, 1], [], []>} : vector<64x16xbf16>, vector<16x16xbf16>, vector<64x16xf32> -> vector<64x16xf32>
    %c0_22 = arith.constant 0 : index
    %c0_23 = arith.constant 0 : index
    %21 = vector.load %arg5[%c0_22, %c0_23] : memref<1x16xf32, #tpu.memory_space<vmem>>, vector<1x16xf32>
    %22 = vector.broadcast %21 : vector<1x16xf32> to vector<64x16xf32>
    %23 = arith.mulf %20, %22 : vector<64x16xf32>
    %c0_24 = arith.constant 0 : index
    %c0_25 = arith.constant 0 : index
    %24 = vector.load %arg6[%c0_24, %c0_25] : memref<1x16xf32, #tpu.memory_space<vmem>>, vector<1x16xf32>
    %25 = vector.broadcast %24 : vector<1x16xf32> to vector<64x16xf32>
    %26 = arith.addf %23, %25 : vector<64x16xf32>
    %cst_26 = arith.constant 0.000000e+00 : f32
    %27 = vector.broadcast %cst_26 : f32 to vector<64x16xf32>
    %28 = arith.maximumf %26, %27 : vector<64x16xf32>
    %29 = vector.shape_cast %28 : vector<64x16xf32> to vector<8x8x16xf32>
    %c1 = arith.constant 1 : index
    %c1_27 = arith.constant 1 : index
    %c0_28 = arith.constant 0 : index
    %30 = vector.load %arg15[%c1, %c1_27, %c0_28] : memref<10x10x16xf32, #tpu.memory_space<vmem>>, vector<8x8x16xf32>
    tpu.vector_store %arg15[%c1, %c1_27, %c0_28], %29 {strides = array<i32>} : memref<10x10x16xf32, #tpu.memory_space<vmem>>, vector<8x8x16xf32>,
    %cst_29 = arith.constant 0.000000e+00 : f32
    %31 = vector.broadcast %cst_29 : f32 to vector<64x8xf32>
    %c0_30 = arith.constant 0 : index
    %c0_31 = arith.constant 0 : index
    %c0_32 = arith.constant 0 : index
    %32 = vector.load %arg15[%c0_30, %c0_31, %c0_32] : memref<10x10x16xf32, #tpu.memory_space<vmem>>, vector<8x8x16xf32>
    %33 = vector.shape_cast %32 : vector<8x8x16xf32> to vector<64x16xf32>
    %34 = arith.truncf %33 : vector<64x16xf32> to vector<64x16xbf16>
    %c0_33 = arith.constant 0 : index
    %c0_34 = arith.constant 0 : index
    %c0_35 = arith.constant 0 : index
    %35 = vector.load %arg7[%c0_33, %c0_34, %c0_35] : memref<9x16x8xbf16, #tpu.memory_space<vmem>>, vector<1x16x8xbf16>
    %36 = vector.shape_cast %35 : vector<1x16x8xbf16> to vector<16x8xbf16>
    %cst_36 = arith.constant dense<0.000000e+00> : vector<64x8xf32>
    %37 = tpu.matmul %34, %36, %cst_36 {dimension_numbers = #tpu.dot_dimension_numbers<[1], [0], [0], [1], [0, 0, 1, 1], [], []>} : vector<64x16xbf16>, vector<16x8xbf16>, vector<64x8xf32> -> vector<64x8xf32>
    %38 = arith.addf %31, %37 : vector<64x8xf32>
    %c0_37 = arith.constant 0 : index
    %c1_38 = arith.constant 1 : index
    %c0_39 = arith.constant 0 : index
    %39 = vector.load %arg15[%c0_37, %c1_38, %c0_39] : memref<10x10x16xf32, #tpu.memory_space<vmem>>, vector<8x8x16xf32>
    %40 = vector.shape_cast %39 : vector<8x8x16xf32> to vector<64x16xf32>
    %41 = arith.truncf %40 : vector<64x16xf32> to vector<64x16xbf16>
    %c1_40 = arith.constant 1 : index
    %c0_41 = arith.constant 0 : index
    %c0_42 = arith.constant 0 : index
    %42 = vector.load %arg7[%c1_40, %c0_41, %c0_42] : memref<9x16x8xbf16, #tpu.memory_space<vmem>>, vector<1x16x8xbf16>
    %43 = vector.shape_cast %42 : vector<1x16x8xbf16> to vector<16x8xbf16>
    %cst_43 = arith.constant dense<0.000000e+00> : vector<64x8xf32>
    %44 = tpu.matmul %41, %43, %cst_43 {dimension_numbers = #tpu.dot_dimension_numbers<[1], [0], [0], [1], [0, 0, 1, 1], [], []>} : vector<64x16xbf16>, vector<16x8xbf16>, vector<64x8xf32> -> vector<64x8xf32>
    %45 = arith.addf %38, %44 : vector<64x8xf32>
    %c0_44 = arith.constant 0 : index
    %c2 = arith.constant 2 : index
    %c0_45 = arith.constant 0 : index
    %46 = vector.load %arg15[%c0_44, %c2, %c0_45] : memref<10x10x16xf32, #tpu.memory_space<vmem>>, vector<8x8x16xf32>
    %47 = vector.shape_cast %46 : vector<8x8x16xf32> to vector<64x16xf32>
    %48 = arith.truncf %47 : vector<64x16xf32> to vector<64x16xbf16>
    %c2_46 = arith.constant 2 : index
    %c0_47 = arith.constant 0 : index
    %c0_48 = arith.constant 0 : index
    %49 = vector.load %arg7[%c2_46, %c0_47, %c0_48] : memref<9x16x8xbf16, #tpu.memory_space<vmem>>, vector<1x16x8xbf16>
    %50 = vector.shape_cast %49 : vector<1x16x8xbf16> to vector<16x8xbf16>
    %cst_49 = arith.constant dense<0.000000e+00> : vector<64x8xf32>
    %51 = tpu.matmul %48, %50, %cst_49 {dimension_numbers = #tpu.dot_dimension_numbers<[1], [0], [0], [1], [0, 0, 1, 1], [], []>} : vector<64x16xbf16>, vector<16x8xbf16>, vector<64x8xf32> -> vector<64x8xf32>
    %52 = arith.addf %45, %51 : vector<64x8xf32>
    %c1_50 = arith.constant 1 : index
    %c0_51 = arith.constant 0 : index
    %c0_52 = arith.constant 0 : index
    %53 = vector.load %arg15[%c1_50, %c0_51, %c0_52] : memref<10x10x16xf32, #tpu.memory_space<vmem>>, vector<8x8x16xf32>
    %54 = vector.shape_cast %53 : vector<8x8x16xf32> to vector<64x16xf32>
    %55 = arith.truncf %54 : vector<64x16xf32> to vector<64x16xbf16>
    %c3 = arith.constant 3 : index
    %c0_53 = arith.constant 0 : index
    %c0_54 = arith.constant 0 : index
    %56 = vector.load %arg7[%c3, %c0_53, %c0_54] : memref<9x16x8xbf16, #tpu.memory_space<vmem>>, vector<1x16x8xbf16>
    %57 = vector.shape_cast %56 : vector<1x16x8xbf16> to vector<16x8xbf16>
    %cst_55 = arith.constant dense<0.000000e+00> : vector<64x8xf32>
    %58 = tpu.matmul %55, %57, %cst_55 {dimension_numbers = #tpu.dot_dimension_numbers<[1], [0], [0], [1], [0, 0, 1, 1], [], []>} : vector<64x16xbf16>, vector<16x8xbf16>, vector<64x8xf32> -> vector<64x8xf32>
    %59 = arith.addf %52, %58 : vector<64x8xf32>
    %c1_56 = arith.constant 1 : index
    %c1_57 = arith.constant 1 : index
    %c0_58 = arith.constant 0 : index
    %60 = vector.load %arg15[%c1_56, %c1_57, %c0_58] : memref<10x10x16xf32, #tpu.memory_space<vmem>>, vector<8x8x16xf32>
    %61 = vector.shape_cast %60 : vector<8x8x16xf32> to vector<64x16xf32>
    %62 = arith.truncf %61 : vector<64x16xf32> to vector<64x16xbf16>
    %c4 = arith.constant 4 : index
    %c0_59 = arith.constant 0 : index
    %c0_60 = arith.constant 0 : index
    %63 = vector.load %arg7[%c4, %c0_59, %c0_60] : memref<9x16x8xbf16, #tpu.memory_space<vmem>>, vector<1x16x8xbf16>
    %64 = vector.shape_cast %63 : vector<1x16x8xbf16> to vector<16x8xbf16>
    %cst_61 = arith.constant dense<0.000000e+00> : vector<64x8xf32>
    %65 = tpu.matmul %62, %64, %cst_61 {dimension_numbers = #tpu.dot_dimension_numbers<[1], [0], [0], [1], [0, 0, 1, 1], [], []>} : vector<64x16xbf16>, vector<16x8xbf16>, vector<64x8xf32> -> vector<64x8xf32>
    %66 = arith.addf %59, %65 : vector<64x8xf32>
    %c1_62 = arith.constant 1 : index
    %c2_63 = arith.constant 2 : index
    %c0_64 = arith.constant 0 : index
    %67 = vector.load %arg15[%c1_62, %c2_63, %c0_64] : memref<10x10x16xf32, #tpu.memory_space<vmem>>, vector<8x8x16xf32>
    %68 = vector.shape_cast %67 : vector<8x8x16xf32> to vector<64x16xf32>
    %69 = arith.truncf %68 : vector<64x16xf32> to vector<64x16xbf16>
    %c5 = arith.constant 5 : index
    %c0_65 = arith.constant 0 : index
    %c0_66 = arith.constant 0 : index
    %70 = vector.load %arg7[%c5, %c0_65, %c0_66] : memref<9x16x8xbf16, #tpu.memory_space<vmem>>, vector<1x16x8xbf16>
    %71 = vector.shape_cast %70 : vector<1x16x8xbf16> to vector<16x8xbf16>
    %cst_67 = arith.constant dense<0.000000e+00> : vector<64x8xf32>
    %72 = tpu.matmul %69, %71, %cst_67 {dimension_numbers = #tpu.dot_dimension_numbers<[1], [0], [0], [1], [0, 0, 1, 1], [], []>} : vector<64x16xbf16>, vector<16x8xbf16>, vector<64x8xf32> -> vector<64x8xf32>
    %73 = arith.addf %66, %72 : vector<64x8xf32>
    %c2_68 = arith.constant 2 : index
    %c0_69 = arith.constant 0 : index
    %c0_70 = arith.constant 0 : index
    %74 = vector.load %arg15[%c2_68, %c0_69, %c0_70] : memref<10x10x16xf32, #tpu.memory_space<vmem>>, vector<8x8x16xf32>
    %75 = vector.shape_cast %74 : vector<8x8x16xf32> to vector<64x16xf32>
    %76 = arith.truncf %75 : vector<64x16xf32> to vector<64x16xbf16>
    %c6 = arith.constant 6 : index
    %c0_71 = arith.constant 0 : index
    %c0_72 = arith.constant 0 : index
    %77 = vector.load %arg7[%c6, %c0_71, %c0_72] : memref<9x16x8xbf16, #tpu.memory_space<vmem>>, vector<1x16x8xbf16>
    %78 = vector.shape_cast %77 : vector<1x16x8xbf16> to vector<16x8xbf16>
    %cst_73 = arith.constant dense<0.000000e+00> : vector<64x8xf32>
    %79 = tpu.matmul %76, %78, %cst_73 {dimension_numbers = #tpu.dot_dimension_numbers<[1], [0], [0], [1], [0, 0, 1, 1], [], []>} : vector<64x16xbf16>, vector<16x8xbf16>, vector<64x8xf32> -> vector<64x8xf32>
    %80 = arith.addf %73, %79 : vector<64x8xf32>
    %c2_74 = arith.constant 2 : index
    %c1_75 = arith.constant 1 : index
    %c0_76 = arith.constant 0 : index
    %81 = vector.load %arg15[%c2_74, %c1_75, %c0_76] : memref<10x10x16xf32, #tpu.memory_space<vmem>>, vector<8x8x16xf32>
    %82 = vector.shape_cast %81 : vector<8x8x16xf32> to vector<64x16xf32>
    %83 = arith.truncf %82 : vector<64x16xf32> to vector<64x16xbf16>
    %c7 = arith.constant 7 : index
    %c0_77 = arith.constant 0 : index
    %c0_78 = arith.constant 0 : index
    %84 = vector.load %arg7[%c7, %c0_77, %c0_78] : memref<9x16x8xbf16, #tpu.memory_space<vmem>>, vector<1x16x8xbf16>
    %85 = vector.shape_cast %84 : vector<1x16x8xbf16> to vector<16x8xbf16>
    %cst_79 = arith.constant dense<0.000000e+00> : vector<64x8xf32>
    %86 = tpu.matmul %83, %85, %cst_79 {dimension_numbers = #tpu.dot_dimension_numbers<[1], [0], [0], [1], [0, 0, 1, 1], [], []>} : vector<64x16xbf16>, vector<16x8xbf16>, vector<64x8xf32> -> vector<64x8xf32>
    %87 = arith.addf %80, %86 : vector<64x8xf32>
    %c2_80 = arith.constant 2 : index
    %c2_81 = arith.constant 2 : index
    %c0_82 = arith.constant 0 : index
    %88 = vector.load %arg15[%c2_80, %c2_81, %c0_82] : memref<10x10x16xf32, #tpu.memory_space<vmem>>, vector<8x8x16xf32>
    %89 = vector.shape_cast %88 : vector<8x8x16xf32> to vector<64x16xf32>
    %90 = arith.truncf %89 : vector<64x16xf32> to vector<64x16xbf16>
    %c8 = arith.constant 8 : index
    %c0_83 = arith.constant 0 : index
    %c0_84 = arith.constant 0 : index
    %91 = vector.load %arg7[%c8, %c0_83, %c0_84] : memref<9x16x8xbf16, #tpu.memory_space<vmem>>, vector<1x16x8xbf16>
    %92 = vector.shape_cast %91 : vector<1x16x8xbf16> to vector<16x8xbf16>
    %cst_85 = arith.constant dense<0.000000e+00> : vector<64x8xf32>
    %93 = tpu.matmul %90, %92, %cst_85 {dimension_numbers = #tpu.dot_dimension_numbers<[1], [0], [0], [1], [0, 0, 1, 1], [], []>} : vector<64x16xbf16>, vector<16x8xbf16>, vector<64x8xf32> -> vector<64x8xf32>
    %94 = arith.addf %87, %93 : vector<64x8xf32>
    %95 = vector.shape_cast %94 : vector<64x8xf32> to vector<8x8x8xf32>
    %c0_86 = arith.constant 0 : index
    %c0_87 = arith.constant 0 : index
    %c0_88 = arith.constant 0 : index
    %c16 = arith.constant 16 : index
    %96 = vector.load %arg14[%c0_86, %c0_87, %c0_88, %c16] : memref<1x8x8x32xf32, #tpu.memory_space<vmem>>, vector<1x8x8x8xf32>
    %97 = vector.shape_cast %96 : vector<1x8x8x8xf32> to vector<8x8x8xf32>
    %98 = vector.shape_cast %95 : vector<8x8x8xf32> to vector<1x8x8x8xf32>
    tpu.vector_store %arg14[%c0_86, %c0_87, %c0_88, %c16], %98 {strides = array<i32>} : memref<1x8x8x32xf32, #tpu.memory_space<vmem>>, vector<1x8x8x8xf32>,
    %c0_89 = arith.constant 0 : index
    %c0_90 = arith.constant 0 : index
    %c0_91 = arith.constant 0 : index
    %c0_92 = arith.constant 0 : index
    %99 = vector.load %arg14[%c0_89, %c0_90, %c0_91, %c0_92] : memref<1x8x8x32xf32, #tpu.memory_space<vmem>>, vector<1x8x8x24xf32>
    %100 = vector.shape_cast %99 : vector<1x8x8x24xf32> to vector<8x8x24xf32>
    %101 = vector.shape_cast %100 : vector<8x8x24xf32> to vector<64x24xf32>
    %c0_93 = arith.constant 0 : index
    %c0_94 = arith.constant 0 : index
    %102 = vector.load %arg8[%c0_93, %c0_94] : memref<1x24xf32, #tpu.memory_space<vmem>>, vector<1x24xf32>
    %103 = vector.broadcast %102 : vector<1x24xf32> to vector<64x24xf32>
    %104 = arith.mulf %101, %103 : vector<64x24xf32>
    %c0_95 = arith.constant 0 : index
    %c0_96 = arith.constant 0 : index
    %105 = vector.load %arg9[%c0_95, %c0_96] : memref<1x24xf32, #tpu.memory_space<vmem>>, vector<1x24xf32>
    %106 = vector.broadcast %105 : vector<1x24xf32> to vector<64x24xf32>
    %107 = arith.addf %104, %106 : vector<64x24xf32>
    %cst_97 = arith.constant 0.000000e+00 : f32
    %108 = vector.broadcast %cst_97 : f32 to vector<64x24xf32>
    %109 = arith.maximumf %107, %108 : vector<64x24xf32>
    %110 = arith.truncf %109 : vector<64x24xf32> to vector<64x24xbf16>
    %c0_98 = arith.constant 0 : index
    %c0_99 = arith.constant 0 : index
    %111 = vector.load %arg10[%c0_98, %c0_99] : memref<24x16xbf16, #tpu.memory_space<vmem>>, vector<24x16xbf16>
    %cst_100 = arith.constant dense<0.000000e+00> : vector<64x16xf32>
    %112 = tpu.matmul %110, %111, %cst_100 {dimension_numbers = #tpu.dot_dimension_numbers<[1], [0], [0], [1], [0, 0, 1, 1], [], []>} : vector<64x24xbf16>, vector<24x16xbf16>, vector<64x16xf32> -> vector<64x16xf32>
    %c0_101 = arith.constant 0 : index
    %c0_102 = arith.constant 0 : index
    %113 = vector.load %arg11[%c0_101, %c0_102] : memref<1x16xf32, #tpu.memory_space<vmem>>, vector<1x16xf32>
    %114 = vector.broadcast %113 : vector<1x16xf32> to vector<64x16xf32>
    %115 = arith.mulf %112, %114 : vector<64x16xf32>
    %c0_103 = arith.constant 0 : index
    %c0_104 = arith.constant 0 : index
    %116 = vector.load %arg12[%c0_103, %c0_104] : memref<1x16xf32, #tpu.memory_space<vmem>>, vector<1x16xf32>
    %117 = vector.broadcast %116 : vector<1x16xf32> to vector<64x16xf32>
    %118 = arith.addf %115, %117 : vector<64x16xf32>
    %cst_105 = arith.constant 0.000000e+00 : f32
    %119 = vector.broadcast %cst_105 : f32 to vector<64x16xf32>
    %120 = arith.maximumf %118, %119 : vector<64x16xf32>
    %121 = vector.shape_cast %120 : vector<64x16xf32> to vector<8x8x16xf32>
    %c1_106 = arith.constant 1 : index
    %c1_107 = arith.constant 1 : index
    %c0_108 = arith.constant 0 : index
    %122 = vector.load %arg15[%c1_106, %c1_107, %c0_108] : memref<10x10x16xf32, #tpu.memory_space<vmem>>, vector<8x8x16xf32>
    tpu.vector_store %arg15[%c1_106, %c1_107, %c0_108], %121 {strides = array<i32>} : memref<10x10x16xf32, #tpu.memory_space<vmem>>, vector<8x8x16xf32>,
    %cst_109 = arith.constant 0.000000e+00 : f32
    %123 = vector.broadcast %cst_109 : f32 to vector<64x8xf32>
    %c0_110 = arith.constant 0 : index
    %c0_111 = arith.constant 0 : index
    %c0_112 = arith.constant 0 : index
    %124 = vector.load %arg15[%c0_110, %c0_111, %c0_112] : memref<10x10x16xf32, #tpu.memory_space<vmem>>, vector<8x8x16xf32>
    %125 = vector.shape_cast %124 : vector<8x8x16xf32> to vector<64x16xf32>
    %126 = arith.truncf %125 : vector<64x16xf32> to vector<64x16xbf16>
    %c0_113 = arith.constant 0 : index
    %c0_114 = arith.constant 0 : index
    %c0_115 = arith.constant 0 : index
    %127 = vector.load %arg13[%c0_113, %c0_114, %c0_115] : memref<9x16x8xbf16, #tpu.memory_space<vmem>>, vector<1x16x8xbf16>
    %128 = vector.shape_cast %127 : vector<1x16x8xbf16> to vector<16x8xbf16>
    %cst_116 = arith.constant dense<0.000000e+00> : vector<64x8xf32>
    %129 = tpu.matmul %126, %128, %cst_116 {dimension_numbers = #tpu.dot_dimension_numbers<[1], [0], [0], [1], [0, 0, 1, 1], [], []>} : vector<64x16xbf16>, vector<16x8xbf16>, vector<64x8xf32> -> vector<64x8xf32>
    %130 = arith.addf %123, %129 : vector<64x8xf32>
    %c0_117 = arith.constant 0 : index
    %c1_118 = arith.constant 1 : index
    %c0_119 = arith.constant 0 : index
    %131 = vector.load %arg15[%c0_117, %c1_118, %c0_119] : memref<10x10x16xf32, #tpu.memory_space<vmem>>, vector<8x8x16xf32>
    %132 = vector.shape_cast %131 : vector<8x8x16xf32> to vector<64x16xf32>
    %133 = arith.truncf %132 : vector<64x16xf32> to vector<64x16xbf16>
    %c1_120 = arith.constant 1 : index
    %c0_121 = arith.constant 0 : index
    %c0_122 = arith.constant 0 : index
    %134 = vector.load %arg13[%c1_120, %c0_121, %c0_122] : memref<9x16x8xbf16, #tpu.memory_space<vmem>>, vector<1x16x8xbf16>
    %135 = vector.shape_cast %134 : vector<1x16x8xbf16> to vector<16x8xbf16>
    %cst_123 = arith.constant dense<0.000000e+00> : vector<64x8xf32>
    %136 = tpu.matmul %133, %135, %cst_123 {dimension_numbers = #tpu.dot_dimension_numbers<[1], [0], [0], [1], [0, 0, 1, 1], [], []>} : vector<64x16xbf16>, vector<16x8xbf16>, vector<64x8xf32> -> vector<64x8xf32>
    %137 = arith.addf %130, %136 : vector<64x8xf32>
    %c0_124 = arith.constant 0 : index
    %c2_125 = arith.constant 2 : index
    %c0_126 = arith.constant 0 : index
    %138 = vector.load %arg15[%c0_124, %c2_125, %c0_126] : memref<10x10x16xf32, #tpu.memory_space<vmem>>, vector<8x8x16xf32>
    %139 = vector.shape_cast %138 : vector<8x8x16xf32> to vector<64x16xf32>
    %140 = arith.truncf %139 : vector<64x16xf32> to vector<64x16xbf16>
    %c2_127 = arith.constant 2 : index
    %c0_128 = arith.constant 0 : index
    %c0_129 = arith.constant 0 : index
    %141 = vector.load %arg13[%c2_127, %c0_128, %c0_129] : memref<9x16x8xbf16, #tpu.memory_space<vmem>>, vector<1x16x8xbf16>
    %142 = vector.shape_cast %141 : vector<1x16x8xbf16> to vector<16x8xbf16>
    %cst_130 = arith.constant dense<0.000000e+00> : vector<64x8xf32>
    %143 = tpu.matmul %140, %142, %cst_130 {dimension_numbers = #tpu.dot_dimension_numbers<[1], [0], [0], [1], [0, 0, 1, 1], [], []>} : vector<64x16xbf16>, vector<16x8xbf16>, vector<64x8xf32> -> vector<64x8xf32>
    %144 = arith.addf %137, %143 : vector<64x8xf32>
    %c1_131 = arith.constant 1 : index
    %c0_132 = arith.constant 0 : index
    %c0_133 = arith.constant 0 : index
    %145 = vector.load %arg15[%c1_131, %c0_132, %c0_133] : memref<10x10x16xf32, #tpu.memory_space<vmem>>, vector<8x8x16xf32>
    %146 = vector.shape_cast %145 : vector<8x8x16xf32> to vector<64x16xf32>
    %147 = arith.truncf %146 : vector<64x16xf32> to vector<64x16xbf16>
    %c3_134 = arith.constant 3 : index
    %c0_135 = arith.constant 0 : index
    %c0_136 = arith.constant 0 : index
    %148 = vector.load %arg13[%c3_134, %c0_135, %c0_136] : memref<9x16x8xbf16, #tpu.memory_space<vmem>>, vector<1x16x8xbf16>
    %149 = vector.shape_cast %148 : vector<1x16x8xbf16> to vector<16x8xbf16>
    %cst_137 = arith.constant dense<0.000000e+00> : vector<64x8xf32>
    %150 = tpu.matmul %147, %149, %cst_137 {dimension_numbers = #tpu.dot_dimension_numbers<[1], [0], [0], [1], [0, 0, 1, 1], [], []>} : vector<64x16xbf16>, vector<16x8xbf16>, vector<64x8xf32> -> vector<64x8xf32>
    %151 = arith.addf %144, %150 : vector<64x8xf32>
    %c1_138 = arith.constant 1 : index
    %c1_139 = arith.constant 1 : index
    %c0_140 = arith.constant 0 : index
    %152 = vector.load %arg15[%c1_138, %c1_139, %c0_140] : memref<10x10x16xf32, #tpu.memory_space<vmem>>, vector<8x8x16xf32>
    %153 = vector.shape_cast %152 : vector<8x8x16xf32> to vector<64x16xf32>
    %154 = arith.truncf %153 : vector<64x16xf32> to vector<64x16xbf16>
    %c4_141 = arith.constant 4 : index
    %c0_142 = arith.constant 0 : index
    %c0_143 = arith.constant 0 : index
    %155 = vector.load %arg13[%c4_141, %c0_142, %c0_143] : memref<9x16x8xbf16, #tpu.memory_space<vmem>>, vector<1x16x8xbf16>
    %156 = vector.shape_cast %155 : vector<1x16x8xbf16> to vector<16x8xbf16>
    %cst_144 = arith.constant dense<0.000000e+00> : vector<64x8xf32>
    %157 = tpu.matmul %154, %156, %cst_144 {dimension_numbers = #tpu.dot_dimension_numbers<[1], [0], [0], [1], [0, 0, 1, 1], [], []>} : vector<64x16xbf16>, vector<16x8xbf16>, vector<64x8xf32> -> vector<64x8xf32>
    %158 = arith.addf %151, %157 : vector<64x8xf32>
    %c1_145 = arith.constant 1 : index
    %c2_146 = arith.constant 2 : index
    %c0_147 = arith.constant 0 : index
    %159 = vector.load %arg15[%c1_145, %c2_146, %c0_147] : memref<10x10x16xf32, #tpu.memory_space<vmem>>, vector<8x8x16xf32>
    %160 = vector.shape_cast %159 : vector<8x8x16xf32> to vector<64x16xf32>
    %161 = arith.truncf %160 : vector<64x16xf32> to vector<64x16xbf16>
    %c5_148 = arith.constant 5 : index
    %c0_149 = arith.constant 0 : index
    %c0_150 = arith.constant 0 : index
    %162 = vector.load %arg13[%c5_148, %c0_149, %c0_150] : memref<9x16x8xbf16, #tpu.memory_space<vmem>>, vector<1x16x8xbf16>
    %163 = vector.shape_cast %162 : vector<1x16x8xbf16> to vector<16x8xbf16>
    %cst_151 = arith.constant dense<0.000000e+00> : vector<64x8xf32>
    %164 = tpu.matmul %161, %163, %cst_151 {dimension_numbers = #tpu.dot_dimension_numbers<[1], [0], [0], [1], [0, 0, 1, 1], [], []>} : vector<64x16xbf16>, vector<16x8xbf16>, vector<64x8xf32> -> vector<64x8xf32>
    %165 = arith.addf %158, %164 : vector<64x8xf32>
    %c2_152 = arith.constant 2 : index
    %c0_153 = arith.constant 0 : index
    %c0_154 = arith.constant 0 : index
    %166 = vector.load %arg15[%c2_152, %c0_153, %c0_154] : memref<10x10x16xf32, #tpu.memory_space<vmem>>, vector<8x8x16xf32>
    %167 = vector.shape_cast %166 : vector<8x8x16xf32> to vector<64x16xf32>
    %168 = arith.truncf %167 : vector<64x16xf32> to vector<64x16xbf16>
    %c6_155 = arith.constant 6 : index
    %c0_156 = arith.constant 0 : index
    %c0_157 = arith.constant 0 : index
    %169 = vector.load %arg13[%c6_155, %c0_156, %c0_157] : memref<9x16x8xbf16, #tpu.memory_space<vmem>>, vector<1x16x8xbf16>
    %170 = vector.shape_cast %169 : vector<1x16x8xbf16> to vector<16x8xbf16>
    %cst_158 = arith.constant dense<0.000000e+00> : vector<64x8xf32>
    %171 = tpu.matmul %168, %170, %cst_158 {dimension_numbers = #tpu.dot_dimension_numbers<[1], [0], [0], [1], [0, 0, 1, 1], [], []>} : vector<64x16xbf16>, vector<16x8xbf16>, vector<64x8xf32> -> vector<64x8xf32>
    %172 = arith.addf %165, %171 : vector<64x8xf32>
    %c2_159 = arith.constant 2 : index
    %c1_160 = arith.constant 1 : index
    %c0_161 = arith.constant 0 : index
    %173 = vector.load %arg15[%c2_159, %c1_160, %c0_161] : memref<10x10x16xf32, #tpu.memory_space<vmem>>, vector<8x8x16xf32>
    %174 = vector.shape_cast %173 : vector<8x8x16xf32> to vector<64x16xf32>
    %175 = arith.truncf %174 : vector<64x16xf32> to vector<64x16xbf16>
    %c7_162 = arith.constant 7 : index
    %c0_163 = arith.constant 0 : index
    %c0_164 = arith.constant 0 : index
    %176 = vector.load %arg13[%c7_162, %c0_163, %c0_164] : memref<9x16x8xbf16, #tpu.memory_space<vmem>>, vector<1x16x8xbf16>
    %177 = vector.shape_cast %176 : vector<1x16x8xbf16> to vector<16x8xbf16>
    %cst_165 = arith.constant dense<0.000000e+00> : vector<64x8xf32>
    %178 = tpu.matmul %175, %177, %cst_165 {dimension_numbers = #tpu.dot_dimension_numbers<[1], [0], [0], [1], [0, 0, 1, 1], [], []>} : vector<64x16xbf16>, vector<16x8xbf16>, vector<64x8xf32> -> vector<64x8xf32>
    %179 = arith.addf %172, %178 : vector<64x8xf32>
    %c2_166 = arith.constant 2 : index
    %c2_167 = arith.constant 2 : index
    %c0_168 = arith.constant 0 : index
    %180 = vector.load %arg15[%c2_166, %c2_167, %c0_168] : memref<10x10x16xf32, #tpu.memory_space<vmem>>, vector<8x8x16xf32>
    %181 = vector.shape_cast %180 : vector<8x8x16xf32> to vector<64x16xf32>
    %182 = arith.truncf %181 : vector<64x16xf32> to vector<64x16xbf16>
    %c8_169 = arith.constant 8 : index
    %c0_170 = arith.constant 0 : index
    %c0_171 = arith.constant 0 : index
    %183 = vector.load %arg13[%c8_169, %c0_170, %c0_171] : memref<9x16x8xbf16, #tpu.memory_space<vmem>>, vector<1x16x8xbf16>
    %184 = vector.shape_cast %183 : vector<1x16x8xbf16> to vector<16x8xbf16>
    %cst_172 = arith.constant dense<0.000000e+00> : vector<64x8xf32>
    %185 = tpu.matmul %182, %184, %cst_172 {dimension_numbers = #tpu.dot_dimension_numbers<[1], [0], [0], [1], [0, 0, 1, 1], [], []>} : vector<64x16xbf16>, vector<16x8xbf16>, vector<64x8xf32> -> vector<64x8xf32>
    %186 = arith.addf %179, %185 : vector<64x8xf32>
    %187 = vector.shape_cast %186 : vector<64x8xf32> to vector<8x8x8xf32>
    %c0_173 = arith.constant 0 : index
    %c0_174 = arith.constant 0 : index
    %c0_175 = arith.constant 0 : index
    %c24 = arith.constant 24 : index
    %188 = vector.load %arg14[%c0_173, %c0_174, %c0_175, %c24] : memref<1x8x8x32xf32, #tpu.memory_space<vmem>>, vector<1x8x8x8xf32>
    %189 = vector.shape_cast %188 : vector<1x8x8x8xf32> to vector<8x8x8xf32>
    %190 = vector.shape_cast %187 : vector<8x8x8xf32> to vector<1x8x8x8xf32>
    tpu.vector_store %arg14[%c0_173, %c0_174, %c0_175, %c24], %190 {strides = array<i32>} : memref<1x8x8x32xf32, #tpu.memory_space<vmem>>, vector<1x8x8x8xf32>,
    return
  }
  func.func @transform_0(%arg0: i32) -> (i32, i32, i32, i32) {
    %c0_i32 = arith.constant 0 : i32
    %c0_i32_0 = arith.constant 0 : i32
    %c0_i32_1 = arith.constant 0 : i32
    %c0_i32_2 = arith.constant 0 : i32
    return %arg0, %c0_i32, %c0_i32_0, %c0_i32_1 : i32, i32, i32, i32
  }
  func.func @transform_1(%arg0: i32) -> (i32, i32) {
    %c0_i32 = arith.constant 0 : i32
    %c0_i32_0 = arith.constant 0 : i32
    %c0_i32_1 = arith.constant 0 : i32
    return %c0_i32, %c0_i32_0 : i32, i32
  }
  func.func @transform_2(%arg0: i32) -> (i32, i32) {
    %c0_i32 = arith.constant 0 : i32
    %c0_i32_0 = arith.constant 0 : i32
    %c0_i32_1 = arith.constant 0 : i32
    return %c0_i32, %c0_i32_0 : i32, i32
  }
  func.func @transform_3(%arg0: i32) -> (i32, i32) {
    %c0_i32 = arith.constant 0 : i32
    %c0_i32_0 = arith.constant 0 : i32
    %c0_i32_1 = arith.constant 0 : i32
    return %c0_i32, %c0_i32_0 : i32, i32
  }
  func.func @transform_4(%arg0: i32) -> (i32, i32) {
    %c0_i32 = arith.constant 0 : i32
    %c0_i32_0 = arith.constant 0 : i32
    %c0_i32_1 = arith.constant 0 : i32
    return %c0_i32, %c0_i32_0 : i32, i32
  }
  func.func @transform_5(%arg0: i32) -> (i32, i32) {
    %c0_i32 = arith.constant 0 : i32
    %c0_i32_0 = arith.constant 0 : i32
    %c0_i32_1 = arith.constant 0 : i32
    return %c0_i32, %c0_i32_0 : i32, i32
  }
  func.func @transform_6(%arg0: i32) -> (i32, i32, i32) {
    %c0_i32 = arith.constant 0 : i32
    %c0_i32_0 = arith.constant 0 : i32
    %c0_i32_1 = arith.constant 0 : i32
    %c0_i32_2 = arith.constant 0 : i32
    return %c0_i32, %c0_i32_0, %c0_i32_1 : i32, i32, i32
  }
  func.func @transform_7(%arg0: i32) -> (i32, i32) {
    %c0_i32 = arith.constant 0 : i32
    %c0_i32_0 = arith.constant 0 : i32
    %c0_i32_1 = arith.constant 0 : i32
    return %c0_i32, %c0_i32_0 : i32, i32
  }
  func.func @transform_8(%arg0: i32) -> (i32, i32) {
    %c0_i32 = arith.constant 0 : i32
    %c0_i32_0 = arith.constant 0 : i32
    %c0_i32_1 = arith.constant 0 : i32
    return %c0_i32, %c0_i32_0 : i32, i32
  }
  func.func @transform_9(%arg0: i32) -> (i32, i32) {
    %c0_i32 = arith.constant 0 : i32
    %c0_i32_0 = arith.constant 0 : i32
    %c0_i32_1 = arith.constant 0 : i32
    return %c0_i32, %c0_i32_0 : i32, i32
  }
  func.func @transform_10(%arg0: i32) -> (i32, i32) {
    %c0_i32 = arith.constant 0 : i32
    %c0_i32_0 = arith.constant 0 : i32
    %c0_i32_1 = arith.constant 0 : i32
    return %c0_i32, %c0_i32_0 : i32, i32
  }
  func.func @transform_11(%arg0: i32) -> (i32, i32) {
    %c0_i32 = arith.constant 0 : i32
    %c0_i32_0 = arith.constant 0 : i32
    %c0_i32_1 = arith.constant 0 : i32
    return %c0_i32, %c0_i32_0 : i32, i32
  }
  func.func @transform_12(%arg0: i32) -> (i32, i32, i32) {
    %c0_i32 = arith.constant 0 : i32
    %c0_i32_0 = arith.constant 0 : i32
    %c0_i32_1 = arith.constant 0 : i32
    %c0_i32_2 = arith.constant 0 : i32
    return %c0_i32, %c0_i32_0, %c0_i32_1 : i32, i32, i32
  }
  func.func @transform_13(%arg0: i32) -> (i32, i32, i32, i32) {
    %c0_i32 = arith.constant 0 : i32
    %c0_i32_0 = arith.constant 0 : i32
    %c0_i32_1 = arith.constant 0 : i32
    %c0_i32_2 = arith.constant 0 : i32
    return %arg0, %c0_i32, %c0_i32_0, %c0_i32_1 : i32, i32, i32, i32
  }
}

module attributes {stable_mosaic.version = 11 : i64} {
  func.func @_transition_kernel(%arg0: i32, %arg1: memref<1x8x8x32xf32, #tpu.memory_space<vmem>>, %arg2: memref<1x32xf32, #tpu.memory_space<vmem>>, %arg3: memref<1x32xf32, #tpu.memory_space<vmem>>, %arg4: memref<32x16xbf16, #tpu.memory_space<vmem>>, %arg5: memref<1x8x8x16xf32, #tpu.memory_space<vmem>>) attributes {dimension_semantics = [#tpu.dimension_semantics<parallel>], iteration_bounds = array<i64: 2>, scalar_prefetch = 0 : i64, scratch_operands = 0 : i64, tpu.core_type = #tpu.core_type<tc>, window_params = [{transform_indices = @transform_0, window_bounds = array<i64: 1, 8, 8, 32>}, {pipeline_mode = #tpu.pipeline_mode<synchronous>, transform_indices = @transform_1, window_bounds = array<i64: 1, 32>}, {pipeline_mode = #tpu.pipeline_mode<synchronous>, transform_indices = @transform_2, window_bounds = array<i64: 1, 32>}, {pipeline_mode = #tpu.pipeline_mode<synchronous>, transform_indices = @transform_3, window_bounds = array<i64: 32, 16>}, {transform_indices = @transform_4, window_bounds = array<i64: 1, 8, 8, 16>}]} {
    %c0 = arith.constant 0 : index
    %c0_0 = arith.constant 0 : index
    %c0_1 = arith.constant 0 : index
    %c0_2 = arith.constant 0 : index
    %0 = vector.load %arg1[%c0, %c0_0, %c0_1, %c0_2] : memref<1x8x8x32xf32, #tpu.memory_space<vmem>>, vector<1x8x8x32xf32>
    %1 = vector.shape_cast %0 : vector<1x8x8x32xf32> to vector<8x8x32xf32>
    %2 = vector.shape_cast %1 : vector<8x8x32xf32> to vector<64x32xf32>
    %c0_3 = arith.constant 0 : index
    %c0_4 = arith.constant 0 : index
    %3 = vector.load %arg2[%c0_3, %c0_4] : memref<1x32xf32, #tpu.memory_space<vmem>>, vector<1x32xf32>
    %4 = vector.broadcast %3 : vector<1x32xf32> to vector<64x32xf32>
    %5 = arith.mulf %2, %4 : vector<64x32xf32>
    %c0_5 = arith.constant 0 : index
    %c0_6 = arith.constant 0 : index
    %6 = vector.load %arg3[%c0_5, %c0_6] : memref<1x32xf32, #tpu.memory_space<vmem>>, vector<1x32xf32>
    %7 = vector.broadcast %6 : vector<1x32xf32> to vector<64x32xf32>
    %8 = arith.addf %5, %7 : vector<64x32xf32>
    %cst = arith.constant 0.000000e+00 : f32
    %9 = vector.broadcast %cst : f32 to vector<64x32xf32>
    %10 = arith.maximumf %8, %9 : vector<64x32xf32>
    %11 = arith.truncf %10 : vector<64x32xf32> to vector<64x32xbf16>
    %c0_7 = arith.constant 0 : index
    %c0_8 = arith.constant 0 : index
    %12 = vector.load %arg4[%c0_7, %c0_8] : memref<32x16xbf16, #tpu.memory_space<vmem>>, vector<32x16xbf16>
    %cst_9 = arith.constant dense<0.000000e+00> : vector<64x16xf32>
    %13 = tpu.matmul %11, %12, %cst_9 {dimension_numbers = #tpu.dot_dimension_numbers<[1], [0], [0], [1], [0, 0, 1, 1], [], []>} : vector<64x32xbf16>, vector<32x16xbf16>, vector<64x16xf32> -> vector<64x16xf32>
    %14 = vector.shape_cast %13 : vector<64x16xf32> to vector<8x8x16xf32>
    %c0_10 = arith.constant 0 : index
    %c0_11 = arith.constant 0 : index
    %c0_12 = arith.constant 0 : index
    %c0_13 = arith.constant 0 : index
    %15 = vector.load %arg5[%c0_10, %c0_11, %c0_12, %c0_13] : memref<1x8x8x16xf32, #tpu.memory_space<vmem>>, vector<1x8x8x16xf32>
    %16 = vector.shape_cast %15 : vector<1x8x8x16xf32> to vector<8x8x16xf32>
    %17 = vector.shape_cast %14 : vector<8x8x16xf32> to vector<1x8x8x16xf32>
    tpu.vector_store %arg5[%c0_10, %c0_11, %c0_12, %c0_13], %17 {strides = array<i32>} : memref<1x8x8x16xf32, #tpu.memory_space<vmem>>, vector<1x8x8x16xf32>,
    return
  }
  func.func @transform_0(%arg0: i32) -> (i32, i32, i32, i32) {
    %c0_i32 = arith.constant 0 : i32
    %c0_i32_0 = arith.constant 0 : i32
    %c0_i32_1 = arith.constant 0 : i32
    %c0_i32_2 = arith.constant 0 : i32
    return %arg0, %c0_i32, %c0_i32_0, %c0_i32_1 : i32, i32, i32, i32
  }
  func.func @transform_1(%arg0: i32) -> (i32, i32) {
    %c0_i32 = arith.constant 0 : i32
    %c0_i32_0 = arith.constant 0 : i32
    %c0_i32_1 = arith.constant 0 : i32
    return %c0_i32, %c0_i32_0 : i32, i32
  }
  func.func @transform_2(%arg0: i32) -> (i32, i32) {
    %c0_i32 = arith.constant 0 : i32
    %c0_i32_0 = arith.constant 0 : i32
    %c0_i32_1 = arith.constant 0 : i32
    return %c0_i32, %c0_i32_0 : i32, i32
  }
  func.func @transform_3(%arg0: i32) -> (i32, i32) {
    %c0_i32 = arith.constant 0 : i32
    %c0_i32_0 = arith.constant 0 : i32
    %c0_i32_1 = arith.constant 0 : i32
    return %c0_i32, %c0_i32_0 : i32, i32
  }
  func.func @transform_4(%arg0: i32) -> (i32, i32, i32, i32) {
    %c0_i32 = arith.constant 0 : i32
    %c0_i32_0 = arith.constant 0 : i32
    %c0_i32_1 = arith.constant 0 : i32
    %c0_i32_2 = arith.constant 0 : i32
    return %arg0, %c0_i32, %c0_i32_0, %c0_i32_1 : i32, i32, i32, i32
  }
}

module attributes {stable_mosaic.version = 11 : i64} {
  func.func @_dense_block_kernel(%arg0: i32, %arg1: memref<1x4x4x16xf32, #tpu.memory_space<vmem>>, %arg2: memref<1x16xf32, #tpu.memory_space<vmem>>, %arg3: memref<1x16xf32, #tpu.memory_space<vmem>>, %arg4: memref<16x16xbf16, #tpu.memory_space<vmem>>, %arg5: memref<1x16xf32, #tpu.memory_space<vmem>>, %arg6: memref<1x16xf32, #tpu.memory_space<vmem>>, %arg7: memref<9x16x8xbf16, #tpu.memory_space<vmem>>, %arg8: memref<1x24xf32, #tpu.memory_space<vmem>>, %arg9: memref<1x24xf32, #tpu.memory_space<vmem>>, %arg10: memref<24x16xbf16, #tpu.memory_space<vmem>>, %arg11: memref<1x16xf32, #tpu.memory_space<vmem>>, %arg12: memref<1x16xf32, #tpu.memory_space<vmem>>, %arg13: memref<9x16x8xbf16, #tpu.memory_space<vmem>>, %arg14: memref<1x4x4x32xf32, #tpu.memory_space<vmem>>, %arg15: memref<6x6x16xf32, #tpu.memory_space<vmem>>) attributes {dimension_semantics = [#tpu.dimension_semantics<parallel>], iteration_bounds = array<i64: 2>, scalar_prefetch = 0 : i64, scratch_operands = 1 : i64, tpu.core_type = #tpu.core_type<tc>, window_params = [{transform_indices = @transform_0, window_bounds = array<i64: 1, 4, 4, 16>}, {pipeline_mode = #tpu.pipeline_mode<synchronous>, transform_indices = @transform_1, window_bounds = array<i64: 1, 16>}, {pipeline_mode = #tpu.pipeline_mode<synchronous>, transform_indices = @transform_2, window_bounds = array<i64: 1, 16>}, {pipeline_mode = #tpu.pipeline_mode<synchronous>, transform_indices = @transform_3, window_bounds = array<i64: 16, 16>}, {pipeline_mode = #tpu.pipeline_mode<synchronous>, transform_indices = @transform_4, window_bounds = array<i64: 1, 16>}, {pipeline_mode = #tpu.pipeline_mode<synchronous>, transform_indices = @transform_5, window_bounds = array<i64: 1, 16>}, {pipeline_mode = #tpu.pipeline_mode<synchronous>, transform_indices = @transform_6, window_bounds = array<i64: 9, 16, 8>}, {pipeline_mode = #tpu.pipeline_mode<synchronous>, transform_indices = @transform_7, window_bounds = array<i64: 1, 24>}, {pipeline_mode = #tpu.pipeline_mode<synchronous>, transform_indices = @transform_8, window_bounds = array<i64: 1, 24>}, {pipeline_mode = #tpu.pipeline_mode<synchronous>, transform_indices = @transform_9, window_bounds = array<i64: 24, 16>}, {pipeline_mode = #tpu.pipeline_mode<synchronous>, transform_indices = @transform_10, window_bounds = array<i64: 1, 16>}, {pipeline_mode = #tpu.pipeline_mode<synchronous>, transform_indices = @transform_11, window_bounds = array<i64: 1, 16>}, {pipeline_mode = #tpu.pipeline_mode<synchronous>, transform_indices = @transform_12, window_bounds = array<i64: 9, 16, 8>}, {transform_indices = @transform_13, window_bounds = array<i64: 1, 4, 4, 32>}]} {
    %cst = arith.constant 0.000000e+00 : f32
    %0 = vector.broadcast %cst : f32 to vector<6x6x16xf32>
    %c0 = arith.constant 0 : index
    %c0_0 = arith.constant 0 : index
    %c0_1 = arith.constant 0 : index
    %1 = vector.load %arg15[%c0, %c0_0, %c0_1] : memref<6x6x16xf32, #tpu.memory_space<vmem>>, vector<6x6x16xf32>
    tpu.vector_store %arg15[%c0, %c0_0, %c0_1], %0 {strides = array<i32>} : memref<6x6x16xf32, #tpu.memory_space<vmem>>, vector<6x6x16xf32>,
    %c0_2 = arith.constant 0 : index
    %c0_3 = arith.constant 0 : index
    %c0_4 = arith.constant 0 : index
    %c0_5 = arith.constant 0 : index
    %2 = vector.load %arg1[%c0_2, %c0_3, %c0_4, %c0_5] : memref<1x4x4x16xf32, #tpu.memory_space<vmem>>, vector<1x4x4x16xf32>
    %3 = vector.shape_cast %2 : vector<1x4x4x16xf32> to vector<4x4x16xf32>
    %c0_6 = arith.constant 0 : index
    %c0_7 = arith.constant 0 : index
    %c0_8 = arith.constant 0 : index
    %c0_9 = arith.constant 0 : index
    %4 = vector.load %arg14[%c0_6, %c0_7, %c0_8, %c0_9] : memref<1x4x4x32xf32, #tpu.memory_space<vmem>>, vector<1x4x4x16xf32>
    %5 = vector.shape_cast %4 : vector<1x4x4x16xf32> to vector<4x4x16xf32>
    %6 = vector.shape_cast %3 : vector<4x4x16xf32> to vector<1x4x4x16xf32>
    tpu.vector_store %arg14[%c0_6, %c0_7, %c0_8, %c0_9], %6 {strides = array<i32>} : memref<1x4x4x32xf32, #tpu.memory_space<vmem>>, vector<1x4x4x16xf32>,
    %c0_10 = arith.constant 0 : index
    %c0_11 = arith.constant 0 : index
    %c0_12 = arith.constant 0 : index
    %c0_13 = arith.constant 0 : index
    %7 = vector.load %arg14[%c0_10, %c0_11, %c0_12, %c0_13] : memref<1x4x4x32xf32, #tpu.memory_space<vmem>>, vector<1x4x4x16xf32>
    %8 = vector.shape_cast %7 : vector<1x4x4x16xf32> to vector<4x4x16xf32>
    %9 = vector.shape_cast %8 : vector<4x4x16xf32> to vector<16x16xf32>
    %c0_14 = arith.constant 0 : index
    %c0_15 = arith.constant 0 : index
    %10 = vector.load %arg2[%c0_14, %c0_15] : memref<1x16xf32, #tpu.memory_space<vmem>>, vector<1x16xf32>
    %11 = vector.broadcast %10 : vector<1x16xf32> to vector<16x16xf32>
    %12 = arith.mulf %9, %11 : vector<16x16xf32>
    %c0_16 = arith.constant 0 : index
    %c0_17 = arith.constant 0 : index
    %13 = vector.load %arg3[%c0_16, %c0_17] : memref<1x16xf32, #tpu.memory_space<vmem>>, vector<1x16xf32>
    %14 = vector.broadcast %13 : vector<1x16xf32> to vector<16x16xf32>
    %15 = arith.addf %12, %14 : vector<16x16xf32>
    %cst_18 = arith.constant 0.000000e+00 : f32
    %16 = vector.broadcast %cst_18 : f32 to vector<16x16xf32>
    %17 = arith.maximumf %15, %16 : vector<16x16xf32>
    %18 = arith.truncf %17 : vector<16x16xf32> to vector<16x16xbf16>
    %c0_19 = arith.constant 0 : index
    %c0_20 = arith.constant 0 : index
    %19 = vector.load %arg4[%c0_19, %c0_20] : memref<16x16xbf16, #tpu.memory_space<vmem>>, vector<16x16xbf16>
    %cst_21 = arith.constant dense<0.000000e+00> : vector<16x16xf32>
    %20 = tpu.matmul %18, %19, %cst_21 {dimension_numbers = #tpu.dot_dimension_numbers<[1], [0], [0], [1], [0, 0, 1, 1], [], []>} : vector<16x16xbf16>, vector<16x16xbf16>, vector<16x16xf32> -> vector<16x16xf32>
    %c0_22 = arith.constant 0 : index
    %c0_23 = arith.constant 0 : index
    %21 = vector.load %arg5[%c0_22, %c0_23] : memref<1x16xf32, #tpu.memory_space<vmem>>, vector<1x16xf32>
    %22 = vector.broadcast %21 : vector<1x16xf32> to vector<16x16xf32>
    %23 = arith.mulf %20, %22 : vector<16x16xf32>
    %c0_24 = arith.constant 0 : index
    %c0_25 = arith.constant 0 : index
    %24 = vector.load %arg6[%c0_24, %c0_25] : memref<1x16xf32, #tpu.memory_space<vmem>>, vector<1x16xf32>
    %25 = vector.broadcast %24 : vector<1x16xf32> to vector<16x16xf32>
    %26 = arith.addf %23, %25 : vector<16x16xf32>
    %cst_26 = arith.constant 0.000000e+00 : f32
    %27 = vector.broadcast %cst_26 : f32 to vector<16x16xf32>
    %28 = arith.maximumf %26, %27 : vector<16x16xf32>
    %29 = vector.shape_cast %28 : vector<16x16xf32> to vector<4x4x16xf32>
    %c1 = arith.constant 1 : index
    %c1_27 = arith.constant 1 : index
    %c0_28 = arith.constant 0 : index
    %30 = vector.load %arg15[%c1, %c1_27, %c0_28] : memref<6x6x16xf32, #tpu.memory_space<vmem>>, vector<4x4x16xf32>
    tpu.vector_store %arg15[%c1, %c1_27, %c0_28], %29 {strides = array<i32>} : memref<6x6x16xf32, #tpu.memory_space<vmem>>, vector<4x4x16xf32>,
    %cst_29 = arith.constant 0.000000e+00 : f32
    %31 = vector.broadcast %cst_29 : f32 to vector<16x8xf32>
    %c0_30 = arith.constant 0 : index
    %c0_31 = arith.constant 0 : index
    %c0_32 = arith.constant 0 : index
    %32 = vector.load %arg15[%c0_30, %c0_31, %c0_32] : memref<6x6x16xf32, #tpu.memory_space<vmem>>, vector<4x4x16xf32>
    %33 = vector.shape_cast %32 : vector<4x4x16xf32> to vector<16x16xf32>
    %34 = arith.truncf %33 : vector<16x16xf32> to vector<16x16xbf16>
    %c0_33 = arith.constant 0 : index
    %c0_34 = arith.constant 0 : index
    %c0_35 = arith.constant 0 : index
    %35 = vector.load %arg7[%c0_33, %c0_34, %c0_35] : memref<9x16x8xbf16, #tpu.memory_space<vmem>>, vector<1x16x8xbf16>
    %36 = vector.shape_cast %35 : vector<1x16x8xbf16> to vector<16x8xbf16>
    %cst_36 = arith.constant dense<0.000000e+00> : vector<16x8xf32>
    %37 = tpu.matmul %34, %36, %cst_36 {dimension_numbers = #tpu.dot_dimension_numbers<[1], [0], [0], [1], [0, 0, 1, 1], [], []>} : vector<16x16xbf16>, vector<16x8xbf16>, vector<16x8xf32> -> vector<16x8xf32>
    %38 = arith.addf %31, %37 : vector<16x8xf32>
    %c0_37 = arith.constant 0 : index
    %c1_38 = arith.constant 1 : index
    %c0_39 = arith.constant 0 : index
    %39 = vector.load %arg15[%c0_37, %c1_38, %c0_39] : memref<6x6x16xf32, #tpu.memory_space<vmem>>, vector<4x4x16xf32>
    %40 = vector.shape_cast %39 : vector<4x4x16xf32> to vector<16x16xf32>
    %41 = arith.truncf %40 : vector<16x16xf32> to vector<16x16xbf16>
    %c1_40 = arith.constant 1 : index
    %c0_41 = arith.constant 0 : index
    %c0_42 = arith.constant 0 : index
    %42 = vector.load %arg7[%c1_40, %c0_41, %c0_42] : memref<9x16x8xbf16, #tpu.memory_space<vmem>>, vector<1x16x8xbf16>
    %43 = vector.shape_cast %42 : vector<1x16x8xbf16> to vector<16x8xbf16>
    %cst_43 = arith.constant dense<0.000000e+00> : vector<16x8xf32>
    %44 = tpu.matmul %41, %43, %cst_43 {dimension_numbers = #tpu.dot_dimension_numbers<[1], [0], [0], [1], [0, 0, 1, 1], [], []>} : vector<16x16xbf16>, vector<16x8xbf16>, vector<16x8xf32> -> vector<16x8xf32>
    %45 = arith.addf %38, %44 : vector<16x8xf32>
    %c0_44 = arith.constant 0 : index
    %c2 = arith.constant 2 : index
    %c0_45 = arith.constant 0 : index
    %46 = vector.load %arg15[%c0_44, %c2, %c0_45] : memref<6x6x16xf32, #tpu.memory_space<vmem>>, vector<4x4x16xf32>
    %47 = vector.shape_cast %46 : vector<4x4x16xf32> to vector<16x16xf32>
    %48 = arith.truncf %47 : vector<16x16xf32> to vector<16x16xbf16>
    %c2_46 = arith.constant 2 : index
    %c0_47 = arith.constant 0 : index
    %c0_48 = arith.constant 0 : index
    %49 = vector.load %arg7[%c2_46, %c0_47, %c0_48] : memref<9x16x8xbf16, #tpu.memory_space<vmem>>, vector<1x16x8xbf16>
    %50 = vector.shape_cast %49 : vector<1x16x8xbf16> to vector<16x8xbf16>
    %cst_49 = arith.constant dense<0.000000e+00> : vector<16x8xf32>
    %51 = tpu.matmul %48, %50, %cst_49 {dimension_numbers = #tpu.dot_dimension_numbers<[1], [0], [0], [1], [0, 0, 1, 1], [], []>} : vector<16x16xbf16>, vector<16x8xbf16>, vector<16x8xf32> -> vector<16x8xf32>
    %52 = arith.addf %45, %51 : vector<16x8xf32>
    %c1_50 = arith.constant 1 : index
    %c0_51 = arith.constant 0 : index
    %c0_52 = arith.constant 0 : index
    %53 = vector.load %arg15[%c1_50, %c0_51, %c0_52] : memref<6x6x16xf32, #tpu.memory_space<vmem>>, vector<4x4x16xf32>
    %54 = vector.shape_cast %53 : vector<4x4x16xf32> to vector<16x16xf32>
    %55 = arith.truncf %54 : vector<16x16xf32> to vector<16x16xbf16>
    %c3 = arith.constant 3 : index
    %c0_53 = arith.constant 0 : index
    %c0_54 = arith.constant 0 : index
    %56 = vector.load %arg7[%c3, %c0_53, %c0_54] : memref<9x16x8xbf16, #tpu.memory_space<vmem>>, vector<1x16x8xbf16>
    %57 = vector.shape_cast %56 : vector<1x16x8xbf16> to vector<16x8xbf16>
    %cst_55 = arith.constant dense<0.000000e+00> : vector<16x8xf32>
    %58 = tpu.matmul %55, %57, %cst_55 {dimension_numbers = #tpu.dot_dimension_numbers<[1], [0], [0], [1], [0, 0, 1, 1], [], []>} : vector<16x16xbf16>, vector<16x8xbf16>, vector<16x8xf32> -> vector<16x8xf32>
    %59 = arith.addf %52, %58 : vector<16x8xf32>
    %c1_56 = arith.constant 1 : index
    %c1_57 = arith.constant 1 : index
    %c0_58 = arith.constant 0 : index
    %60 = vector.load %arg15[%c1_56, %c1_57, %c0_58] : memref<6x6x16xf32, #tpu.memory_space<vmem>>, vector<4x4x16xf32>
    %61 = vector.shape_cast %60 : vector<4x4x16xf32> to vector<16x16xf32>
    %62 = arith.truncf %61 : vector<16x16xf32> to vector<16x16xbf16>
    %c4 = arith.constant 4 : index
    %c0_59 = arith.constant 0 : index
    %c0_60 = arith.constant 0 : index
    %63 = vector.load %arg7[%c4, %c0_59, %c0_60] : memref<9x16x8xbf16, #tpu.memory_space<vmem>>, vector<1x16x8xbf16>
    %64 = vector.shape_cast %63 : vector<1x16x8xbf16> to vector<16x8xbf16>
    %cst_61 = arith.constant dense<0.000000e+00> : vector<16x8xf32>
    %65 = tpu.matmul %62, %64, %cst_61 {dimension_numbers = #tpu.dot_dimension_numbers<[1], [0], [0], [1], [0, 0, 1, 1], [], []>} : vector<16x16xbf16>, vector<16x8xbf16>, vector<16x8xf32> -> vector<16x8xf32>
    %66 = arith.addf %59, %65 : vector<16x8xf32>
    %c1_62 = arith.constant 1 : index
    %c2_63 = arith.constant 2 : index
    %c0_64 = arith.constant 0 : index
    %67 = vector.load %arg15[%c1_62, %c2_63, %c0_64] : memref<6x6x16xf32, #tpu.memory_space<vmem>>, vector<4x4x16xf32>
    %68 = vector.shape_cast %67 : vector<4x4x16xf32> to vector<16x16xf32>
    %69 = arith.truncf %68 : vector<16x16xf32> to vector<16x16xbf16>
    %c5 = arith.constant 5 : index
    %c0_65 = arith.constant 0 : index
    %c0_66 = arith.constant 0 : index
    %70 = vector.load %arg7[%c5, %c0_65, %c0_66] : memref<9x16x8xbf16, #tpu.memory_space<vmem>>, vector<1x16x8xbf16>
    %71 = vector.shape_cast %70 : vector<1x16x8xbf16> to vector<16x8xbf16>
    %cst_67 = arith.constant dense<0.000000e+00> : vector<16x8xf32>
    %72 = tpu.matmul %69, %71, %cst_67 {dimension_numbers = #tpu.dot_dimension_numbers<[1], [0], [0], [1], [0, 0, 1, 1], [], []>} : vector<16x16xbf16>, vector<16x8xbf16>, vector<16x8xf32> -> vector<16x8xf32>
    %73 = arith.addf %66, %72 : vector<16x8xf32>
    %c2_68 = arith.constant 2 : index
    %c0_69 = arith.constant 0 : index
    %c0_70 = arith.constant 0 : index
    %74 = vector.load %arg15[%c2_68, %c0_69, %c0_70] : memref<6x6x16xf32, #tpu.memory_space<vmem>>, vector<4x4x16xf32>
    %75 = vector.shape_cast %74 : vector<4x4x16xf32> to vector<16x16xf32>
    %76 = arith.truncf %75 : vector<16x16xf32> to vector<16x16xbf16>
    %c6 = arith.constant 6 : index
    %c0_71 = arith.constant 0 : index
    %c0_72 = arith.constant 0 : index
    %77 = vector.load %arg7[%c6, %c0_71, %c0_72] : memref<9x16x8xbf16, #tpu.memory_space<vmem>>, vector<1x16x8xbf16>
    %78 = vector.shape_cast %77 : vector<1x16x8xbf16> to vector<16x8xbf16>
    %cst_73 = arith.constant dense<0.000000e+00> : vector<16x8xf32>
    %79 = tpu.matmul %76, %78, %cst_73 {dimension_numbers = #tpu.dot_dimension_numbers<[1], [0], [0], [1], [0, 0, 1, 1], [], []>} : vector<16x16xbf16>, vector<16x8xbf16>, vector<16x8xf32> -> vector<16x8xf32>
    %80 = arith.addf %73, %79 : vector<16x8xf32>
    %c2_74 = arith.constant 2 : index
    %c1_75 = arith.constant 1 : index
    %c0_76 = arith.constant 0 : index
    %81 = vector.load %arg15[%c2_74, %c1_75, %c0_76] : memref<6x6x16xf32, #tpu.memory_space<vmem>>, vector<4x4x16xf32>
    %82 = vector.shape_cast %81 : vector<4x4x16xf32> to vector<16x16xf32>
    %83 = arith.truncf %82 : vector<16x16xf32> to vector<16x16xbf16>
    %c7 = arith.constant 7 : index
    %c0_77 = arith.constant 0 : index
    %c0_78 = arith.constant 0 : index
    %84 = vector.load %arg7[%c7, %c0_77, %c0_78] : memref<9x16x8xbf16, #tpu.memory_space<vmem>>, vector<1x16x8xbf16>
    %85 = vector.shape_cast %84 : vector<1x16x8xbf16> to vector<16x8xbf16>
    %cst_79 = arith.constant dense<0.000000e+00> : vector<16x8xf32>
    %86 = tpu.matmul %83, %85, %cst_79 {dimension_numbers = #tpu.dot_dimension_numbers<[1], [0], [0], [1], [0, 0, 1, 1], [], []>} : vector<16x16xbf16>, vector<16x8xbf16>, vector<16x8xf32> -> vector<16x8xf32>
    %87 = arith.addf %80, %86 : vector<16x8xf32>
    %c2_80 = arith.constant 2 : index
    %c2_81 = arith.constant 2 : index
    %c0_82 = arith.constant 0 : index
    %88 = vector.load %arg15[%c2_80, %c2_81, %c0_82] : memref<6x6x16xf32, #tpu.memory_space<vmem>>, vector<4x4x16xf32>
    %89 = vector.shape_cast %88 : vector<4x4x16xf32> to vector<16x16xf32>
    %90 = arith.truncf %89 : vector<16x16xf32> to vector<16x16xbf16>
    %c8 = arith.constant 8 : index
    %c0_83 = arith.constant 0 : index
    %c0_84 = arith.constant 0 : index
    %91 = vector.load %arg7[%c8, %c0_83, %c0_84] : memref<9x16x8xbf16, #tpu.memory_space<vmem>>, vector<1x16x8xbf16>
    %92 = vector.shape_cast %91 : vector<1x16x8xbf16> to vector<16x8xbf16>
    %cst_85 = arith.constant dense<0.000000e+00> : vector<16x8xf32>
    %93 = tpu.matmul %90, %92, %cst_85 {dimension_numbers = #tpu.dot_dimension_numbers<[1], [0], [0], [1], [0, 0, 1, 1], [], []>} : vector<16x16xbf16>, vector<16x8xbf16>, vector<16x8xf32> -> vector<16x8xf32>
    %94 = arith.addf %87, %93 : vector<16x8xf32>
    %95 = vector.shape_cast %94 : vector<16x8xf32> to vector<4x4x8xf32>
    %c0_86 = arith.constant 0 : index
    %c0_87 = arith.constant 0 : index
    %c0_88 = arith.constant 0 : index
    %c16 = arith.constant 16 : index
    %96 = vector.load %arg14[%c0_86, %c0_87, %c0_88, %c16] : memref<1x4x4x32xf32, #tpu.memory_space<vmem>>, vector<1x4x4x8xf32>
    %97 = vector.shape_cast %96 : vector<1x4x4x8xf32> to vector<4x4x8xf32>
    %98 = vector.shape_cast %95 : vector<4x4x8xf32> to vector<1x4x4x8xf32>
    tpu.vector_store %arg14[%c0_86, %c0_87, %c0_88, %c16], %98 {strides = array<i32>} : memref<1x4x4x32xf32, #tpu.memory_space<vmem>>, vector<1x4x4x8xf32>,
    %c0_89 = arith.constant 0 : index
    %c0_90 = arith.constant 0 : index
    %c0_91 = arith.constant 0 : index
    %c0_92 = arith.constant 0 : index
    %99 = vector.load %arg14[%c0_89, %c0_90, %c0_91, %c0_92] : memref<1x4x4x32xf32, #tpu.memory_space<vmem>>, vector<1x4x4x24xf32>
    %100 = vector.shape_cast %99 : vector<1x4x4x24xf32> to vector<4x4x24xf32>
    %101 = vector.shape_cast %100 : vector<4x4x24xf32> to vector<16x24xf32>
    %c0_93 = arith.constant 0 : index
    %c0_94 = arith.constant 0 : index
    %102 = vector.load %arg8[%c0_93, %c0_94] : memref<1x24xf32, #tpu.memory_space<vmem>>, vector<1x24xf32>
    %103 = vector.broadcast %102 : vector<1x24xf32> to vector<16x24xf32>
    %104 = arith.mulf %101, %103 : vector<16x24xf32>
    %c0_95 = arith.constant 0 : index
    %c0_96 = arith.constant 0 : index
    %105 = vector.load %arg9[%c0_95, %c0_96] : memref<1x24xf32, #tpu.memory_space<vmem>>, vector<1x24xf32>
    %106 = vector.broadcast %105 : vector<1x24xf32> to vector<16x24xf32>
    %107 = arith.addf %104, %106 : vector<16x24xf32>
    %cst_97 = arith.constant 0.000000e+00 : f32
    %108 = vector.broadcast %cst_97 : f32 to vector<16x24xf32>
    %109 = arith.maximumf %107, %108 : vector<16x24xf32>
    %110 = arith.truncf %109 : vector<16x24xf32> to vector<16x24xbf16>
    %c0_98 = arith.constant 0 : index
    %c0_99 = arith.constant 0 : index
    %111 = vector.load %arg10[%c0_98, %c0_99] : memref<24x16xbf16, #tpu.memory_space<vmem>>, vector<24x16xbf16>
    %cst_100 = arith.constant dense<0.000000e+00> : vector<16x16xf32>
    %112 = tpu.matmul %110, %111, %cst_100 {dimension_numbers = #tpu.dot_dimension_numbers<[1], [0], [0], [1], [0, 0, 1, 1], [], []>} : vector<16x24xbf16>, vector<24x16xbf16>, vector<16x16xf32> -> vector<16x16xf32>
    %c0_101 = arith.constant 0 : index
    %c0_102 = arith.constant 0 : index
    %113 = vector.load %arg11[%c0_101, %c0_102] : memref<1x16xf32, #tpu.memory_space<vmem>>, vector<1x16xf32>
    %114 = vector.broadcast %113 : vector<1x16xf32> to vector<16x16xf32>
    %115 = arith.mulf %112, %114 : vector<16x16xf32>
    %c0_103 = arith.constant 0 : index
    %c0_104 = arith.constant 0 : index
    %116 = vector.load %arg12[%c0_103, %c0_104] : memref<1x16xf32, #tpu.memory_space<vmem>>, vector<1x16xf32>
    %117 = vector.broadcast %116 : vector<1x16xf32> to vector<16x16xf32>
    %118 = arith.addf %115, %117 : vector<16x16xf32>
    %cst_105 = arith.constant 0.000000e+00 : f32
    %119 = vector.broadcast %cst_105 : f32 to vector<16x16xf32>
    %120 = arith.maximumf %118, %119 : vector<16x16xf32>
    %121 = vector.shape_cast %120 : vector<16x16xf32> to vector<4x4x16xf32>
    %c1_106 = arith.constant 1 : index
    %c1_107 = arith.constant 1 : index
    %c0_108 = arith.constant 0 : index
    %122 = vector.load %arg15[%c1_106, %c1_107, %c0_108] : memref<6x6x16xf32, #tpu.memory_space<vmem>>, vector<4x4x16xf32>
    tpu.vector_store %arg15[%c1_106, %c1_107, %c0_108], %121 {strides = array<i32>} : memref<6x6x16xf32, #tpu.memory_space<vmem>>, vector<4x4x16xf32>,
    %cst_109 = arith.constant 0.000000e+00 : f32
    %123 = vector.broadcast %cst_109 : f32 to vector<16x8xf32>
    %c0_110 = arith.constant 0 : index
    %c0_111 = arith.constant 0 : index
    %c0_112 = arith.constant 0 : index
    %124 = vector.load %arg15[%c0_110, %c0_111, %c0_112] : memref<6x6x16xf32, #tpu.memory_space<vmem>>, vector<4x4x16xf32>
    %125 = vector.shape_cast %124 : vector<4x4x16xf32> to vector<16x16xf32>
    %126 = arith.truncf %125 : vector<16x16xf32> to vector<16x16xbf16>
    %c0_113 = arith.constant 0 : index
    %c0_114 = arith.constant 0 : index
    %c0_115 = arith.constant 0 : index
    %127 = vector.load %arg13[%c0_113, %c0_114, %c0_115] : memref<9x16x8xbf16, #tpu.memory_space<vmem>>, vector<1x16x8xbf16>
    %128 = vector.shape_cast %127 : vector<1x16x8xbf16> to vector<16x8xbf16>
    %cst_116 = arith.constant dense<0.000000e+00> : vector<16x8xf32>
    %129 = tpu.matmul %126, %128, %cst_116 {dimension_numbers = #tpu.dot_dimension_numbers<[1], [0], [0], [1], [0, 0, 1, 1], [], []>} : vector<16x16xbf16>, vector<16x8xbf16>, vector<16x8xf32> -> vector<16x8xf32>
    %130 = arith.addf %123, %129 : vector<16x8xf32>
    %c0_117 = arith.constant 0 : index
    %c1_118 = arith.constant 1 : index
    %c0_119 = arith.constant 0 : index
    %131 = vector.load %arg15[%c0_117, %c1_118, %c0_119] : memref<6x6x16xf32, #tpu.memory_space<vmem>>, vector<4x4x16xf32>
    %132 = vector.shape_cast %131 : vector<4x4x16xf32> to vector<16x16xf32>
    %133 = arith.truncf %132 : vector<16x16xf32> to vector<16x16xbf16>
    %c1_120 = arith.constant 1 : index
    %c0_121 = arith.constant 0 : index
    %c0_122 = arith.constant 0 : index
    %134 = vector.load %arg13[%c1_120, %c0_121, %c0_122] : memref<9x16x8xbf16, #tpu.memory_space<vmem>>, vector<1x16x8xbf16>
    %135 = vector.shape_cast %134 : vector<1x16x8xbf16> to vector<16x8xbf16>
    %cst_123 = arith.constant dense<0.000000e+00> : vector<16x8xf32>
    %136 = tpu.matmul %133, %135, %cst_123 {dimension_numbers = #tpu.dot_dimension_numbers<[1], [0], [0], [1], [0, 0, 1, 1], [], []>} : vector<16x16xbf16>, vector<16x8xbf16>, vector<16x8xf32> -> vector<16x8xf32>
    %137 = arith.addf %130, %136 : vector<16x8xf32>
    %c0_124 = arith.constant 0 : index
    %c2_125 = arith.constant 2 : index
    %c0_126 = arith.constant 0 : index
    %138 = vector.load %arg15[%c0_124, %c2_125, %c0_126] : memref<6x6x16xf32, #tpu.memory_space<vmem>>, vector<4x4x16xf32>
    %139 = vector.shape_cast %138 : vector<4x4x16xf32> to vector<16x16xf32>
    %140 = arith.truncf %139 : vector<16x16xf32> to vector<16x16xbf16>
    %c2_127 = arith.constant 2 : index
    %c0_128 = arith.constant 0 : index
    %c0_129 = arith.constant 0 : index
    %141 = vector.load %arg13[%c2_127, %c0_128, %c0_129] : memref<9x16x8xbf16, #tpu.memory_space<vmem>>, vector<1x16x8xbf16>
    %142 = vector.shape_cast %141 : vector<1x16x8xbf16> to vector<16x8xbf16>
    %cst_130 = arith.constant dense<0.000000e+00> : vector<16x8xf32>
    %143 = tpu.matmul %140, %142, %cst_130 {dimension_numbers = #tpu.dot_dimension_numbers<[1], [0], [0], [1], [0, 0, 1, 1], [], []>} : vector<16x16xbf16>, vector<16x8xbf16>, vector<16x8xf32> -> vector<16x8xf32>
    %144 = arith.addf %137, %143 : vector<16x8xf32>
    %c1_131 = arith.constant 1 : index
    %c0_132 = arith.constant 0 : index
    %c0_133 = arith.constant 0 : index
    %145 = vector.load %arg15[%c1_131, %c0_132, %c0_133] : memref<6x6x16xf32, #tpu.memory_space<vmem>>, vector<4x4x16xf32>
    %146 = vector.shape_cast %145 : vector<4x4x16xf32> to vector<16x16xf32>
    %147 = arith.truncf %146 : vector<16x16xf32> to vector<16x16xbf16>
    %c3_134 = arith.constant 3 : index
    %c0_135 = arith.constant 0 : index
    %c0_136 = arith.constant 0 : index
    %148 = vector.load %arg13[%c3_134, %c0_135, %c0_136] : memref<9x16x8xbf16, #tpu.memory_space<vmem>>, vector<1x16x8xbf16>
    %149 = vector.shape_cast %148 : vector<1x16x8xbf16> to vector<16x8xbf16>
    %cst_137 = arith.constant dense<0.000000e+00> : vector<16x8xf32>
    %150 = tpu.matmul %147, %149, %cst_137 {dimension_numbers = #tpu.dot_dimension_numbers<[1], [0], [0], [1], [0, 0, 1, 1], [], []>} : vector<16x16xbf16>, vector<16x8xbf16>, vector<16x8xf32> -> vector<16x8xf32>
    %151 = arith.addf %144, %150 : vector<16x8xf32>
    %c1_138 = arith.constant 1 : index
    %c1_139 = arith.constant 1 : index
    %c0_140 = arith.constant 0 : index
    %152 = vector.load %arg15[%c1_138, %c1_139, %c0_140] : memref<6x6x16xf32, #tpu.memory_space<vmem>>, vector<4x4x16xf32>
    %153 = vector.shape_cast %152 : vector<4x4x16xf32> to vector<16x16xf32>
    %154 = arith.truncf %153 : vector<16x16xf32> to vector<16x16xbf16>
    %c4_141 = arith.constant 4 : index
    %c0_142 = arith.constant 0 : index
    %c0_143 = arith.constant 0 : index
    %155 = vector.load %arg13[%c4_141, %c0_142, %c0_143] : memref<9x16x8xbf16, #tpu.memory_space<vmem>>, vector<1x16x8xbf16>
    %156 = vector.shape_cast %155 : vector<1x16x8xbf16> to vector<16x8xbf16>
    %cst_144 = arith.constant dense<0.000000e+00> : vector<16x8xf32>
    %157 = tpu.matmul %154, %156, %cst_144 {dimension_numbers = #tpu.dot_dimension_numbers<[1], [0], [0], [1], [0, 0, 1, 1], [], []>} : vector<16x16xbf16>, vector<16x8xbf16>, vector<16x8xf32> -> vector<16x8xf32>
    %158 = arith.addf %151, %157 : vector<16x8xf32>
    %c1_145 = arith.constant 1 : index
    %c2_146 = arith.constant 2 : index
    %c0_147 = arith.constant 0 : index
    %159 = vector.load %arg15[%c1_145, %c2_146, %c0_147] : memref<6x6x16xf32, #tpu.memory_space<vmem>>, vector<4x4x16xf32>
    %160 = vector.shape_cast %159 : vector<4x4x16xf32> to vector<16x16xf32>
    %161 = arith.truncf %160 : vector<16x16xf32> to vector<16x16xbf16>
    %c5_148 = arith.constant 5 : index
    %c0_149 = arith.constant 0 : index
    %c0_150 = arith.constant 0 : index
    %162 = vector.load %arg13[%c5_148, %c0_149, %c0_150] : memref<9x16x8xbf16, #tpu.memory_space<vmem>>, vector<1x16x8xbf16>
    %163 = vector.shape_cast %162 : vector<1x16x8xbf16> to vector<16x8xbf16>
    %cst_151 = arith.constant dense<0.000000e+00> : vector<16x8xf32>
    %164 = tpu.matmul %161, %163, %cst_151 {dimension_numbers = #tpu.dot_dimension_numbers<[1], [0], [0], [1], [0, 0, 1, 1], [], []>} : vector<16x16xbf16>, vector<16x8xbf16>, vector<16x8xf32> -> vector<16x8xf32>
    %165 = arith.addf %158, %164 : vector<16x8xf32>
    %c2_152 = arith.constant 2 : index
    %c0_153 = arith.constant 0 : index
    %c0_154 = arith.constant 0 : index
    %166 = vector.load %arg15[%c2_152, %c0_153, %c0_154] : memref<6x6x16xf32, #tpu.memory_space<vmem>>, vector<4x4x16xf32>
    %167 = vector.shape_cast %166 : vector<4x4x16xf32> to vector<16x16xf32>
    %168 = arith.truncf %167 : vector<16x16xf32> to vector<16x16xbf16>
    %c6_155 = arith.constant 6 : index
    %c0_156 = arith.constant 0 : index
    %c0_157 = arith.constant 0 : index
    %169 = vector.load %arg13[%c6_155, %c0_156, %c0_157] : memref<9x16x8xbf16, #tpu.memory_space<vmem>>, vector<1x16x8xbf16>
    %170 = vector.shape_cast %169 : vector<1x16x8xbf16> to vector<16x8xbf16>
    %cst_158 = arith.constant dense<0.000000e+00> : vector<16x8xf32>
    %171 = tpu.matmul %168, %170, %cst_158 {dimension_numbers = #tpu.dot_dimension_numbers<[1], [0], [0], [1], [0, 0, 1, 1], [], []>} : vector<16x16xbf16>, vector<16x8xbf16>, vector<16x8xf32> -> vector<16x8xf32>
    %172 = arith.addf %165, %171 : vector<16x8xf32>
    %c2_159 = arith.constant 2 : index
    %c1_160 = arith.constant 1 : index
    %c0_161 = arith.constant 0 : index
    %173 = vector.load %arg15[%c2_159, %c1_160, %c0_161] : memref<6x6x16xf32, #tpu.memory_space<vmem>>, vector<4x4x16xf32>
    %174 = vector.shape_cast %173 : vector<4x4x16xf32> to vector<16x16xf32>
    %175 = arith.truncf %174 : vector<16x16xf32> to vector<16x16xbf16>
    %c7_162 = arith.constant 7 : index
    %c0_163 = arith.constant 0 : index
    %c0_164 = arith.constant 0 : index
    %176 = vector.load %arg13[%c7_162, %c0_163, %c0_164] : memref<9x16x8xbf16, #tpu.memory_space<vmem>>, vector<1x16x8xbf16>
    %177 = vector.shape_cast %176 : vector<1x16x8xbf16> to vector<16x8xbf16>
    %cst_165 = arith.constant dense<0.000000e+00> : vector<16x8xf32>
    %178 = tpu.matmul %175, %177, %cst_165 {dimension_numbers = #tpu.dot_dimension_numbers<[1], [0], [0], [1], [0, 0, 1, 1], [], []>} : vector<16x16xbf16>, vector<16x8xbf16>, vector<16x8xf32> -> vector<16x8xf32>
    %179 = arith.addf %172, %178 : vector<16x8xf32>
    %c2_166 = arith.constant 2 : index
    %c2_167 = arith.constant 2 : index
    %c0_168 = arith.constant 0 : index
    %180 = vector.load %arg15[%c2_166, %c2_167, %c0_168] : memref<6x6x16xf32, #tpu.memory_space<vmem>>, vector<4x4x16xf32>
    %181 = vector.shape_cast %180 : vector<4x4x16xf32> to vector<16x16xf32>
    %182 = arith.truncf %181 : vector<16x16xf32> to vector<16x16xbf16>
    %c8_169 = arith.constant 8 : index
    %c0_170 = arith.constant 0 : index
    %c0_171 = arith.constant 0 : index
    %183 = vector.load %arg13[%c8_169, %c0_170, %c0_171] : memref<9x16x8xbf16, #tpu.memory_space<vmem>>, vector<1x16x8xbf16>
    %184 = vector.shape_cast %183 : vector<1x16x8xbf16> to vector<16x8xbf16>
    %cst_172 = arith.constant dense<0.000000e+00> : vector<16x8xf32>
    %185 = tpu.matmul %182, %184, %cst_172 {dimension_numbers = #tpu.dot_dimension_numbers<[1], [0], [0], [1], [0, 0, 1, 1], [], []>} : vector<16x16xbf16>, vector<16x8xbf16>, vector<16x8xf32> -> vector<16x8xf32>
    %186 = arith.addf %179, %185 : vector<16x8xf32>
    %187 = vector.shape_cast %186 : vector<16x8xf32> to vector<4x4x8xf32>
    %c0_173 = arith.constant 0 : index
    %c0_174 = arith.constant 0 : index
    %c0_175 = arith.constant 0 : index
    %c24 = arith.constant 24 : index
    %188 = vector.load %arg14[%c0_173, %c0_174, %c0_175, %c24] : memref<1x4x4x32xf32, #tpu.memory_space<vmem>>, vector<1x4x4x8xf32>
    %189 = vector.shape_cast %188 : vector<1x4x4x8xf32> to vector<4x4x8xf32>
    %190 = vector.shape_cast %187 : vector<4x4x8xf32> to vector<1x4x4x8xf32>
    tpu.vector_store %arg14[%c0_173, %c0_174, %c0_175, %c24], %190 {strides = array<i32>} : memref<1x4x4x32xf32, #tpu.memory_space<vmem>>, vector<1x4x4x8xf32>,
    return
  }
  func.func @transform_0(%arg0: i32) -> (i32, i32, i32, i32) {
    %c0_i32 = arith.constant 0 : i32
    %c0_i32_0 = arith.constant 0 : i32
    %c0_i32_1 = arith.constant 0 : i32
    %c0_i32_2 = arith.constant 0 : i32
    return %arg0, %c0_i32, %c0_i32_0, %c0_i32_1 : i32, i32, i32, i32
  }
  func.func @transform_1(%arg0: i32) -> (i32, i32) {
    %c0_i32 = arith.constant 0 : i32
    %c0_i32_0 = arith.constant 0 : i32
    %c0_i32_1 = arith.constant 0 : i32
    return %c0_i32, %c0_i32_0 : i32, i32
  }
  func.func @transform_2(%arg0: i32) -> (i32, i32) {
    %c0_i32 = arith.constant 0 : i32
    %c0_i32_0 = arith.constant 0 : i32
    %c0_i32_1 = arith.constant 0 : i32
    return %c0_i32, %c0_i32_0 : i32, i32
  }
  func.func @transform_3(%arg0: i32) -> (i32, i32) {
    %c0_i32 = arith.constant 0 : i32
    %c0_i32_0 = arith.constant 0 : i32
    %c0_i32_1 = arith.constant 0 : i32
    return %c0_i32, %c0_i32_0 : i32, i32
  }
  func.func @transform_4(%arg0: i32) -> (i32, i32) {
    %c0_i32 = arith.constant 0 : i32
    %c0_i32_0 = arith.constant 0 : i32
    %c0_i32_1 = arith.constant 0 : i32
    return %c0_i32, %c0_i32_0 : i32, i32
  }
  func.func @transform_5(%arg0: i32) -> (i32, i32) {
    %c0_i32 = arith.constant 0 : i32
    %c0_i32_0 = arith.constant 0 : i32
    %c0_i32_1 = arith.constant 0 : i32
    return %c0_i32, %c0_i32_0 : i32, i32
  }
  func.func @transform_6(%arg0: i32) -> (i32, i32, i32) {
    %c0_i32 = arith.constant 0 : i32
    %c0_i32_0 = arith.constant 0 : i32
    %c0_i32_1 = arith.constant 0 : i32
    %c0_i32_2 = arith.constant 0 : i32
    return %c0_i32, %c0_i32_0, %c0_i32_1 : i32, i32, i32
  }
  func.func @transform_7(%arg0: i32) -> (i32, i32) {
    %c0_i32 = arith.constant 0 : i32
    %c0_i32_0 = arith.constant 0 : i32
    %c0_i32_1 = arith.constant 0 : i32
    return %c0_i32, %c0_i32_0 : i32, i32
  }
  func.func @transform_8(%arg0: i32) -> (i32, i32) {
    %c0_i32 = arith.constant 0 : i32
    %c0_i32_0 = arith.constant 0 : i32
    %c0_i32_1 = arith.constant 0 : i32
    return %c0_i32, %c0_i32_0 : i32, i32
  }
  func.func @transform_9(%arg0: i32) -> (i32, i32) {
    %c0_i32 = arith.constant 0 : i32
    %c0_i32_0 = arith.constant 0 : i32
    %c0_i32_1 = arith.constant 0 : i32
    return %c0_i32, %c0_i32_0 : i32, i32
  }
  func.func @transform_10(%arg0: i32) -> (i32, i32) {
    %c0_i32 = arith.constant 0 : i32
    %c0_i32_0 = arith.constant 0 : i32
    %c0_i32_1 = arith.constant 0 : i32
    return %c0_i32, %c0_i32_0 : i32, i32
  }
  func.func @transform_11(%arg0: i32) -> (i32, i32) {
    %c0_i32 = arith.constant 0 : i32
    %c0_i32_0 = arith.constant 0 : i32
    %c0_i32_1 = arith.constant 0 : i32
    return %c0_i32, %c0_i32_0 : i32, i32
  }
  func.func @transform_12(%arg0: i32) -> (i32, i32, i32) {
    %c0_i32 = arith.constant 0 : i32
    %c0_i32_0 = arith.constant 0 : i32
    %c0_i32_1 = arith.constant 0 : i32
    %c0_i32_2 = arith.constant 0 : i32
    return %c0_i32, %c0_i32_0, %c0_i32_1 : i32, i32, i32
  }
  func.func @transform_13(%arg0: i32) -> (i32, i32, i32, i32) {
    %c0_i32 = arith.constant 0 : i32
    %c0_i32_0 = arith.constant 0 : i32
    %c0_i32_1 = arith.constant 0 : i32
    %c0_i32_2 = arith.constant 0 : i32
    return %arg0, %c0_i32, %c0_i32_0, %c0_i32_1 : i32, i32, i32, i32
  }
}

module attributes {stable_mosaic.version = 11 : i64} {
  func.func @_transition_kernel(%arg0: i32, %arg1: memref<1x4x4x32xf32, #tpu.memory_space<vmem>>, %arg2: memref<1x32xf32, #tpu.memory_space<vmem>>, %arg3: memref<1x32xf32, #tpu.memory_space<vmem>>, %arg4: memref<32x16xbf16, #tpu.memory_space<vmem>>, %arg5: memref<1x4x4x16xf32, #tpu.memory_space<vmem>>) attributes {dimension_semantics = [#tpu.dimension_semantics<parallel>], iteration_bounds = array<i64: 2>, scalar_prefetch = 0 : i64, scratch_operands = 0 : i64, tpu.core_type = #tpu.core_type<tc>, window_params = [{transform_indices = @transform_0, window_bounds = array<i64: 1, 4, 4, 32>}, {pipeline_mode = #tpu.pipeline_mode<synchronous>, transform_indices = @transform_1, window_bounds = array<i64: 1, 32>}, {pipeline_mode = #tpu.pipeline_mode<synchronous>, transform_indices = @transform_2, window_bounds = array<i64: 1, 32>}, {pipeline_mode = #tpu.pipeline_mode<synchronous>, transform_indices = @transform_3, window_bounds = array<i64: 32, 16>}, {transform_indices = @transform_4, window_bounds = array<i64: 1, 4, 4, 16>}]} {
    %c0 = arith.constant 0 : index
    %c0_0 = arith.constant 0 : index
    %c0_1 = arith.constant 0 : index
    %c0_2 = arith.constant 0 : index
    %0 = vector.load %arg1[%c0, %c0_0, %c0_1, %c0_2] : memref<1x4x4x32xf32, #tpu.memory_space<vmem>>, vector<1x4x4x32xf32>
    %1 = vector.shape_cast %0 : vector<1x4x4x32xf32> to vector<4x4x32xf32>
    %2 = vector.shape_cast %1 : vector<4x4x32xf32> to vector<16x32xf32>
    %c0_3 = arith.constant 0 : index
    %c0_4 = arith.constant 0 : index
    %3 = vector.load %arg2[%c0_3, %c0_4] : memref<1x32xf32, #tpu.memory_space<vmem>>, vector<1x32xf32>
    %4 = vector.broadcast %3 : vector<1x32xf32> to vector<16x32xf32>
    %5 = arith.mulf %2, %4 : vector<16x32xf32>
    %c0_5 = arith.constant 0 : index
    %c0_6 = arith.constant 0 : index
    %6 = vector.load %arg3[%c0_5, %c0_6] : memref<1x32xf32, #tpu.memory_space<vmem>>, vector<1x32xf32>
    %7 = vector.broadcast %6 : vector<1x32xf32> to vector<16x32xf32>
    %8 = arith.addf %5, %7 : vector<16x32xf32>
    %cst = arith.constant 0.000000e+00 : f32
    %9 = vector.broadcast %cst : f32 to vector<16x32xf32>
    %10 = arith.maximumf %8, %9 : vector<16x32xf32>
    %11 = arith.truncf %10 : vector<16x32xf32> to vector<16x32xbf16>
    %c0_7 = arith.constant 0 : index
    %c0_8 = arith.constant 0 : index
    %12 = vector.load %arg4[%c0_7, %c0_8] : memref<32x16xbf16, #tpu.memory_space<vmem>>, vector<32x16xbf16>
    %cst_9 = arith.constant dense<0.000000e+00> : vector<16x16xf32>
    %13 = tpu.matmul %11, %12, %cst_9 {dimension_numbers = #tpu.dot_dimension_numbers<[1], [0], [0], [1], [0, 0, 1, 1], [], []>} : vector<16x32xbf16>, vector<32x16xbf16>, vector<16x16xf32> -> vector<16x16xf32>
    %14 = vector.shape_cast %13 : vector<16x16xf32> to vector<4x4x16xf32>
    %c0_10 = arith.constant 0 : index
    %c0_11 = arith.constant 0 : index
    %c0_12 = arith.constant 0 : index
    %c0_13 = arith.constant 0 : index
    %15 = vector.load %arg5[%c0_10, %c0_11, %c0_12, %c0_13] : memref<1x4x4x16xf32, #tpu.memory_space<vmem>>, vector<1x4x4x16xf32>
    %16 = vector.shape_cast %15 : vector<1x4x4x16xf32> to vector<4x4x16xf32>
    %17 = vector.shape_cast %14 : vector<4x4x16xf32> to vector<1x4x4x16xf32>
    tpu.vector_store %arg5[%c0_10, %c0_11, %c0_12, %c0_13], %17 {strides = array<i32>} : memref<1x4x4x16xf32, #tpu.memory_space<vmem>>, vector<1x4x4x16xf32>,
    return
  }
  func.func @transform_0(%arg0: i32) -> (i32, i32, i32, i32) {
    %c0_i32 = arith.constant 0 : i32
    %c0_i32_0 = arith.constant 0 : i32
    %c0_i32_1 = arith.constant 0 : i32
    %c0_i32_2 = arith.constant 0 : i32
    return %arg0, %c0_i32, %c0_i32_0, %c0_i32_1 : i32, i32, i32, i32
  }
  func.func @transform_1(%arg0: i32) -> (i32, i32) {
    %c0_i32 = arith.constant 0 : i32
    %c0_i32_0 = arith.constant 0 : i32
    %c0_i32_1 = arith.constant 0 : i32
    return %c0_i32, %c0_i32_0 : i32, i32
  }
  func.func @transform_2(%arg0: i32) -> (i32, i32) {
    %c0_i32 = arith.constant 0 : i32
    %c0_i32_0 = arith.constant 0 : i32
    %c0_i32_1 = arith.constant 0 : i32
    return %c0_i32, %c0_i32_0 : i32, i32
  }
  func.func @transform_3(%arg0: i32) -> (i32, i32) {
    %c0_i32 = arith.constant 0 : i32
    %c0_i32_0 = arith.constant 0 : i32
    %c0_i32_1 = arith.constant 0 : i32
    return %c0_i32, %c0_i32_0 : i32, i32
  }
  func.func @transform_4(%arg0: i32) -> (i32, i32, i32, i32) {
    %c0_i32 = arith.constant 0 : i32
    %c0_i32_0 = arith.constant 0 : i32
    %c0_i32_1 = arith.constant 0 : i32
    %c0_i32_2 = arith.constant 0 : i32
    return %arg0, %c0_i32, %c0_i32_0, %c0_i32_1 : i32, i32, i32, i32
  }
}

module attributes {stable_mosaic.version = 11 : i64} {
  func.func @_dense_block_kernel(%arg0: i32, %arg1: memref<1x4x4x16xf32, #tpu.memory_space<vmem>>, %arg2: memref<1x16xf32, #tpu.memory_space<vmem>>, %arg3: memref<1x16xf32, #tpu.memory_space<vmem>>, %arg4: memref<16x16xbf16, #tpu.memory_space<vmem>>, %arg5: memref<1x16xf32, #tpu.memory_space<vmem>>, %arg6: memref<1x16xf32, #tpu.memory_space<vmem>>, %arg7: memref<9x16x8xbf16, #tpu.memory_space<vmem>>, %arg8: memref<1x24xf32, #tpu.memory_space<vmem>>, %arg9: memref<1x24xf32, #tpu.memory_space<vmem>>, %arg10: memref<24x16xbf16, #tpu.memory_space<vmem>>, %arg11: memref<1x16xf32, #tpu.memory_space<vmem>>, %arg12: memref<1x16xf32, #tpu.memory_space<vmem>>, %arg13: memref<9x16x8xbf16, #tpu.memory_space<vmem>>, %arg14: memref<1x4x4x32xf32, #tpu.memory_space<vmem>>, %arg15: memref<8x8x16xf32, #tpu.memory_space<vmem>>) attributes {dimension_semantics = [#tpu.dimension_semantics<parallel>], iteration_bounds = array<i64: 2>, scalar_prefetch = 0 : i64, scratch_operands = 1 : i64, tpu.core_type = #tpu.core_type<tc>, window_params = [{transform_indices = @transform_0, window_bounds = array<i64: 1, 4, 4, 16>}, {pipeline_mode = #tpu.pipeline_mode<synchronous>, transform_indices = @transform_1, window_bounds = array<i64: 1, 16>}, {pipeline_mode = #tpu.pipeline_mode<synchronous>, transform_indices = @transform_2, window_bounds = array<i64: 1, 16>}, {pipeline_mode = #tpu.pipeline_mode<synchronous>, transform_indices = @transform_3, window_bounds = array<i64: 16, 16>}, {pipeline_mode = #tpu.pipeline_mode<synchronous>, transform_indices = @transform_4, window_bounds = array<i64: 1, 16>}, {pipeline_mode = #tpu.pipeline_mode<synchronous>, transform_indices = @transform_5, window_bounds = array<i64: 1, 16>}, {pipeline_mode = #tpu.pipeline_mode<synchronous>, transform_indices = @transform_6, window_bounds = array<i64: 9, 16, 8>}, {pipeline_mode = #tpu.pipeline_mode<synchronous>, transform_indices = @transform_7, window_bounds = array<i64: 1, 24>}, {pipeline_mode = #tpu.pipeline_mode<synchronous>, transform_indices = @transform_8, window_bounds = array<i64: 1, 24>}, {pipeline_mode = #tpu.pipeline_mode<synchronous>, transform_indices = @transform_9, window_bounds = array<i64: 24, 16>}, {pipeline_mode = #tpu.pipeline_mode<synchronous>, transform_indices = @transform_10, window_bounds = array<i64: 1, 16>}, {pipeline_mode = #tpu.pipeline_mode<synchronous>, transform_indices = @transform_11, window_bounds = array<i64: 1, 16>}, {pipeline_mode = #tpu.pipeline_mode<synchronous>, transform_indices = @transform_12, window_bounds = array<i64: 9, 16, 8>}, {transform_indices = @transform_13, window_bounds = array<i64: 1, 4, 4, 32>}]} {
    %cst = arith.constant 0.000000e+00 : f32
    %0 = vector.broadcast %cst : f32 to vector<8x8x16xf32>
    %c0 = arith.constant 0 : index
    %c0_0 = arith.constant 0 : index
    %c0_1 = arith.constant 0 : index
    %1 = vector.load %arg15[%c0, %c0_0, %c0_1] : memref<8x8x16xf32, #tpu.memory_space<vmem>>, vector<8x8x16xf32>
    tpu.vector_store %arg15[%c0, %c0_0, %c0_1], %0 {strides = array<i32>} : memref<8x8x16xf32, #tpu.memory_space<vmem>>, vector<8x8x16xf32>,
    %c0_2 = arith.constant 0 : index
    %c0_3 = arith.constant 0 : index
    %c0_4 = arith.constant 0 : index
    %c0_5 = arith.constant 0 : index
    %2 = vector.load %arg1[%c0_2, %c0_3, %c0_4, %c0_5] : memref<1x4x4x16xf32, #tpu.memory_space<vmem>>, vector<1x4x4x16xf32>
    %3 = vector.shape_cast %2 : vector<1x4x4x16xf32> to vector<4x4x16xf32>
    %c0_6 = arith.constant 0 : index
    %c0_7 = arith.constant 0 : index
    %c0_8 = arith.constant 0 : index
    %c0_9 = arith.constant 0 : index
    %4 = vector.load %arg14[%c0_6, %c0_7, %c0_8, %c0_9] : memref<1x4x4x32xf32, #tpu.memory_space<vmem>>, vector<1x4x4x16xf32>
    %5 = vector.shape_cast %4 : vector<1x4x4x16xf32> to vector<4x4x16xf32>
    %6 = vector.shape_cast %3 : vector<4x4x16xf32> to vector<1x4x4x16xf32>
    tpu.vector_store %arg14[%c0_6, %c0_7, %c0_8, %c0_9], %6 {strides = array<i32>} : memref<1x4x4x32xf32, #tpu.memory_space<vmem>>, vector<1x4x4x16xf32>,
    %c0_10 = arith.constant 0 : index
    %c0_11 = arith.constant 0 : index
    %c0_12 = arith.constant 0 : index
    %c0_13 = arith.constant 0 : index
    %7 = vector.load %arg14[%c0_10, %c0_11, %c0_12, %c0_13] : memref<1x4x4x32xf32, #tpu.memory_space<vmem>>, vector<1x4x4x16xf32>
    %8 = vector.shape_cast %7 : vector<1x4x4x16xf32> to vector<4x4x16xf32>
    %9 = vector.shape_cast %8 : vector<4x4x16xf32> to vector<16x16xf32>
    %c0_14 = arith.constant 0 : index
    %c0_15 = arith.constant 0 : index
    %10 = vector.load %arg2[%c0_14, %c0_15] : memref<1x16xf32, #tpu.memory_space<vmem>>, vector<1x16xf32>
    %11 = vector.broadcast %10 : vector<1x16xf32> to vector<16x16xf32>
    %12 = arith.mulf %9, %11 : vector<16x16xf32>
    %c0_16 = arith.constant 0 : index
    %c0_17 = arith.constant 0 : index
    %13 = vector.load %arg3[%c0_16, %c0_17] : memref<1x16xf32, #tpu.memory_space<vmem>>, vector<1x16xf32>
    %14 = vector.broadcast %13 : vector<1x16xf32> to vector<16x16xf32>
    %15 = arith.addf %12, %14 : vector<16x16xf32>
    %cst_18 = arith.constant 0.000000e+00 : f32
    %16 = vector.broadcast %cst_18 : f32 to vector<16x16xf32>
    %17 = arith.maximumf %15, %16 : vector<16x16xf32>
    %18 = arith.truncf %17 : vector<16x16xf32> to vector<16x16xbf16>
    %c0_19 = arith.constant 0 : index
    %c0_20 = arith.constant 0 : index
    %19 = vector.load %arg4[%c0_19, %c0_20] : memref<16x16xbf16, #tpu.memory_space<vmem>>, vector<16x16xbf16>
    %cst_21 = arith.constant dense<0.000000e+00> : vector<16x16xf32>
    %20 = tpu.matmul %18, %19, %cst_21 {dimension_numbers = #tpu.dot_dimension_numbers<[1], [0], [0], [1], [0, 0, 1, 1], [], []>} : vector<16x16xbf16>, vector<16x16xbf16>, vector<16x16xf32> -> vector<16x16xf32>
    %c0_22 = arith.constant 0 : index
    %c0_23 = arith.constant 0 : index
    %21 = vector.load %arg5[%c0_22, %c0_23] : memref<1x16xf32, #tpu.memory_space<vmem>>, vector<1x16xf32>
    %22 = vector.broadcast %21 : vector<1x16xf32> to vector<16x16xf32>
    %23 = arith.mulf %20, %22 : vector<16x16xf32>
    %c0_24 = arith.constant 0 : index
    %c0_25 = arith.constant 0 : index
    %24 = vector.load %arg6[%c0_24, %c0_25] : memref<1x16xf32, #tpu.memory_space<vmem>>, vector<1x16xf32>
    %25 = vector.broadcast %24 : vector<1x16xf32> to vector<16x16xf32>
    %26 = arith.addf %23, %25 : vector<16x16xf32>
    %cst_26 = arith.constant 0.000000e+00 : f32
    %27 = vector.broadcast %cst_26 : f32 to vector<16x16xf32>
    %28 = arith.maximumf %26, %27 : vector<16x16xf32>
    %29 = vector.shape_cast %28 : vector<16x16xf32> to vector<4x4x16xf32>
    %c2 = arith.constant 2 : index
    %c2_27 = arith.constant 2 : index
    %c0_28 = arith.constant 0 : index
    %30 = vector.load %arg15[%c2, %c2_27, %c0_28] : memref<8x8x16xf32, #tpu.memory_space<vmem>>, vector<4x4x16xf32>
    tpu.vector_store %arg15[%c2, %c2_27, %c0_28], %29 {strides = array<i32>} : memref<8x8x16xf32, #tpu.memory_space<vmem>>, vector<4x4x16xf32>,
    %cst_29 = arith.constant 0.000000e+00 : f32
    %31 = vector.broadcast %cst_29 : f32 to vector<16x8xf32>
    %c0_30 = arith.constant 0 : index
    %c0_31 = arith.constant 0 : index
    %c0_32 = arith.constant 0 : index
    %32 = vector.load %arg15[%c0_30, %c0_31, %c0_32] : memref<8x8x16xf32, #tpu.memory_space<vmem>>, vector<4x4x16xf32>
    %33 = vector.shape_cast %32 : vector<4x4x16xf32> to vector<16x16xf32>
    %34 = arith.truncf %33 : vector<16x16xf32> to vector<16x16xbf16>
    %c0_33 = arith.constant 0 : index
    %c0_34 = arith.constant 0 : index
    %c0_35 = arith.constant 0 : index
    %35 = vector.load %arg7[%c0_33, %c0_34, %c0_35] : memref<9x16x8xbf16, #tpu.memory_space<vmem>>, vector<1x16x8xbf16>
    %36 = vector.shape_cast %35 : vector<1x16x8xbf16> to vector<16x8xbf16>
    %cst_36 = arith.constant dense<0.000000e+00> : vector<16x8xf32>
    %37 = tpu.matmul %34, %36, %cst_36 {dimension_numbers = #tpu.dot_dimension_numbers<[1], [0], [0], [1], [0, 0, 1, 1], [], []>} : vector<16x16xbf16>, vector<16x8xbf16>, vector<16x8xf32> -> vector<16x8xf32>
    %38 = arith.addf %31, %37 : vector<16x8xf32>
    %c0_37 = arith.constant 0 : index
    %c2_38 = arith.constant 2 : index
    %c0_39 = arith.constant 0 : index
    %39 = vector.load %arg15[%c0_37, %c2_38, %c0_39] : memref<8x8x16xf32, #tpu.memory_space<vmem>>, vector<4x4x16xf32>
    %40 = vector.shape_cast %39 : vector<4x4x16xf32> to vector<16x16xf32>
    %41 = arith.truncf %40 : vector<16x16xf32> to vector<16x16xbf16>
    %c1 = arith.constant 1 : index
    %c0_40 = arith.constant 0 : index
    %c0_41 = arith.constant 0 : index
    %42 = vector.load %arg7[%c1, %c0_40, %c0_41] : memref<9x16x8xbf16, #tpu.memory_space<vmem>>, vector<1x16x8xbf16>
    %43 = vector.shape_cast %42 : vector<1x16x8xbf16> to vector<16x8xbf16>
    %cst_42 = arith.constant dense<0.000000e+00> : vector<16x8xf32>
    %44 = tpu.matmul %41, %43, %cst_42 {dimension_numbers = #tpu.dot_dimension_numbers<[1], [0], [0], [1], [0, 0, 1, 1], [], []>} : vector<16x16xbf16>, vector<16x8xbf16>, vector<16x8xf32> -> vector<16x8xf32>
    %45 = arith.addf %38, %44 : vector<16x8xf32>
    %c0_43 = arith.constant 0 : index
    %c4 = arith.constant 4 : index
    %c0_44 = arith.constant 0 : index
    %46 = vector.load %arg15[%c0_43, %c4, %c0_44] : memref<8x8x16xf32, #tpu.memory_space<vmem>>, vector<4x4x16xf32>
    %47 = vector.shape_cast %46 : vector<4x4x16xf32> to vector<16x16xf32>
    %48 = arith.truncf %47 : vector<16x16xf32> to vector<16x16xbf16>
    %c2_45 = arith.constant 2 : index
    %c0_46 = arith.constant 0 : index
    %c0_47 = arith.constant 0 : index
    %49 = vector.load %arg7[%c2_45, %c0_46, %c0_47] : memref<9x16x8xbf16, #tpu.memory_space<vmem>>, vector<1x16x8xbf16>
    %50 = vector.shape_cast %49 : vector<1x16x8xbf16> to vector<16x8xbf16>
    %cst_48 = arith.constant dense<0.000000e+00> : vector<16x8xf32>
    %51 = tpu.matmul %48, %50, %cst_48 {dimension_numbers = #tpu.dot_dimension_numbers<[1], [0], [0], [1], [0, 0, 1, 1], [], []>} : vector<16x16xbf16>, vector<16x8xbf16>, vector<16x8xf32> -> vector<16x8xf32>
    %52 = arith.addf %45, %51 : vector<16x8xf32>
    %c2_49 = arith.constant 2 : index
    %c0_50 = arith.constant 0 : index
    %c0_51 = arith.constant 0 : index
    %53 = vector.load %arg15[%c2_49, %c0_50, %c0_51] : memref<8x8x16xf32, #tpu.memory_space<vmem>>, vector<4x4x16xf32>
    %54 = vector.shape_cast %53 : vector<4x4x16xf32> to vector<16x16xf32>
    %55 = arith.truncf %54 : vector<16x16xf32> to vector<16x16xbf16>
    %c3 = arith.constant 3 : index
    %c0_52 = arith.constant 0 : index
    %c0_53 = arith.constant 0 : index
    %56 = vector.load %arg7[%c3, %c0_52, %c0_53] : memref<9x16x8xbf16, #tpu.memory_space<vmem>>, vector<1x16x8xbf16>
    %57 = vector.shape_cast %56 : vector<1x16x8xbf16> to vector<16x8xbf16>
    %cst_54 = arith.constant dense<0.000000e+00> : vector<16x8xf32>
    %58 = tpu.matmul %55, %57, %cst_54 {dimension_numbers = #tpu.dot_dimension_numbers<[1], [0], [0], [1], [0, 0, 1, 1], [], []>} : vector<16x16xbf16>, vector<16x8xbf16>, vector<16x8xf32> -> vector<16x8xf32>
    %59 = arith.addf %52, %58 : vector<16x8xf32>
    %c2_55 = arith.constant 2 : index
    %c2_56 = arith.constant 2 : index
    %c0_57 = arith.constant 0 : index
    %60 = vector.load %arg15[%c2_55, %c2_56, %c0_57] : memref<8x8x16xf32, #tpu.memory_space<vmem>>, vector<4x4x16xf32>
    %61 = vector.shape_cast %60 : vector<4x4x16xf32> to vector<16x16xf32>
    %62 = arith.truncf %61 : vector<16x16xf32> to vector<16x16xbf16>
    %c4_58 = arith.constant 4 : index
    %c0_59 = arith.constant 0 : index
    %c0_60 = arith.constant 0 : index
    %63 = vector.load %arg7[%c4_58, %c0_59, %c0_60] : memref<9x16x8xbf16, #tpu.memory_space<vmem>>, vector<1x16x8xbf16>
    %64 = vector.shape_cast %63 : vector<1x16x8xbf16> to vector<16x8xbf16>
    %cst_61 = arith.constant dense<0.000000e+00> : vector<16x8xf32>
    %65 = tpu.matmul %62, %64, %cst_61 {dimension_numbers = #tpu.dot_dimension_numbers<[1], [0], [0], [1], [0, 0, 1, 1], [], []>} : vector<16x16xbf16>, vector<16x8xbf16>, vector<16x8xf32> -> vector<16x8xf32>
    %66 = arith.addf %59, %65 : vector<16x8xf32>
    %c2_62 = arith.constant 2 : index
    %c4_63 = arith.constant 4 : index
    %c0_64 = arith.constant 0 : index
    %67 = vector.load %arg15[%c2_62, %c4_63, %c0_64] : memref<8x8x16xf32, #tpu.memory_space<vmem>>, vector<4x4x16xf32>
    %68 = vector.shape_cast %67 : vector<4x4x16xf32> to vector<16x16xf32>
    %69 = arith.truncf %68 : vector<16x16xf32> to vector<16x16xbf16>
    %c5 = arith.constant 5 : index
    %c0_65 = arith.constant 0 : index
    %c0_66 = arith.constant 0 : index
    %70 = vector.load %arg7[%c5, %c0_65, %c0_66] : memref<9x16x8xbf16, #tpu.memory_space<vmem>>, vector<1x16x8xbf16>
    %71 = vector.shape_cast %70 : vector<1x16x8xbf16> to vector<16x8xbf16>
    %cst_67 = arith.constant dense<0.000000e+00> : vector<16x8xf32>
    %72 = tpu.matmul %69, %71, %cst_67 {dimension_numbers = #tpu.dot_dimension_numbers<[1], [0], [0], [1], [0, 0, 1, 1], [], []>} : vector<16x16xbf16>, vector<16x8xbf16>, vector<16x8xf32> -> vector<16x8xf32>
    %73 = arith.addf %66, %72 : vector<16x8xf32>
    %c4_68 = arith.constant 4 : index
    %c0_69 = arith.constant 0 : index
    %c0_70 = arith.constant 0 : index
    %74 = vector.load %arg15[%c4_68, %c0_69, %c0_70] : memref<8x8x16xf32, #tpu.memory_space<vmem>>, vector<4x4x16xf32>
    %75 = vector.shape_cast %74 : vector<4x4x16xf32> to vector<16x16xf32>
    %76 = arith.truncf %75 : vector<16x16xf32> to vector<16x16xbf16>
    %c6 = arith.constant 6 : index
    %c0_71 = arith.constant 0 : index
    %c0_72 = arith.constant 0 : index
    %77 = vector.load %arg7[%c6, %c0_71, %c0_72] : memref<9x16x8xbf16, #tpu.memory_space<vmem>>, vector<1x16x8xbf16>
    %78 = vector.shape_cast %77 : vector<1x16x8xbf16> to vector<16x8xbf16>
    %cst_73 = arith.constant dense<0.000000e+00> : vector<16x8xf32>
    %79 = tpu.matmul %76, %78, %cst_73 {dimension_numbers = #tpu.dot_dimension_numbers<[1], [0], [0], [1], [0, 0, 1, 1], [], []>} : vector<16x16xbf16>, vector<16x8xbf16>, vector<16x8xf32> -> vector<16x8xf32>
    %80 = arith.addf %73, %79 : vector<16x8xf32>
    %c4_74 = arith.constant 4 : index
    %c2_75 = arith.constant 2 : index
    %c0_76 = arith.constant 0 : index
    %81 = vector.load %arg15[%c4_74, %c2_75, %c0_76] : memref<8x8x16xf32, #tpu.memory_space<vmem>>, vector<4x4x16xf32>
    %82 = vector.shape_cast %81 : vector<4x4x16xf32> to vector<16x16xf32>
    %83 = arith.truncf %82 : vector<16x16xf32> to vector<16x16xbf16>
    %c7 = arith.constant 7 : index
    %c0_77 = arith.constant 0 : index
    %c0_78 = arith.constant 0 : index
    %84 = vector.load %arg7[%c7, %c0_77, %c0_78] : memref<9x16x8xbf16, #tpu.memory_space<vmem>>, vector<1x16x8xbf16>
    %85 = vector.shape_cast %84 : vector<1x16x8xbf16> to vector<16x8xbf16>
    %cst_79 = arith.constant dense<0.000000e+00> : vector<16x8xf32>
    %86 = tpu.matmul %83, %85, %cst_79 {dimension_numbers = #tpu.dot_dimension_numbers<[1], [0], [0], [1], [0, 0, 1, 1], [], []>} : vector<16x16xbf16>, vector<16x8xbf16>, vector<16x8xf32> -> vector<16x8xf32>
    %87 = arith.addf %80, %86 : vector<16x8xf32>
    %c4_80 = arith.constant 4 : index
    %c4_81 = arith.constant 4 : index
    %c0_82 = arith.constant 0 : index
    %88 = vector.load %arg15[%c4_80, %c4_81, %c0_82] : memref<8x8x16xf32, #tpu.memory_space<vmem>>, vector<4x4x16xf32>
    %89 = vector.shape_cast %88 : vector<4x4x16xf32> to vector<16x16xf32>
    %90 = arith.truncf %89 : vector<16x16xf32> to vector<16x16xbf16>
    %c8 = arith.constant 8 : index
    %c0_83 = arith.constant 0 : index
    %c0_84 = arith.constant 0 : index
    %91 = vector.load %arg7[%c8, %c0_83, %c0_84] : memref<9x16x8xbf16, #tpu.memory_space<vmem>>, vector<1x16x8xbf16>
    %92 = vector.shape_cast %91 : vector<1x16x8xbf16> to vector<16x8xbf16>
    %cst_85 = arith.constant dense<0.000000e+00> : vector<16x8xf32>
    %93 = tpu.matmul %90, %92, %cst_85 {dimension_numbers = #tpu.dot_dimension_numbers<[1], [0], [0], [1], [0, 0, 1, 1], [], []>} : vector<16x16xbf16>, vector<16x8xbf16>, vector<16x8xf32> -> vector<16x8xf32>
    %94 = arith.addf %87, %93 : vector<16x8xf32>
    %95 = vector.shape_cast %94 : vector<16x8xf32> to vector<4x4x8xf32>
    %c0_86 = arith.constant 0 : index
    %c0_87 = arith.constant 0 : index
    %c0_88 = arith.constant 0 : index
    %c16 = arith.constant 16 : index
    %96 = vector.load %arg14[%c0_86, %c0_87, %c0_88, %c16] : memref<1x4x4x32xf32, #tpu.memory_space<vmem>>, vector<1x4x4x8xf32>
    %97 = vector.shape_cast %96 : vector<1x4x4x8xf32> to vector<4x4x8xf32>
    %98 = vector.shape_cast %95 : vector<4x4x8xf32> to vector<1x4x4x8xf32>
    tpu.vector_store %arg14[%c0_86, %c0_87, %c0_88, %c16], %98 {strides = array<i32>} : memref<1x4x4x32xf32, #tpu.memory_space<vmem>>, vector<1x4x4x8xf32>,
    %c0_89 = arith.constant 0 : index
    %c0_90 = arith.constant 0 : index
    %c0_91 = arith.constant 0 : index
    %c0_92 = arith.constant 0 : index
    %99 = vector.load %arg14[%c0_89, %c0_90, %c0_91, %c0_92] : memref<1x4x4x32xf32, #tpu.memory_space<vmem>>, vector<1x4x4x24xf32>
    %100 = vector.shape_cast %99 : vector<1x4x4x24xf32> to vector<4x4x24xf32>
    %101 = vector.shape_cast %100 : vector<4x4x24xf32> to vector<16x24xf32>
    %c0_93 = arith.constant 0 : index
    %c0_94 = arith.constant 0 : index
    %102 = vector.load %arg8[%c0_93, %c0_94] : memref<1x24xf32, #tpu.memory_space<vmem>>, vector<1x24xf32>
    %103 = vector.broadcast %102 : vector<1x24xf32> to vector<16x24xf32>
    %104 = arith.mulf %101, %103 : vector<16x24xf32>
    %c0_95 = arith.constant 0 : index
    %c0_96 = arith.constant 0 : index
    %105 = vector.load %arg9[%c0_95, %c0_96] : memref<1x24xf32, #tpu.memory_space<vmem>>, vector<1x24xf32>
    %106 = vector.broadcast %105 : vector<1x24xf32> to vector<16x24xf32>
    %107 = arith.addf %104, %106 : vector<16x24xf32>
    %cst_97 = arith.constant 0.000000e+00 : f32
    %108 = vector.broadcast %cst_97 : f32 to vector<16x24xf32>
    %109 = arith.maximumf %107, %108 : vector<16x24xf32>
    %110 = arith.truncf %109 : vector<16x24xf32> to vector<16x24xbf16>
    %c0_98 = arith.constant 0 : index
    %c0_99 = arith.constant 0 : index
    %111 = vector.load %arg10[%c0_98, %c0_99] : memref<24x16xbf16, #tpu.memory_space<vmem>>, vector<24x16xbf16>
    %cst_100 = arith.constant dense<0.000000e+00> : vector<16x16xf32>
    %112 = tpu.matmul %110, %111, %cst_100 {dimension_numbers = #tpu.dot_dimension_numbers<[1], [0], [0], [1], [0, 0, 1, 1], [], []>} : vector<16x24xbf16>, vector<24x16xbf16>, vector<16x16xf32> -> vector<16x16xf32>
    %c0_101 = arith.constant 0 : index
    %c0_102 = arith.constant 0 : index
    %113 = vector.load %arg11[%c0_101, %c0_102] : memref<1x16xf32, #tpu.memory_space<vmem>>, vector<1x16xf32>
    %114 = vector.broadcast %113 : vector<1x16xf32> to vector<16x16xf32>
    %115 = arith.mulf %112, %114 : vector<16x16xf32>
    %c0_103 = arith.constant 0 : index
    %c0_104 = arith.constant 0 : index
    %116 = vector.load %arg12[%c0_103, %c0_104] : memref<1x16xf32, #tpu.memory_space<vmem>>, vector<1x16xf32>
    %117 = vector.broadcast %116 : vector<1x16xf32> to vector<16x16xf32>
    %118 = arith.addf %115, %117 : vector<16x16xf32>
    %cst_105 = arith.constant 0.000000e+00 : f32
    %119 = vector.broadcast %cst_105 : f32 to vector<16x16xf32>
    %120 = arith.maximumf %118, %119 : vector<16x16xf32>
    %121 = vector.shape_cast %120 : vector<16x16xf32> to vector<4x4x16xf32>
    %c2_106 = arith.constant 2 : index
    %c2_107 = arith.constant 2 : index
    %c0_108 = arith.constant 0 : index
    %122 = vector.load %arg15[%c2_106, %c2_107, %c0_108] : memref<8x8x16xf32, #tpu.memory_space<vmem>>, vector<4x4x16xf32>
    tpu.vector_store %arg15[%c2_106, %c2_107, %c0_108], %121 {strides = array<i32>} : memref<8x8x16xf32, #tpu.memory_space<vmem>>, vector<4x4x16xf32>,
    %cst_109 = arith.constant 0.000000e+00 : f32
    %123 = vector.broadcast %cst_109 : f32 to vector<16x8xf32>
    %c0_110 = arith.constant 0 : index
    %c0_111 = arith.constant 0 : index
    %c0_112 = arith.constant 0 : index
    %124 = vector.load %arg15[%c0_110, %c0_111, %c0_112] : memref<8x8x16xf32, #tpu.memory_space<vmem>>, vector<4x4x16xf32>
    %125 = vector.shape_cast %124 : vector<4x4x16xf32> to vector<16x16xf32>
    %126 = arith.truncf %125 : vector<16x16xf32> to vector<16x16xbf16>
    %c0_113 = arith.constant 0 : index
    %c0_114 = arith.constant 0 : index
    %c0_115 = arith.constant 0 : index
    %127 = vector.load %arg13[%c0_113, %c0_114, %c0_115] : memref<9x16x8xbf16, #tpu.memory_space<vmem>>, vector<1x16x8xbf16>
    %128 = vector.shape_cast %127 : vector<1x16x8xbf16> to vector<16x8xbf16>
    %cst_116 = arith.constant dense<0.000000e+00> : vector<16x8xf32>
    %129 = tpu.matmul %126, %128, %cst_116 {dimension_numbers = #tpu.dot_dimension_numbers<[1], [0], [0], [1], [0, 0, 1, 1], [], []>} : vector<16x16xbf16>, vector<16x8xbf16>, vector<16x8xf32> -> vector<16x8xf32>
    %130 = arith.addf %123, %129 : vector<16x8xf32>
    %c0_117 = arith.constant 0 : index
    %c2_118 = arith.constant 2 : index
    %c0_119 = arith.constant 0 : index
    %131 = vector.load %arg15[%c0_117, %c2_118, %c0_119] : memref<8x8x16xf32, #tpu.memory_space<vmem>>, vector<4x4x16xf32>
    %132 = vector.shape_cast %131 : vector<4x4x16xf32> to vector<16x16xf32>
    %133 = arith.truncf %132 : vector<16x16xf32> to vector<16x16xbf16>
    %c1_120 = arith.constant 1 : index
    %c0_121 = arith.constant 0 : index
    %c0_122 = arith.constant 0 : index
    %134 = vector.load %arg13[%c1_120, %c0_121, %c0_122] : memref<9x16x8xbf16, #tpu.memory_space<vmem>>, vector<1x16x8xbf16>
    %135 = vector.shape_cast %134 : vector<1x16x8xbf16> to vector<16x8xbf16>
    %cst_123 = arith.constant dense<0.000000e+00> : vector<16x8xf32>
    %136 = tpu.matmul %133, %135, %cst_123 {dimension_numbers = #tpu.dot_dimension_numbers<[1], [0], [0], [1], [0, 0, 1, 1], [], []>} : vector<16x16xbf16>, vector<16x8xbf16>, vector<16x8xf32> -> vector<16x8xf32>
    %137 = arith.addf %130, %136 : vector<16x8xf32>
    %c0_124 = arith.constant 0 : index
    %c4_125 = arith.constant 4 : index
    %c0_126 = arith.constant 0 : index
    %138 = vector.load %arg15[%c0_124, %c4_125, %c0_126] : memref<8x8x16xf32, #tpu.memory_space<vmem>>, vector<4x4x16xf32>
    %139 = vector.shape_cast %138 : vector<4x4x16xf32> to vector<16x16xf32>
    %140 = arith.truncf %139 : vector<16x16xf32> to vector<16x16xbf16>
    %c2_127 = arith.constant 2 : index
    %c0_128 = arith.constant 0 : index
    %c0_129 = arith.constant 0 : index
    %141 = vector.load %arg13[%c2_127, %c0_128, %c0_129] : memref<9x16x8xbf16, #tpu.memory_space<vmem>>, vector<1x16x8xbf16>
    %142 = vector.shape_cast %141 : vector<1x16x8xbf16> to vector<16x8xbf16>
    %cst_130 = arith.constant dense<0.000000e+00> : vector<16x8xf32>
    %143 = tpu.matmul %140, %142, %cst_130 {dimension_numbers = #tpu.dot_dimension_numbers<[1], [0], [0], [1], [0, 0, 1, 1], [], []>} : vector<16x16xbf16>, vector<16x8xbf16>, vector<16x8xf32> -> vector<16x8xf32>
    %144 = arith.addf %137, %143 : vector<16x8xf32>
    %c2_131 = arith.constant 2 : index
    %c0_132 = arith.constant 0 : index
    %c0_133 = arith.constant 0 : index
    %145 = vector.load %arg15[%c2_131, %c0_132, %c0_133] : memref<8x8x16xf32, #tpu.memory_space<vmem>>, vector<4x4x16xf32>
    %146 = vector.shape_cast %145 : vector<4x4x16xf32> to vector<16x16xf32>
    %147 = arith.truncf %146 : vector<16x16xf32> to vector<16x16xbf16>
    %c3_134 = arith.constant 3 : index
    %c0_135 = arith.constant 0 : index
    %c0_136 = arith.constant 0 : index
    %148 = vector.load %arg13[%c3_134, %c0_135, %c0_136] : memref<9x16x8xbf16, #tpu.memory_space<vmem>>, vector<1x16x8xbf16>
    %149 = vector.shape_cast %148 : vector<1x16x8xbf16> to vector<16x8xbf16>
    %cst_137 = arith.constant dense<0.000000e+00> : vector<16x8xf32>
    %150 = tpu.matmul %147, %149, %cst_137 {dimension_numbers = #tpu.dot_dimension_numbers<[1], [0], [0], [1], [0, 0, 1, 1], [], []>} : vector<16x16xbf16>, vector<16x8xbf16>, vector<16x8xf32> -> vector<16x8xf32>
    %151 = arith.addf %144, %150 : vector<16x8xf32>
    %c2_138 = arith.constant 2 : index
    %c2_139 = arith.constant 2 : index
    %c0_140 = arith.constant 0 : index
    %152 = vector.load %arg15[%c2_138, %c2_139, %c0_140] : memref<8x8x16xf32, #tpu.memory_space<vmem>>, vector<4x4x16xf32>
    %153 = vector.shape_cast %152 : vector<4x4x16xf32> to vector<16x16xf32>
    %154 = arith.truncf %153 : vector<16x16xf32> to vector<16x16xbf16>
    %c4_141 = arith.constant 4 : index
    %c0_142 = arith.constant 0 : index
    %c0_143 = arith.constant 0 : index
    %155 = vector.load %arg13[%c4_141, %c0_142, %c0_143] : memref<9x16x8xbf16, #tpu.memory_space<vmem>>, vector<1x16x8xbf16>
    %156 = vector.shape_cast %155 : vector<1x16x8xbf16> to vector<16x8xbf16>
    %cst_144 = arith.constant dense<0.000000e+00> : vector<16x8xf32>
    %157 = tpu.matmul %154, %156, %cst_144 {dimension_numbers = #tpu.dot_dimension_numbers<[1], [0], [0], [1], [0, 0, 1, 1], [], []>} : vector<16x16xbf16>, vector<16x8xbf16>, vector<16x8xf32> -> vector<16x8xf32>
    %158 = arith.addf %151, %157 : vector<16x8xf32>
    %c2_145 = arith.constant 2 : index
    %c4_146 = arith.constant 4 : index
    %c0_147 = arith.constant 0 : index
    %159 = vector.load %arg15[%c2_145, %c4_146, %c0_147] : memref<8x8x16xf32, #tpu.memory_space<vmem>>, vector<4x4x16xf32>
    %160 = vector.shape_cast %159 : vector<4x4x16xf32> to vector<16x16xf32>
    %161 = arith.truncf %160 : vector<16x16xf32> to vector<16x16xbf16>
    %c5_148 = arith.constant 5 : index
    %c0_149 = arith.constant 0 : index
    %c0_150 = arith.constant 0 : index
    %162 = vector.load %arg13[%c5_148, %c0_149, %c0_150] : memref<9x16x8xbf16, #tpu.memory_space<vmem>>, vector<1x16x8xbf16>
    %163 = vector.shape_cast %162 : vector<1x16x8xbf16> to vector<16x8xbf16>
    %cst_151 = arith.constant dense<0.000000e+00> : vector<16x8xf32>
    %164 = tpu.matmul %161, %163, %cst_151 {dimension_numbers = #tpu.dot_dimension_numbers<[1], [0], [0], [1], [0, 0, 1, 1], [], []>} : vector<16x16xbf16>, vector<16x8xbf16>, vector<16x8xf32> -> vector<16x8xf32>
    %165 = arith.addf %158, %164 : vector<16x8xf32>
    %c4_152 = arith.constant 4 : index
    %c0_153 = arith.constant 0 : index
    %c0_154 = arith.constant 0 : index
    %166 = vector.load %arg15[%c4_152, %c0_153, %c0_154] : memref<8x8x16xf32, #tpu.memory_space<vmem>>, vector<4x4x16xf32>
    %167 = vector.shape_cast %166 : vector<4x4x16xf32> to vector<16x16xf32>
    %168 = arith.truncf %167 : vector<16x16xf32> to vector<16x16xbf16>
    %c6_155 = arith.constant 6 : index
    %c0_156 = arith.constant 0 : index
    %c0_157 = arith.constant 0 : index
    %169 = vector.load %arg13[%c6_155, %c0_156, %c0_157] : memref<9x16x8xbf16, #tpu.memory_space<vmem>>, vector<1x16x8xbf16>
    %170 = vector.shape_cast %169 : vector<1x16x8xbf16> to vector<16x8xbf16>
    %cst_158 = arith.constant dense<0.000000e+00> : vector<16x8xf32>
    %171 = tpu.matmul %168, %170, %cst_158 {dimension_numbers = #tpu.dot_dimension_numbers<[1], [0], [0], [1], [0, 0, 1, 1], [], []>} : vector<16x16xbf16>, vector<16x8xbf16>, vector<16x8xf32> -> vector<16x8xf32>
    %172 = arith.addf %165, %171 : vector<16x8xf32>
    %c4_159 = arith.constant 4 : index
    %c2_160 = arith.constant 2 : index
    %c0_161 = arith.constant 0 : index
    %173 = vector.load %arg15[%c4_159, %c2_160, %c0_161] : memref<8x8x16xf32, #tpu.memory_space<vmem>>, vector<4x4x16xf32>
    %174 = vector.shape_cast %173 : vector<4x4x16xf32> to vector<16x16xf32>
    %175 = arith.truncf %174 : vector<16x16xf32> to vector<16x16xbf16>
    %c7_162 = arith.constant 7 : index
    %c0_163 = arith.constant 0 : index
    %c0_164 = arith.constant 0 : index
    %176 = vector.load %arg13[%c7_162, %c0_163, %c0_164] : memref<9x16x8xbf16, #tpu.memory_space<vmem>>, vector<1x16x8xbf16>
    %177 = vector.shape_cast %176 : vector<1x16x8xbf16> to vector<16x8xbf16>
    %cst_165 = arith.constant dense<0.000000e+00> : vector<16x8xf32>
    %178 = tpu.matmul %175, %177, %cst_165 {dimension_numbers = #tpu.dot_dimension_numbers<[1], [0], [0], [1], [0, 0, 1, 1], [], []>} : vector<16x16xbf16>, vector<16x8xbf16>, vector<16x8xf32> -> vector<16x8xf32>
    %179 = arith.addf %172, %178 : vector<16x8xf32>
    %c4_166 = arith.constant 4 : index
    %c4_167 = arith.constant 4 : index
    %c0_168 = arith.constant 0 : index
    %180 = vector.load %arg15[%c4_166, %c4_167, %c0_168] : memref<8x8x16xf32, #tpu.memory_space<vmem>>, vector<4x4x16xf32>
    %181 = vector.shape_cast %180 : vector<4x4x16xf32> to vector<16x16xf32>
    %182 = arith.truncf %181 : vector<16x16xf32> to vector<16x16xbf16>
    %c8_169 = arith.constant 8 : index
    %c0_170 = arith.constant 0 : index
    %c0_171 = arith.constant 0 : index
    %183 = vector.load %arg13[%c8_169, %c0_170, %c0_171] : memref<9x16x8xbf16, #tpu.memory_space<vmem>>, vector<1x16x8xbf16>
    %184 = vector.shape_cast %183 : vector<1x16x8xbf16> to vector<16x8xbf16>
    %cst_172 = arith.constant dense<0.000000e+00> : vector<16x8xf32>
    %185 = tpu.matmul %182, %184, %cst_172 {dimension_numbers = #tpu.dot_dimension_numbers<[1], [0], [0], [1], [0, 0, 1, 1], [], []>} : vector<16x16xbf16>, vector<16x8xbf16>, vector<16x8xf32> -> vector<16x8xf32>
    %186 = arith.addf %179, %185 : vector<16x8xf32>
    %187 = vector.shape_cast %186 : vector<16x8xf32> to vector<4x4x8xf32>
    %c0_173 = arith.constant 0 : index
    %c0_174 = arith.constant 0 : index
    %c0_175 = arith.constant 0 : index
    %c24 = arith.constant 24 : index
    %188 = vector.load %arg14[%c0_173, %c0_174, %c0_175, %c24] : memref<1x4x4x32xf32, #tpu.memory_space<vmem>>, vector<1x4x4x8xf32>
    %189 = vector.shape_cast %188 : vector<1x4x4x8xf32> to vector<4x4x8xf32>
    %190 = vector.shape_cast %187 : vector<4x4x8xf32> to vector<1x4x4x8xf32>
    tpu.vector_store %arg14[%c0_173, %c0_174, %c0_175, %c24], %190 {strides = array<i32>} : memref<1x4x4x32xf32, #tpu.memory_space<vmem>>, vector<1x4x4x8xf32>,
    return
  }
  func.func @transform_0(%arg0: i32) -> (i32, i32, i32, i32) {
    %c0_i32 = arith.constant 0 : i32
    %c0_i32_0 = arith.constant 0 : i32
    %c0_i32_1 = arith.constant 0 : i32
    %c0_i32_2 = arith.constant 0 : i32
    return %arg0, %c0_i32, %c0_i32_0, %c0_i32_1 : i32, i32, i32, i32
  }
  func.func @transform_1(%arg0: i32) -> (i32, i32) {
    %c0_i32 = arith.constant 0 : i32
    %c0_i32_0 = arith.constant 0 : i32
    %c0_i32_1 = arith.constant 0 : i32
    return %c0_i32, %c0_i32_0 : i32, i32
  }
  func.func @transform_2(%arg0: i32) -> (i32, i32) {
    %c0_i32 = arith.constant 0 : i32
    %c0_i32_0 = arith.constant 0 : i32
    %c0_i32_1 = arith.constant 0 : i32
    return %c0_i32, %c0_i32_0 : i32, i32
  }
  func.func @transform_3(%arg0: i32) -> (i32, i32) {
    %c0_i32 = arith.constant 0 : i32
    %c0_i32_0 = arith.constant 0 : i32
    %c0_i32_1 = arith.constant 0 : i32
    return %c0_i32, %c0_i32_0 : i32, i32
  }
  func.func @transform_4(%arg0: i32) -> (i32, i32) {
    %c0_i32 = arith.constant 0 : i32
    %c0_i32_0 = arith.constant 0 : i32
    %c0_i32_1 = arith.constant 0 : i32
    return %c0_i32, %c0_i32_0 : i32, i32
  }
  func.func @transform_5(%arg0: i32) -> (i32, i32) {
    %c0_i32 = arith.constant 0 : i32
    %c0_i32_0 = arith.constant 0 : i32
    %c0_i32_1 = arith.constant 0 : i32
    return %c0_i32, %c0_i32_0 : i32, i32
  }
  func.func @transform_6(%arg0: i32) -> (i32, i32, i32) {
    %c0_i32 = arith.constant 0 : i32
    %c0_i32_0 = arith.constant 0 : i32
    %c0_i32_1 = arith.constant 0 : i32
    %c0_i32_2 = arith.constant 0 : i32
    return %c0_i32, %c0_i32_0, %c0_i32_1 : i32, i32, i32
  }
  func.func @transform_7(%arg0: i32) -> (i32, i32) {
    %c0_i32 = arith.constant 0 : i32
    %c0_i32_0 = arith.constant 0 : i32
    %c0_i32_1 = arith.constant 0 : i32
    return %c0_i32, %c0_i32_0 : i32, i32
  }
  func.func @transform_8(%arg0: i32) -> (i32, i32) {
    %c0_i32 = arith.constant 0 : i32
    %c0_i32_0 = arith.constant 0 : i32
    %c0_i32_1 = arith.constant 0 : i32
    return %c0_i32, %c0_i32_0 : i32, i32
  }
  func.func @transform_9(%arg0: i32) -> (i32, i32) {
    %c0_i32 = arith.constant 0 : i32
    %c0_i32_0 = arith.constant 0 : i32
    %c0_i32_1 = arith.constant 0 : i32
    return %c0_i32, %c0_i32_0 : i32, i32
  }
  func.func @transform_10(%arg0: i32) -> (i32, i32) {
    %c0_i32 = arith.constant 0 : i32
    %c0_i32_0 = arith.constant 0 : i32
    %c0_i32_1 = arith.constant 0 : i32
    return %c0_i32, %c0_i32_0 : i32, i32
  }
  func.func @transform_11(%arg0: i32) -> (i32, i32) {
    %c0_i32 = arith.constant 0 : i32
    %c0_i32_0 = arith.constant 0 : i32
    %c0_i32_1 = arith.constant 0 : i32
    return %c0_i32, %c0_i32_0 : i32, i32
  }
  func.func @transform_12(%arg0: i32) -> (i32, i32, i32) {
    %c0_i32 = arith.constant 0 : i32
    %c0_i32_0 = arith.constant 0 : i32
    %c0_i32_1 = arith.constant 0 : i32
    %c0_i32_2 = arith.constant 0 : i32
    return %c0_i32, %c0_i32_0, %c0_i32_1 : i32, i32, i32
  }
  func.func @transform_13(%arg0: i32) -> (i32, i32, i32, i32) {
    %c0_i32 = arith.constant 0 : i32
    %c0_i32_0 = arith.constant 0 : i32
    %c0_i32_1 = arith.constant 0 : i32
    %c0_i32_2 = arith.constant 0 : i32
    return %arg0, %c0_i32, %c0_i32_0, %c0_i32_1 : i32, i32, i32, i32
  }
}

module attributes {stable_mosaic.version = 11 : i64} {
  func.func @_dense_block_kernel(%arg0: i32, %arg1: memref<1x4x4x16xf32, #tpu.memory_space<vmem>>, %arg2: memref<1x16xf32, #tpu.memory_space<vmem>>, %arg3: memref<1x16xf32, #tpu.memory_space<vmem>>, %arg4: memref<16x16xbf16, #tpu.memory_space<vmem>>, %arg5: memref<1x16xf32, #tpu.memory_space<vmem>>, %arg6: memref<1x16xf32, #tpu.memory_space<vmem>>, %arg7: memref<9x16x8xbf16, #tpu.memory_space<vmem>>, %arg8: memref<1x24xf32, #tpu.memory_space<vmem>>, %arg9: memref<1x24xf32, #tpu.memory_space<vmem>>, %arg10: memref<24x16xbf16, #tpu.memory_space<vmem>>, %arg11: memref<1x16xf32, #tpu.memory_space<vmem>>, %arg12: memref<1x16xf32, #tpu.memory_space<vmem>>, %arg13: memref<9x16x8xbf16, #tpu.memory_space<vmem>>, %arg14: memref<1x4x4x32xf32, #tpu.memory_space<vmem>>, %arg15: memref<12x12x16xf32, #tpu.memory_space<vmem>>) attributes {dimension_semantics = [#tpu.dimension_semantics<parallel>], iteration_bounds = array<i64: 2>, scalar_prefetch = 0 : i64, scratch_operands = 1 : i64, tpu.core_type = #tpu.core_type<tc>, window_params = [{transform_indices = @transform_0, window_bounds = array<i64: 1, 4, 4, 16>}, {pipeline_mode = #tpu.pipeline_mode<synchronous>, transform_indices = @transform_1, window_bounds = array<i64: 1, 16>}, {pipeline_mode = #tpu.pipeline_mode<synchronous>, transform_indices = @transform_2, window_bounds = array<i64: 1, 16>}, {pipeline_mode = #tpu.pipeline_mode<synchronous>, transform_indices = @transform_3, window_bounds = array<i64: 16, 16>}, {pipeline_mode = #tpu.pipeline_mode<synchronous>, transform_indices = @transform_4, window_bounds = array<i64: 1, 16>}, {pipeline_mode = #tpu.pipeline_mode<synchronous>, transform_indices = @transform_5, window_bounds = array<i64: 1, 16>}, {pipeline_mode = #tpu.pipeline_mode<synchronous>, transform_indices = @transform_6, window_bounds = array<i64: 9, 16, 8>}, {pipeline_mode = #tpu.pipeline_mode<synchronous>, transform_indices = @transform_7, window_bounds = array<i64: 1, 24>}, {pipeline_mode = #tpu.pipeline_mode<synchronous>, transform_indices = @transform_8, window_bounds = array<i64: 1, 24>}, {pipeline_mode = #tpu.pipeline_mode<synchronous>, transform_indices = @transform_9, window_bounds = array<i64: 24, 16>}, {pipeline_mode = #tpu.pipeline_mode<synchronous>, transform_indices = @transform_10, window_bounds = array<i64: 1, 16>}, {pipeline_mode = #tpu.pipeline_mode<synchronous>, transform_indices = @transform_11, window_bounds = array<i64: 1, 16>}, {pipeline_mode = #tpu.pipeline_mode<synchronous>, transform_indices = @transform_12, window_bounds = array<i64: 9, 16, 8>}, {transform_indices = @transform_13, window_bounds = array<i64: 1, 4, 4, 32>}]} {
    %cst = arith.constant 0.000000e+00 : f32
    %0 = vector.broadcast %cst : f32 to vector<12x12x16xf32>
    %c0 = arith.constant 0 : index
    %c0_0 = arith.constant 0 : index
    %c0_1 = arith.constant 0 : index
    %1 = vector.load %arg15[%c0, %c0_0, %c0_1] : memref<12x12x16xf32, #tpu.memory_space<vmem>>, vector<12x12x16xf32>
    tpu.vector_store %arg15[%c0, %c0_0, %c0_1], %0 {strides = array<i32>} : memref<12x12x16xf32, #tpu.memory_space<vmem>>, vector<12x12x16xf32>,
    %c0_2 = arith.constant 0 : index
    %c0_3 = arith.constant 0 : index
    %c0_4 = arith.constant 0 : index
    %c0_5 = arith.constant 0 : index
    %2 = vector.load %arg1[%c0_2, %c0_3, %c0_4, %c0_5] : memref<1x4x4x16xf32, #tpu.memory_space<vmem>>, vector<1x4x4x16xf32>
    %3 = vector.shape_cast %2 : vector<1x4x4x16xf32> to vector<4x4x16xf32>
    %c0_6 = arith.constant 0 : index
    %c0_7 = arith.constant 0 : index
    %c0_8 = arith.constant 0 : index
    %c0_9 = arith.constant 0 : index
    %4 = vector.load %arg14[%c0_6, %c0_7, %c0_8, %c0_9] : memref<1x4x4x32xf32, #tpu.memory_space<vmem>>, vector<1x4x4x16xf32>
    %5 = vector.shape_cast %4 : vector<1x4x4x16xf32> to vector<4x4x16xf32>
    %6 = vector.shape_cast %3 : vector<4x4x16xf32> to vector<1x4x4x16xf32>
    tpu.vector_store %arg14[%c0_6, %c0_7, %c0_8, %c0_9], %6 {strides = array<i32>} : memref<1x4x4x32xf32, #tpu.memory_space<vmem>>, vector<1x4x4x16xf32>,
    %c0_10 = arith.constant 0 : index
    %c0_11 = arith.constant 0 : index
    %c0_12 = arith.constant 0 : index
    %c0_13 = arith.constant 0 : index
    %7 = vector.load %arg14[%c0_10, %c0_11, %c0_12, %c0_13] : memref<1x4x4x32xf32, #tpu.memory_space<vmem>>, vector<1x4x4x16xf32>
    %8 = vector.shape_cast %7 : vector<1x4x4x16xf32> to vector<4x4x16xf32>
    %9 = vector.shape_cast %8 : vector<4x4x16xf32> to vector<16x16xf32>
    %c0_14 = arith.constant 0 : index
    %c0_15 = arith.constant 0 : index
    %10 = vector.load %arg2[%c0_14, %c0_15] : memref<1x16xf32, #tpu.memory_space<vmem>>, vector<1x16xf32>
    %11 = vector.broadcast %10 : vector<1x16xf32> to vector<16x16xf32>
    %12 = arith.mulf %9, %11 : vector<16x16xf32>
    %c0_16 = arith.constant 0 : index
    %c0_17 = arith.constant 0 : index
    %13 = vector.load %arg3[%c0_16, %c0_17] : memref<1x16xf32, #tpu.memory_space<vmem>>, vector<1x16xf32>
    %14 = vector.broadcast %13 : vector<1x16xf32> to vector<16x16xf32>
    %15 = arith.addf %12, %14 : vector<16x16xf32>
    %cst_18 = arith.constant 0.000000e+00 : f32
    %16 = vector.broadcast %cst_18 : f32 to vector<16x16xf32>
    %17 = arith.maximumf %15, %16 : vector<16x16xf32>
    %18 = arith.truncf %17 : vector<16x16xf32> to vector<16x16xbf16>
    %c0_19 = arith.constant 0 : index
    %c0_20 = arith.constant 0 : index
    %19 = vector.load %arg4[%c0_19, %c0_20] : memref<16x16xbf16, #tpu.memory_space<vmem>>, vector<16x16xbf16>
    %cst_21 = arith.constant dense<0.000000e+00> : vector<16x16xf32>
    %20 = tpu.matmul %18, %19, %cst_21 {dimension_numbers = #tpu.dot_dimension_numbers<[1], [0], [0], [1], [0, 0, 1, 1], [], []>} : vector<16x16xbf16>, vector<16x16xbf16>, vector<16x16xf32> -> vector<16x16xf32>
    %c0_22 = arith.constant 0 : index
    %c0_23 = arith.constant 0 : index
    %21 = vector.load %arg5[%c0_22, %c0_23] : memref<1x16xf32, #tpu.memory_space<vmem>>, vector<1x16xf32>
    %22 = vector.broadcast %21 : vector<1x16xf32> to vector<16x16xf32>
    %23 = arith.mulf %20, %22 : vector<16x16xf32>
    %c0_24 = arith.constant 0 : index
    %c0_25 = arith.constant 0 : index
    %24 = vector.load %arg6[%c0_24, %c0_25] : memref<1x16xf32, #tpu.memory_space<vmem>>, vector<1x16xf32>
    %25 = vector.broadcast %24 : vector<1x16xf32> to vector<16x16xf32>
    %26 = arith.addf %23, %25 : vector<16x16xf32>
    %cst_26 = arith.constant 0.000000e+00 : f32
    %27 = vector.broadcast %cst_26 : f32 to vector<16x16xf32>
    %28 = arith.maximumf %26, %27 : vector<16x16xf32>
    %29 = vector.shape_cast %28 : vector<16x16xf32> to vector<4x4x16xf32>
    %c4 = arith.constant 4 : index
    %c4_27 = arith.constant 4 : index
    %c0_28 = arith.constant 0 : index
    %30 = vector.load %arg15[%c4, %c4_27, %c0_28] : memref<12x12x16xf32, #tpu.memory_space<vmem>>, vector<4x4x16xf32>
    tpu.vector_store %arg15[%c4, %c4_27, %c0_28], %29 {strides = array<i32>} : memref<12x12x16xf32, #tpu.memory_space<vmem>>, vector<4x4x16xf32>,
    %cst_29 = arith.constant 0.000000e+00 : f32
    %31 = vector.broadcast %cst_29 : f32 to vector<16x8xf32>
    %c0_30 = arith.constant 0 : index
    %c0_31 = arith.constant 0 : index
    %c0_32 = arith.constant 0 : index
    %32 = vector.load %arg15[%c0_30, %c0_31, %c0_32] : memref<12x12x16xf32, #tpu.memory_space<vmem>>, vector<4x4x16xf32>
    %33 = vector.shape_cast %32 : vector<4x4x16xf32> to vector<16x16xf32>
    %34 = arith.truncf %33 : vector<16x16xf32> to vector<16x16xbf16>
    %c0_33 = arith.constant 0 : index
    %c0_34 = arith.constant 0 : index
    %c0_35 = arith.constant 0 : index
    %35 = vector.load %arg7[%c0_33, %c0_34, %c0_35] : memref<9x16x8xbf16, #tpu.memory_space<vmem>>, vector<1x16x8xbf16>
    %36 = vector.shape_cast %35 : vector<1x16x8xbf16> to vector<16x8xbf16>
    %cst_36 = arith.constant dense<0.000000e+00> : vector<16x8xf32>
    %37 = tpu.matmul %34, %36, %cst_36 {dimension_numbers = #tpu.dot_dimension_numbers<[1], [0], [0], [1], [0, 0, 1, 1], [], []>} : vector<16x16xbf16>, vector<16x8xbf16>, vector<16x8xf32> -> vector<16x8xf32>
    %38 = arith.addf %31, %37 : vector<16x8xf32>
    %c0_37 = arith.constant 0 : index
    %c4_38 = arith.constant 4 : index
    %c0_39 = arith.constant 0 : index
    %39 = vector.load %arg15[%c0_37, %c4_38, %c0_39] : memref<12x12x16xf32, #tpu.memory_space<vmem>>, vector<4x4x16xf32>
    %40 = vector.shape_cast %39 : vector<4x4x16xf32> to vector<16x16xf32>
    %41 = arith.truncf %40 : vector<16x16xf32> to vector<16x16xbf16>
    %c1 = arith.constant 1 : index
    %c0_40 = arith.constant 0 : index
    %c0_41 = arith.constant 0 : index
    %42 = vector.load %arg7[%c1, %c0_40, %c0_41] : memref<9x16x8xbf16, #tpu.memory_space<vmem>>, vector<1x16x8xbf16>
    %43 = vector.shape_cast %42 : vector<1x16x8xbf16> to vector<16x8xbf16>
    %cst_42 = arith.constant dense<0.000000e+00> : vector<16x8xf32>
    %44 = tpu.matmul %41, %43, %cst_42 {dimension_numbers = #tpu.dot_dimension_numbers<[1], [0], [0], [1], [0, 0, 1, 1], [], []>} : vector<16x16xbf16>, vector<16x8xbf16>, vector<16x8xf32> -> vector<16x8xf32>
    %45 = arith.addf %38, %44 : vector<16x8xf32>
    %c0_43 = arith.constant 0 : index
    %c8 = arith.constant 8 : index
    %c0_44 = arith.constant 0 : index
    %46 = vector.load %arg15[%c0_43, %c8, %c0_44] : memref<12x12x16xf32, #tpu.memory_space<vmem>>, vector<4x4x16xf32>
    %47 = vector.shape_cast %46 : vector<4x4x16xf32> to vector<16x16xf32>
    %48 = arith.truncf %47 : vector<16x16xf32> to vector<16x16xbf16>
    %c2 = arith.constant 2 : index
    %c0_45 = arith.constant 0 : index
    %c0_46 = arith.constant 0 : index
    %49 = vector.load %arg7[%c2, %c0_45, %c0_46] : memref<9x16x8xbf16, #tpu.memory_space<vmem>>, vector<1x16x8xbf16>
    %50 = vector.shape_cast %49 : vector<1x16x8xbf16> to vector<16x8xbf16>
    %cst_47 = arith.constant dense<0.000000e+00> : vector<16x8xf32>
    %51 = tpu.matmul %48, %50, %cst_47 {dimension_numbers = #tpu.dot_dimension_numbers<[1], [0], [0], [1], [0, 0, 1, 1], [], []>} : vector<16x16xbf16>, vector<16x8xbf16>, vector<16x8xf32> -> vector<16x8xf32>
    %52 = arith.addf %45, %51 : vector<16x8xf32>
    %c4_48 = arith.constant 4 : index
    %c0_49 = arith.constant 0 : index
    %c0_50 = arith.constant 0 : index
    %53 = vector.load %arg15[%c4_48, %c0_49, %c0_50] : memref<12x12x16xf32, #tpu.memory_space<vmem>>, vector<4x4x16xf32>
    %54 = vector.shape_cast %53 : vector<4x4x16xf32> to vector<16x16xf32>
    %55 = arith.truncf %54 : vector<16x16xf32> to vector<16x16xbf16>
    %c3 = arith.constant 3 : index
    %c0_51 = arith.constant 0 : index
    %c0_52 = arith.constant 0 : index
    %56 = vector.load %arg7[%c3, %c0_51, %c0_52] : memref<9x16x8xbf16, #tpu.memory_space<vmem>>, vector<1x16x8xbf16>
    %57 = vector.shape_cast %56 : vector<1x16x8xbf16> to vector<16x8xbf16>
    %cst_53 = arith.constant dense<0.000000e+00> : vector<16x8xf32>
    %58 = tpu.matmul %55, %57, %cst_53 {dimension_numbers = #tpu.dot_dimension_numbers<[1], [0], [0], [1], [0, 0, 1, 1], [], []>} : vector<16x16xbf16>, vector<16x8xbf16>, vector<16x8xf32> -> vector<16x8xf32>
    %59 = arith.addf %52, %58 : vector<16x8xf32>
    %c4_54 = arith.constant 4 : index
    %c4_55 = arith.constant 4 : index
    %c0_56 = arith.constant 0 : index
    %60 = vector.load %arg15[%c4_54, %c4_55, %c0_56] : memref<12x12x16xf32, #tpu.memory_space<vmem>>, vector<4x4x16xf32>
    %61 = vector.shape_cast %60 : vector<4x4x16xf32> to vector<16x16xf32>
    %62 = arith.truncf %61 : vector<16x16xf32> to vector<16x16xbf16>
    %c4_57 = arith.constant 4 : index
    %c0_58 = arith.constant 0 : index
    %c0_59 = arith.constant 0 : index
    %63 = vector.load %arg7[%c4_57, %c0_58, %c0_59] : memref<9x16x8xbf16, #tpu.memory_space<vmem>>, vector<1x16x8xbf16>
    %64 = vector.shape_cast %63 : vector<1x16x8xbf16> to vector<16x8xbf16>
    %cst_60 = arith.constant dense<0.000000e+00> : vector<16x8xf32>
    %65 = tpu.matmul %62, %64, %cst_60 {dimension_numbers = #tpu.dot_dimension_numbers<[1], [0], [0], [1], [0, 0, 1, 1], [], []>} : vector<16x16xbf16>, vector<16x8xbf16>, vector<16x8xf32> -> vector<16x8xf32>
    %66 = arith.addf %59, %65 : vector<16x8xf32>
    %c4_61 = arith.constant 4 : index
    %c8_62 = arith.constant 8 : index
    %c0_63 = arith.constant 0 : index
    %67 = vector.load %arg15[%c4_61, %c8_62, %c0_63] : memref<12x12x16xf32, #tpu.memory_space<vmem>>, vector<4x4x16xf32>
    %68 = vector.shape_cast %67 : vector<4x4x16xf32> to vector<16x16xf32>
    %69 = arith.truncf %68 : vector<16x16xf32> to vector<16x16xbf16>
    %c5 = arith.constant 5 : index
    %c0_64 = arith.constant 0 : index
    %c0_65 = arith.constant 0 : index
    %70 = vector.load %arg7[%c5, %c0_64, %c0_65] : memref<9x16x8xbf16, #tpu.memory_space<vmem>>, vector<1x16x8xbf16>
    %71 = vector.shape_cast %70 : vector<1x16x8xbf16> to vector<16x8xbf16>
    %cst_66 = arith.constant dense<0.000000e+00> : vector<16x8xf32>
    %72 = tpu.matmul %69, %71, %cst_66 {dimension_numbers = #tpu.dot_dimension_numbers<[1], [0], [0], [1], [0, 0, 1, 1], [], []>} : vector<16x16xbf16>, vector<16x8xbf16>, vector<16x8xf32> -> vector<16x8xf32>
    %73 = arith.addf %66, %72 : vector<16x8xf32>
    %c8_67 = arith.constant 8 : index
    %c0_68 = arith.constant 0 : index
    %c0_69 = arith.constant 0 : index
    %74 = vector.load %arg15[%c8_67, %c0_68, %c0_69] : memref<12x12x16xf32, #tpu.memory_space<vmem>>, vector<4x4x16xf32>
    %75 = vector.shape_cast %74 : vector<4x4x16xf32> to vector<16x16xf32>
    %76 = arith.truncf %75 : vector<16x16xf32> to vector<16x16xbf16>
    %c6 = arith.constant 6 : index
    %c0_70 = arith.constant 0 : index
    %c0_71 = arith.constant 0 : index
    %77 = vector.load %arg7[%c6, %c0_70, %c0_71] : memref<9x16x8xbf16, #tpu.memory_space<vmem>>, vector<1x16x8xbf16>
    %78 = vector.shape_cast %77 : vector<1x16x8xbf16> to vector<16x8xbf16>
    %cst_72 = arith.constant dense<0.000000e+00> : vector<16x8xf32>
    %79 = tpu.matmul %76, %78, %cst_72 {dimension_numbers = #tpu.dot_dimension_numbers<[1], [0], [0], [1], [0, 0, 1, 1], [], []>} : vector<16x16xbf16>, vector<16x8xbf16>, vector<16x8xf32> -> vector<16x8xf32>
    %80 = arith.addf %73, %79 : vector<16x8xf32>
    %c8_73 = arith.constant 8 : index
    %c4_74 = arith.constant 4 : index
    %c0_75 = arith.constant 0 : index
    %81 = vector.load %arg15[%c8_73, %c4_74, %c0_75] : memref<12x12x16xf32, #tpu.memory_space<vmem>>, vector<4x4x16xf32>
    %82 = vector.shape_cast %81 : vector<4x4x16xf32> to vector<16x16xf32>
    %83 = arith.truncf %82 : vector<16x16xf32> to vector<16x16xbf16>
    %c7 = arith.constant 7 : index
    %c0_76 = arith.constant 0 : index
    %c0_77 = arith.constant 0 : index
    %84 = vector.load %arg7[%c7, %c0_76, %c0_77] : memref<9x16x8xbf16, #tpu.memory_space<vmem>>, vector<1x16x8xbf16>
    %85 = vector.shape_cast %84 : vector<1x16x8xbf16> to vector<16x8xbf16>
    %cst_78 = arith.constant dense<0.000000e+00> : vector<16x8xf32>
    %86 = tpu.matmul %83, %85, %cst_78 {dimension_numbers = #tpu.dot_dimension_numbers<[1], [0], [0], [1], [0, 0, 1, 1], [], []>} : vector<16x16xbf16>, vector<16x8xbf16>, vector<16x8xf32> -> vector<16x8xf32>
    %87 = arith.addf %80, %86 : vector<16x8xf32>
    %c8_79 = arith.constant 8 : index
    %c8_80 = arith.constant 8 : index
    %c0_81 = arith.constant 0 : index
    %88 = vector.load %arg15[%c8_79, %c8_80, %c0_81] : memref<12x12x16xf32, #tpu.memory_space<vmem>>, vector<4x4x16xf32>
    %89 = vector.shape_cast %88 : vector<4x4x16xf32> to vector<16x16xf32>
    %90 = arith.truncf %89 : vector<16x16xf32> to vector<16x16xbf16>
    %c8_82 = arith.constant 8 : index
    %c0_83 = arith.constant 0 : index
    %c0_84 = arith.constant 0 : index
    %91 = vector.load %arg7[%c8_82, %c0_83, %c0_84] : memref<9x16x8xbf16, #tpu.memory_space<vmem>>, vector<1x16x8xbf16>
    %92 = vector.shape_cast %91 : vector<1x16x8xbf16> to vector<16x8xbf16>
    %cst_85 = arith.constant dense<0.000000e+00> : vector<16x8xf32>
    %93 = tpu.matmul %90, %92, %cst_85 {dimension_numbers = #tpu.dot_dimension_numbers<[1], [0], [0], [1], [0, 0, 1, 1], [], []>} : vector<16x16xbf16>, vector<16x8xbf16>, vector<16x8xf32> -> vector<16x8xf32>
    %94 = arith.addf %87, %93 : vector<16x8xf32>
    %95 = vector.shape_cast %94 : vector<16x8xf32> to vector<4x4x8xf32>
    %c0_86 = arith.constant 0 : index
    %c0_87 = arith.constant 0 : index
    %c0_88 = arith.constant 0 : index
    %c16 = arith.constant 16 : index
    %96 = vector.load %arg14[%c0_86, %c0_87, %c0_88, %c16] : memref<1x4x4x32xf32, #tpu.memory_space<vmem>>, vector<1x4x4x8xf32>
    %97 = vector.shape_cast %96 : vector<1x4x4x8xf32> to vector<4x4x8xf32>
    %98 = vector.shape_cast %95 : vector<4x4x8xf32> to vector<1x4x4x8xf32>
    tpu.vector_store %arg14[%c0_86, %c0_87, %c0_88, %c16], %98 {strides = array<i32>} : memref<1x4x4x32xf32, #tpu.memory_space<vmem>>, vector<1x4x4x8xf32>,
    %c0_89 = arith.constant 0 : index
    %c0_90 = arith.constant 0 : index
    %c0_91 = arith.constant 0 : index
    %c0_92 = arith.constant 0 : index
    %99 = vector.load %arg14[%c0_89, %c0_90, %c0_91, %c0_92] : memref<1x4x4x32xf32, #tpu.memory_space<vmem>>, vector<1x4x4x24xf32>
    %100 = vector.shape_cast %99 : vector<1x4x4x24xf32> to vector<4x4x24xf32>
    %101 = vector.shape_cast %100 : vector<4x4x24xf32> to vector<16x24xf32>
    %c0_93 = arith.constant 0 : index
    %c0_94 = arith.constant 0 : index
    %102 = vector.load %arg8[%c0_93, %c0_94] : memref<1x24xf32, #tpu.memory_space<vmem>>, vector<1x24xf32>
    %103 = vector.broadcast %102 : vector<1x24xf32> to vector<16x24xf32>
    %104 = arith.mulf %101, %103 : vector<16x24xf32>
    %c0_95 = arith.constant 0 : index
    %c0_96 = arith.constant 0 : index
    %105 = vector.load %arg9[%c0_95, %c0_96] : memref<1x24xf32, #tpu.memory_space<vmem>>, vector<1x24xf32>
    %106 = vector.broadcast %105 : vector<1x24xf32> to vector<16x24xf32>
    %107 = arith.addf %104, %106 : vector<16x24xf32>
    %cst_97 = arith.constant 0.000000e+00 : f32
    %108 = vector.broadcast %cst_97 : f32 to vector<16x24xf32>
    %109 = arith.maximumf %107, %108 : vector<16x24xf32>
    %110 = arith.truncf %109 : vector<16x24xf32> to vector<16x24xbf16>
    %c0_98 = arith.constant 0 : index
    %c0_99 = arith.constant 0 : index
    %111 = vector.load %arg10[%c0_98, %c0_99] : memref<24x16xbf16, #tpu.memory_space<vmem>>, vector<24x16xbf16>
    %cst_100 = arith.constant dense<0.000000e+00> : vector<16x16xf32>
    %112 = tpu.matmul %110, %111, %cst_100 {dimension_numbers = #tpu.dot_dimension_numbers<[1], [0], [0], [1], [0, 0, 1, 1], [], []>} : vector<16x24xbf16>, vector<24x16xbf16>, vector<16x16xf32> -> vector<16x16xf32>
    %c0_101 = arith.constant 0 : index
    %c0_102 = arith.constant 0 : index
    %113 = vector.load %arg11[%c0_101, %c0_102] : memref<1x16xf32, #tpu.memory_space<vmem>>, vector<1x16xf32>
    %114 = vector.broadcast %113 : vector<1x16xf32> to vector<16x16xf32>
    %115 = arith.mulf %112, %114 : vector<16x16xf32>
    %c0_103 = arith.constant 0 : index
    %c0_104 = arith.constant 0 : index
    %116 = vector.load %arg12[%c0_103, %c0_104] : memref<1x16xf32, #tpu.memory_space<vmem>>, vector<1x16xf32>
    %117 = vector.broadcast %116 : vector<1x16xf32> to vector<16x16xf32>
    %118 = arith.addf %115, %117 : vector<16x16xf32>
    %cst_105 = arith.constant 0.000000e+00 : f32
    %119 = vector.broadcast %cst_105 : f32 to vector<16x16xf32>
    %120 = arith.maximumf %118, %119 : vector<16x16xf32>
    %121 = vector.shape_cast %120 : vector<16x16xf32> to vector<4x4x16xf32>
    %c4_106 = arith.constant 4 : index
    %c4_107 = arith.constant 4 : index
    %c0_108 = arith.constant 0 : index
    %122 = vector.load %arg15[%c4_106, %c4_107, %c0_108] : memref<12x12x16xf32, #tpu.memory_space<vmem>>, vector<4x4x16xf32>
    tpu.vector_store %arg15[%c4_106, %c4_107, %c0_108], %121 {strides = array<i32>} : memref<12x12x16xf32, #tpu.memory_space<vmem>>, vector<4x4x16xf32>,
    %cst_109 = arith.constant 0.000000e+00 : f32
    %123 = vector.broadcast %cst_109 : f32 to vector<16x8xf32>
    %c0_110 = arith.constant 0 : index
    %c0_111 = arith.constant 0 : index
    %c0_112 = arith.constant 0 : index
    %124 = vector.load %arg15[%c0_110, %c0_111, %c0_112] : memref<12x12x16xf32, #tpu.memory_space<vmem>>, vector<4x4x16xf32>
    %125 = vector.shape_cast %124 : vector<4x4x16xf32> to vector<16x16xf32>
    %126 = arith.truncf %125 : vector<16x16xf32> to vector<16x16xbf16>
    %c0_113 = arith.constant 0 : index
    %c0_114 = arith.constant 0 : index
    %c0_115 = arith.constant 0 : index
    %127 = vector.load %arg13[%c0_113, %c0_114, %c0_115] : memref<9x16x8xbf16, #tpu.memory_space<vmem>>, vector<1x16x8xbf16>
    %128 = vector.shape_cast %127 : vector<1x16x8xbf16> to vector<16x8xbf16>
    %cst_116 = arith.constant dense<0.000000e+00> : vector<16x8xf32>
    %129 = tpu.matmul %126, %128, %cst_116 {dimension_numbers = #tpu.dot_dimension_numbers<[1], [0], [0], [1], [0, 0, 1, 1], [], []>} : vector<16x16xbf16>, vector<16x8xbf16>, vector<16x8xf32> -> vector<16x8xf32>
    %130 = arith.addf %123, %129 : vector<16x8xf32>
    %c0_117 = arith.constant 0 : index
    %c4_118 = arith.constant 4 : index
    %c0_119 = arith.constant 0 : index
    %131 = vector.load %arg15[%c0_117, %c4_118, %c0_119] : memref<12x12x16xf32, #tpu.memory_space<vmem>>, vector<4x4x16xf32>
    %132 = vector.shape_cast %131 : vector<4x4x16xf32> to vector<16x16xf32>
    %133 = arith.truncf %132 : vector<16x16xf32> to vector<16x16xbf16>
    %c1_120 = arith.constant 1 : index
    %c0_121 = arith.constant 0 : index
    %c0_122 = arith.constant 0 : index
    %134 = vector.load %arg13[%c1_120, %c0_121, %c0_122] : memref<9x16x8xbf16, #tpu.memory_space<vmem>>, vector<1x16x8xbf16>
    %135 = vector.shape_cast %134 : vector<1x16x8xbf16> to vector<16x8xbf16>
    %cst_123 = arith.constant dense<0.000000e+00> : vector<16x8xf32>
    %136 = tpu.matmul %133, %135, %cst_123 {dimension_numbers = #tpu.dot_dimension_numbers<[1], [0], [0], [1], [0, 0, 1, 1], [], []>} : vector<16x16xbf16>, vector<16x8xbf16>, vector<16x8xf32> -> vector<16x8xf32>
    %137 = arith.addf %130, %136 : vector<16x8xf32>
    %c0_124 = arith.constant 0 : index
    %c8_125 = arith.constant 8 : index
    %c0_126 = arith.constant 0 : index
    %138 = vector.load %arg15[%c0_124, %c8_125, %c0_126] : memref<12x12x16xf32, #tpu.memory_space<vmem>>, vector<4x4x16xf32>
    %139 = vector.shape_cast %138 : vector<4x4x16xf32> to vector<16x16xf32>
    %140 = arith.truncf %139 : vector<16x16xf32> to vector<16x16xbf16>
    %c2_127 = arith.constant 2 : index
    %c0_128 = arith.constant 0 : index
    %c0_129 = arith.constant 0 : index
    %141 = vector.load %arg13[%c2_127, %c0_128, %c0_129] : memref<9x16x8xbf16, #tpu.memory_space<vmem>>, vector<1x16x8xbf16>
    %142 = vector.shape_cast %141 : vector<1x16x8xbf16> to vector<16x8xbf16>
    %cst_130 = arith.constant dense<0.000000e+00> : vector<16x8xf32>
    %143 = tpu.matmul %140, %142, %cst_130 {dimension_numbers = #tpu.dot_dimension_numbers<[1], [0], [0], [1], [0, 0, 1, 1], [], []>} : vector<16x16xbf16>, vector<16x8xbf16>, vector<16x8xf32> -> vector<16x8xf32>
    %144 = arith.addf %137, %143 : vector<16x8xf32>
    %c4_131 = arith.constant 4 : index
    %c0_132 = arith.constant 0 : index
    %c0_133 = arith.constant 0 : index
    %145 = vector.load %arg15[%c4_131, %c0_132, %c0_133] : memref<12x12x16xf32, #tpu.memory_space<vmem>>, vector<4x4x16xf32>
    %146 = vector.shape_cast %145 : vector<4x4x16xf32> to vector<16x16xf32>
    %147 = arith.truncf %146 : vector<16x16xf32> to vector<16x16xbf16>
    %c3_134 = arith.constant 3 : index
    %c0_135 = arith.constant 0 : index
    %c0_136 = arith.constant 0 : index
    %148 = vector.load %arg13[%c3_134, %c0_135, %c0_136] : memref<9x16x8xbf16, #tpu.memory_space<vmem>>, vector<1x16x8xbf16>
    %149 = vector.shape_cast %148 : vector<1x16x8xbf16> to vector<16x8xbf16>
    %cst_137 = arith.constant dense<0.000000e+00> : vector<16x8xf32>
    %150 = tpu.matmul %147, %149, %cst_137 {dimension_numbers = #tpu.dot_dimension_numbers<[1], [0], [0], [1], [0, 0, 1, 1], [], []>} : vector<16x16xbf16>, vector<16x8xbf16>, vector<16x8xf32> -> vector<16x8xf32>
    %151 = arith.addf %144, %150 : vector<16x8xf32>
    %c4_138 = arith.constant 4 : index
    %c4_139 = arith.constant 4 : index
    %c0_140 = arith.constant 0 : index
    %152 = vector.load %arg15[%c4_138, %c4_139, %c0_140] : memref<12x12x16xf32, #tpu.memory_space<vmem>>, vector<4x4x16xf32>
    %153 = vector.shape_cast %152 : vector<4x4x16xf32> to vector<16x16xf32>
    %154 = arith.truncf %153 : vector<16x16xf32> to vector<16x16xbf16>
    %c4_141 = arith.constant 4 : index
    %c0_142 = arith.constant 0 : index
    %c0_143 = arith.constant 0 : index
    %155 = vector.load %arg13[%c4_141, %c0_142, %c0_143] : memref<9x16x8xbf16, #tpu.memory_space<vmem>>, vector<1x16x8xbf16>
    %156 = vector.shape_cast %155 : vector<1x16x8xbf16> to vector<16x8xbf16>
    %cst_144 = arith.constant dense<0.000000e+00> : vector<16x8xf32>
    %157 = tpu.matmul %154, %156, %cst_144 {dimension_numbers = #tpu.dot_dimension_numbers<[1], [0], [0], [1], [0, 0, 1, 1], [], []>} : vector<16x16xbf16>, vector<16x8xbf16>, vector<16x8xf32> -> vector<16x8xf32>
    %158 = arith.addf %151, %157 : vector<16x8xf32>
    %c4_145 = arith.constant 4 : index
    %c8_146 = arith.constant 8 : index
    %c0_147 = arith.constant 0 : index
    %159 = vector.load %arg15[%c4_145, %c8_146, %c0_147] : memref<12x12x16xf32, #tpu.memory_space<vmem>>, vector<4x4x16xf32>
    %160 = vector.shape_cast %159 : vector<4x4x16xf32> to vector<16x16xf32>
    %161 = arith.truncf %160 : vector<16x16xf32> to vector<16x16xbf16>
    %c5_148 = arith.constant 5 : index
    %c0_149 = arith.constant 0 : index
    %c0_150 = arith.constant 0 : index
    %162 = vector.load %arg13[%c5_148, %c0_149, %c0_150] : memref<9x16x8xbf16, #tpu.memory_space<vmem>>, vector<1x16x8xbf16>
    %163 = vector.shape_cast %162 : vector<1x16x8xbf16> to vector<16x8xbf16>
    %cst_151 = arith.constant dense<0.000000e+00> : vector<16x8xf32>
    %164 = tpu.matmul %161, %163, %cst_151 {dimension_numbers = #tpu.dot_dimension_numbers<[1], [0], [0], [1], [0, 0, 1, 1], [], []>} : vector<16x16xbf16>, vector<16x8xbf16>, vector<16x8xf32> -> vector<16x8xf32>
    %165 = arith.addf %158, %164 : vector<16x8xf32>
    %c8_152 = arith.constant 8 : index
    %c0_153 = arith.constant 0 : index
    %c0_154 = arith.constant 0 : index
    %166 = vector.load %arg15[%c8_152, %c0_153, %c0_154] : memref<12x12x16xf32, #tpu.memory_space<vmem>>, vector<4x4x16xf32>
    %167 = vector.shape_cast %166 : vector<4x4x16xf32> to vector<16x16xf32>
    %168 = arith.truncf %167 : vector<16x16xf32> to vector<16x16xbf16>
    %c6_155 = arith.constant 6 : index
    %c0_156 = arith.constant 0 : index
    %c0_157 = arith.constant 0 : index
    %169 = vector.load %arg13[%c6_155, %c0_156, %c0_157] : memref<9x16x8xbf16, #tpu.memory_space<vmem>>, vector<1x16x8xbf16>
    %170 = vector.shape_cast %169 : vector<1x16x8xbf16> to vector<16x8xbf16>
    %cst_158 = arith.constant dense<0.000000e+00> : vector<16x8xf32>
    %171 = tpu.matmul %168, %170, %cst_158 {dimension_numbers = #tpu.dot_dimension_numbers<[1], [0], [0], [1], [0, 0, 1, 1], [], []>} : vector<16x16xbf16>, vector<16x8xbf16>, vector<16x8xf32> -> vector<16x8xf32>
    %172 = arith.addf %165, %171 : vector<16x8xf32>
    %c8_159 = arith.constant 8 : index
    %c4_160 = arith.constant 4 : index
    %c0_161 = arith.constant 0 : index
    %173 = vector.load %arg15[%c8_159, %c4_160, %c0_161] : memref<12x12x16xf32, #tpu.memory_space<vmem>>, vector<4x4x16xf32>
    %174 = vector.shape_cast %173 : vector<4x4x16xf32> to vector<16x16xf32>
    %175 = arith.truncf %174 : vector<16x16xf32> to vector<16x16xbf16>
    %c7_162 = arith.constant 7 : index
    %c0_163 = arith.constant 0 : index
    %c0_164 = arith.constant 0 : index
    %176 = vector.load %arg13[%c7_162, %c0_163, %c0_164] : memref<9x16x8xbf16, #tpu.memory_space<vmem>>, vector<1x16x8xbf16>
    %177 = vector.shape_cast %176 : vector<1x16x8xbf16> to vector<16x8xbf16>
    %cst_165 = arith.constant dense<0.000000e+00> : vector<16x8xf32>
    %178 = tpu.matmul %175, %177, %cst_165 {dimension_numbers = #tpu.dot_dimension_numbers<[1], [0], [0], [1], [0, 0, 1, 1], [], []>} : vector<16x16xbf16>, vector<16x8xbf16>, vector<16x8xf32> -> vector<16x8xf32>
    %179 = arith.addf %172, %178 : vector<16x8xf32>
    %c8_166 = arith.constant 8 : index
    %c8_167 = arith.constant 8 : index
    %c0_168 = arith.constant 0 : index
    %180 = vector.load %arg15[%c8_166, %c8_167, %c0_168] : memref<12x12x16xf32, #tpu.memory_space<vmem>>, vector<4x4x16xf32>
    %181 = vector.shape_cast %180 : vector<4x4x16xf32> to vector<16x16xf32>
    %182 = arith.truncf %181 : vector<16x16xf32> to vector<16x16xbf16>
    %c8_169 = arith.constant 8 : index
    %c0_170 = arith.constant 0 : index
    %c0_171 = arith.constant 0 : index
    %183 = vector.load %arg13[%c8_169, %c0_170, %c0_171] : memref<9x16x8xbf16, #tpu.memory_space<vmem>>, vector<1x16x8xbf16>
    %184 = vector.shape_cast %183 : vector<1x16x8xbf16> to vector<16x8xbf16>
    %cst_172 = arith.constant dense<0.000000e+00> : vector<16x8xf32>
    %185 = tpu.matmul %182, %184, %cst_172 {dimension_numbers = #tpu.dot_dimension_numbers<[1], [0], [0], [1], [0, 0, 1, 1], [], []>} : vector<16x16xbf16>, vector<16x8xbf16>, vector<16x8xf32> -> vector<16x8xf32>
    %186 = arith.addf %179, %185 : vector<16x8xf32>
    %187 = vector.shape_cast %186 : vector<16x8xf32> to vector<4x4x8xf32>
    %c0_173 = arith.constant 0 : index
    %c0_174 = arith.constant 0 : index
    %c0_175 = arith.constant 0 : index
    %c24 = arith.constant 24 : index
    %188 = vector.load %arg14[%c0_173, %c0_174, %c0_175, %c24] : memref<1x4x4x32xf32, #tpu.memory_space<vmem>>, vector<1x4x4x8xf32>
    %189 = vector.shape_cast %188 : vector<1x4x4x8xf32> to vector<4x4x8xf32>
    %190 = vector.shape_cast %187 : vector<4x4x8xf32> to vector<1x4x4x8xf32>
    tpu.vector_store %arg14[%c0_173, %c0_174, %c0_175, %c24], %190 {strides = array<i32>} : memref<1x4x4x32xf32, #tpu.memory_space<vmem>>, vector<1x4x4x8xf32>,
    return
  }
  func.func @transform_0(%arg0: i32) -> (i32, i32, i32, i32) {
    %c0_i32 = arith.constant 0 : i32
    %c0_i32_0 = arith.constant 0 : i32
    %c0_i32_1 = arith.constant 0 : i32
    %c0_i32_2 = arith.constant 0 : i32
    return %arg0, %c0_i32, %c0_i32_0, %c0_i32_1 : i32, i32, i32, i32
  }
  func.func @transform_1(%arg0: i32) -> (i32, i32) {
    %c0_i32 = arith.constant 0 : i32
    %c0_i32_0 = arith.constant 0 : i32
    %c0_i32_1 = arith.constant 0 : i32
    return %c0_i32, %c0_i32_0 : i32, i32
  }
  func.func @transform_2(%arg0: i32) -> (i32, i32) {
    %c0_i32 = arith.constant 0 : i32
    %c0_i32_0 = arith.constant 0 : i32
    %c0_i32_1 = arith.constant 0 : i32
    return %c0_i32, %c0_i32_0 : i32, i32
  }
  func.func @transform_3(%arg0: i32) -> (i32, i32) {
    %c0_i32 = arith.constant 0 : i32
    %c0_i32_0 = arith.constant 0 : i32
    %c0_i32_1 = arith.constant 0 : i32
    return %c0_i32, %c0_i32_0 : i32, i32
  }
  func.func @transform_4(%arg0: i32) -> (i32, i32) {
    %c0_i32 = arith.constant 0 : i32
    %c0_i32_0 = arith.constant 0 : i32
    %c0_i32_1 = arith.constant 0 : i32
    return %c0_i32, %c0_i32_0 : i32, i32
  }
  func.func @transform_5(%arg0: i32) -> (i32, i32) {
    %c0_i32 = arith.constant 0 : i32
    %c0_i32_0 = arith.constant 0 : i32
    %c0_i32_1 = arith.constant 0 : i32
    return %c0_i32, %c0_i32_0 : i32, i32
  }
  func.func @transform_6(%arg0: i32) -> (i32, i32, i32) {
    %c0_i32 = arith.constant 0 : i32
    %c0_i32_0 = arith.constant 0 : i32
    %c0_i32_1 = arith.constant 0 : i32
    %c0_i32_2 = arith.constant 0 : i32
    return %c0_i32, %c0_i32_0, %c0_i32_1 : i32, i32, i32
  }
  func.func @transform_7(%arg0: i32) -> (i32, i32) {
    %c0_i32 = arith.constant 0 : i32
    %c0_i32_0 = arith.constant 0 : i32
    %c0_i32_1 = arith.constant 0 : i32
    return %c0_i32, %c0_i32_0 : i32, i32
  }
  func.func @transform_8(%arg0: i32) -> (i32, i32) {
    %c0_i32 = arith.constant 0 : i32
    %c0_i32_0 = arith.constant 0 : i32
    %c0_i32_1 = arith.constant 0 : i32
    return %c0_i32, %c0_i32_0 : i32, i32
  }
  func.func @transform_9(%arg0: i32) -> (i32, i32) {
    %c0_i32 = arith.constant 0 : i32
    %c0_i32_0 = arith.constant 0 : i32
    %c0_i32_1 = arith.constant 0 : i32
    return %c0_i32, %c0_i32_0 : i32, i32
  }
  func.func @transform_10(%arg0: i32) -> (i32, i32) {
    %c0_i32 = arith.constant 0 : i32
    %c0_i32_0 = arith.constant 0 : i32
    %c0_i32_1 = arith.constant 0 : i32
    return %c0_i32, %c0_i32_0 : i32, i32
  }
  func.func @transform_11(%arg0: i32) -> (i32, i32) {
    %c0_i32 = arith.constant 0 : i32
    %c0_i32_0 = arith.constant 0 : i32
    %c0_i32_1 = arith.constant 0 : i32
    return %c0_i32, %c0_i32_0 : i32, i32
  }
  func.func @transform_12(%arg0: i32) -> (i32, i32, i32) {
    %c0_i32 = arith.constant 0 : i32
    %c0_i32_0 = arith.constant 0 : i32
    %c0_i32_1 = arith.constant 0 : i32
    %c0_i32_2 = arith.constant 0 : i32
    return %c0_i32, %c0_i32_0, %c0_i32_1 : i32, i32, i32
  }
  func.func @transform_13(%arg0: i32) -> (i32, i32, i32, i32) {
    %c0_i32 = arith.constant 0 : i32
    %c0_i32_0 = arith.constant 0 : i32
    %c0_i32_1 = arith.constant 0 : i32
    %c0_i32_2 = arith.constant 0 : i32
    return %arg0, %c0_i32, %c0_i32_0, %c0_i32_1 : i32, i32, i32, i32
  }
}

module attributes {stable_mosaic.version = 11 : i64} {
  func.func @_bn_kernel(%arg0: i32, %arg1: memref<16x32xf32, #tpu.memory_space<vmem>>, %arg2: memref<1x32xf32, #tpu.memory_space<vmem>>, %arg3: memref<1x32xf32, #tpu.memory_space<vmem>>, %arg4: memref<16x32xf32, #tpu.memory_space<vmem>>) attributes {dimension_semantics = [#tpu.dimension_semantics<parallel>], iteration_bounds = array<i64: 2>, scalar_prefetch = 0 : i64, scratch_operands = 0 : i64, tpu.core_type = #tpu.core_type<tc>, window_params = [{transform_indices = @transform_0, window_bounds = array<i64: 16, 32>}, {pipeline_mode = #tpu.pipeline_mode<synchronous>, transform_indices = @transform_1, window_bounds = array<i64: 1, 32>}, {pipeline_mode = #tpu.pipeline_mode<synchronous>, transform_indices = @transform_2, window_bounds = array<i64: 1, 32>}, {transform_indices = @transform_3, window_bounds = array<i64: 16, 32>}]} {
    %c0 = arith.constant 0 : index
    %c0_0 = arith.constant 0 : index
    %0 = vector.load %arg1[%c0, %c0_0] : memref<16x32xf32, #tpu.memory_space<vmem>>, vector<16x32xf32>
    %c0_1 = arith.constant 0 : index
    %c0_2 = arith.constant 0 : index
    %1 = vector.load %arg2[%c0_1, %c0_2] : memref<1x32xf32, #tpu.memory_space<vmem>>, vector<1x32xf32>
    %2 = vector.broadcast %1 : vector<1x32xf32> to vector<16x32xf32>
    %3 = arith.mulf %0, %2 : vector<16x32xf32>
    %c0_3 = arith.constant 0 : index
    %c0_4 = arith.constant 0 : index
    %4 = vector.load %arg3[%c0_3, %c0_4] : memref<1x32xf32, #tpu.memory_space<vmem>>, vector<1x32xf32>
    %5 = vector.broadcast %4 : vector<1x32xf32> to vector<16x32xf32>
    %6 = arith.addf %3, %5 : vector<16x32xf32>
    %c0_5 = arith.constant 0 : index
    %c0_6 = arith.constant 0 : index
    %7 = vector.load %arg4[%c0_5, %c0_6] : memref<16x32xf32, #tpu.memory_space<vmem>>, vector<16x32xf32>
    tpu.vector_store %arg4[%c0_5, %c0_6], %6 {strides = array<i32>} : memref<16x32xf32, #tpu.memory_space<vmem>>, vector<16x32xf32>,
    return
  }
  func.func @transform_0(%arg0: i32) -> (i32, i32) {
    %c0_i32 = arith.constant 0 : i32
    %c0_i32_0 = arith.constant 0 : i32
    return %arg0, %c0_i32 : i32, i32
  }
  func.func @transform_1(%arg0: i32) -> (i32, i32) {
    %c0_i32 = arith.constant 0 : i32
    %c0_i32_0 = arith.constant 0 : i32
    %c0_i32_1 = arith.constant 0 : i32
    return %c0_i32, %c0_i32_0 : i32, i32
  }
  func.func @transform_2(%arg0: i32) -> (i32, i32) {
    %c0_i32 = arith.constant 0 : i32
    %c0_i32_0 = arith.constant 0 : i32
    %c0_i32_1 = arith.constant 0 : i32
    return %c0_i32, %c0_i32_0 : i32, i32
  }
  func.func @transform_3(%arg0: i32) -> (i32, i32) {
    %c0_i32 = arith.constant 0 : i32
    %c0_i32_0 = arith.constant 0 : i32
    return %arg0, %c0_i32 : i32, i32
  }
}

</mosaic_0001>

<bundles_post_ra>
// kernel: backbone_forward.9
= control target key start
LH: loop header
LB: loop body
LE: loop exit
PB: predicated region body
PF: predicated region fallthrough
CT: control target
= control target key end

     0   :  { %s1173_s15 = smov 0   ;;  %s1455_s0 = inlined_call_operand.vmem [shape: bf16[512,147], index: 0, kind: input, shape index: {}]   ;;  %s1456_s1 = inlined_call_operand.vmem [shape: bf16[147,16], index: 1, kind: input, shape index: {}]   ;;  %s1457_s2 = inlined_call_operand.vmem [shape: f32[1,16], index: 2, kind: input, shape index: {}]   ;;  %s1458_s3 = inlined_call_operand.vmem [shape: f32[1,16], index: 3, kind: input, shape index: {}]   ;;  %s1459_s4 = inlined_call_operand.vmem [shape: f32[512,16], index: 4, kind: output, shape index: {}]  }
   0x1 LB: > { %s884_s16 = sadd.s32 4294967295, %s1145_s15   ;;  %p888_p0 = scmp.ge.s32.totalorder %s1145_s15, 1  ;;  %s1145_s15 = sphi %s1173_s15, %s14_s15  }
   0x2   : > { %p164_p1 = scmp.lt.s32.totalorder %s1145_s15, 3 }
   0x4   : > { %p165_p2 = pnand %p888_p0, %p164_p1 }
   0x5   : > { %s889_s21 = sshll.u32 (!%p165_p2), %s884_s16, 5 }
   0x6   : > { %168 = sbr.rel (%p165_p2) target bundleno = 304 (0x130), region = 36  ;;  %p192_p3 = scmp.lt.s32.totalorder (!%p165_p2), %s889_s21, 63 }
   0xb   : > { %v1116_v0 = vld [vmem:[%s1456_s1 + $0x38] sm:$0xff]  ;;  %v255_v1 = vld [vmem:[%s1456_s1 + $0x48] sm:$0x3]  ;;  %vm506_vm0 = vcmask 1040384   ;;  %vm507_vm1 = vcmask 1041408   ;;  %v1115_v3 = vld [vmem:[%s1456_s1 + $0x30] sm:$0xff] }
   0xc   : > { %v437_v2 = vunpack.c.l.b16 %v255_v1  ;;  %513 = vmatpush.bf16.msra.mxu0 %v1116_v0  ;;  %1118 = vmatpush.bf16.msra.mxu2 %v1116_v0  ;;  %v1147_v4 = vmov 65535   ;;  %s1461_s21 = smov (!%p192_p3, %s889_s21), 63  ;;  %v1114_v9 = vld [vmem:[%s1456_s1 + $0x28] sm:$0xff]  ;;  %v1117_v10 = vld [vmem:[%s1456_s1 + $0x40] sm:$0xff]  ;;  %vm457_vm2 = vcmask 154624   ;;  %v1112_v18 = vld [vmem:[%s1456_s1 + $0x18] sm:$0xff] }
   0xd   : > { %v508_v5 = vsel %vm506_vm0, 4294967295, %v1147_v4  ;;  %s1076_s26 = sshll.u32 %s1461_s21, 3  ;;  %v1113_v14 = vld [vmem:[%s1456_s1 + $0x20] sm:$0xff]  ;;  %v1111_v19 = vld [vmem:[%s1456_s1 + $0x10] sm:$0xff]  ;;  %v1110_v20 = vld [vmem:[%s1456_s1 + $0x8] sm:$0xff]  ;;  %vm795_vm3 = vcmask 130048  }
   0xe   : > { %v447_v6 = vpack.c.b16 %v437_v2, %v437_v2  ;;  %v509_v7 = vsel %vm507_vm1, %v508_v5, 0  ;;  %s1204_s5 = scalar_lea.vmem %s1455_s0, %s1076_s26  ;;  %v1109_v26 = vld [vmem:[%s1456_s1] sm:$0xff]  ;;  %s1318_s24 = scalar_lea.vmem %s1459_s4, %s1076_s26 }
   0xf   : > { %v1077_v11 = vld [vmem:[%s1204_s5 + $0x4] sm:$0xf]  ;;  %v898_v12 = vld [vmem:[%s1204_s5 + $0x8] sm:$0xf0]  ;;  %v1095_v15 = vld [vmem:[%s1204_s5 + $0x94] sm:$0xf] }
  0x10   : > { %v511_v8 = vand.u32 %v509_v7, %v447_v6  ;;  %514 = vmatpush.bf16.msra.mxu0 %v1115_v3  ;;  %1119 = vmatpush.bf16.msra.mxu2 %v1115_v3  ;;  %v901_v13 = vor.u32 %v1077_v11, %v898_v12  ;;  %v970_v16 = vld [vmem:[%s1204_s5 + $0x98] sm:$0xf0]  ;;  %v1079_v21 = vld [vmem:[%s1204_s5 + $0x14] sm:$0xf]  ;;  %v1097_v23 = vld [vmem:[%s1204_s5 + $0xa4] sm:$0xf] }
  0x11   : > { %v973_v17 = vor.u32 %v1095_v15, %v970_v16  ;;  %v906_v22 = vld [vmem:[%s1204_s5 + $0x18] sm:$0xf0]  ;;  %v978_v24 = vld [vmem:[%s1204_s5 + $0xa8] sm:$0xf0]  ;;  %v896_v27 = vld [vmem:[%s1204_s5] sm:$0xf] }
  0x12   : > { %608 = vmatpush.bf16.msra.mxu1 %v511_v8  ;;  %1126 = vmatpush.bf16.msra.mxu3 %v511_v8  ;;  %v909_v25 = vor.u32 %v1079_v21, %v906_v22  ;;  %v1078_v28 = vld [vmem:[%s1204_s5 + $0x4] sm:$0xf0]  ;;  %v960_v29 = vld [vmem:[%s1204_s5 + $0x80] sm:$0xf]  ;;  %v981_v31 = vor.u32 %v1097_v23, %v978_v24  ;;  %v1081_v34 = vld [vmem:[%s1204_s5 + $0x24] sm:$0xf] }
  0x13   : > { %v1094_v30 = vld [vmem:[%s1204_s5 + $0x84] sm:$0xf0]  ;;  %v897_v32 = vor.u32 %v1078_v28, %v896_v27  ;;  %v914_v35 = vld [vmem:[%s1204_s5 + $0x28] sm:$0xf0]  ;;  %v1099_v36 = vld [vmem:[%s1204_s5 + $0xb4] sm:$0xf] }
  0x14   : > { %515 = vmatpush.bf16.msra.mxu0 %v1114_v9  ;;  %1120 = vmatpush.bf16.msra.mxu2 %v1114_v9  ;;  %v961_v33 = vor.u32 %v1094_v30, %v960_v29  ;;  %v986_v37 = vld [vmem:[%s1204_s5 + $0xb8] sm:$0xf0]  ;;  %v917_v38 = vor.u32 %v1081_v34, %v914_v35  ;;  %v904_v39 = vld [vmem:[%s1204_s5 + $0x10] sm:$0xf]  ;;  %v1080_v40 = vld [vmem:[%s1204_s5 + $0x14] sm:$0xf0] }
  0x15   : > { %v968_v41 = vld [vmem:[%s1204_s5 + $0x90] sm:$0xf]  ;;  %v1096_v42 = vld [vmem:[%s1204_s5 + $0x94] sm:$0xf0]  ;;  %v989_v43 = vor.u32 %v1099_v36, %v986_v37  ;;  %v905_v44 = vor.u32 %v1080_v40, %v904_v39  ;;  %v1083_v46 = vld [vmem:[%s1204_s5 + $0x34] sm:$0xf] }
  0x16   : > { %609 = vmatpush.bf16.msra.mxu1 %v1117_v10  ;;  %1127 = vmatpush.bf16.msra.mxu3 %v1117_v10  ;;  %v969_v45 = vor.u32 %v1096_v42, %v968_v41  ;;  %v922_v47 = vld [vmem:[%s1204_s5 + $0x38] sm:$0xf0]  ;;  %v1101_v48 = vld [vmem:[%s1204_s5 + $0xc4] sm:$0xf]  ;;  %v994_v49 = vld [vmem:[%s1204_s5 + $0xc8] sm:$0xf0] }
  0x17   : > { %v925_v50 = vor.u32 %v1083_v46, %v922_v47  ;;  %v912_v51 = vld [vmem:[%s1204_s5 + $0x20] sm:$0xf]  ;;  %v1082_v52 = vld [vmem:[%s1204_s5 + $0x24] sm:$0xf0]  ;;  %v997_v55 = vor.u32 %v1101_v48, %v994_v49  ;;  %v1085_v58 = vld [vmem:[%s1204_s5 + $0x44] sm:$0xf] }
  0x18   : > { %516 = vmatpush.bf16.msra.mxu0 %v1113_v14  ;;  %1121 = vmatpush.bf16.msra.mxu2 %v1113_v14  ;;  %v976_v53 = vld [vmem:[%s1204_s5 + $0xa0] sm:$0xf]  ;;  %v1098_v54 = vld [vmem:[%s1204_s5 + $0xa4] sm:$0xf0]  ;;  %v913_v56 = vor.u32 %v1082_v52, %v912_v51  ;;  %v930_v59 = vld [vmem:[%s1204_s5 + $0x48] sm:$0xf0] }
  0x19   : > { %1058 = vmatmul.msk.bf16.vlgmr.msra.gmra.mxu1 %vm457_vm2, %v901_v13  ;;  %1067 = vmatmul.msk.bf16.vlgmr.msra.gmra.mxu3 %vm457_vm2, %v973_v17  ;;  %v977_v57 = vor.u32 %v1098_v54, %v976_v53  ;;  %v1103_v60 = vld [vmem:[%s1204_s5 + $0xd4] sm:$0xf]  ;;  %v1002_v61 = vld [vmem:[%s1204_s5 + $0xd8] sm:$0xf0]  ;;  %v933_v62 = vor.u32 %v1085_v58, %v930_v59  ;;  %v920_v63 = vld [vmem:[%s1204_s5 + $0x30] sm:$0xf] }
  0x1a   : > { %v1084_v0 = vld [vmem:[%s1204_s5 + $0x34] sm:$0xf0]  ;;  %v984_v1 = vld [vmem:[%s1204_s5 + $0xb0] sm:$0xf]  ;;  %v1005_v3 = vor.u32 %v1103_v60, %v1002_v61  ;;  %v1087_v6 = vld [vmem:[%s1204_s5 + $0x54] sm:$0xf] }
  0x1b   : > { %v1100_v2 = vld [vmem:[%s1204_s5 + $0xb4] sm:$0xf0]  ;;  %v921_v4 = vor.u32 %v1084_v0, %v920_v63  ;;  %v938_v7 = vld [vmem:[%s1204_s5 + $0x58] sm:$0xf0]  ;;  %v1105_v8 = vld [vmem:[%s1204_s5 + $0xe4] sm:$0xf] }
  0x1c   : > { %517 = vmatpush.bf16.msra.mxu0 %v1112_v18  ;;  %1122 = vmatpush.bf16.msra.mxu2 %v1112_v18  ;;  %v985_v5 = vor.u32 %v1100_v2, %v984_v1  ;;  %v1010_v9 = vld [vmem:[%s1204_s5 + $0xe8] sm:$0xf0]  ;;  %v941_v10 = vor.u32 %v1087_v6, %v938_v7  ;;  %v928_v11 = vld [vmem:[%s1204_s5 + $0x40] sm:$0xf]  ;;  %v1086_v12 = vld [vmem:[%s1204_s5 + $0x44] sm:$0xf0] }
  0x1d   : > { %v992_v13 = vld [vmem:[%s1204_s5 + $0xc0] sm:$0xf]  ;;  %v1102_v14 = vld [vmem:[%s1204_s5 + $0xc4] sm:$0xf0]  ;;  %v1013_v15 = vor.u32 %v1105_v8, %v1010_v9  ;;  %v929_v16 = vor.u32 %v1086_v12, %v928_v11  ;;  %v1089_v18 = vld [vmem:[%s1204_s5 + $0x64] sm:$0xf] }
  0x1e   : > { %v993_v17 = vor.u32 %v1102_v14, %v992_v13  ;;  %v1018_v21 = vld [vmem:[%s1204_s5 + $0xf8] sm:$0xf0]  ;;  %v936_v23 = vld [vmem:[%s1204_s5 + $0x50] sm:$0xf]  ;;  %v1088_v24 = vld [vmem:[%s1204_s5 + $0x54] sm:$0xf0] }
  0x1f   : > { %v937_v28 = vor.u32 %v1088_v24, %v936_v23  ;;  %v1091_v30 = vld [vmem:[%s1204_s5 + $0x74] sm:$0xf]  ;;  %v1090_v34 = vld [vmem:[%s1204_s5 + $0x64] sm:$0xf0]  ;;  %v1008_v35 = vld [vmem:[%s1204_s5 + $0xe0] sm:$0xf] }
  0x20   : > { %518 = vmatpush.bf16.msra.mxu0 %v1111_v19  ;;  %1123 = vmatpush.bf16.msra.mxu2 %v1111_v19  ;;  %v946_v19 = vld [vmem:[%s1204_s5 + $0x68] sm:$0xf0]  ;;  %v1106_v36 = vld [vmem:[%s1204_s5 + $0xe4] sm:$0xf0]  ;;  %v1093_v39 = vld [vmem:[%s1204_s5 + $0x84] sm:$0xf] }
  0x21   : > { %v949_v22 = vor.u32 %v1089_v18, %v946_v19  ;;  %v962_v40 = vld [vmem:[%s1204_s5 + $0x88] sm:$0xf0]  ;;  %v952_v42 = vld [vmem:[%s1204_s5 + $0x70] sm:$0xf]  ;;  %v1108_v46 = vld [vmem:[%s1204_s5 + $0xf4] sm:$0xf0] }
  0x22   : > { %v965_v41 = vor.u32 %v1093_v39, %v962_v40  ;;  %v1304_v52 = vld [vmem:[%s1457_s2] ss:$0 sm:$0xff] }
  0x24   : > { %519 = vmatpush.bf16.msra.mxu0 %v1110_v20  ;;  %1124 = vmatpush.bf16.msra.mxu2 %v1110_v20  ;;  %v1107_v20 = vld [vmem:[%s1204_s5 + $0xf4] sm:$0xf] }
  0x25   : > { %v1021_v27 = vor.u32 %v1107_v20, %v1018_v21 }
  0x28   : > { %520 = vmatpush.bf16.msra.mxu0 %v1109_v26  ;;  %1125 = vmatpush.bf16.msra.mxu2 %v1109_v26  ;;  %v1104_v26 = vld [vmem:[%s1204_s5 + $0xd4] sm:$0xf0] }
  0x29   : > { %1059 = vmatmul.msk.bf16.gmra.mxu1 %vm457_vm2, %v909_v25  ;;  %1068 = vmatmul.msk.bf16.gmra.mxu3 %vm457_vm2, %v981_v31  ;;  %v1000_v25 = vld [vmem:[%s1204_s5 + $0xd0] sm:$0xf]  ;;  %v954_v31 = vld [vmem:[%s1204_s5 + $0x78] sm:$0xf0] }
  0x2a   : > { %v1001_v29 = vor.u32 %v1104_v26, %v1000_v25 }
  0x2b   : > { %521 = vmatmul.bf16.vlgmr.msra.gmra.mxu0 %v897_v32  ;;  %561 = vmatmul.bf16.vlgmr.msra.gmra.mxu2 %v961_v33  ;;  %v957_v32 = vor.u32 %v1091_v30, %v954_v31  ;;  %v944_v33 = vld [vmem:[%s1204_s5 + $0x60] sm:$0xf] }
  0x2c   : > { %v945_v37 = vor.u32 %v1090_v34, %v944_v33 }
  0x39   : > { %1060 = vmatmul.msk.bf16.gmra.mxu1 %vm457_vm2, %v917_v38  ;;  %1069 = vmatmul.msk.bf16.gmra.mxu3 %vm457_vm2, %v989_v43  ;;  %v1009_v38 = vor.u32 %v1106_v36, %v1008_v35  ;;  %v1092_v43 = vld [vmem:[%s1204_s5 + $0x74] sm:$0xf0] }
  0x3a   : > { %v953_v47 = vor.u32 %v1092_v43, %v952_v42 }
  0x3b   : > { %526 = vmatmul.bf16.gmra.mxu0 %v905_v44  ;;  %566 = vmatmul.bf16.gmra.mxu2 %v969_v45  ;;  %v1016_v45 = vld [vmem:[%s1204_s5 + $0xf0] sm:$0xf] }
  0x3c   : > { %v1017_v48 = vor.u32 %v1108_v46, %v1016_v45 }
  0x49   : > { %1061 = vmatmul.msk.bf16.gmra.mxu1 %vm457_vm2, %v925_v50  ;;  %1070 = vmatmul.msk.bf16.gmra.mxu3 %vm457_vm2, %v997_v55  ;;  %v1309_v55 = vld [vmem:[%s1458_s3] ss:$0 sm:$0xff] }
  0x4b   : > { %531 = vmatmul.bf16.gmra.mxu0 %v913_v56  ;;  %571 = vmatmul.bf16.gmra.mxu2 %v977_v57 }
  0x59   : > { %1062 = vmatmul.msk.bf16.gmra.mxu1 %vm457_vm2, %v933_v62  ;;  %1071 = vmatmul.msk.bf16.gmra.mxu3 %vm457_vm2, %v1005_v3 }
  0x5b   : > { %536 = vmatmul.bf16.gmra.mxu0 %v921_v4  ;;  %576 = vmatmul.bf16.gmra.mxu2 %v985_v5 }
  0x69   : > { %1063 = vmatmul.msk.bf16.gmra.mxu1 %vm457_vm2, %v941_v10  ;;  %1072 = vmatmul.msk.bf16.gmra.mxu3 %vm457_vm2, %v1013_v15 }
  0x6b   : > { %541 = vmatmul.bf16.gmra.mxu0 %v929_v16  ;;  %581 = vmatmul.bf16.gmra.mxu2 %v993_v17 }
  0x79   : > { %1064 = vmatmul.msk.bf16.gmra.mxu1 %vm457_vm2, %v949_v22  ;;  %1073 = vmatmul.msk.bf16.gmra.mxu3 %vm457_vm2, %v1021_v27 }
  0x7b   : > { %546 = vmatmul.bf16.gmra.mxu0 %v937_v28  ;;  %586 = vmatmul.bf16.gmra.mxu2 %v1001_v29 }
  0x89   : > { %1065 = vmatmul.msk.bf16.gmra.mxu1 %vm457_vm2, %v957_v32 }
  0x8b   : > { %551 = vmatmul.bf16.gmra.mxu0 %v945_v37  ;;  %591 = vmatmul.bf16.gmra.mxu2 %v1009_v38 }
  0x96   : > { %v611_v44 = vpop.f32.mrf.mxu1 }
  0x99   : > { %1066 = vmatmul.msk.bf16.gmra.mxu1 %vm457_vm2, %v965_v41 }
  0x9b   : > { %556 = vmatmul.bf16.gmra.mxu0 %v953_v47  ;;  %596 = vmatmul.bf16.gmra.mxu2 %v1017_v48 }
  0x9c   : > { %v656_v51 = vpop.f32.mrf.mxu3 }
  0x9e   : > { %v613_v49 = vpop.f32.mrf.mxu1 }
  0xa4   : > { %v658_v61 = vpop.f32.mrf.mxu3 }
  0xa6   : > { %v616_v50 = vpop.f32.mrf.mxu1 }
  0xa8   : > { %v522_v53 = vpop.f32.mrf.mxu0 }
  0xa9   : > { %v612_v54 = vadd.f32 %v611_v44, %v522_v53 }
  0xab   : > { %v695_v56 = vmul.f32 %v1304_v52, %v612_v54 }
  0xac   : > { %v661_v7 = vpop.f32.mrf.mxu3 }
  0xad   : > { %v731_v57 = vadd.f32 %v1309_v55, %v695_v56 }
  0xae   : > { %v618_v58 = vpop.f32.mrf.mxu1  ;;  %v1320_v60 = vpop.f32.mrf.mxu2 }
  0xaf   : > { %v763_v59 = vmax.f32 %v731_v57, 0.0 }
  0xb0   : > { %v524_v62 = vpop.f32.mrf.mxu0 }
  0xb1   : > { %796 = vst.msk [vmem:[%s1318_s24] sm:$0xff] %vm795_vm3, %v763_v59  ;;  %v614_v63 = vadd.f32 %v613_v49, %v524_v62 }
  0xb3   : > { %v696_v0 = vmul.f32 %v1304_v52, %v614_v63 }
  0xb4   : > { %v663_v18 = vpop.f32.mrf.mxu3 }
  0xb5   : > { %v732_v1 = vadd.f32 %v1309_v55, %v696_v0 }
  0xb6   : > { %v621_v2 = vpop.f32.mrf.mxu1  ;;  %v1326_v4 = vpop.f32.mrf.mxu2 }
  0xb7   : > { %v764_v3 = vmax.f32 %v732_v1, 0.0 }
  0xb8   : > { %v527_v5 = vpop.f32.mrf.mxu0 }
  0xb9   : > { %797 = vst.msk [vmem:[%s1318_s24 + $0x8] sm:$0xff] %vm795_vm3, %v764_v3  ;;  %v617_v6 = vadd.f32 %v616_v50, %v527_v5 }
  0xbb   : > { %v697_v8 = vmul.f32 %v1304_v52, %v617_v6 }
  0xbc   : > { %v666_v33 = vpop.f32.mrf.mxu3 }
  0xbd   : > { %v733_v9 = vadd.f32 %v1309_v55, %v697_v8 }
  0xbe   : > { %v623_v10 = vpop.f32.mrf.mxu1  ;;  %v567_v12 = vpop.f32.mrf.mxu2 }
  0xbf   : > { %v765_v11 = vmax.f32 %v733_v9, 0.0  ;;  %v657_v13 = vadd.f32 %v656_v51, %v567_v12 }
  0xc0   : > { %v529_v14 = vpop.f32.mrf.mxu0 }
  0xc1   : > { %798 = vst.msk [vmem:[%s1318_s24 + $0x10] sm:$0xff] %vm795_vm3, %v765_v11  ;;  %v619_v15 = vadd.f32 %v618_v58, %v529_v14  ;;  %v713_v16 = vmul.f32 %v1304_v52, %v657_v13 }
  0xc3   : > { %v698_v17 = vmul.f32 %v1304_v52, %v619_v15  ;;  %v749_v19 = vadd.f32 %v1309_v55, %v713_v16 }
  0xc4   : > { %v668_v48 = vpop.f32.mrf.mxu3 }
  0xc5   : > { %v734_v20 = vadd.f32 %v1309_v55, %v698_v17  ;;  %v781_v22 = vmax.f32 %v749_v19, 0.0 }
  0xc6   : > { %v626_v21 = vpop.f32.mrf.mxu1  ;;  %v569_v24 = vpop.f32.mrf.mxu2 }
  0xc7   : > { %v766_v23 = vmax.f32 %v734_v20, 0.0  ;;  %814 = vst.msk [vmem:[%s1318_s24 + $0x90] sm:$0xff] %vm795_vm3, %v781_v22  ;;  %v659_v25 = vadd.f32 %v658_v61, %v569_v24 }
  0xc8   : > { %v532_v26 = vpop.f32.mrf.mxu0 }
  0xc9   : > { %799 = vst.msk [vmem:[%s1318_s24 + $0x18] sm:$0xff] %vm795_vm3, %v766_v23  ;;  %v622_v27 = vadd.f32 %v621_v2, %v532_v26  ;;  %v714_v28 = vmul.f32 %v1304_v52, %v659_v25 }
  0xcb   : > { %v699_v29 = vmul.f32 %v1304_v52, %v622_v27  ;;  %v750_v30 = vadd.f32 %v1309_v55, %v714_v28 }
  0xcc   : > { %v671_v2 = vpop.f32.mrf.mxu3 }
  0xcd   : > { %v735_v31 = vadd.f32 %v1309_v55, %v699_v29  ;;  %v782_v34 = vmax.f32 %v750_v30, 0.0 }
  0xce   : > { %v628_v32 = vpop.f32.mrf.mxu1  ;;  %v572_v36 = vpop.f32.mrf.mxu2 }
  0xcf   : > { %v767_v35 = vmax.f32 %v735_v31, 0.0  ;;  %815 = vst.msk [vmem:[%s1318_s24 + $0x98] sm:$0xff] %vm795_vm3, %v782_v34  ;;  %v662_v37 = vadd.f32 %v661_v7, %v572_v36 }
  0xd0   : > { %v534_v38 = vpop.f32.mrf.mxu0 }
  0xd1   : > { %800 = vst.msk [vmem:[%s1318_s24 + $0x20] sm:$0xff] %vm795_vm3, %v767_v35  ;;  %v624_v39 = vadd.f32 %v623_v10, %v534_v38  ;;  %v715_v40 = vmul.f32 %v1304_v52, %v662_v37 }
  0xd3   : > { %v700_v41 = vmul.f32 %v1304_v52, %v624_v39  ;;  %v751_v42 = vadd.f32 %v1309_v55, %v715_v40 }
  0xd4   : > { %v673_v17 = vpop.f32.mrf.mxu3 }
  0xd5   : > { %v736_v43 = vadd.f32 %v1309_v55, %v700_v41  ;;  %v783_v45 = vmax.f32 %v751_v42, 0.0 }
  0xd6   : > { %v631_v44 = vpop.f32.mrf.mxu1  ;;  %v574_v47 = vpop.f32.mrf.mxu2 }
  0xd7   : > { %v768_v46 = vmax.f32 %v736_v43, 0.0  ;;  %816 = vst.msk [vmem:[%s1318_s24 + $0xa0] sm:$0xff] %vm795_vm3, %v783_v45  ;;  %v664_v49 = vadd.f32 %v663_v18, %v574_v47 }
  0xd8   : > { %v537_v50 = vpop.f32.mrf.mxu0 }
  0xd9   : > { %801 = vst.msk [vmem:[%s1318_s24 + $0x28] sm:$0xff] %vm795_vm3, %v768_v46  ;;  %v627_v51 = vadd.f32 %v626_v21, %v537_v50  ;;  %v716_v53 = vmul.f32 %v1304_v52, %v664_v49 }
  0xdb   : > { %v701_v54 = vmul.f32 %v1304_v52, %v627_v51  ;;  %v752_v56 = vadd.f32 %v1309_v55, %v716_v53 }
  0xdd   : > { %v737_v57 = vadd.f32 %v1309_v55, %v701_v54  ;;  %v784_v59 = vmax.f32 %v752_v56, 0.0 }
  0xde   : > { %v633_v58 = vpop.f32.mrf.mxu1  ;;  %v577_v62 = vpop.f32.mrf.mxu2 }
  0xdf   : > { %v769_v61 = vmax.f32 %v737_v57, 0.0  ;;  %817 = vst.msk [vmem:[%s1318_s24 + $0xa8] sm:$0xff] %vm795_vm3, %v784_v59  ;;  %v667_v63 = vadd.f32 %v666_v33, %v577_v62 }
  0xe0   : > { %v539_v0 = vpop.f32.mrf.mxu0 }
  0xe1   : > { %802 = vst.msk [vmem:[%s1318_s24 + $0x30] sm:$0xff] %vm795_vm3, %v769_v61  ;;  %v629_v1 = vadd.f32 %v628_v32, %v539_v0  ;;  %v717_v3 = vmul.f32 %v1304_v52, %v667_v63  ;;  %v676_v32 = vpop.f32.mrf.mxu3 }
  0xe3   : > { %v702_v5 = vmul.f32 %v1304_v52, %v629_v1  ;;  %v753_v6 = vadd.f32 %v1309_v55, %v717_v3 }
  0xe5   : > { %v738_v7 = vadd.f32 %v1309_v55, %v702_v5  ;;  %v785_v9 = vmax.f32 %v753_v6, 0.0 }
  0xe6   : > { %v636_v8 = vpop.f32.mrf.mxu1  ;;  %v579_v11 = vpop.f32.mrf.mxu2 }
  0xe7   : > { %v770_v10 = vmax.f32 %v738_v7, 0.0  ;;  %818 = vst.msk [vmem:[%s1318_s24 + $0xb0] sm:$0xff] %vm795_vm3, %v785_v9  ;;  %v669_v12 = vadd.f32 %v668_v48, %v579_v11 }
  0xe8   : > { %v542_v13 = vpop.f32.mrf.mxu0 }
  0xe9   : > { %803 = vst.msk [vmem:[%s1318_s24 + $0x38] sm:$0xff] %vm795_vm3, %v770_v10  ;;  %v632_v14 = vadd.f32 %v631_v44, %v542_v13  ;;  %v718_v15 = vmul.f32 %v1304_v52, %v669_v12  ;;  %v678_v47 = vpop.f32.mrf.mxu3 }
  0xeb   : > { %v703_v16 = vmul.f32 %v1304_v52, %v632_v14  ;;  %v754_v18 = vadd.f32 %v1309_v55, %v718_v15 }
  0xed   : > { %v739_v19 = vadd.f32 %v1309_v55, %v703_v16  ;;  %v786_v21 = vmax.f32 %v754_v18, 0.0 }
  0xee   : > { %v638_v20 = vpop.f32.mrf.mxu1  ;;  %v582_v23 = vpop.f32.mrf.mxu2 }
  0xef   : > { %v771_v22 = vmax.f32 %v739_v19, 0.0  ;;  %819 = vst.msk [vmem:[%s1318_s24 + $0xb8] sm:$0xff] %vm795_vm3, %v786_v21  ;;  %v672_v24 = vadd.f32 %v671_v2, %v582_v23 }
  0xf0   : > { %v544_v25 = vpop.f32.mrf.mxu0 }
  0xf1   : > { %804 = vst.msk [vmem:[%s1318_s24 + $0x40] sm:$0xff] %vm795_vm3, %v771_v22  ;;  %v634_v26 = vadd.f32 %v633_v58, %v544_v25  ;;  %v719_v27 = vmul.f32 %v1304_v52, %v672_v24  ;;  %v681_v0 = vpop.f32.mrf.mxu3 }
  0xf3   : > { %v704_v28 = vmul.f32 %v1304_v52, %v634_v26  ;;  %v755_v29 = vadd.f32 %v1309_v55, %v719_v27 }
  0xf5   : > { %v740_v30 = vadd.f32 %v1309_v55, %v704_v28  ;;  %v787_v33 = vmax.f32 %v755_v29, 0.0 }
  0xf6   : > { %v641_v31 = vpop.f32.mrf.mxu1  ;;  %v584_v35 = vpop.f32.mrf.mxu2 }
  0xf7   : > { %v772_v34 = vmax.f32 %v740_v30, 0.0  ;;  %820 = vst.msk [vmem:[%s1318_s24 + $0xc0] sm:$0xff] %vm795_vm3, %v787_v33  ;;  %v674_v36 = vadd.f32 %v673_v17, %v584_v35 }
  0xf8   : > { %v547_v37 = vpop.f32.mrf.mxu0 }
  0xf9   : > { %805 = vst.msk [vmem:[%s1318_s24 + $0x48] sm:$0xff] %vm795_vm3, %v772_v34  ;;  %v637_v38 = vadd.f32 %v636_v8, %v547_v37  ;;  %v720_v39 = vmul.f32 %v1304_v52, %v674_v36  ;;  %v683_v15 = vpop.f32.mrf.mxu3 }
  0xfb   : > { %v705_v40 = vmul.f32 %v1304_v52, %v637_v38  ;;  %v756_v41 = vadd.f32 %v1309_v55, %v720_v39 }
  0xfd   : > { %v741_v42 = vadd.f32 %v1309_v55, %v705_v40  ;;  %v788_v44 = vmax.f32 %v756_v41, 0.0 }
  0xfe   : > { %v643_v43 = vpop.f32.mrf.mxu1  ;;  %v587_v46 = vpop.f32.mrf.mxu2 }
  0xff   : > { %v773_v45 = vmax.f32 %v741_v42, 0.0  ;;  %821 = vst.msk [vmem:[%s1318_s24 + $0xc8] sm:$0xff] %vm795_vm3, %v788_v44  ;;  %v677_v48 = vadd.f32 %v676_v32, %v587_v46 }
 0x100   : > { %v549_v49 = vpop.f32.mrf.mxu0 }
 0x101   : > { %806 = vst.msk [vmem:[%s1318_s24 + $0x50] sm:$0xff] %vm795_vm3, %v773_v45  ;;  %v639_v50 = vadd.f32 %v638_v20, %v549_v49  ;;  %v721_v51 = vmul.f32 %v1304_v52, %v677_v48  ;;  %v686_v32 = vpop.f32.mrf.mxu3 }
 0x103   : > { %v706_v53 = vmul.f32 %v1304_v52, %v639_v50  ;;  %v757_v54 = vadd.f32 %v1309_v55, %v721_v51 }
 0x105   : > { %v742_v56 = vadd.f32 %v1309_v55, %v706_v53  ;;  %v789_v58 = vmax.f32 %v757_v54, 0.0 }
 0x106   : > { %v646_v57 = vpop.f32.mrf.mxu1  ;;  %v589_v61 = vpop.f32.mrf.mxu2 }
 0x107   : > { %v774_v59 = vmax.f32 %v742_v56, 0.0  ;;  %822 = vst.msk [vmem:[%s1318_s24 + $0xd0] sm:$0xff] %vm795_vm3, %v789_v58  ;;  %v679_v62 = vadd.f32 %v678_v47, %v589_v61 }
 0x108   : > { %v552_v63 = vpop.f32.mrf.mxu0 }
 0x109   : > { %807 = vst.msk [vmem:[%s1318_s24 + $0x58] sm:$0xff] %vm795_vm3, %v774_v59  ;;  %v642_v1 = vadd.f32 %v641_v31, %v552_v63  ;;  %v722_v2 = vmul.f32 %v1304_v52, %v679_v62  ;;  %v688_v49 = vpop.f32.mrf.mxu3 }
 0x10b   : > { %v707_v3 = vmul.f32 %v1304_v52, %v642_v1  ;;  %v758_v5 = vadd.f32 %v1309_v55, %v722_v2 }
 0x10d   : > { %v743_v6 = vadd.f32 %v1309_v55, %v707_v3  ;;  %v790_v8 = vmax.f32 %v758_v5, 0.0 }
 0x10e   : > { %v648_v7 = vpop.f32.mrf.mxu1  ;;  %v592_v10 = vpop.f32.mrf.mxu2 }
 0x10f   : > { %v775_v9 = vmax.f32 %v743_v6, 0.0  ;;  %823 = vst.msk [vmem:[%s1318_s24 + $0xd8] sm:$0xff] %vm795_vm3, %v790_v8  ;;  %v682_v11 = vadd.f32 %v681_v0, %v592_v10 }
 0x110   : > { %v554_v12 = vpop.f32.mrf.mxu0 }
 0x111   : > { %808 = vst.msk [vmem:[%s1318_s24 + $0x60] sm:$0xff] %vm795_vm3, %v775_v9  ;;  %v644_v13 = vadd.f32 %v643_v43, %v554_v12  ;;  %v723_v14 = vmul.f32 %v1304_v52, %v682_v11 }
 0x113   : > { %v708_v16 = vmul.f32 %v1304_v52, %v644_v13  ;;  %v759_v17 = vadd.f32 %v1309_v55, %v723_v14 }
 0x115   : > { %v744_v18 = vadd.f32 %v1309_v55, %v708_v16  ;;  %v791_v20 = vmax.f32 %v759_v17, 0.0 }
 0x116   : > { %v651_v19 = vpop.f32.mrf.mxu1  ;;  %v594_v23 = vpop.f32.mrf.mxu2 }
 0x117   : > { %v652_v21 = vadd.f32 %v651_v19, %v1320_v60  ;;  %v776_v22 = vmax.f32 %v744_v18, 0.0  ;;  %824 = vst.msk [vmem:[%s1318_s24 + $0xe0] sm:$0xff] %vm795_vm3, %v791_v20  ;;  %v684_v25 = vadd.f32 %v683_v15, %v594_v23 }
 0x118   : > { %v557_v26 = vpop.f32.mrf.mxu0 }
 0x119   : > { %v711_v24 = vmul.f32 %v1304_v52, %v652_v21  ;;  %809 = vst.msk [vmem:[%s1318_s24 + $0x68] sm:$0xff] %vm795_vm3, %v776_v22  ;;  %v647_v27 = vadd.f32 %v646_v57, %v557_v26  ;;  %v724_v29 = vmul.f32 %v1304_v52, %v684_v25 }
 0x11b   : > { %v747_v28 = vadd.f32 %v1309_v55, %v711_v24  ;;  %v709_v60 = vmul.f32 %v1304_v52, %v647_v27  ;;  %v760_v31 = vadd.f32 %v1309_v55, %v724_v29 }
 0x11d   : > { %v779_v30 = vmax.f32 %v747_v28, 0.0  ;;  %v745_v33 = vadd.f32 %v1309_v55, %v709_v60  ;;  %v792_v35 = vmax.f32 %v760_v31, 0.0 }
 0x11e   : > { %v653_v34 = vpop.f32.mrf.mxu1  ;;  %v597_v38 = vpop.f32.mrf.mxu2 }
 0x11f   : > { %812 = vst.msk [vmem:[%s1318_s24 + $0x80] sm:$0xff] %vm795_vm3, %v779_v30  ;;  %v654_v36 = vadd.f32 %v653_v34, %v1326_v4  ;;  %v777_v37 = vmax.f32 %v745_v33, 0.0  ;;  %v687_v40 = vadd.f32 %v686_v32, %v597_v38 }
 0x120   : > { %825 = vst.msk [vmem:[%s1318_s24 + $0xe8] sm:$0xff] %vm795_vm3, %v792_v35  ;;  %v559_v41 = vpop.f32.mrf.mxu0 }
 0x121   : > { %v712_v39 = vmul.f32 %v1304_v52, %v654_v36  ;;  %810 = vst.msk [vmem:[%s1318_s24 + $0x70] sm:$0xff] %vm795_vm3, %v777_v37  ;;  %v649_v42 = vadd.f32 %v648_v7, %v559_v41  ;;  %v725_v44 = vmul.f32 %v1304_v52, %v687_v40 }
 0x123   : > { %v748_v43 = vadd.f32 %v1309_v55, %v712_v39  ;;  %v710_v4 = vmul.f32 %v1304_v52, %v649_v42  ;;  %v761_v46 = vadd.f32 %v1309_v55, %v725_v44 }
 0x125   : > { %v780_v45 = vmax.f32 %v748_v43, 0.0  ;;  %v746_v47 = vadd.f32 %v1309_v55, %v710_v4  ;;  %v793_v48 = vmax.f32 %v761_v46, 0.0 }
 0x126   : > { %v599_v51 = vpop.f32.mrf.mxu2 }
 0x127   : > { %813 = vst.msk [vmem:[%s1318_s24 + $0x88] sm:$0xff] %vm795_vm3, %v780_v45  ;;  %v778_v50 = vmax.f32 %v746_v47, 0.0  ;;  %v689_v53 = vadd.f32 %v688_v49, %v599_v51 }
 0x128   : > { %826 = vst.msk [vmem:[%s1318_s24 + $0xf0] sm:$0xff] %vm795_vm3, %v793_v48 }
 0x129   : > { %811 = vst.msk [vmem:[%s1318_s24 + $0x78] sm:$0xff] %vm795_vm3, %v778_v50  ;;  %v726_v54 = vmul.f32 %v1304_v52, %v689_v53 }
 0x12b   : > { %v762_v56 = vadd.f32 %v1309_v55, %v726_v54 }
 0x12d   : > { %v794_v57 = vmax.f32 %v762_v56, 0.0 }
 0x12f   : > { %827 = vst.msk [vmem:[%s1318_s24 + $0xf8] sm:$0xff] %vm795_vm3, %v794_v57 }
 0x130 PF: > { %s14_s15 = sadd.s32 1, %s1145_s15  }
 0x131   : > { %p11_p4 = scmp.ge.s32.totalorder %s14_s15, 4  }
 0x133   :  { %13 = sbr.rel (!%p11_p4) target bundleno = 1 (0x1), region = 66 }

// kernel: backbone_forward.11
= control target key start
LH: loop header
LB: loop body
LE: loop exit
PB: predicated region body
PF: predicated region fallthrough
CT: control target
= control target key end

     0   :  { %s441_s15 = smov 0   ;;  %s489_s0 = inlined_call_operand.vmem [shape: f32[2,8,8,32], index: 0, kind: input, shape index: {}]   ;;  %s490_s1 = inlined_call_operand.vmem [shape: f32[1,32], index: 1, kind: input, shape index: {}]   ;;  %s491_s2 = inlined_call_operand.vmem [shape: f32[1,32], index: 2, kind: input, shape index: {}]   ;;  %s492_s3 = inlined_call_operand.vmem [shape: bf16[32,16], index: 3, kind: input, shape index: {}]   ;;  %s493_s4 = inlined_call_operand.vmem [shape: f32[2,8,8,16], index: 4, kind: output, shape index: {}]  }
   0x1 LB: > { %s365_s16 = sadd.s32 4294967295, %s414_s15   ;;  %p369_p0 = scmp.ge.s32.totalorder %s414_s15, 1  ;;  %s414_s15 = sphi %s441_s15, %s14_s15  }
   0x2   : > { %p162_p1 = scmp.lt.s32.totalorder %s414_s15, 3 }
   0x4   : > { %p163_p2 = pnand %p369_p0, %p162_p1 }
   0x5   : > { %p188_p3 = scmp.lt.s32.totalorder (!%p163_p2), %s365_s16, 1 }
   0x6   : > { %166 = sbr.rel (%p163_p2) target bundleno = 168 (0xa8), region = 36 }
   0xb   : > { %v391_v0 = vld [vmem:[%s492_s3 + $0x8] sm:$0xff]  ;;  %v390_v1 = vld [vmem:[%s492_s3] sm:$0xff]  ;;  %s495_s16 = smov (!%p188_p3, %s365_s16), 1  ;;  %vm259_vm0 = vcmask 261120   ;;  %vm301_vm1 = vcmask 130048  }
   0xc   : > { %278 = vmatpush.bf16.msra.mxu0 %v391_v0  ;;  %392 = vmatpush.bf16.msra.mxu1 %v391_v0  ;;  %v406_v2 = vld [vmem:[%s490_s1] ss:$0 sm:$0xff]  ;;  %s388_s23 = sshll.u32 %s495_s16, 6 }
   0xd   : > { %393 = vmatpush.bf16.msra.mxu2 %v391_v0  ;;  %394 = vmatpush.bf16.msra.mxu3 %v391_v0  ;;  %s192_s26 = scalar_lea.vmem %s489_s0, %s388_s23  ;;  %v407_v3 = vld [vmem:[%s491_s2] ss:$0 sm:$0xff]  ;;  %s197_s5 = scalar_lea.vmem %s493_s4, %s388_s23 }
   0xe   : > { %v199_v4 = vld [vmem:[%s192_s26] sm:$0xff]  ;;  %v200_v5 = vld [vmem:[%s192_s26 + $0x8] sm:$0xff]  ;;  %v201_v6 = vld [vmem:[%s192_s26 + $0x10] sm:$0xff] }
   0xf   : > { %v211_v7 = vmul.f32 %v406_v2, %v199_v4  ;;  %v212_v8 = vmul.f32 %v406_v2, %v200_v5  ;;  %v202_v9 = vld [vmem:[%s192_s26 + $0x18] sm:$0xff]  ;;  %v213_v10 = vmul.f32 %v406_v2, %v201_v6  ;;  %v203_v11 = vld [vmem:[%s192_s26 + $0x20] sm:$0xff]  ;;  %v204_v12 = vld [vmem:[%s192_s26 + $0x28] sm:$0xff] }
  0x10   : > { %279 = vmatpush.bf16.msra.mxu0 %v390_v1  ;;  %395 = vmatpush.bf16.msra.mxu1 %v390_v1  ;;  %v214_v13 = vmul.f32 %v406_v2, %v202_v9  ;;  %v215_v14 = vmul.f32 %v406_v2, %v203_v11  ;;  %v216_v15 = vmul.f32 %v406_v2, %v204_v12  ;;  %v205_v16 = vld [vmem:[%s192_s26 + $0x30] sm:$0xff]  ;;  %v206_v17 = vld [vmem:[%s192_s26 + $0x38] sm:$0xff] }
  0x11   : > { %396 = vmatpush.bf16.msra.mxu2 %v390_v1  ;;  %397 = vmatpush.bf16.msra.mxu3 %v390_v1  ;;  %v223_v18 = vadd.f32 %v407_v3, %v211_v7  ;;  %v224_v19 = vadd.f32 %v407_v3, %v212_v8  ;;  %v225_v20 = vadd.f32 %v407_v3, %v213_v10 }
  0x12   : > { %v217_v21 = vmul.f32 %v406_v2, %v205_v16  ;;  %v226_v22 = vadd.f32 %v407_v3, %v214_v13  ;;  %v227_v23 = vadd.f32 %v407_v3, %v215_v14  ;;  %v228_v24 = vadd.f32 %v407_v3, %v216_v15 }
  0x13   : > { %v218_v25 = vmul.f32 %v406_v2, %v206_v17  ;;  %v231_v26 = vmax.f32 %v223_v18, 0.0  ;;  %v232_v27 = vmax.f32 %v224_v19, 0.0  ;;  %v233_v28 = vmax.f32 %v225_v20, 0.0 }
  0x14   : > { %v229_v29 = vadd.f32 %v407_v3, %v217_v21  ;;  %v234_v30 = vmax.f32 %v226_v22, 0.0  ;;  %v235_v31 = vmax.f32 %v227_v23, 0.0  ;;  %v236_v32 = vmax.f32 %v228_v24, 0.0 }
  0x15   : > { %v230_v33 = vadd.f32 %v407_v3, %v218_v25  ;;  %v239_v34 = vpack.c.bf16 %v232_v27, %v231_v26 }
  0x16   : > { %v237_v35 = vmax.f32 %v229_v29, 0.0  ;;  %v240_v36 = vpack.c.bf16 %v234_v30, %v233_v28  ;;  %v241_v37 = vpack.c.bf16 %v236_v32, %v235_v31 }
  0x17   : > { %v238_v38 = vmax.f32 %v230_v33, 0.0  ;;  %382 = vmatmul.msk.bf16.vlgmr.msra.gmra.mxu0 %vm259_vm0, %v239_v34 }
  0x18   : > { %383 = vmatmul.msk.bf16.vlgmr.msra.gmra.mxu1 %vm259_vm0, %v240_v36  ;;  %384 = vmatmul.msk.bf16.vlgmr.msra.gmra.mxu2 %vm259_vm0, %v241_v37 }
  0x19   : > { %v242_v39 = vpack.c.bf16 %v238_v38, %v237_v35 }
  0x1b   : > { %385 = vmatmul.msk.bf16.vlgmr.msra.gmra.mxu3 %vm259_vm0, %v242_v39 }
  0x94   : > { %v281_v40 = vpop.f32.mrf.mxu0 }
  0x95   : > { %302 = vst.msk [vmem:[%s197_s5] sm:$0xff] %vm301_vm1, %v281_v40  ;;  %v286_v41 = vpop.f32.mrf.mxu1 }
  0x96   : > { %304 = vst.msk [vmem:[%s197_s5 + $0x10] sm:$0xff] %vm301_vm1, %v286_v41 }
  0x9b   : > { %v291_v42 = vpop.f32.mrf.mxu2 }
  0x9c   : > { %306 = vst.msk [vmem:[%s197_s5 + $0x20] sm:$0xff] %vm301_vm1, %v291_v42  ;;  %v283_v43 = vpop.f32.mrf.mxu0 }
  0x9d   : > { %303 = vst.msk [vmem:[%s197_s5 + $0x8] sm:$0xff] %vm301_vm1, %v283_v43  ;;  %v288_v45 = vpop.f32.mrf.mxu1 }
  0x9e   : > { %v296_v44 = vpop.f32.mrf.mxu3  ;;  %305 = vst.msk [vmem:[%s197_s5 + $0x18] sm:$0xff] %vm301_vm1, %v288_v45 }
  0x9f   : > { %308 = vst.msk [vmem:[%s197_s5 + $0x30] sm:$0xff] %vm301_vm1, %v296_v44 }
  0xa3   : > { %v293_v46 = vpop.f32.mrf.mxu2 }
  0xa4   : > { %307 = vst.msk [vmem:[%s197_s5 + $0x28] sm:$0xff] %vm301_vm1, %v293_v46 }
  0xa6   : > { %v298_v47 = vpop.f32.mrf.mxu3 }
  0xa7   : > { %309 = vst.msk [vmem:[%s197_s5 + $0x38] sm:$0xff] %vm301_vm1, %v298_v47 }
  0xa8 PF: > { %s14_s15 = sadd.s32 1, %s414_s15  }
  0xa9   : > { %p11_p4 = scmp.ge.s32.totalorder %s14_s15, 4  }
  0xab   :  { %13 = sbr.rel (!%p11_p4) target bundleno = 1 (0x1), region = 66 }

// kernel: backbone_forward.10
= control target key start
LH: loop header
LB: loop body
LE: loop exit
PB: predicated region body
PF: predicated region fallthrough
CT: control target
= control target key end

     0   :  { %s2445_s25 = smov 0   ;;  %s3005_s0 = inlined_call_operand.vmem [shape: f32[2,8,8,16], index: 0, kind: input, shape index: {}]   ;;  %s3006_s1 = inlined_call_operand.vmem [shape: f32[1,16], index: 1, kind: input, shape index: {}]   ;;  %s3007_s2 = inlined_call_operand.vmem [shape: f32[1,16], index: 2, kind: input, shape index: {}]   ;;  %s3008_s3 = inlined_call_operand.vmem [shape: bf16[16,16], index: 3, kind: input, shape index: {}]   ;;  %s3009_s4 = inlined_call_operand.vmem [shape: f32[1,16], index: 4, kind: input, shape index: {}]   ;;  %s3010_s5 = inlined_call_operand.vmem [shape: f32[1,16], index: 5, kind: input, shape index: {}]   ;;  %s3011_s6 = inlined_call_operand.vmem [shape: bf16[9,16,8], index: 6, kind: input, shape index: {}]   ;;  %s3012_s7 = inlined_call_operand.vmem [shape: f32[1,24], index: 7, kind: input, shape index: {}]   ;;  %s3013_s8 = inlined_call_operand.vmem [shape: f32[1,24], index: 8, kind: input, shape index: {}]   ;;  %s3014_s9 = inlined_call_operand.vmem [shape: bf16[24,16], index: 9, kind: input, shape index: {}]   ;;  %s3015_s10 = inlined_call_operand.vmem [shape: f32[1,16], index: 10, kind: input, shape index: {}]   ;;  %s3016_s11 = inlined_call_operand.vmem [shape: f32[1,16], index: 11, kind: input, shape index: {}]   ;;  %s3017_s12 = inlined_call_operand.vmem [shape: bf16[9,16,8], index: 12, kind: input, shape index: {}]   ;;  %s3018_s13 = inlined_call_operand.vmem [shape: f32[2,8,8,32], index: 13, kind: output, shape index: {}]  }
   0x1 LB: > { %s2120_s26 = sadd.s32 4294967295, %s2370_s25   ;;  %p2124_p0 = scmp.ge.s32.totalorder %s2370_s25, 1  ;;  %s2370_s25 = sphi %s2445_s25, %s23_s25  }
   0x2   : > { %p387_p1 = scmp.lt.s32.totalorder %s2370_s25, 3 }
   0x4   : > { %p388_p2 = pnand %p2124_p0, %p387_p1 }
   0x6   : > { %391 = sbr.rel (%p388_p2) target bundleno = 1153 (0x481), region = 72 }
   0xb   : > { %v2325_v0 = vld [vmem:[%s3008_s3] sm:$0xff]  ;;  %p431_p3 = scmp.lt.s32.totalorder %s2120_s26, 1  ;;  %vm442_vm0 = vcmask 130048   ;;  %vm444_vm1 = vcmask 123904   ;;  %v2372_v33 = vmov 0.0   ;;  %v2327_v48 = vld [vmem:[%s3011_s6 + $0x8] sm:$0xff] }
   0xc   : > { %551 = vmatpush.bf16.msra.mxu0 %v2325_v0  ;;  %v2356_v7 = vld [vmem:[%s3006_s1] ss:$0 sm:$0xff]  ;;  %446 = vst.msk [vmem:[#allocation2 + $0x10] sm:$0xff] %vm442_vm0, %v2372_v33  ;;  %v2328_v50 = vld [vmem:[%s3011_s6 + $0x10] sm:$0xff]  ;;  %668 = vmatpush.bf16.msra.mxu1 %v2327_v48  ;;  %v2329_v51 = vld [vmem:[%s3011_s6 + $0x18] sm:$0xff]  ;;  %s2373_s14 = smov 16  }
   0xd   : > { %s3026_s26 = smov (!%p431_p3, %s2120_s26), 1  ;;  %v2357_v8 = vld [vmem:[%s3007_s2] ss:$0 sm:$0xff]  ;;  %447 = vst.msk [vmem:[#allocation2 + $0x18] sm:$0x3] %vm444_vm1, %v2372_v33  ;;  %777 = vmatpush.bf16.msra.mxu3 %v2328_v50  ;;  %vm1338_vm2 = vcmask 1043456  }
   0xe   : > { %s2323_s29 = sshll.u32 %s3026_s26, 6  ;;  %443 = vst.msk [vmem:[#allocation2] sm:$0xff] %vm442_vm0, %v2372_v33  ;;  %v2326_v49 = vld [vmem:[%s3011_s6] sm:$0xff]  ;;  %vm1260_vm3 = vcmask 195712   ;;  %vm1325_vm4 = vcmask 195584   ;;  %vm2056_vm5 = vcmask 261312  }
   0xf   : > { %s435_s15 = scalar_lea.vmem %s3005_s0, %s2323_s29  ;;  %s2462_s18 = scalar_lea.vmem %s3018_s13, %s2323_s29  ;;  %445 = vst.msk [vmem:[#allocation2 + $0x8] sm:$0x3] %vm444_vm1, %v2372_v33  ;;  %715 = vmatpush.bf16.msra.mxu2 %v2326_v49  ;;  %v2330_v52 = vld [vmem:[%s3011_s6 + $0x20] sm:$0xff] }
  0x10   : > { %v464_v1 = vld [vmem:[%s435_s15] sm:$0xff]  ;;  %v465_v2 = vld [vmem:[%s435_s15 + $0x8] sm:$0xff]  ;;  %v466_v3 = vld [vmem:[%s435_s15 + $0x10] sm:$0xff]  ;;  %448 = vst.msk [vmem:[#allocation2 + $0x20] sm:$0xff] %vm442_vm0, %v2372_v33  ;;  %847 = vmatpush.bf16.msrb.mxu0 %v2329_v51  ;;  %917 = vmatpush.bf16.msrb.mxu1 %v2330_v52 }
  0x11   : > { %472 = vst.msk [vmem:[%s2462_s18] sm:$0xff] %vm442_vm0, %v464_v1  ;;  %v467_v4 = vld [vmem:[%s435_s15 + $0x18] sm:$0xff]  ;;  %v468_v5 = vld [vmem:[%s435_s15 + $0x20] sm:$0xff]  ;;  %v469_v6 = vld [vmem:[%s435_s15 + $0x28] sm:$0xff] }
  0x12   : > { %473 = vst.msk [vmem:[%s2462_s18 + $0x8] sm:$0xff] %vm442_vm0, %v465_v2  ;;  %v470_v20 = vld [vmem:[%s435_s15 + $0x30] sm:$0xff]  ;;  %v471_v21 = vld [vmem:[%s435_s15 + $0x38] sm:$0xff]  ;;  %v2536_v53 = vld [vmem:[%s3009_s4] ss:$0 sm:$0xff]  ;;  %s2374_s15 = smov 24  }
  0x13   : > { %474 = vst.msk [vmem:[%s2462_s18 + $0x10] sm:$0xff] %vm442_vm0, %v466_v3  ;;  %v2541_v54 = vld [vmem:[%s3010_s5] ss:$0 sm:$0xff] }
  0x14   : > { %475 = vst.msk [vmem:[%s2462_s18 + $0x18] sm:$0xff] %vm442_vm0, %v467_v4  ;;  %v2334_v49 = vld [vmem:[%s3011_s6 + $0x40] sm:$0xff] }
  0x15   : > { %476 = vst.msk [vmem:[%s2462_s18 + $0x20] sm:$0xff] %vm442_vm0, %v468_v5  ;;  %v2550_v63 = vld [vmem:[#allocation2] sm:$0xff] }
  0x16   : > { %477 = vst.msk [vmem:[%s2462_s18 + $0x28] sm:$0xff] %vm442_vm0, %v469_v6  ;;  %v2548_v62 = vld [vmem:[#allocation2 + $0x1] sm:$0xff] }
  0x17   : > { %478 = vst.msk [vmem:[%s2462_s18 + $0x30] sm:$0xff] %vm442_vm0, %v470_v20  ;;  %v2552_v0 = vld [vmem:[#allocation2 + $0x2] sm:$0xff] }
  0x18   : > { %v480_v9 = vld [vmem:[%s2462_s18] sm:$0xff]  ;;  %479 = vst.msk [vmem:[%s2462_s18 + $0x38] sm:$0xff] %vm442_vm0, %v471_v21 }
  0x19   : > { %v481_v10 = vld [vmem:[%s2462_s18 + $0x8] sm:$0xff]  ;;  %v492_v11 = vmul.f32 %v2356_v7, %v480_v9  ;;  %449 = vst.msk [vmem:[#allocation2 + $0x28] sm:$0x3] %vm444_vm1, %v2372_v33 }
  0x1a   : > { %v493_v12 = vmul.f32 %v2356_v7, %v481_v10  ;;  %v482_v17 = vld [vmem:[%s2462_s18 + $0x10] sm:$0xff]  ;;  %450 = vst.msk [vmem:[#allocation2 + $0x30] sm:$0xff] %vm442_vm0, %v2372_v33 }
  0x1b   : > { %v504_v13 = vadd.f32 %v2357_v8, %v492_v11  ;;  %v483_v18 = vld [vmem:[%s2462_s18 + $0x18] sm:$0xff]  ;;  %v494_v22 = vmul.f32 %v2356_v7, %v482_v17  ;;  %451 = vst.msk [vmem:[#allocation2 + $0x38] sm:$0x3] %vm444_vm1, %v2372_v33 }
  0x1c   : > { %v505_v14 = vadd.f32 %v2357_v8, %v493_v12  ;;  %v495_v23 = vmul.f32 %v2356_v7, %v483_v18  ;;  %v484_v29 = vld [vmem:[%s2462_s18 + $0x20] sm:$0xff]  ;;  %452 = vst.msk [vmem:[#allocation2 + $0x40] sm:$0xff] %vm442_vm0, %v2372_v33 }
  0x1d   : > { %v512_v15 = vmax.f32 %v504_v13, 0.0  ;;  %v506_v24 = vadd.f32 %v2357_v8, %v494_v22  ;;  %v485_v30 = vld [vmem:[%s2462_s18 + $0x28] sm:$0xff]  ;;  %v496_v31 = vmul.f32 %v2356_v7, %v484_v29  ;;  %453 = vst.msk [vmem:[#allocation2 + $0x48] sm:$0x3] %vm444_vm1, %v2372_v33  ;;  %v2332_v29 = vld [vmem:[%s3011_s6 + $0x30] sm:$0xff] }
  0x1e   : > { %v513_v16 = vmax.f32 %v505_v14, 0.0  ;;  %v507_v25 = vadd.f32 %v2357_v8, %v495_v23  ;;  %v497_v32 = vmul.f32 %v2356_v7, %v485_v30  ;;  %454 = vst.msk [vmem:[#allocation2 + $0x50] sm:$0xff] %vm442_vm0, %v2372_v33  ;;  %v486_v39 = vld [vmem:[%s2462_s18 + $0x30] sm:$0xff]  ;;  %1058 = vmatpush.bf16.msrb.mxu3 %v2332_v29 }
  0x1f   : > { %v514_v26 = vmax.f32 %v506_v24, 0.0  ;;  %v508_v34 = vadd.f32 %v2357_v8, %v496_v31  ;;  %455 = vst.msk [vmem:[#allocation2 + $0x58] sm:$0x3] %vm444_vm1, %v2372_v33  ;;  %v487_v40 = vld [vmem:[%s2462_s18 + $0x38] sm:$0xff]  ;;  %v498_v41 = vmul.f32 %v2356_v7, %v486_v39 }
  0x20   : > { %v520_v19 = vpack.c.bf16 %v513_v16, %v512_v15  ;;  %v515_v27 = vmax.f32 %v507_v25, 0.0  ;;  %v509_v35 = vadd.f32 %v2357_v8, %v497_v32  ;;  %456 = vst.msk [vmem:[#allocation2 + $0x60] sm:$0xff] %vm442_vm0, %v2372_v33  ;;  %v499_v42 = vmul.f32 %v2356_v7, %v487_v40 }
  0x21   : > { %v516_v36 = vmax.f32 %v508_v34, 0.0  ;;  %457 = vst.msk [vmem:[#allocation2 + $0x68] sm:$0x3] %vm444_vm1, %v2372_v33  ;;  %v510_v43 = vadd.f32 %v2357_v8, %v498_v41 }
  0x22   : > { %2133 = vmatmul.msk.bf16.vlgmr.msra.gmra.mxu0 %vm442_vm0, %v520_v19  ;;  %v521_v28 = vpack.c.bf16 %v515_v27, %v514_v26  ;;  %v517_v37 = vmax.f32 %v509_v35, 0.0  ;;  %458 = vst.msk [vmem:[#allocation2 + $0x70] sm:$0xff] %vm442_vm0, %v2372_v33  ;;  %v511_v44 = vadd.f32 %v2357_v8, %v499_v42 }
  0x23   : > { %459 = vst.msk [vmem:[#allocation2 + $0x78] sm:$0x3] %vm444_vm1, %v2372_v33  ;;  %v518_v45 = vmax.f32 %v510_v43, 0.0 }
  0x24   : > { %v522_v38 = vpack.c.bf16 %v517_v37, %v516_v36  ;;  %460 = vst.msk [vmem:[#allocation2 + $0x80] sm:$0xff] %vm442_vm0, %v2372_v33  ;;  %v519_v46 = vmax.f32 %v511_v44, 0.0  ;;  %v2333_v36 = vld [vmem:[%s3011_s6 + $0x38] sm:$0xff] }
  0x25   : > { %461 = vst.msk [vmem:[#allocation2 + $0x88] sm:$0x3] %vm444_vm1, %v2372_v33  ;;  %1128 = vmatpush.bf16.msra.mxu0 %v2333_v36 }
  0x26   : > { %462 = vst.msk [vmem:[#allocation2 + $0x90] sm:$0xff] %vm442_vm0, %v2372_v33  ;;  %v523_v47 = vpack.c.bf16 %v519_v46, %v518_v45 }
  0x27   : > { %463 = vst.msk [vmem:[#allocation2 + $0x98] sm:$0x3] %vm444_vm1, %v2372_v33 }
  0x32   : > { %2134 = vmatmul.msk.bf16.gmra.mxu0 %vm442_vm0, %v521_v28  ;;  %v2331_v28 = vld [vmem:[%s3011_s6 + $0x28] sm:$0xff] }
  0x33   : > { %987 = vmatpush.bf16.msrb.mxu2 %v2331_v28 }
  0x42   : > { %2135 = vmatmul.msk.bf16.gmra.mxu0 %vm442_vm0, %v522_v38 }
  0x52   : > { %2136 = vmatmul.msk.bf16.gmra.mxu0 %vm442_vm0, %v523_v47 }
  0x9f   : > { %v553_v55 = vpop.f32.mrf.mxu0 }
  0xa0   : > { %v577_v56 = vmul.f32 %v2536_v53, %v553_v55 }
  0xa2   : > { %v589_v57 = vadd.f32 %v2541_v54, %v577_v56 }
  0xa4   : > { %v597_v58 = vmax.f32 %v589_v57, 0.0 }
  0xa6   : > { %606 = vst.msk [vmem:[#allocation2 + $0x11] sm:$0xff] %vm442_vm0, %v597_v58 }
  0xa7   : > { %v555_v59 = vpop.f32.mrf.mxu0 }
  0xa8   : > { %v578_v60 = vmul.f32 %v2536_v53, %v555_v59 }
  0xaa   : > { %v590_v61 = vadd.f32 %v2541_v54, %v578_v60 }
  0xac   : > { %v598_v1 = vmax.f32 %v590_v61, 0.0 }
  0xad   : > { %v2554_v2 = vld [vmem:[#allocation2 + $0x11] sm:$0xff] }
  0xae   : > { %v615_v3 = vld [vmem:[#allocation2 + $0x10] sm:$0xff]  ;;  %607 = vst.msk [vmem:[#allocation2 + $0x21] sm:$0xff] %vm442_vm0, %v598_v1  ;;  %v636_v5 = vpack.c.bf16 %v2554_v2, %v2548_v62 }
  0xaf   : > { %v2556_v4 = vld [vmem:[#allocation2 + $0x12] sm:$0xff]  ;;  %v622_v6 = vpack.c.bf16 %v615_v3, %v2550_v63  ;;  %v558_v8 = vpop.f32.mrf.mxu0 }
  0xb0   : > { %v745_v7 = vpack.c.bf16 %v2556_v4, %v2552_v0  ;;  %v579_v9 = vmul.f32 %v2536_v53, %v558_v8  ;;  %2143 = vmatmul.msk.bf16.vlgmr.msra.gmra.mxu1 %vm442_vm0, %v636_v5 }
  0xb1   : > { %2151 = vmatmul.msk.bf16.vlgmr.msra.gmra.mxu2 %vm442_vm0, %v622_v6  ;;  %1198 = vmatpush.bf16.msra.mxu1 %v2334_v49 }
  0xb2   : > { %2161 = vmatmul.msk.bf16.vlgmr.msra.gmra.mxu3 %vm442_vm0, %v745_v7  ;;  %v591_v10 = vadd.f32 %v2541_v54, %v579_v9 }
  0xb4   : > { %v599_v11 = vmax.f32 %v591_v10, 0.0 }
  0xb5   : > { %v808_v12 = vld [vmem:[#allocation2 + $0x20] sm:$0xff] }
  0xb6   : > { %608 = vst.msk [vmem:[#allocation2 + $0x31] sm:$0xff] %vm442_vm0, %v599_v11  ;;  %v815_v13 = vpack.c.bf16 %v808_v12, %v615_v3  ;;  %v2573_v18 = vld [vmem:[#allocation2 + $0x21] sm:$0xff] }
  0xb7   : > { %v560_v14 = vpop.f32.mrf.mxu0  ;;  %v2575_v19 = vld [vmem:[#allocation2 + $0x22] sm:$0xff] }
  0xb8   : > { %v580_v15 = vmul.f32 %v2536_v53, %v560_v14  ;;  %2171 = vmatmul.msk.bf16.vlgmr.msrb.gmra.mxu0 %vm442_vm0, %v815_v13  ;;  %v955_v10 = vpack.c.bf16 %v2575_v19, %v2556_v4 }
  0xba   : > { %v592_v16 = vadd.f32 %v2541_v54, %v580_v15  ;;  %v2654_v15 = vld [vmem:[#allocation2 + $0x90] sm:$0xff] }
  0xbc   : > { %v600_v17 = vmax.f32 %v592_v16, 0.0 }
  0xbd   : > { %v2577_v20 = vld [vmem:[#allocation2 + $0x31] sm:$0xff] }
  0xbe   : > { %v617_v21 = vld [vmem:[#allocation2 + $0x30] sm:$0xff]  ;;  %609 = vst.msk [vmem:[#allocation2 + $0x41] sm:$0xff] %vm442_vm0, %v600_v17  ;;  %v2584_v23 = vpack.c.bf16 %v2577_v20, %v2573_v18 }
  0xbf   : > { %v2579_v22 = vld [vmem:[#allocation2 + $0x32] sm:$0xff]  ;;  %v2586_v24 = vpack.c.bf16 %v617_v21, %v808_v12  ;;  %v563_v26 = vpop.f32.mrf.mxu0 }
  0xc0   : > { %v2590_v25 = vpack.c.bf16 %v2579_v22, %v2575_v19  ;;  %v581_v27 = vmul.f32 %v2536_v53, %v563_v26  ;;  %2144 = vmatmul.msk.bf16.gmra.mxu1 %vm442_vm0, %v2584_v23  ;;  %v2660_v19 = vld [vmem:[#allocation2 + $0x91] sm:$0xff] }
  0xc1   : > { %2152 = vmatmul.msk.bf16.gmra.mxu2 %vm442_vm0, %v2586_v24  ;;  %3021 = vst [vmem:[#allocation3_spill] sm:$0xff] %v2660_v19 }
  0xc2   : > { %2162 = vmatmul.msk.bf16.gmra.mxu3 %vm442_vm0, %v2590_v25  ;;  %v593_v30 = vadd.f32 %v2541_v54, %v581_v27 }
  0xc4   : > { %v601_v31 = vmax.f32 %v593_v30, 0.0 }
  0xc5   : > { %v810_v32 = vld [vmem:[#allocation2 + $0x40] sm:$0xff] }
  0xc6   : > { %610 = vst.msk [vmem:[#allocation2 + $0x51] sm:$0xff] %vm442_vm0, %v601_v31  ;;  %v816_v33 = vpack.c.bf16 %v810_v32, %v617_v21  ;;  %v632_v39 = vld [vmem:[#allocation2 + $0x41] sm:$0xff] }
  0xc7   : > { %v565_v34 = vpop.f32.mrf.mxu0  ;;  %v741_v40 = vld [vmem:[#allocation2 + $0x42] sm:$0xff]  ;;  %v886_v11 = vpack.c.bf16 %v632_v39, %v2577_v20 }
  0xc8   : > { %v582_v35 = vmul.f32 %v2536_v53, %v565_v34  ;;  %2172 = vmatmul.msk.bf16.gmra.mxu0 %vm442_vm0, %v816_v33  ;;  %v956_v12 = vpack.c.bf16 %v741_v40, %v2579_v22  ;;  %v2675_v34 = vld [vmem:[#allocation2 + $0x92] sm:$0xff] }
  0xc9   : > { %3022 = vst [vmem:[#allocation4_spill] sm:$0xff] %v2675_v34 }
  0xca   : > { %v594_v37 = vadd.f32 %v2541_v54, %v582_v35 }
  0xcc   : > { %v602_v38 = vmax.f32 %v594_v37, 0.0 }
  0xcd   : > { %v633_v41 = vld [vmem:[#allocation2 + $0x51] sm:$0xff] }
  0xce   : > { %v619_v42 = vld [vmem:[#allocation2 + $0x50] sm:$0xff]  ;;  %611 = vst.msk [vmem:[#allocation2 + $0x61] sm:$0xff] %vm442_vm0, %v602_v38  ;;  %v638_v44 = vpack.c.bf16 %v633_v41, %v632_v39 }
  0xcf   : > { %v742_v43 = vld [vmem:[#allocation2 + $0x52] sm:$0xff]  ;;  %v624_v45 = vpack.c.bf16 %v619_v42, %v810_v32  ;;  %v568_v47 = vpop.f32.mrf.mxu0 }
  0xd0   : > { %v2614_v46 = vpack.c.bf16 %v742_v43, %v741_v40  ;;  %v583_v48 = vmul.f32 %v2536_v53, %v568_v47  ;;  %2145 = vmatmul.msk.bf16.gmra.mxu1 %vm442_vm0, %v638_v44 }
  0xd1   : > { %2153 = vmatmul.msk.bf16.gmra.mxu2 %vm442_vm0, %v624_v45 }
  0xd2   : > { %2163 = vmatmul.msk.bf16.gmra.mxu3 %vm442_vm0, %v2614_v46  ;;  %v595_v50 = vadd.f32 %v2541_v54, %v583_v48 }
  0xd4   : > { %v603_v51 = vmax.f32 %v595_v50, 0.0 }
  0xd5   : > { %v812_v52 = vld [vmem:[#allocation2 + $0x60] sm:$0xff] }
  0xd6   : > { %612 = vst.msk [vmem:[#allocation2 + $0x71] sm:$0xff] %vm442_vm0, %v603_v51  ;;  %v817_v55 = vpack.c.bf16 %v812_v52, %v619_v42  ;;  %v634_v60 = vld [vmem:[#allocation2 + $0x61] sm:$0xff] }
  0xd7   : > { %v570_v56 = vpop.f32.mrf.mxu0  ;;  %v743_v61 = vld [vmem:[#allocation2 + $0x62] sm:$0xff] }
  0xd8   : > { %v584_v57 = vmul.f32 %v2536_v53, %v570_v56  ;;  %2173 = vmatmul.msk.bf16.gmra.mxu0 %vm442_vm0, %v817_v55  ;;  %v957_v4 = vpack.c.bf16 %v743_v61, %v742_v43 }
  0xda   : > { %v596_v58 = vadd.f32 %v2541_v54, %v584_v57  ;;  %v885_v54 = vpack.c.bf16 %v2573_v18, %v2554_v2  ;;  %v887_v2 = vpack.c.bf16 %v634_v60, %v633_v41 }
  0xdc   : > { %v604_v59 = vmax.f32 %v596_v58, 0.0 }
  0xdd   : > { %v635_v1 = vld [vmem:[#allocation2 + $0x71] sm:$0xff] }
  0xde   : > { %v621_v3 = vld [vmem:[#allocation2 + $0x70] sm:$0xff]  ;;  %613 = vst.msk [vmem:[#allocation2 + $0x81] sm:$0xff] %vm442_vm0, %v604_v59  ;;  %v639_v6 = vpack.c.bf16 %v635_v1, %v634_v60 }
  0xdf   : > { %v744_v5 = vld [vmem:[#allocation2 + $0x72] sm:$0xff]  ;;  %v625_v7 = vpack.c.bf16 %v621_v3, %v812_v52 }
  0xe0   : > { %v748_v8 = vpack.c.bf16 %v744_v5, %v743_v61  ;;  %2146 = vmatmul.msk.bf16.gmra.mxu1 %vm442_vm0, %v639_v6 }
  0xe1   : > { %2154 = vmatmul.msk.bf16.gmra.mxu2 %vm442_vm0, %v625_v7 }
  0xe2   : > { %2164 = vmatmul.msk.bf16.gmra.mxu3 %vm442_vm0, %v748_v8 }
  0xe5   : > { %v814_v53 = vld [vmem:[#allocation2 + $0x80] sm:$0xff] }
  0xe6   : > { %v818_v9 = vpack.c.bf16 %v814_v53, %v621_v3  ;;  %v884_v13 = vld [vmem:[#allocation2 + $0x81] sm:$0xff]  ;;  %v1029_v18 = vpack.c.bf16 %v2654_v15, %v814_v53 }
  0xe7   : > { %v954_v14 = vld [vmem:[#allocation2 + $0x82] sm:$0xff]  ;;  %v888_v16 = vpack.c.bf16 %v884_v13, %v635_v1  ;;  %v1099_v20 = vpack.c.bf16 %v2660_v19, %v884_v13 }
  0xe8   : > { %2174 = vmatmul.msk.bf16.gmra.mxu0 %vm442_vm0, %v818_v9  ;;  %v958_v17 = vpack.c.bf16 %v954_v14, %v744_v5  ;;  %v1169_v37 = vpack.c.bf16 %v2675_v34, %v954_v14 }
  0xf0   : > { %2181 = vmatmul.msk.bf16.vlgmr.msrb.gmra.mxu1 %vm442_vm0, %v885_v54 }
  0xf1   : > { %2191 = vmatmul.msk.bf16.vlgmr.msrb.gmra.mxu2 %vm442_vm0, %v955_v10 }
  0xf2   : > { %2201 = vmatmul.msk.bf16.vlgmr.msrb.gmra.mxu3 %vm442_vm0, %v2586_v24 }
  0xf8   : > { %2211 = vmatmul.msk.bf16.vlgmr.msra.gmra.mxu0 %vm442_vm0, %v2584_v23 }
 0x100   : > { %2182 = vmatmul.msk.bf16.gmra.mxu1 %vm442_vm0, %v886_v11 }
 0x101   : > { %2192 = vmatmul.msk.bf16.gmra.mxu2 %vm442_vm0, %v956_v12 }
 0x102   : > { %2202 = vmatmul.msk.bf16.gmra.mxu3 %vm442_vm0, %v624_v45 }
 0x108   : > { %2212 = vmatmul.msk.bf16.gmra.mxu0 %vm442_vm0, %v638_v44 }
 0x110   : > { %2183 = vmatmul.msk.bf16.gmra.mxu1 %vm442_vm0, %v887_v2 }
 0x111   : > { %2193 = vmatmul.msk.bf16.gmra.mxu2 %vm442_vm0, %v957_v4 }
 0x112   : > { %2203 = vmatmul.msk.bf16.gmra.mxu3 %vm442_vm0, %v625_v7 }
 0x118   : > { %2213 = vmatmul.msk.bf16.gmra.mxu0 %vm442_vm0, %v639_v6 }
 0x120   : > { %2184 = vmatmul.msk.bf16.gmra.mxu1 %vm442_vm0, %v888_v16 }
 0x121   : > { %2194 = vmatmul.msk.bf16.gmra.mxu2 %vm442_vm0, %v958_v17 }
 0x122   : > { %2204 = vmatmul.msk.bf16.gmra.mxu3 %vm442_vm0, %v1029_v18 }
 0x128   : > { %2214 = vmatmul.msk.bf16.gmra.mxu0 %vm442_vm0, %v1099_v20 }
 0x12d   : > { %v670_v21 = vpop.f32.mrf.mxu1 }
 0x130   : > { %2221 = vmatmul.msk.bf16.vlgmr.msra.gmra.mxu1 %vm442_vm0, %v2590_v25 }
 0x134   : > { %v717_v24 = vpop.f32.mrf.mxu2 }
 0x135   : > { %v672_v22 = vpop.f32.mrf.mxu1  ;;  %v779_v27 = vpop.f32.mrf.mxu3  ;;  %v718_v5 = vadd.f32 %v717_v24, %v670_v21 }
 0x136   : > { %v849_v28 = vpop.f32.mrf.mxu0 }
 0x137   : > { %v799_v7 = vadd.f32 %v779_v27, %v718_v5 }
 0x139   : > { %v869_v54 = vadd.f32 %v849_v28, %v799_v7 }
 0x13c   : > { %v719_v29 = vpop.f32.mrf.mxu2 }
 0x13d   : > { %v675_v23 = vpop.f32.mrf.mxu1  ;;  %v781_v31 = vpop.f32.mrf.mxu3  ;;  %v720_v10 = vadd.f32 %v719_v29, %v672_v22 }
 0x13e   : > { %v851_v33 = vpop.f32.mrf.mxu0 }
 0x13f   : > { %v800_v2 = vadd.f32 %v781_v31, %v720_v10 }
 0x140   : > { %2222 = vmatmul.msk.bf16.gmra.mxu1 %vm442_vm0, %v2614_v46 }
 0x141   : > { %v870_v17 = vadd.f32 %v851_v33, %v800_v2 }
 0x144   : > { %v722_v25 = vpop.f32.mrf.mxu2 }
 0x145   : > { %v2668_v26 = vpop.f32.mrf.mxu1  ;;  %v784_v35 = vpop.f32.mrf.mxu3  ;;  %v723_v18 = vadd.f32 %v722_v25, %v675_v23 }
 0x146   : > { %v854_v38 = vpop.f32.mrf.mxu0 }
 0x147   : > { %v801_v24 = vadd.f32 %v784_v35, %v723_v18 }
 0x149   : > { %v871_v28 = vadd.f32 %v854_v38, %v801_v24 }
 0x14c   : > { %v724_v39 = vpop.f32.mrf.mxu2 }
 0x14d   : > { %v2670_v30 = vpop.f32.mrf.mxu1  ;;  %v786_v41 = vpop.f32.mrf.mxu3  ;;  %v725_v22 = vadd.f32 %v724_v39, %v2668_v26 }
 0x14e   : > { %v856_v42 = vpop.f32.mrf.mxu0 }
 0x14f   : > { %v802_v33 = vadd.f32 %v786_v41, %v725_v22 }
 0x150   : > { %2223 = vmatmul.msk.bf16.gmra.mxu1 %vm442_vm0, %v748_v8 }
 0x151   : > { %v872_v7 = vadd.f32 %v856_v42, %v802_v33 }
 0x154   : > { %v727_v43 = vpop.f32.mrf.mxu2 }
 0x155   : > { %v2673_v32 = vpop.f32.mrf.mxu1  ;;  %v2683_v45 = vpop.f32.mrf.mxu3 }
 0x156   : > { %v2685_v46 = vpop.f32.mrf.mxu0 }
 0x15c   : > { %v2687_v47 = vpop.f32.mrf.mxu2 }
 0x15d   : > { %v2677_v36 = vpop.f32.mrf.mxu1  ;;  %v2689_v49 = vpop.f32.mrf.mxu3 }
 0x15e   : > { %v2691_v51 = vpop.f32.mrf.mxu0 }
 0x160   : > { %2224 = vmatmul.msk.bf16.gmra.mxu1 %vm442_vm0, %v1169_v37 }
 0x164   : > { %v2693_v52 = vpop.f32.mrf.mxu2 }
 0x165   : > { %v2681_v40 = vpop.f32.mrf.mxu1  ;;  %v2695_v55 = vpop.f32.mrf.mxu3 }
 0x166   : > { %v2697_v57 = vpop.f32.mrf.mxu0 }
 0x16c   : > { %v2699_v58 = vpop.f32.mrf.mxu2 }
 0x16d   : > { %v919_v44 = vpop.f32.mrf.mxu1  ;;  %v2701_v60 = vpop.f32.mrf.mxu3 }
 0x16e   : > { %v2703_v61 = vpop.f32.mrf.mxu0  ;;  %v939_v11 = vadd.f32 %v919_v44, %v869_v54 }
 0x174   : > { %v989_v1 = vpop.f32.mrf.mxu2 }
 0x175   : > { %v921_v48 = vpop.f32.mrf.mxu1  ;;  %v1060_v6 = vpop.f32.mrf.mxu3  ;;  %v1009_v4 = vadd.f32 %v989_v1, %v939_v11  ;;  %v730_v11 = vadd.f32 %v2687_v47, %v2673_v32  ;;  %v1315_v32 = vld [vmem:[%s3014_s9 + $0x8] sm:$0xf] }
 0x176   : > { %v1130_v8 = vpop.f32.mrf.mxu0  ;;  %v940_v21 = vadd.f32 %v921_v48, %v870_v17  ;;  %v1321_v47 = vunpack.c.l.b16 %v1315_v32 }
 0x177   : > { %v1080_v20 = vadd.f32 %v1060_v6, %v1009_v4 }
 0x179   : > { %v1150_v27 = vadd.f32 %v1130_v8, %v1080_v20  ;;  %v728_v8 = vadd.f32 %v727_v43, %v2670_v30  ;;  %v1323_v20 = vpack.c.b16 %v1321_v47, %v1321_v47 }
 0x17c   : > { %v991_v53 = vpop.f32.mrf.mxu2 }
 0x17d   : > { %v924_v50 = vpop.f32.mrf.mxu1  ;;  %v1062_v12 = vpop.f32.mrf.mxu3  ;;  %v1010_v37 = vadd.f32 %v991_v53, %v940_v21  ;;  %v803_v53 = vadd.f32 %v2683_v45, %v728_v8 }
 0x17e   : > { %v1132_v14 = vpop.f32.mrf.mxu0  ;;  %v941_v1 = vadd.f32 %v924_v50, %v871_v28 }
 0x17f   : > { %v1081_v29 = vadd.f32 %v1062_v12, %v1010_v37  ;;  %v873_v10 = vadd.f32 %v2685_v46, %v803_v53  ;;  %v733_v46 = vadd.f32 %v2693_v52, %v2677_v36  ;;  %v1340_v37 = vsel %vm1338_vm2, %v1323_v20, 0  ;;  %v2335_v52 = vld [vmem:[%s3014_s9] sm:$0xff] }
 0x180   : > { %1348 = vmatpush.bf16.msra.mxu2 %v1340_v37 }
 0x181   : > { %v1151_v23 = vadd.f32 %v1132_v14, %v1081_v29  ;;  %v805_v21 = vadd.f32 %v2695_v55, %v733_v46 }
 0x183   : > { %v875_v22 = vadd.f32 %v2697_v57, %v805_v21 }
 0x184   : > { %v994_v16 = vpop.f32.mrf.mxu2  ;;  %1349 = vmatpush.bf16.msra.mxu2 %v2335_v52 }
 0x185   : > { %v926_v56 = vpop.f32.mrf.mxu1  ;;  %v1065_v5 = vpop.f32.mrf.mxu3  ;;  %v1011_v25 = vadd.f32 %v994_v16, %v941_v1 }
 0x186   : > { %v1135_v31 = vpop.f32.mrf.mxu0  ;;  %v942_v26 = vadd.f32 %v926_v56, %v872_v7  ;;  %v804_v56 = vadd.f32 %v2689_v49, %v730_v11 }
 0x188   : > { %v874_v17 = vadd.f32 %v2691_v51, %v804_v56 }
 0x18c   : > { %v996_v44 = vpop.f32.mrf.mxu2 }
 0x18d   : > { %v929_v59 = vpop.f32.mrf.mxu1  ;;  %v1067_v6 = vpop.f32.mrf.mxu3  ;;  %v1012_v54 = vadd.f32 %v996_v44, %v942_v26 }
 0x18e   : > { %v1137_v38 = vpop.f32.mrf.mxu0  ;;  %v943_v43 = vadd.f32 %v929_v59, %v873_v10  ;;  %v2361_v10 = vld [vmem:[%s3013_s8] ss:$0 sm:$0xff] }
 0x18f   : > { %v1083_v42 = vadd.f32 %v1067_v6, %v1012_v54  ;;  %v2360_v54 = vld [vmem:[%s3012_s7] ss:$0 sm:$0xff] }
 0x191   : > { %v1153_v12 = vadd.f32 %v1137_v38, %v1083_v42 }
 0x194   : > { %v999_v39 = vpop.f32.mrf.mxu2 }
 0x195   : > { %v2705_v3 = vpop.f32.mrf.mxu1  ;;  %v1070_v30 = vpop.f32.mrf.mxu3  ;;  %v1013_v2 = vadd.f32 %v999_v39, %v943_v43 }
 0x196   : > { %v1140_v4 = vpop.f32.mrf.mxu0  ;;  %v944_v49 = vadd.f32 %v2705_v3, %v874_v17  ;;  %v735_v3 = vadd.f32 %v2699_v58, %v2681_v40 }
 0x197   : > { %v1084_v18 = vadd.f32 %v1070_v30, %v1013_v2 }
 0x199   : > { %v1154_v24 = vadd.f32 %v1140_v4, %v1084_v18 }
 0x19c   : > { %v1001_v45 = vpop.f32.mrf.mxu2 }
 0x19d   : > { %v2707_v9 = vpop.f32.mrf.mxu1  ;;  %v1072_v59 = vpop.f32.mrf.mxu3  ;;  %v1014_v51 = vadd.f32 %v1001_v45, %v944_v49 }
 0x19e   : > { %v945_v55 = vadd.f32 %v2707_v9, %v875_v22 }
 0x19f   : > { %v1085_v29 = vadd.f32 %v1072_v59, %v1014_v51 }
 0x1a4   : > { %v1004_v28 = vpop.f32.mrf.mxu2 }
 0x1a5   : > { %v2709_v13 = vpop.f32.mrf.mxu1  ;;  %v1015_v1 = vadd.f32 %v1004_v28, %v945_v55  ;;  %v1075_v33 = vpop.f32.mrf.mxu3 }
 0x1ac   : > { %v1006_v40 = vpop.f32.mrf.mxu2 }
 0x1ad   : > { %v1200_v34 = vpop.f32.mrf.mxu1  ;;  %v1077_v8 = vpop.f32.mrf.mxu3 }
 0x1ae   : > { %v1220_v19 = vadd.f32 %v1200_v34, %v1150_v27  ;;  %v1082_v34 = vadd.f32 %v1065_v5, %v1011_v25  ;;  %v1142_v5 = vpop.f32.mrf.mxu0 }
 0x1af   : > { %v1155_v44 = vadd.f32 %v1142_v5, %v1085_v29 }
 0x1b0   : > { %1236 = vrot.lane.b32.xlu0 %v1220_v19, %s2373_s14  ;;  %v1152_v19 = vadd.f32 %v1135_v31, %v1082_v34  ;;  %v806_v31 = vadd.f32 %v2701_v60, %v735_v3 }
 0x1b5   : > { %v1202_v48 = vpop.f32.mrf.mxu1 }
 0x1b6   : > { %v1221_v35 = vadd.f32 %v1202_v48, %v1151_v23  ;;  %v876_v48 = vadd.f32 %v2703_v61, %v806_v31  ;;  %v1145_v57 = vpop.f32.mrf.mxu0 }
 0x1b8   : > { %1238 = vrot.lane.b32.xlu0 %v1221_v35, %s2373_s14  ;;  %v1086_v35 = vadd.f32 %v1075_v33, %v1015_v1  ;;  %v946_v58 = vadd.f32 %v2709_v13, %v876_v48 }
 0x1ba   : > { %v1156_v6 = vadd.f32 %v1145_v57, %v1086_v35  ;;  %v1016_v9 = vadd.f32 %v1006_v40, %v946_v58  ;;  %v2336_v57 = vld [vmem:[%s3017_s12] sm:$0xff]  ;;  %v2338_v40 = vld [vmem:[%s3017_s12 + $0x10] sm:$0xff]  ;;  %v2339_v58 = vld [vmem:[%s3017_s12 + $0x18] sm:$0xff] }
 0x1bb   : > { %1512 = vmatpush.bf16.msrb.mxu0 %v2336_v57  ;;  %1574 = vmatpush.bf16.msrb.mxu1 %v2338_v40 }
 0x1bc   : > { %v1087_v34 = vadd.f32 %v1077_v8, %v1016_v9  ;;  %1644 = vmatpush.bf16.msrb.mxu2 %v2339_v58  ;;  %v2796_v9 = vld [vmem:[%s3015_s10] ss:$0 sm:$0xff] }
 0x1bd   : > { %v1205_v50 = vpop.f32.mrf.mxu1 }
 0x1be   : > { %v1222_v41 = vadd.f32 %v1205_v50, %v1152_v19  ;;  %v1147_v61 = vpop.f32.mrf.mxu0 }
 0x1bf   : > { %v1157_v26 = vadd.f32 %v1147_v61, %v1087_v34 }
 0x1c0   : > { %1240 = vrot.lane.b32.xlu1 %v1222_v41, %s2373_s14 }
 0x1c5   : > { %v1207_v14 = vpop.f32.mrf.mxu1 }
 0x1c6   : > { %v1223_v16 = vadd.f32 %v1207_v14, %v1153_v12 }
 0x1c8   : > { %1242 = vrot.lane.b32.xlu1 %v1223_v16, %s2373_s14 }
 0x1cd   : > { %v1210_v27 = vpop.f32.mrf.mxu1 }
 0x1ce   : > { %v1224_v36 = vadd.f32 %v1210_v27, %v1154_v24  ;;  %v2337_v24 = vld [vmem:[%s3017_s12 + $0x8] sm:$0xff] }
 0x1cf   : > { %1465 = vmatpush.bf16.msra.mxu3 %v2337_v24 }
 0x1d0   : > { %1244 = vrot.lane.b32.xlu2 %v1224_v36, %s2373_s14 }
 0x1d5   : > { %v1212_v23 = vpop.f32.mrf.mxu1 }
 0x1d6   : > { %v1225_v25 = vadd.f32 %v1212_v23, %v1155_v44 }
 0x1d8   : > { %1246 = vrot.lane.b32.xlu2 %v1225_v25, %s2373_s14 }
 0x1dd   : > { %v1215_v7 = vpop.f32.mrf.mxu1 }
 0x1de   : > { %v1226_v60 = vadd.f32 %v1215_v7, %v1156_v6  ;;  %v2340_v6 = vld [vmem:[%s3017_s12 + $0x20] sm:$0xff] }
 0x1df   : > { %1714 = vmatpush.bf16.msrb.mxu3 %v2340_v6  ;;  %v2801_v7 = vld [vmem:[%s3016_s11] ss:$0 sm:$0xff] }
 0x1e0   : > { %1248 = vrot.lane.b32.xlu0 %v1226_v60, %s2373_s14 }
 0x1e5   : > { %v1217_v38 = vpop.f32.mrf.mxu1 }
 0x1e6   : > { %v1227_v39 = vadd.f32 %v1217_v38, %v1157_v26 }
 0x1e8   : > { %1250 = vrot.lane.b32.xlu1 %v1227_v39, %s2373_s14 }
 0x222   : > { %v1237_v13 = vpop.permute.xlu0 %1236 }
 0x223   : > { %1261 = vst.msk [vmem:[%s2462_s18] sm:$0xff] %vm1260_vm3, %v1237_v13 }
 0x22a   : > { %v1239_v53 = vpop.permute.xlu0 %1238  ;;  %v1245_v19 = vpop.permute.xlu2 %1244  ;;  %v1269_v50 = vld [vmem:[%s2462_s18] sm:$0xff] }
 0x22b   : > { %1262 = vst.msk [vmem:[%s2462_s18 + $0x8] sm:$0xff] %vm1260_vm3, %v1239_v53  ;;  %v1281_v41 = vmul.f32 %v2360_v54, %v1269_v50 }
 0x22c   : > { %1265 = vst.msk [vmem:[%s2462_s18 + $0x20] sm:$0xff] %vm1260_vm3, %v1245_v19 }
 0x22d   : > { %v1293_v56 = vadd.f32 %v2361_v10, %v1281_v41 }
 0x22f   : > { %v1301_v2 = vmax.f32 %v1293_v56, 0.0 }
 0x232   : > { %v1241_v11 = vpop.permute.xlu1 %1240  ;;  %v1247_v42 = vpop.permute.xlu2 %1246  ;;  %v1270_v30 = vld [vmem:[%s2462_s18 + $0x8] sm:$0xff] }
 0x233   : > { %1263 = vst.msk [vmem:[%s2462_s18 + $0x10] sm:$0xff] %vm1260_vm3, %v1241_v11  ;;  %v1282_v43 = vmul.f32 %v2360_v54, %v1270_v30  ;;  %v1273_v51 = vld [vmem:[%s2462_s18 + $0x20] sm:$0xff] }
 0x234   : > { %1266 = vst.msk [vmem:[%s2462_s18 + $0x28] sm:$0xff] %vm1260_vm3, %v1247_v42  ;;  %v1285_v37 = vmul.f32 %v2360_v54, %v1273_v51 }
 0x235   : > { %v1294_v12 = vadd.f32 %v2361_v10, %v1282_v43 }
 0x236   : > { %v1297_v5 = vadd.f32 %v2361_v10, %v1285_v37  ;;  %v2341_v37 = vld [vmem:[%s3017_s12 + $0x28] sm:$0xff] }
 0x237   : > { %v1302_v4 = vmax.f32 %v1294_v12, 0.0  ;;  %1784 = vmatpush.bf16.msra.mxu0 %v2341_v37 }
 0x238   : > { %v1305_v22 = vmax.f32 %v1297_v5, 0.0 }
 0x239   : > { %v1309_v45 = vpack.c.bf16 %v1302_v4, %v1301_v2 }
 0x23a   : > { %v1243_v14 = vpop.permute.xlu1 %1242  ;;  %v1271_v16 = vld [vmem:[%s2462_s18 + $0x10] sm:$0xff] }
 0x23b   : > { %1264 = vst.msk [vmem:[%s2462_s18 + $0x18] sm:$0xff] %vm1260_vm3, %v1243_v14  ;;  %2229 = vmatmul.msk.bf16.vlgmr.msra.gmra.mxu2 %vm1325_vm4, %v1309_v45  ;;  %v1283_v17 = vmul.f32 %v2360_v54, %v1271_v16  ;;  %v1274_v21 = vld [vmem:[%s2462_s18 + $0x28] sm:$0xff] }
 0x23c   : > { %v1286_v27 = vmul.f32 %v2360_v54, %v1274_v21 }
 0x23d   : > { %v1295_v32 = vadd.f32 %v2361_v10, %v1283_v17 }
 0x23e   : > { %v1298_v36 = vadd.f32 %v2361_v10, %v1286_v27 }
 0x23f   : > { %v1303_v49 = vmax.f32 %v1295_v32, 0.0 }
 0x240   : > { %v1306_v28 = vmax.f32 %v1298_v36, 0.0  ;;  %v2342_v36 = vld [vmem:[%s3017_s12 + $0x30] sm:$0xff] }
 0x241   : > { %1854 = vmatpush.bf16.msra.mxu1 %v2342_v36 }
 0x242   : > { %v1272_v46 = vld [vmem:[%s2462_s18 + $0x18] sm:$0xff]  ;;  %v1311_v3 = vpack.c.bf16 %v1306_v28, %v1305_v22 }
 0x243   : > { %v1284_v18 = vmul.f32 %v2360_v54, %v1272_v46 }
 0x245   : > { %v1296_v47 = vadd.f32 %v2361_v10, %v1284_v18 }
 0x247   : > { %v1304_v59 = vmax.f32 %v1296_v47, 0.0 }
 0x249   : > { %v1310_v20 = vpack.c.bf16 %v1304_v59, %v1303_v49 }
 0x24b   : > { %2230 = vmatmul.msk.bf16.gmra.mxu2 %vm1325_vm4, %v1310_v20 }
 0x252   : > { %v1249_v52 = vpop.permute.xlu0 %1248 }
 0x253   : > { %1267 = vst.msk [vmem:[%s2462_s18 + $0x30] sm:$0xff] %vm1260_vm3, %v1249_v52  ;;  %v2343_v52 = vld [vmem:[%s3017_s12 + $0x38] sm:$0xff] }
 0x254   : > { %1924 = vmatpush.bf16.msra.mxu2 %v2343_v52 }
 0x25a   : > { %v1251_v29 = vpop.permute.xlu1 %1250  ;;  %v1275_v55 = vld [vmem:[%s2462_s18 + $0x30] sm:$0xff] }
 0x25b   : > { %1268 = vst.msk [vmem:[%s2462_s18 + $0x38] sm:$0xff] %vm1260_vm3, %v1251_v29  ;;  %2231 = vmatmul.msk.bf16.gmra.mxu2 %vm1325_vm4, %v1311_v3  ;;  %v1287_v31 = vmul.f32 %v2360_v54, %v1275_v55 }
 0x25d   : > { %v1299_v33 = vadd.f32 %v2361_v10, %v1287_v31 }
 0x25f   : > { %v1307_v25 = vmax.f32 %v1299_v33, 0.0 }
 0x262   : > { %v1276_v44 = vld [vmem:[%s2462_s18 + $0x38] sm:$0xff] }
 0x263   : > { %v1288_v1 = vmul.f32 %v2360_v54, %v1276_v44 }
 0x265   : > { %v1300_v23 = vadd.f32 %v2361_v10, %v1288_v1 }
 0x267   : > { %v1308_v48 = vmax.f32 %v1300_v23, 0.0 }
 0x269   : > { %v1312_v35 = vpack.c.bf16 %v1308_v48, %v1307_v25  ;;  %v2344_v48 = vld [vmem:[%s3017_s12 + $0x40] sm:$0xff] }
 0x26b   : > { %2232 = vmatmul.msk.bf16.gmra.mxu2 %vm1325_vm4, %v1312_v35 }
 0x2be   : > { %v1351_v60 = vpop.f32.mrf.mxu2 }
 0x2bf   : > { %v1375_v8 = vmul.f32 %v2796_v9, %v1351_v60 }
 0x2c1   : > { %v1387_v34 = vadd.f32 %v2801_v7, %v1375_v8 }
 0x2c3   : > { %v1395_v61 = vmax.f32 %v1387_v34, 0.0 }
 0x2c5   : > { %1403 = vst.msk [vmem:[#allocation2 + $0x11] sm:$0xff] %vm442_vm0, %v1395_v61 }
 0x2c6   : > { %v1353_v26 = vpop.f32.mrf.mxu2 }
 0x2c7   : > { %v1376_v38 = vmul.f32 %v2796_v9, %v1353_v26 }
 0x2c9   : > { %v1388_v39 = vadd.f32 %v2801_v7, %v1376_v38 }
 0x2cb   : > { %v1396_v13 = vmax.f32 %v1388_v39, 0.0 }
 0x2cc   : > { %v2808_v53 = vld [vmem:[#allocation2 + $0x11] sm:$0xff] }
 0x2cd   : > { %v1412_v19 = vld [vmem:[#allocation2 + $0x10] sm:$0xff]  ;;  %1404 = vst.msk [vmem:[#allocation2 + $0x21] sm:$0xff] %vm442_vm0, %v1396_v13  ;;  %v1433_v50 = vpack.c.bf16 %v2808_v53, %v2548_v62 }
 0x2ce   : > { %v2810_v54 = vld [vmem:[#allocation2 + $0x12] sm:$0xff]  ;;  %v1419_v41 = vpack.c.bf16 %v1412_v19, %v2550_v63  ;;  %v1356_v11 = vpop.f32.mrf.mxu2 }
 0x2cf   : > { %v1542_v10 = vpack.c.bf16 %v2810_v54, %v2552_v0  ;;  %v1377_v42 = vmul.f32 %v2796_v9, %v1356_v11  ;;  %2239 = vmatmul.msk.bf16.vlgmr.msra.gmra.mxu3 %vm442_vm0, %v1433_v50 }
 0x2d0   : > { %2247 = vmatmul.msk.bf16.vlgmr.msrb.gmra.mxu0 %vm442_vm0, %v1419_v41  ;;  %1994 = vmatpush.bf16.msra.mxu3 %v2344_v48 }
 0x2d1   : > { %2257 = vmatmul.msk.bf16.vlgmr.msrb.gmra.mxu1 %vm442_vm0, %v1542_v10  ;;  %v1389_v30 = vadd.f32 %v2801_v7, %v1377_v42 }
 0x2d3   : > { %v1397_v43 = vmax.f32 %v1389_v30, 0.0 }
 0x2d4   : > { %v1605_v56 = vld [vmem:[#allocation2 + $0x20] sm:$0xff] }
 0x2d5   : > { %1405 = vst.msk [vmem:[#allocation2 + $0x31] sm:$0xff] %vm442_vm0, %v1397_v43  ;;  %v1612_v62 = vpack.c.bf16 %v1605_v56, %v1412_v19  ;;  %v2827_v4 = vld [vmem:[#allocation2 + $0x21] sm:$0xff] }
 0x2d6   : > { %v1358_v63 = vpop.f32.mrf.mxu2  ;;  %v2829_v45 = vld [vmem:[#allocation2 + $0x22] sm:$0xff] }
 0x2d7   : > { %v1378_v12 = vmul.f32 %v2796_v9, %v1358_v63  ;;  %2267 = vmatmul.msk.bf16.vlgmr.msrb.gmra.mxu2 %vm442_vm0, %v1612_v62  ;;  %v1752_v11 = vpack.c.bf16 %v2829_v45, %v2810_v54 }
 0x2d9   : > { %v1390_v0 = vadd.f32 %v2801_v7, %v1378_v12 }
 0x2db   : > { %v1398_v2 = vmax.f32 %v1390_v0, 0.0  ;;  %v3023_v0 = vld [vmem:[#allocation3_spill] sm:$0xff] }
 0x2dc   : > { %v2831_v14 = vld [vmem:[#allocation2 + $0x31] sm:$0xff] }
 0x2dd   : > { %v1414_v16 = vld [vmem:[#allocation2 + $0x30] sm:$0xff]  ;;  %1406 = vst.msk [vmem:[#allocation2 + $0x41] sm:$0xff] %vm442_vm0, %v1398_v2  ;;  %v2838_v46 = vpack.c.bf16 %v2831_v14, %v2827_v4 }
 0x2de   : > { %v2833_v17 = vld [vmem:[#allocation2 + $0x32] sm:$0xff]  ;;  %v2840_v18 = vpack.c.bf16 %v1414_v16, %v1605_v56  ;;  %v1361_v47 = vpop.f32.mrf.mxu2 }
 0x2df   : > { %v2844_v32 = vpack.c.bf16 %v2833_v17, %v2829_v45  ;;  %v1379_v49 = vmul.f32 %v2796_v9, %v1361_v47  ;;  %2240 = vmatmul.msk.bf16.gmra.mxu3 %vm442_vm0, %v2838_v46 }
 0x2e0   : > { %2248 = vmatmul.msk.bf16.gmra.mxu0 %vm442_vm0, %v2840_v18 }
 0x2e1   : > { %2258 = vmatmul.msk.bf16.gmra.mxu1 %vm442_vm0, %v2844_v32  ;;  %v1391_v59 = vadd.f32 %v2801_v7, %v1379_v49 }
 0x2e3   : > { %v1399_v20 = vmax.f32 %v1391_v59, 0.0 }
 0x2e4   : > { %v1607_v21 = vld [vmem:[#allocation2 + $0x40] sm:$0xff] }
 0x2e5   : > { %1407 = vst.msk [vmem:[#allocation2 + $0x51] sm:$0xff] %vm442_vm0, %v1399_v20  ;;  %v1613_v24 = vpack.c.bf16 %v1607_v21, %v1414_v16  ;;  %v1429_v22 = vld [vmem:[#allocation2 + $0x41] sm:$0xff] }
 0x2e6   : > { %v1363_v51 = vpop.f32.mrf.mxu2  ;;  %v1538_v3 = vld [vmem:[#allocation2 + $0x42] sm:$0xff]  ;;  %v1683_v42 = vpack.c.bf16 %v1429_v22, %v2831_v14 }
 0x2e7   : > { %v1380_v27 = vmul.f32 %v2796_v9, %v1363_v51  ;;  %2268 = vmatmul.msk.bf16.gmra.mxu2 %vm442_vm0, %v1613_v24  ;;  %v1753_v30 = vpack.c.bf16 %v1538_v3, %v2833_v17 }
 0x2e9   : > { %v1392_v5 = vadd.f32 %v2801_v7, %v1380_v27 }
 0x2eb   : > { %v1400_v28 = vmax.f32 %v1392_v5, 0.0 }
 0x2ec   : > { %v1430_v29 = vld [vmem:[#allocation2 + $0x51] sm:$0xff] }
 0x2ed   : > { %v1416_v55 = vld [vmem:[#allocation2 + $0x50] sm:$0xff]  ;;  %1408 = vst.msk [vmem:[#allocation2 + $0x61] sm:$0xff] %vm442_vm0, %v1400_v28  ;;  %v1435_v44 = vpack.c.bf16 %v1430_v29, %v1429_v22 }
 0x2ee   : > { %v1539_v31 = vld [vmem:[#allocation2 + $0x52] sm:$0xff]  ;;  %v1421_v1 = vpack.c.bf16 %v1416_v55, %v1607_v21  ;;  %v1366_v23 = vpop.f32.mrf.mxu2 }
 0x2ef   : > { %v2868_v33 = vpack.c.bf16 %v1539_v31, %v1538_v3  ;;  %v1381_v25 = vmul.f32 %v2796_v9, %v1366_v23  ;;  %2241 = vmatmul.msk.bf16.gmra.mxu3 %vm442_vm0, %v1435_v44 }
 0x2f0   : > { %2249 = vmatmul.msk.bf16.gmra.mxu0 %vm442_vm0, %v1421_v1 }
 0x2f1   : > { %2259 = vmatmul.msk.bf16.gmra.mxu1 %vm442_vm0, %v2868_v33  ;;  %v1393_v35 = vadd.f32 %v2801_v7, %v1381_v25 }
 0x2f3   : > { %v1401_v57 = vmax.f32 %v1393_v35, 0.0 }
 0x2f4   : > { %v1609_v40 = vld [vmem:[#allocation2 + $0x60] sm:$0xff] }
 0x2f5   : > { %1409 = vst.msk [vmem:[#allocation2 + $0x71] sm:$0xff] %vm442_vm0, %v1401_v57  ;;  %v1614_v58 = vpack.c.bf16 %v1609_v40, %v1416_v55  ;;  %v1431_v61 = vld [vmem:[#allocation2 + $0x61] sm:$0xff] }
 0x2f6   : > { %v1368_v6 = vpop.f32.mrf.mxu2  ;;  %v1540_v26 = vld [vmem:[#allocation2 + $0x62] sm:$0xff] }
 0x2f7   : > { %v1382_v60 = vmul.f32 %v2796_v9, %v1368_v6  ;;  %2269 = vmatmul.msk.bf16.gmra.mxu2 %vm442_vm0, %v1614_v58  ;;  %v1754_v54 = vpack.c.bf16 %v1540_v26, %v1539_v31 }
 0x2f9   : > { %v1394_v8 = vadd.f32 %v2801_v7, %v1382_v60  ;;  %v1682_v7 = vpack.c.bf16 %v2827_v4, %v2808_v53  ;;  %v1684_v53 = vpack.c.bf16 %v1431_v61, %v1430_v29 }
 0x2fb   : > { %v1402_v34 = vmax.f32 %v1394_v8, 0.0 }
 0x2fc   : > { %v1432_v38 = vld [vmem:[#allocation2 + $0x71] sm:$0xff] }
 0x2fd   : > { %v1418_v39 = vld [vmem:[#allocation2 + $0x70] sm:$0xff]  ;;  %1410 = vst.msk [vmem:[#allocation2 + $0x81] sm:$0xff] %vm442_vm0, %v1402_v34  ;;  %v1436_v19 = vpack.c.bf16 %v1432_v38, %v1431_v61 }
 0x2fe   : > { %v1541_v13 = vld [vmem:[#allocation2 + $0x72] sm:$0xff]  ;;  %v1422_v50 = vpack.c.bf16 %v1418_v39, %v1609_v40 }
 0x2ff   : > { %v1545_v41 = vpack.c.bf16 %v1541_v13, %v1540_v26  ;;  %2242 = vmatmul.msk.bf16.gmra.mxu3 %vm442_vm0, %v1436_v19 }
 0x300   : > { %2250 = vmatmul.msk.bf16.gmra.mxu0 %vm442_vm0, %v1422_v50 }
 0x301   : > { %2260 = vmatmul.msk.bf16.gmra.mxu1 %vm442_vm0, %v1545_v41 }
 0x304   : > { %v1611_v9 = vld [vmem:[#allocation2 + $0x80] sm:$0xff] }
 0x305   : > { %v1615_v10 = vpack.c.bf16 %v1611_v9, %v1418_v39  ;;  %v1681_v43 = vld [vmem:[#allocation2 + $0x81] sm:$0xff]  ;;  %v1825_v12 = vpack.c.bf16 %v2654_v15, %v1611_v9 }
 0x306   : > { %v1751_v56 = vld [vmem:[#allocation2 + $0x82] sm:$0xff]  ;;  %v1685_v62 = vpack.c.bf16 %v1681_v43, %v1432_v38  ;;  %v1895_v2 = vpack.c.bf16 %v3023_v0, %v1681_v43 }
 0x307   : > { %2270 = vmatmul.msk.bf16.gmra.mxu2 %vm442_vm0, %v1615_v10  ;;  %v1755_v63 = vpack.c.bf16 %v1751_v56, %v1541_v13 }
 0x30f   : > { %2277 = vmatmul.msk.bf16.vlgmr.msrb.gmra.mxu3 %vm442_vm0, %v1682_v7 }
 0x310   : > { %2287 = vmatmul.msk.bf16.vlgmr.msra.gmra.mxu0 %vm442_vm0, %v1752_v11 }
 0x311   : > { %2297 = vmatmul.msk.bf16.vlgmr.msra.gmra.mxu1 %vm442_vm0, %v2840_v18 }
 0x317   : > { %2307 = vmatmul.msk.bf16.vlgmr.msra.gmra.mxu2 %vm442_vm0, %v2838_v46 }
 0x31f   : > { %2278 = vmatmul.msk.bf16.gmra.mxu3 %vm442_vm0, %v1683_v42 }
 0x320   : > { %2288 = vmatmul.msk.bf16.gmra.mxu0 %vm442_vm0, %v1753_v30 }
 0x321   : > { %2298 = vmatmul.msk.bf16.gmra.mxu1 %vm442_vm0, %v1421_v1 }
 0x327   : > { %2308 = vmatmul.msk.bf16.gmra.mxu2 %vm442_vm0, %v1435_v44 }
 0x32f   : > { %2279 = vmatmul.msk.bf16.gmra.mxu3 %vm442_vm0, %v1684_v53 }
 0x330   : > { %2289 = vmatmul.msk.bf16.gmra.mxu0 %vm442_vm0, %v1754_v54 }
 0x331   : > { %2299 = vmatmul.msk.bf16.gmra.mxu1 %vm442_vm0, %v1422_v50 }
 0x337   : > { %2309 = vmatmul.msk.bf16.gmra.mxu2 %vm442_vm0, %v1436_v19 }
 0x33f   : > { %2280 = vmatmul.msk.bf16.gmra.mxu3 %vm442_vm0, %v1685_v62 }
 0x340   : > { %2290 = vmatmul.msk.bf16.gmra.mxu0 %vm442_vm0, %v1755_v63 }
 0x341   : > { %2300 = vmatmul.msk.bf16.gmra.mxu1 %vm442_vm0, %v1825_v12 }
 0x347   : > { %2310 = vmatmul.msk.bf16.gmra.mxu2 %vm442_vm0, %v1895_v2 }
 0x34d   : > { %v1514_v16 = vpop.f32.mrf.mxu0 }
 0x34e   : > { %v1576_v17 = vpop.f32.mrf.mxu1 }
 0x34f   : > { %2317 = vmatmul.msk.bf16.vlgmr.msra.gmra.mxu3 %vm442_vm0, %v2844_v32  ;;  %v3024_v32 = vld [vmem:[#allocation4_spill] sm:$0xff] }
 0x350   : > { %v1965_v21 = vpack.c.bf16 %v3024_v32, %v1751_v56 }
 0x352   : > { %v1467_v4 = vpop.f32.mrf.mxu3 }
 0x353   : > { %v1515_v61 = vadd.f32 %v1514_v16, %v1467_v4 }
 0x355   : > { %v1516_v47 = vpop.f32.mrf.mxu0  ;;  %v1596_v13 = vadd.f32 %v1576_v17, %v1515_v61 }
 0x356   : > { %v1578_v49 = vpop.f32.mrf.mxu1 }
 0x35a   : > { %v1469_v45 = vpop.f32.mrf.mxu3  ;;  %v1646_v46 = vpop.f32.mrf.mxu2 }
 0x35b   : > { %v1666_v19 = vadd.f32 %v1646_v46, %v1596_v13 }
 0x35d   : > { %v1519_v24 = vpop.f32.mrf.mxu0 }
 0x35e   : > { %v1581_v27 = vpop.f32.mrf.mxu1 }
 0x35f   : > { %2318 = vmatmul.msk.bf16.gmra.mxu3 %vm442_vm0, %v2868_v33 }
 0x362   : > { %v1472_v14 = vpop.f32.mrf.mxu3  ;;  %v1648_v59 = vpop.f32.mrf.mxu2 }
 0x363   : > { %v1520_v54 = vadd.f32 %v1519_v24, %v1472_v14 }
 0x365   : > { %v1521_v36 = vpop.f32.mrf.mxu0  ;;  %v1598_v0 = vadd.f32 %v1581_v27, %v1520_v54 }
 0x366   : > { %v1583_v5 = vpop.f32.mrf.mxu1 }
 0x36a   : > { %v2918_v15 = vpop.f32.mrf.mxu3  ;;  %v1651_v37 = vpop.f32.mrf.mxu2 }
 0x36b   : > { %v1522_v46 = vadd.f32 %v1521_v36, %v2918_v15 }
 0x36d   : > { %v1524_v3 = vpop.f32.mrf.mxu0 }
 0x36e   : > { %v2931_v29 = vpop.f32.mrf.mxu1 }
 0x36f   : > { %2319 = vmatmul.msk.bf16.gmra.mxu3 %vm442_vm0, %v1545_v41  ;;  %v1517_v41 = vadd.f32 %v1516_v47, %v1469_v45  ;;  %v1668_v45 = vadd.f32 %v1651_v37, %v1598_v0 }
 0x371   : > { %v1597_v42 = vadd.f32 %v1578_v49, %v1517_v41 }
 0x372   : > { %v2921_v18 = vpop.f32.mrf.mxu3  ;;  %v1653_v28 = vpop.f32.mrf.mxu2 }
 0x373   : > { %v1667_v53 = vadd.f32 %v1648_v59, %v1597_v42  ;;  %v1525_v37 = vadd.f32 %v1524_v3, %v2921_v18 }
 0x375   : > { %v2935_v44 = vpop.f32.mrf.mxu0  ;;  %v1600_v15 = vadd.f32 %v2931_v29, %v1525_v37 }
 0x376   : > { %v2937_v1 = vpop.f32.mrf.mxu1 }
 0x37a   : > { %v2923_v20 = vpop.f32.mrf.mxu3  ;;  %v2933_v55 = vpop.f32.mrf.mxu2 }
 0x37d   : > { %v2941_v25 = vpop.f32.mrf.mxu0 }
 0x37e   : > { %v2943_v35 = vpop.f32.mrf.mxu1 }
 0x37f   : > { %2320 = vmatmul.msk.bf16.gmra.mxu3 %vm442_vm0, %v1965_v21  ;;  %v1599_v21 = vadd.f32 %v1583_v5, %v1522_v46  ;;  %v1670_v5 = vadd.f32 %v2933_v55, %v1600_v15 }
 0x382   : > { %v2927_v51 = vpop.f32.mrf.mxu3  ;;  %v2939_v33 = vpop.f32.mrf.mxu2 }
 0x385   : > { %v2947_v40 = vpop.f32.mrf.mxu0 }
 0x386   : > { %v2949_v6 = vpop.f32.mrf.mxu1 }
 0x38a   : > { %v2929_v52 = vpop.f32.mrf.mxu3  ;;  %v2945_v57 = vpop.f32.mrf.mxu2 }
 0x38d   : > { %v1786_v34 = vpop.f32.mrf.mxu0 }
 0x38e   : > { %v1856_v26 = vpop.f32.mrf.mxu1 }
 0x392   : > { %v1716_v22 = vpop.f32.mrf.mxu3  ;;  %v2951_v60 = vpop.f32.mrf.mxu2 }
 0x393   : > { %v1736_v9 = vadd.f32 %v1716_v22, %v1666_v19 }
 0x395   : > { %v1788_v50 = vpop.f32.mrf.mxu0  ;;  %v1806_v30 = vadd.f32 %v1786_v34, %v1736_v9 }
 0x396   : > { %v1858_v10 = vpop.f32.mrf.mxu1 }
 0x397   : > { %v1876_v56 = vadd.f32 %v1856_v26, %v1806_v30  ;;  %v1530_v30 = vadd.f32 %v2941_v25, %v2927_v51 }
 0x39a   : > { %v1718_v31 = vpop.f32.mrf.mxu3  ;;  %v1926_v38 = vpop.f32.mrf.mxu2 }
 0x39b   : > { %v1737_v43 = vadd.f32 %v1718_v31, %v1667_v53  ;;  %v1946_v63 = vadd.f32 %v1926_v38, %v1876_v56  ;;  %v1669_v31 = vadd.f32 %v1653_v28, %v1599_v21  ;;  %v1527_v28 = vadd.f32 %v2935_v44, %v2923_v20 }
 0x39c   : > { %v1602_v56 = vadd.f32 %v2943_v35, %v1530_v30 }
 0x39d   : > { %v1791_v62 = vpop.f32.mrf.mxu0  ;;  %v1807_v2 = vadd.f32 %v1788_v50, %v1737_v43 }
 0x39e   : > { %v1861_v4 = vpop.f32.mrf.mxu1 }
 0x39f   : > { %v1877_v49 = vadd.f32 %v1858_v10, %v1807_v2  ;;  %v1601_v10 = vadd.f32 %v2937_v1, %v1527_v28 }
 0x3a1   : > { %v1671_v42 = vadd.f32 %v2939_v33, %v1601_v10  ;;  %v1532_v33 = vadd.f32 %v2947_v40, %v2929_v52 }
 0x3a2   : > { %v1721_v23 = vpop.f32.mrf.mxu3  ;;  %v1928_v7 = vpop.f32.mrf.mxu2 }
 0x3a3   : > { %v1738_v47 = vadd.f32 %v1721_v23, %v1668_v45  ;;  %v1947_v59 = vadd.f32 %v1928_v7, %v1877_v49  ;;  %v1603_v2 = vadd.f32 %v2949_v6, %v1532_v33 }
 0x3a5   : > { %v1793_v14 = vpop.f32.mrf.mxu0  ;;  %v1808_v24 = vadd.f32 %v1791_v62, %v1738_v47  ;;  %v1673_v45 = vadd.f32 %v2951_v60, %v1603_v2 }
 0x3a6   : > { %v1863_v27 = vpop.f32.mrf.mxu1 }
 0x3a7   : > { %v1878_v26 = vadd.f32 %v1861_v4, %v1808_v24 }
 0x3aa   : > { %v1723_v48 = vpop.f32.mrf.mxu3  ;;  %v1931_v17 = vpop.f32.mrf.mxu2 }
 0x3ab   : > { %v1739_v61 = vadd.f32 %v1723_v48, %v1669_v31  ;;  %v1948_v38 = vadd.f32 %v1931_v17, %v1878_v26 }
 0x3ad   : > { %v1809_v36 = vadd.f32 %v1793_v14, %v1739_v61  ;;  %v1796_v19 = vpop.f32.mrf.mxu0 }
 0x3ae   : > { %v1866_v50 = vpop.f32.mrf.mxu1 }
 0x3af   : > { %v1879_v9 = vadd.f32 %v1863_v27, %v1809_v36 }
 0x3b2   : > { %v1726_v58 = vpop.f32.mrf.mxu3  ;;  %v1933_v34 = vpop.f32.mrf.mxu2 }
 0x3b3   : > { %v1740_v41 = vadd.f32 %v1726_v58, %v1670_v5  ;;  %v1949_v3 = vadd.f32 %v1933_v34, %v1879_v9 }
 0x3b5   : > { %v1810_v7 = vadd.f32 %v1796_v19, %v1740_v41  ;;  %v1798_v55 = vpop.f32.mrf.mxu0 }
 0x3b6   : > { %v1868_v58 = vpop.f32.mrf.mxu1 }
 0x3b7   : > { %v1880_v44 = vadd.f32 %v1866_v50, %v1810_v7 }
 0x3ba   : > { %v2953_v8 = vpop.f32.mrf.mxu3  ;;  %v1936_v18 = vpop.f32.mrf.mxu2 }
 0x3bb   : > { %v1741_v20 = vadd.f32 %v2953_v8, %v1671_v42  ;;  %v1950_v53 = vadd.f32 %v1936_v18, %v1880_v44 }
 0x3bd   : > { %v1811_v1 = vadd.f32 %v1798_v55, %v1741_v20  ;;  %v1801_v8 = vpop.f32.mrf.mxu0 }
 0x3be   : > { %v1871_v35 = vpop.f32.mrf.mxu1 }
 0x3bf   : > { %v1881_v25 = vadd.f32 %v1868_v58, %v1811_v1 }
 0x3c2   : > { %v2955_v39 = vpop.f32.mrf.mxu3  ;;  %v1938_v54 = vpop.f32.mrf.mxu2 }
 0x3c5   : > { %v1803_v40 = vpop.f32.mrf.mxu0 }
 0x3c6   : > { %v1873_v6 = vpop.f32.mrf.mxu1 }
 0x3ca   : > { %v2957_v11 = vpop.f32.mrf.mxu3  ;;  %v1941_v17 = vpop.f32.mrf.mxu2 }
 0x3d2   : > { %v1996_v12 = vpop.f32.mrf.mxu3 }
 0x3d3   : > { %v2016_v16 = vadd.f32 %v1996_v12, %v1946_v63  ;;  %v1672_v63 = vadd.f32 %v2945_v57, %v1602_v56  ;;  %v1951_v12 = vadd.f32 %v1938_v54, %v1881_v25  ;;  %v1743_v57 = vadd.f32 %v2957_v11, %v1673_v45 }
 0x3d5   : > { %2032 = vrot.lane.b32.xlu2 %v2016_v16, %s2374_s15  ;;  %v1742_v51 = vadd.f32 %v2955_v39, %v1672_v63  ;;  %v1813_v47 = vadd.f32 %v1803_v40, %v1743_v57 }
 0x3d7   : > { %v1812_v4 = vadd.f32 %v1801_v8, %v1742_v51  ;;  %v1883_v60 = vadd.f32 %v1873_v6, %v1813_v47 }
 0x3d9   : > { %v1882_v46 = vadd.f32 %v1871_v35, %v1812_v4 }
 0x3da   : > { %v1998_v32 = vpop.f32.mrf.mxu3 }
 0x3db   : > { %v2017_v22 = vadd.f32 %v1998_v32, %v1947_v59  ;;  %v1952_v52 = vadd.f32 %v1941_v17, %v1882_v46  ;;  %v1943_v59 = vpop.f32.mrf.mxu2 }
 0x3dc   : > { %v1953_v14 = vadd.f32 %v1943_v59, %v1883_v60 }
 0x3dd   : > { %2034 = vrot.lane.b32.xlu0 %v2017_v22, %s2374_s15 }
 0x3e2   : > { %v2001_v13 = vpop.f32.mrf.mxu3 }
 0x3e3   : > { %v2018_v23 = vadd.f32 %v2001_v13, %v1948_v38 }
 0x3e5   : > { %2036 = vrot.lane.b32.xlu1 %v2018_v23, %s2374_s15 }
 0x3ea   : > { %v2003_v48 = vpop.f32.mrf.mxu3 }
 0x3eb   : > { %v2019_v29 = vadd.f32 %v2003_v48, %v1949_v3 }
 0x3ed   : > { %2038 = vrot.lane.b32.xlu2 %v2019_v29, %s2374_s15 }
 0x3f2   : > { %v2006_v43 = vpop.f32.mrf.mxu3 }
 0x3f3   : > { %v2020_v62 = vadd.f32 %v2006_v43, %v1950_v53 }
 0x3f5   : > { %2040 = vrot.lane.b32.xlu0 %v2020_v62, %s2374_s15 }
 0x3fa   : > { %v2008_v0 = vpop.f32.mrf.mxu3 }
 0x3fb   : > { %v2021_v16 = vadd.f32 %v2008_v0, %v1951_v12 }
 0x3fd   : > { %2042 = vrot.lane.b32.xlu1 %v2021_v16, %s2374_s15 }
 0x402   : > { %v2011_v39 = vpop.f32.mrf.mxu3 }
 0x403   : > { %v2022_v49 = vadd.f32 %v2011_v39, %v1952_v52 }
 0x405   : > { %2044 = vrot.lane.b32.xlu2 %v2022_v49, %s2374_s15 }
 0x40a   : > { %v2013_v32 = vpop.f32.mrf.mxu3 }
 0x40b   : > { %v2023_v11 = vadd.f32 %v2013_v32, %v1953_v14 }
 0x40d   : > { %2046 = vrot.lane.b32.xlu0 %v2023_v11, %s2374_s15 }
 0x42f   : > { %v2033_v21 = vpop.permute.xlu2 %2032 }
 0x430   : > { %2057 = vst.msk [vmem:[%s2462_s18] sm:$0xff] %vm2056_vm5, %v2033_v21 }
 0x447   : > { %v2039_v24 = vpop.permute.xlu2 %2038 }
 0x448   : > { %2060 = vst.msk [vmem:[%s2462_s18 + $0x18] sm:$0xff] %vm2056_vm5, %v2039_v24 }
 0x44f   : > { %v2035_v22 = vpop.permute.xlu0 %2034 }
 0x450   : > { %2058 = vst.msk [vmem:[%s2462_s18 + $0x8] sm:$0xff] %vm2056_vm5, %v2035_v22 }
 0x457   : > { %v2037_v31 = vpop.permute.xlu1 %2036 }
 0x458   : > { %2059 = vst.msk [vmem:[%s2462_s18 + $0x10] sm:$0xff] %vm2056_vm5, %v2037_v31 }
 0x45f   : > { %v2045_v27 = vpop.permute.xlu2 %2044 }
 0x460   : > { %2063 = vst.msk [vmem:[%s2462_s18 + $0x30] sm:$0xff] %vm2056_vm5, %v2045_v27 }
 0x467   : > { %v2041_v34 = vpop.permute.xlu0 %2040 }
 0x468   : > { %2061 = vst.msk [vmem:[%s2462_s18 + $0x20] sm:$0xff] %vm2056_vm5, %v2041_v34 }
 0x46f   : > { %v2043_v37 = vpop.permute.xlu1 %2042 }
 0x470   : > { %2062 = vst.msk [vmem:[%s2462_s18 + $0x28] sm:$0xff] %vm2056_vm5, %v2043_v37 }
 0x47f   : > { %v2047_v61 = vpop.permute.xlu0 %2046 }
 0x480   : > { %2064 = vst.msk [vmem:[%s2462_s18 + $0x38] sm:$0xff] %vm2056_vm5, %v2047_v61 }
 0x481 PF: > { %s23_s25 = sadd.s32 1, %s2370_s25  }
 0x482   : > { %p20_p4 = scmp.ge.s32.totalorder %s23_s25, 4  }
 0x484   :  { %22 = sbr.rel (!%p20_p4) target bundleno = 1 (0x1), region = 120 }

// kernel: backbone_forward.13
= control target key start
LH: loop header
LB: loop body
LE: loop exit
PB: predicated region body
PF: predicated region fallthrough
CT: control target
= control target key end

     0   :  { %s410_s15 = smov 0   ;;  %s446_s0 = inlined_call_operand.vmem [shape: f32[2,4,4,32], index: 0, kind: input, shape index: {}]   ;;  %s447_s1 = inlined_call_operand.vmem [shape: f32[1,32], index: 1, kind: input, shape index: {}]   ;;  %s448_s2 = inlined_call_operand.vmem [shape: f32[1,32], index: 2, kind: input, shape index: {}]   ;;  %s449_s3 = inlined_call_operand.vmem [shape: bf16[32,16], index: 3, kind: input, shape index: {}]   ;;  %s450_s4 = inlined_call_operand.vmem [shape: f32[2,4,4,16], index: 4, kind: output, shape index: {}]  }
   0x1 LB: > { %s343_s16 = sadd.s32 4294967295, %s383_s15   ;;  %p347_p0 = scmp.ge.s32.totalorder %s383_s15, 1  ;;  %s383_s15 = sphi %s410_s15, %s14_s15  }
   0x2   : > { %p162_p1 = scmp.lt.s32.totalorder %s383_s15, 3 }
   0x4   : > { %p163_p2 = pnand %p347_p0, %p162_p1 }
   0x5   : > { %p188_p3 = scmp.lt.s32.totalorder (!%p163_p2), %s343_s16, 1 }
   0x6   : > { %166 = sbr.rel (%p163_p2) target bundleno = 171 (0xab), region = 36 }
   0xb   : > { %v366_v0 = vld [vmem:[%s449_s3 + $0x8] sm:$0xff]  ;;  %v375_v1 = vld [vmem:[%s447_s1] ss:$0 sm:$0xff]  ;;  %s452_s16 = smov (!%p188_p3, %s343_s16), 1  ;;  %vm259_vm0 = vcmask 261120   ;;  %vm283_vm1 = vcmask 125952  }
   0xc   : > { %v376_v2 = vld [vmem:[%s448_s2] ss:$0 sm:$0xff]  ;;  %269 = vmatpush.bf16.msra.mxu0 %v366_v0  ;;  %v207_v4 = vrot.slane %v375_v1, 4  ;;  %s363_s25 = sshll.u32 %s452_s16, 4 }
   0xd   : > { %v365_v3 = vld [vmem:[%s449_s3] sm:$0xff]  ;;  %s192_s28 = scalar_lea.vmem %s446_s0, %s363_s25  ;;  %v217_v5 = vrot.slane %v376_v2, 4  ;;  %s197_s5 = scalar_lea.vmem %s450_s4, %s363_s25 }
   0xe   : > { %v199_v6 = vld [vmem:[%s192_s28] sm:$0xf]  ;;  %v200_v7 = vld [vmem:[%s192_s28 + $0x4] sm:$0xf]  ;;  %v201_v8 = vld [vmem:[%s192_s28 + $0x8] sm:$0xf] }
   0xf   : > { %v202_v9 = vld [vmem:[%s192_s28 + $0xc] sm:$0xf]  ;;  %v209_v10 = vmul.f32 %v375_v1, %v199_v6  ;;  %v210_v11 = vmul.f32 %v207_v4, %v200_v7  ;;  %v211_v12 = vmul.f32 %v375_v1, %v201_v8 }
  0x10   : > { %270 = vmatpush.bf16.msra.mxu0 %v365_v3  ;;  %v212_v13 = vmul.f32 %v207_v4, %v202_v9 }
  0x11   : > { %v219_v14 = vadd.f32 %v376_v2, %v209_v10  ;;  %v220_v15 = vadd.f32 %v217_v5, %v210_v11  ;;  %v221_v16 = vadd.f32 %v376_v2, %v211_v12 }
  0x12   : > { %v222_v17 = vadd.f32 %v217_v5, %v212_v13 }
  0x13   : > { %v223_v18 = vmax.f32 %v219_v14, 0.0  ;;  %v224_v19 = vmax.f32 %v220_v15, 0.0  ;;  %v225_v20 = vmax.f32 %v221_v16, 0.0 }
  0x14   : > { %v226_v21 = vmax.f32 %v222_v17, 0.0 }
  0x15   : > { %231 = vst [vmem:[#allocation1] ss:$2 sm:$0xff] %v223_v18 }
  0x16   : > { %233 = vst [vmem:[#allocation1 + $0x1] ss:$2 sm:$0xff] %v224_v19 }
  0x17   : > { %235 = vst [vmem:[#allocation1 + $0x10] ss:$2 sm:$0xff] %v225_v20 }
  0x18   : > { %237 = vst [vmem:[#allocation1 + $0x11] ss:$2 sm:$0xff] %v226_v21 }
  0x1d   : > { %v238_v22 = vld.sshfl [vmem:[#allocation1] sm:$0xff pattern:$0x75316420] }
  0x1f   : > { %v239_v23 = vld.sshfl [vmem:[#allocation1 + $0x10] sm:$0xff pattern:$0x75316420] }
  0x20   : > { %v242_v24 = vpack.c.bf16 %v239_v23, %v238_v22 }
  0x22   : > { %360 = vmatmul.msk.bf16.vlgmr.msra.gmra.mxu0 %vm259_vm0, %v242_v24 }
  0x9f   : > { %v272_v25 = vpop.f32.mrf.mxu0 }
  0xa0   : > { %v279_v26 = vrot.slane %v272_v25, 4  ;;  %284 = vst.msk [vmem:[%s197_s5] sm:$0xf] %vm283_vm1, %v272_v25 }
  0xa2   : > { %285 = vst.msk [vmem:[%s197_s5 + $0x4] sm:$0xf] %vm283_vm1, %v279_v26 }
  0xa7   : > { %v274_v27 = vpop.f32.mrf.mxu0 }
  0xa8   : > { %v280_v28 = vrot.slane %v274_v27, 4  ;;  %286 = vst.msk [vmem:[%s197_s5 + $0x8] sm:$0xf] %vm283_vm1, %v274_v27 }
  0xaa   : > { %287 = vst.msk [vmem:[%s197_s5 + $0xc] sm:$0xf] %vm283_vm1, %v280_v28 }
  0xab PF: > { %s14_s15 = sadd.s32 1, %s383_s15  }
  0xac   : > { %p11_p4 = scmp.ge.s32.totalorder %s14_s15, 4  }
  0xae   :  { %13 = sbr.rel (!%p11_p4) target bundleno = 1 (0x1), region = 69 }

// kernel: backbone_forward.12
= control target key start
LH: loop header
LB: loop body
LE: loop exit
PB: predicated region body
PF: predicated region fallthrough
CT: control target
= control target key end

     0   :  { %s1894_s25 = smov 0   ;;  %s2061_s0 = inlined_call_operand.vmem [shape: f32[2,4,4,16], index: 0, kind: input, shape index: {}]   ;;  %s2062_s1 = inlined_call_operand.vmem [shape: f32[1,16], index: 1, kind: input, shape index: {}]   ;;  %s2063_s2 = inlined_call_operand.vmem [shape: f32[1,16], index: 2, kind: input, shape index: {}]   ;;  %s2064_s3 = inlined_call_operand.vmem [shape: bf16[16,16], index: 3, kind: input, shape index: {}]   ;;  %s2065_s4 = inlined_call_operand.vmem [shape: f32[1,16], index: 4, kind: input, shape index: {}]   ;;  %s2066_s5 = inlined_call_operand.vmem [shape: f32[1,16], index: 5, kind: input, shape index: {}]   ;;  %s2067_s6 = inlined_call_operand.vmem [shape: bf16[9,16,8], index: 6, kind: input, shape index: {}]   ;;  %s2068_s7 = inlined_call_operand.vmem [shape: f32[1,24], index: 7, kind: input, shape index: {}]   ;;  %s2069_s8 = inlined_call_operand.vmem [shape: f32[1,24], index: 8, kind: input, shape index: {}]   ;;  %s2070_s9 = inlined_call_operand.vmem [shape: bf16[24,16], index: 9, kind: input, shape index: {}]   ;;  %s2071_s10 = inlined_call_operand.vmem [shape: f32[1,16], index: 10, kind: input, shape index: {}]   ;;  %s2072_s11 = inlined_call_operand.vmem [shape: f32[1,16], index: 11, kind: input, shape index: {}]   ;;  %s2073_s12 = inlined_call_operand.vmem [shape: bf16[9,16,8], index: 12, kind: input, shape index: {}]   ;;  %s2074_s13 = inlined_call_operand.vmem [shape: f32[2,4,4,32], index: 13, kind: output, shape index: {}]  }
   0x1 LB: > { %s1629_s26 = sadd.s32 4294967295, %s1819_s25   ;;  %p1633_p0 = scmp.ge.s32.totalorder %s1819_s25, 1  ;;  %s1819_s25 = sphi %s1894_s25, %s23_s25  }
   0x2   : > { %p387_p1 = scmp.lt.s32.totalorder %s1819_s25, 3 }
   0x4   : > { %p388_p2 = pnand %p1633_p0, %p387_p1 }
   0x5   : > { %p431_p3 = scmp.lt.s32.totalorder (!%p388_p2), %s1629_s26, 1  ;;  %s1822_s14 = smov (!%p388_p2), 16  }
   0x6   : > { %391 = sbr.rel (%p388_p2) target bundleno = 1073 (0x431), region = 72 }
   0xb   : > { %v1774_v0 = vld [vmem:[%s2064_s3] sm:$0xff]  ;;  %s2076_s26 = smov (!%p431_p3, %s1629_s26), 1  ;;  %vm442_vm0 = vcmask 128000   ;;  %v1821_v1 = vmov 0.0   ;;  %vm453_vm1 = vcmask 125952   ;;  %vm510_vm2 = vcmask 130048  }
   0xc   : > { %521 = vmatpush.bf16.msra.mxu0 %v1774_v0  ;;  %443 = vst.msk [vmem:[#allocation2] sm:$0x3f] %vm442_vm0, %v1821_v1  ;;  %s1772_s29 = sshll.u32 %s2076_s26, 4  ;;  %v1805_v6 = vld [vmem:[%s2062_s1] ss:$0 sm:$0xff]  ;;  %v1776_v45 = vld [vmem:[%s2067_s6 + $0x8] sm:$0xff] }
   0xd   : > { %444 = vst.msk [vmem:[#allocation2 + $0x8] sm:$0x3f] %vm442_vm0, %v1821_v1  ;;  %s435_s15 = scalar_lea.vmem %s2061_s0, %s1772_s29  ;;  %s1913_s18 = scalar_lea.vmem %s2074_s13, %s1772_s29  ;;  %v1806_v7 = vld [vmem:[%s2063_s2] ss:$0 sm:$0xff]  ;;  %v466_v8 = vrot.slane %v1805_v6, 4  ;;  %614 = vmatpush.bf16.msra.mxu1 %v1776_v45  ;;  %v1777_v52 = vld [vmem:[%s2067_s6 + $0x10] sm:$0xff] }
   0xe   : > { %445 = vst.msk [vmem:[#allocation2 + $0x10] sm:$0x3f] %vm442_vm0, %v1821_v1  ;;  %v449_v2 = vld [vmem:[%s435_s15] sm:$0xf]  ;;  %v450_v3 = vld [vmem:[%s435_s15 + $0x4] sm:$0xf]  ;;  %683 = vmatpush.bf16.msra.mxu3 %v1777_v52 }
   0xf   : > { %v451_v4 = vld [vmem:[%s435_s15 + $0x8] sm:$0xf]  ;;  %v452_v5 = vld [vmem:[%s435_s15 + $0xc] sm:$0xf]  ;;  %454 = vst.msk [vmem:[%s1913_s18] sm:$0xf] %vm453_vm1, %v449_v2 }
  0x10   : > { %455 = vst.msk [vmem:[%s1913_s18 + $0x4] sm:$0xf] %vm453_vm1, %v450_v3  ;;  %v476_v10 = vrot.slane %v1806_v7, 4  ;;  %v1807_v30 = vld [vmem:[%s2065_s4] ss:$0 sm:$0xff]  ;;  %v1778_v55 = vld [vmem:[%s2067_s6 + $0x18] sm:$0xff] }
  0x11   : > { %456 = vst.msk [vmem:[%s1913_s18 + $0x8] sm:$0xf] %vm453_vm1, %v451_v4  ;;  %v1808_v31 = vld [vmem:[%s2066_s5] ss:$0 sm:$0xff]  ;;  %731 = vmatpush.bf16.msrb.mxu0 %v1778_v55  ;;  %vm1008_vm3 = vcmask 191616   ;;  %vm1073_vm4 = vcmask 1043456  }
  0x12   : > { %457 = vst.msk [vmem:[%s1913_s18 + $0xc] sm:$0xf] %vm453_vm1, %v452_v5  ;;  %v1775_v40 = vld [vmem:[%s2067_s6] sm:$0xff]  ;;  %vm1069_vm5 = vcmask 195584   ;;  %s1823_s15 = smov 24   ;;  %vm1569_vm6 = vcmask 257216  }
  0x13   : > { %446 = vst.msk [vmem:[#allocation2 + $0x18] sm:$0x3f] %vm442_vm0, %v1821_v1  ;;  %v553_v29 = vld [vmem:[#allocation2] sm:$0xf]  ;;  %637 = vmatpush.bf16.msra.mxu2 %v1775_v40  ;;  %v1779_v62 = vld [vmem:[%s2067_s6 + $0x20] sm:$0xff] }
  0x14   : > { %448 = vst.msk [vmem:[#allocation2 + $0x28] sm:$0x3f] %vm442_vm0, %v1821_v1  ;;  %v575_v46 = vld [vmem:[#allocation2 + $0x1] sm:$0xf]  ;;  %779 = vmatpush.bf16.msrb.mxu1 %v1779_v62 }
  0x15   : > { %447 = vst.msk [vmem:[#allocation2 + $0x20] sm:$0x3f] %vm442_vm0, %v1821_v1  ;;  %v644_v50 = vld [vmem:[#allocation2 + $0x2] sm:$0xf] }
  0x16   : > { %v458_v9 = vld [vmem:[%s1913_s18] sm:$0xf] }
  0x17   : > { %v459_v11 = vld [vmem:[%s1913_s18 + $0x4] sm:$0xf]  ;;  %v468_v12 = vmul.f32 %v1805_v6, %v458_v9 }
  0x18   : > { %v460_v13 = vld [vmem:[%s1913_s18 + $0x8] sm:$0xf]  ;;  %v469_v14 = vmul.f32 %v466_v8, %v459_v11 }
  0x19   : > { %v461_v15 = vld [vmem:[%s1913_s18 + $0xc] sm:$0xf]  ;;  %v470_v16 = vmul.f32 %v1805_v6, %v460_v13  ;;  %v478_v17 = vadd.f32 %v1806_v7, %v468_v12 }
  0x1a   : > { %v471_v18 = vmul.f32 %v466_v8, %v461_v15  ;;  %v479_v19 = vadd.f32 %v476_v10, %v469_v14  ;;  %v1780_v6 = vld [vmem:[%s2067_s6 + $0x28] sm:$0xff]  ;;  %v1781_v14 = vld [vmem:[%s2067_s6 + $0x30] sm:$0xff] }
  0x1b   : > { %v480_v20 = vadd.f32 %v1806_v7, %v470_v16  ;;  %v482_v21 = vmax.f32 %v478_v17, 0.0  ;;  %827 = vmatpush.bf16.msrb.mxu2 %v1780_v6  ;;  %876 = vmatpush.bf16.msrb.mxu3 %v1781_v14 }
  0x1c   : > { %v481_v22 = vadd.f32 %v476_v10, %v471_v18  ;;  %v483_v23 = vmax.f32 %v479_v19, 0.0 }
  0x1d   : > { %v484_v24 = vmax.f32 %v480_v20, 0.0  ;;  %490 = vst [vmem:[#allocation1] ss:$2 sm:$0xff] %v482_v21  ;;  %v1782_v21 = vld [vmem:[%s2067_s6 + $0x38] sm:$0xff] }
  0x1e   : > { %v485_v25 = vmax.f32 %v481_v22, 0.0  ;;  %492 = vst [vmem:[#allocation1 + $0x1] ss:$2 sm:$0xff] %v483_v23 }
  0x1f   : > { %494 = vst [vmem:[#allocation1 + $0x10] ss:$2 sm:$0xff] %v484_v24 }
  0x20   : > { %496 = vst [vmem:[#allocation1 + $0x11] ss:$2 sm:$0xff] %v485_v25 }
  0x25   : > { %v497_v26 = vld.sshfl [vmem:[#allocation1] sm:$0xff pattern:$0x75316420] }
  0x26   : > { %561 = vst [vmem:[#allocation1] ss:$2 sm:$0xff] %v553_v29 }
  0x27   : > { %v498_v27 = vld.sshfl [vmem:[#allocation1 + $0x10] sm:$0xff pattern:$0x75316420] }
  0x28   : > { %v501_v28 = vpack.c.bf16 %v498_v27, %v497_v26  ;;  %v1783_v27 = vld [vmem:[%s2067_s6 + $0x40] sm:$0xff] }
  0x2a   : > { %1642 = vmatmul.msk.bf16.vlgmr.msra.gmra.mxu0 %vm510_vm2, %v501_v28 }
  0x2b   : > { %924 = vmatpush.bf16.msra.mxu0 %v1782_v21 }
  0xa7   : > { %v523_v32 = vpop.f32.mrf.mxu0 }
  0xa8   : > { %v532_v33 = vmul.f32 %v1807_v30, %v523_v32 }
  0xaa   : > { %v538_v34 = vadd.f32 %v1808_v31, %v532_v33 }
  0xac   : > { %v540_v35 = vmax.f32 %v538_v34, 0.0 }
  0xae   : > { %v544_v36 = vrot.slane %v540_v35, 4  ;;  %549 = vst.msk [vmem:[#allocation2 + $0x9] sm:$0xf] %vm453_vm1, %v540_v35 }
  0xaf   : > { %v525_v37 = vpop.f32.mrf.mxu0 }
  0xb0   : > { %550 = vst.msk [vmem:[#allocation2 + $0x11] sm:$0xf] %vm453_vm1, %v544_v36  ;;  %v533_v38 = vmul.f32 %v1807_v30, %v525_v37 }
  0xb2   : > { %v539_v39 = vadd.f32 %v1808_v31, %v533_v38  ;;  %v840_v31 = vld [vmem:[#allocation2 + $0x28] sm:$0xf] }
  0xb3   : > { %v888_v38 = vld [vmem:[#allocation2 + $0x29] sm:$0xf] }
  0xb4   : > { %v541_v42 = vmax.f32 %v539_v39, 0.0 }
  0xb5   : > { %v554_v41 = vld [vmem:[#allocation2 + $0x8] sm:$0xf] }
  0xb6   : > { %563 = vst [vmem:[#allocation1 + $0x1] ss:$2 sm:$0xff] %v554_v41  ;;  %v545_v44 = vrot.slane %v541_v42, 4  ;;  %v576_v48 = vld [vmem:[#allocation2 + $0x9] sm:$0xf] }
  0xb7   : > { %v555_v43 = vld [vmem:[#allocation2 + $0x10] sm:$0xf]  ;;  %551 = vst.msk [vmem:[#allocation2 + $0x19] sm:$0xf] %vm453_vm1, %v541_v42  ;;  %v645_v53 = vld [vmem:[#allocation2 + $0xa] sm:$0xf] }
  0xb8   : > { %565 = vst [vmem:[#allocation1 + $0x10] ss:$2 sm:$0xff] %v555_v43  ;;  %v577_v57 = vld [vmem:[#allocation2 + $0x11] sm:$0xf]  ;;  %v692_v60 = vld [vmem:[#allocation2 + $0x8] sm:$0xf] }
  0xb9   : > { %552 = vst.msk [vmem:[#allocation2 + $0x21] sm:$0xf] %vm453_vm1, %v545_v44  ;;  %v693_v61 = vld [vmem:[#allocation2 + $0x10] sm:$0xf]  ;;  %v740_v4 = vld [vmem:[#allocation2 + $0x9] sm:$0xf] }
  0xba   : > { %v646_v63 = vld [vmem:[#allocation2 + $0x12] sm:$0xf]  ;;  %v788_v12 = vld [vmem:[#allocation2 + $0xa] sm:$0xf] }
  0xbb   : > { %v741_v5 = vld [vmem:[#allocation2 + $0x11] sm:$0xf]  ;;  %v936_v42 = vld [vmem:[#allocation2 + $0x2a] sm:$0xf] }
  0xbc   : > { %v789_v13 = vld [vmem:[#allocation2 + $0x12] sm:$0xf] }
  0xbd   : > { %v568_v47 = vld.sshfl [vmem:[#allocation1] sm:$0xff pattern:$0x75316420]  ;;  %v837_v20 = vld [vmem:[#allocation2 + $0x10] sm:$0xf] }
  0xbe   : > { %583 = vst [vmem:[#allocation1] ss:$2 sm:$0xff] %v575_v46  ;;  %v556_v49 = vld [vmem:[#allocation2 + $0x18] sm:$0xf]  ;;  %v885_v28 = vld [vmem:[#allocation2 + $0x11] sm:$0xf] }
  0xbf   : > { %585 = vst [vmem:[#allocation1 + $0x1] ss:$2 sm:$0xff] %v576_v48  ;;  %v578_v58 = vld [vmem:[#allocation2 + $0x19] sm:$0xf]  ;;  %v933_v35 = vld [vmem:[#allocation2 + $0x12] sm:$0xf] }
  0xc0   : > { %567 = vst [vmem:[#allocation1 + $0x11] ss:$2 sm:$0xff] %v556_v49  ;;  %v647_v1 = vld [vmem:[#allocation2 + $0x1a] sm:$0xf]  ;;  %v695_v9 = vld [vmem:[#allocation2 + $0x20] sm:$0xf] }
  0xc1   : > { %v694_v8 = vld [vmem:[#allocation2 + $0x18] sm:$0xf]  ;;  %v743_v17 = vld [vmem:[#allocation2 + $0x21] sm:$0xf] }
  0xc2   : > { %v742_v16 = vld [vmem:[#allocation2 + $0x19] sm:$0xf]  ;;  %v791_v25 = vld [vmem:[#allocation2 + $0x22] sm:$0xf] }
  0xc3   : > { %v838_v22 = vld [vmem:[#allocation2 + $0x18] sm:$0xf]  ;;  %v839_v33 = vld [vmem:[#allocation2 + $0x20] sm:$0xf] }
  0xc4   : > { %v790_v24 = vld [vmem:[#allocation2 + $0x1a] sm:$0xf]  ;;  %v887_v40 = vld [vmem:[#allocation2 + $0x21] sm:$0xf] }
  0xc5   : > { %v886_v30 = vld [vmem:[#allocation2 + $0x19] sm:$0xf]  ;;  %v935_v44 = vld [vmem:[#allocation2 + $0x22] sm:$0xf] }
  0xc6   : > { %v590_v51 = vld.sshfl [vmem:[#allocation1] sm:$0xff pattern:$0x75316420] }
  0xc7   : > { %652 = vst [vmem:[#allocation1] ss:$2 sm:$0xff] %v644_v50  ;;  %v569_v54 = vld.sshfl [vmem:[#allocation1 + $0x10] sm:$0xff pattern:$0x75316420] }
  0xc8   : > { %654 = vst [vmem:[#allocation1 + $0x1] ss:$2 sm:$0xff] %v645_v53  ;;  %v572_v56 = vpack.c.bf16 %v569_v54, %v568_v47  ;;  %v934_v37 = vld [vmem:[#allocation2 + $0x1a] sm:$0xf] }
  0xc9   : > { %587 = vst [vmem:[#allocation1 + $0x10] ss:$2 sm:$0xff] %v577_v57 }
  0xca   : > { %1654 = vmatmul.msk.bf16.vlgmr.msra.gmra.mxu2 %vm510_vm2, %v572_v56  ;;  %589 = vst [vmem:[#allocation1 + $0x11] ss:$2 sm:$0xff] %v578_v58 }
  0xcf   : > { %v659_v59 = vld.sshfl [vmem:[#allocation1] sm:$0xff pattern:$0x75316420] }
  0xd0   : > { %700 = vst [vmem:[#allocation1] ss:$2 sm:$0xff] %v692_v60 }
  0xd1   : > { %702 = vst [vmem:[#allocation1 + $0x1] ss:$2 sm:$0xff] %v693_v61  ;;  %v591_v0 = vld.sshfl [vmem:[#allocation1 + $0x10] sm:$0xff pattern:$0x75316420] }
  0xd2   : > { %656 = vst [vmem:[#allocation1 + $0x10] ss:$2 sm:$0xff] %v646_v63  ;;  %v594_v2 = vpack.c.bf16 %v591_v0, %v590_v51 }
  0xd3   : > { %658 = vst [vmem:[#allocation1 + $0x11] ss:$2 sm:$0xff] %v647_v1 }
  0xd4   : > { %1649 = vmatmul.msk.bf16.vlgmr.msra.gmra.mxu1 %vm510_vm2, %v594_v2 }
  0xd5   : > { %972 = vmatpush.bf16.msra.mxu1 %v1783_v27 }
  0xd8   : > { %v707_v3 = vld.sshfl [vmem:[#allocation1] sm:$0xff pattern:$0x75316420] }
  0xd9   : > { %748 = vst [vmem:[#allocation1] ss:$2 sm:$0xff] %v740_v4 }
  0xda   : > { %750 = vst [vmem:[#allocation1 + $0x1] ss:$2 sm:$0xff] %v741_v5  ;;  %v660_v7 = vld.sshfl [vmem:[#allocation1 + $0x10] sm:$0xff pattern:$0x75316420] }
  0xdb   : > { %704 = vst [vmem:[#allocation1 + $0x10] ss:$2 sm:$0xff] %v694_v8  ;;  %v663_v10 = vpack.c.bf16 %v660_v7, %v659_v59 }
  0xdc   : > { %706 = vst [vmem:[#allocation1 + $0x11] ss:$2 sm:$0xff] %v695_v9 }
  0xdd   : > { %1661 = vmatmul.msk.bf16.vlgmr.msra.gmra.mxu3 %vm510_vm2, %v663_v10 }
  0xe1   : > { %v755_v11 = vld.sshfl [vmem:[#allocation1] sm:$0xff pattern:$0x75316420] }
  0xe2   : > { %796 = vst [vmem:[#allocation1] ss:$2 sm:$0xff] %v788_v12 }
  0xe3   : > { %798 = vst [vmem:[#allocation1 + $0x1] ss:$2 sm:$0xff] %v789_v13  ;;  %v708_v15 = vld.sshfl [vmem:[#allocation1 + $0x10] sm:$0xff pattern:$0x75316420] }
  0xe4   : > { %752 = vst [vmem:[#allocation1 + $0x10] ss:$2 sm:$0xff] %v742_v16  ;;  %v711_v18 = vpack.c.bf16 %v708_v15, %v707_v3 }
  0xe5   : > { %754 = vst [vmem:[#allocation1 + $0x11] ss:$2 sm:$0xff] %v743_v17 }
  0xe6   : > { %1668 = vmatmul.msk.bf16.vlgmr.msrb.gmra.mxu0 %vm510_vm2, %v711_v18 }
  0xea   : > { %v803_v19 = vld.sshfl [vmem:[#allocation1] sm:$0xff pattern:$0x75316420] }
  0xeb   : > { %845 = vst [vmem:[#allocation1] ss:$2 sm:$0xff] %v837_v20 }
  0xec   : > { %847 = vst [vmem:[#allocation1 + $0x1] ss:$2 sm:$0xff] %v838_v22  ;;  %v756_v23 = vld.sshfl [vmem:[#allocation1 + $0x10] sm:$0xff pattern:$0x75316420] }
  0xed   : > { %800 = vst [vmem:[#allocation1 + $0x10] ss:$2 sm:$0xff] %v790_v24  ;;  %v759_v26 = vpack.c.bf16 %v756_v23, %v755_v11 }
  0xee   : > { %802 = vst [vmem:[#allocation1 + $0x11] ss:$2 sm:$0xff] %v791_v25  ;;  %v1059_v25 = vld [vmem:[%s2070_s9 + $0x8] sm:$0xf] }
  0xef   : > { %1675 = vmatmul.msk.bf16.vlgmr.msrb.gmra.mxu1 %vm510_vm2, %v759_v26  ;;  %v1065_v26 = vunpack.c.l.b16 %v1059_v25 }
  0xf3   : > { %v852_v29 = vld.sshfl [vmem:[#allocation1] sm:$0xff pattern:$0x75316420] }
  0xf4   : > { %893 = vst [vmem:[#allocation1] ss:$2 sm:$0xff] %v885_v28  ;;  %v1067_v28 = vpack.c.b16 %v1065_v26, %v1065_v26 }
  0xf5   : > { %895 = vst [vmem:[#allocation1 + $0x1] ss:$2 sm:$0xff] %v886_v30  ;;  %v804_v32 = vld.sshfl [vmem:[#allocation1 + $0x10] sm:$0xff pattern:$0x75316420]  ;;  %v1784_v30 = vld [vmem:[%s2070_s9] sm:$0xff] }
  0xf6   : > { %849 = vst [vmem:[#allocation1 + $0x10] ss:$2 sm:$0xff] %v839_v33  ;;  %v807_v34 = vpack.c.bf16 %v804_v32, %v803_v19  ;;  %v1810_v32 = vld [vmem:[%s2069_s8] ss:$0 sm:$0xff] }
  0xf7   : > { %851 = vst [vmem:[#allocation1 + $0x11] ss:$2 sm:$0xff] %v840_v31  ;;  %v1809_v31 = vld [vmem:[%s2068_s7] ss:$0 sm:$0xff] }
  0xf8   : > { %1682 = vmatmul.msk.bf16.vlgmr.msrb.gmra.mxu2 %vm510_vm2, %v807_v34 }
  0xfc   : > { %v900_v36 = vld.sshfl [vmem:[#allocation1] sm:$0xff pattern:$0x75316420] }
  0xfd   : > { %941 = vst [vmem:[#allocation1] ss:$2 sm:$0xff] %v933_v35 }
  0xfe   : > { %943 = vst [vmem:[#allocation1 + $0x1] ss:$2 sm:$0xff] %v934_v37  ;;  %v853_v39 = vld.sshfl [vmem:[#allocation1 + $0x10] sm:$0xff pattern:$0x75316420] }
  0xff   : > { %897 = vst [vmem:[#allocation1 + $0x10] ss:$2 sm:$0xff] %v887_v40  ;;  %v856_v41 = vpack.c.bf16 %v853_v39, %v852_v29  ;;  %v1075_v29 = vsel %vm1073_vm4, %v1067_v28, 0  ;;  %v1021_v39 = vrot.slane %v1809_v31, 4  ;;  %v1031_v40 = vrot.slane %v1810_v32, 4 }
 0x100   : > { %899 = vst [vmem:[#allocation1 + $0x11] ss:$2 sm:$0xff] %v888_v38  ;;  %1083 = vmatpush.bf16.msra.mxu2 %v1075_v29 }
 0x101   : > { %1689 = vmatmul.msk.bf16.vlgmr.msrb.gmra.mxu3 %vm510_vm2, %v856_v41 }
 0x104   : > { %1084 = vmatpush.bf16.msra.mxu2 %v1784_v30 }
 0x105   : > { %v948_v46 = vld.sshfl [vmem:[#allocation1] sm:$0xff pattern:$0x75316420] }
 0x107   : > { %v901_v43 = vld.sshfl [vmem:[#allocation1 + $0x10] sm:$0xff pattern:$0x75316420] }
 0x108   : > { %945 = vst [vmem:[#allocation1 + $0x10] ss:$2 sm:$0xff] %v935_v44  ;;  %v904_v45 = vpack.c.bf16 %v901_v43, %v900_v36 }
 0x109   : > { %947 = vst [vmem:[#allocation1 + $0x11] ss:$2 sm:$0xff] %v936_v42 }
 0x10a   : > { %1696 = vmatmul.msk.bf16.vlgmr.msra.gmra.mxu0 %vm510_vm2, %v904_v45 }
 0x110   : > { %v949_v47 = vld.sshfl [vmem:[#allocation1 + $0x10] sm:$0xff pattern:$0x75316420] }
 0x111   : > { %v952_v48 = vpack.c.bf16 %v949_v47, %v948_v46 }
 0x113   : > { %1703 = vmatmul.msk.bf16.vlgmr.msra.gmra.mxu1 %vm510_vm2, %v952_v48 }
 0x14d   : > { %v639_v50 = vpop.f32.mrf.mxu2 }
 0x151   : > { %v616_v49 = vpop.f32.mrf.mxu1 }
 0x152   : > { %v640_v57 = vadd.f32 %v639_v50, %v616_v49 }
 0x155   : > { %v641_v54 = vpop.f32.mrf.mxu2 }
 0x159   : > { %v618_v52 = vpop.f32.mrf.mxu1 }
 0x15a   : > { %v642_v63 = vadd.f32 %v641_v54, %v618_v52 }
 0x160   : > { %v685_v51 = vpop.f32.mrf.mxu3 }
 0x161   : > { %v690_v58 = vadd.f32 %v685_v51, %v640_v57 }
 0x163   : > { %v733_v53 = vpop.f32.mrf.mxu0 }
 0x164   : > { %v738_v61 = vadd.f32 %v733_v53, %v690_v58  ;;  %v1115_v53 = vld [vmem:[#allocation2] sm:$0xf]  ;;  %v1811_v58 = vld [vmem:[%s2071_s10] ss:$0 sm:$0xff] }
 0x168   : > { %v687_v55 = vpop.f32.mrf.mxu3 }
 0x169   : > { %v691_v2 = vadd.f32 %v687_v55, %v642_v63 }
 0x16b   : > { %v735_v59 = vpop.f32.mrf.mxu0 }
 0x16c   : > { %v781_v56 = vpop.f32.mrf.mxu1  ;;  %v739_v6 = vadd.f32 %v735_v59, %v691_v2  ;;  %v1812_v59 = vld [vmem:[%s2072_s11] ss:$0 sm:$0xff] }
 0x16d   : > { %v786_v0 = vadd.f32 %v781_v56, %v738_v61  ;;  %v1785_v61 = vld [vmem:[%s2073_s12] sm:$0xff] }
 0x16e   : > { %1199 = vmatpush.bf16.msrb.mxu0 %v1785_v61 }
 0x174   : > { %v783_v1 = vpop.f32.mrf.mxu1 }
 0x175   : > { %v787_v8 = vadd.f32 %v783_v1, %v739_v6 }
 0x17b   : > { %v829_v60 = vpop.f32.mrf.mxu2 }
 0x17c   : > { %v834_v3 = vadd.f32 %v829_v60, %v786_v0 }
 0x183   : > { %v831_v7 = vpop.f32.mrf.mxu2 }
 0x184   : > { %v878_v62 = vpop.f32.mrf.mxu3  ;;  %v835_v12 = vadd.f32 %v831_v7, %v787_v8 }
 0x185   : > { %v883_v5 = vadd.f32 %v878_v62, %v834_v3 }
 0x187   : > { %v926_v4 = vpop.f32.mrf.mxu0 }
 0x188   : > { %v931_v9 = vadd.f32 %v926_v4, %v883_v5  ;;  %v1786_v4 = vld [vmem:[%s2073_s12 + $0x8] sm:$0xff] }
 0x189   : > { %1176 = vmatpush.bf16.msra.mxu3 %v1786_v4 }
 0x18c   : > { %v880_v10 = vpop.f32.mrf.mxu3 }
 0x18d   : > { %v884_v14 = vadd.f32 %v880_v10, %v835_v12  ;;  %v1787_v10 = vld [vmem:[%s2073_s12 + $0x10] sm:$0xff] }
 0x18e   : > { %1245 = vmatpush.bf16.msrb.mxu1 %v1787_v10 }
 0x18f   : > { %v928_v16 = vpop.f32.mrf.mxu0 }
 0x190   : > { %v974_v11 = vpop.f32.mrf.mxu1  ;;  %v932_v17 = vadd.f32 %v928_v16, %v884_v14 }
 0x191   : > { %v979_v13 = vadd.f32 %v974_v11, %v931_v9  ;;  %v1137_v11 = vld [vmem:[#allocation2 + $0x1] sm:$0xf] }
 0x193   : > { %v983_v15 = vrot.slane %v979_v13, 4  ;;  %985 = vst [vmem:[#allocation1] ss:$2 sm:$0xff] %v979_v13 }
 0x195   : > { %988 = vst [vmem:[#allocation1 + $0x10] ss:$2 sm:$0xff] %v983_v15  ;;  %v1206_v15 = vld [vmem:[#allocation2 + $0x2] sm:$0xf] }
 0x198   : > { %v976_v18 = vpop.f32.mrf.mxu1 }
 0x199   : > { %v980_v19 = vadd.f32 %v976_v18, %v932_v17  ;;  %v1788_v17 = vld [vmem:[%s2073_s12 + $0x18] sm:$0xff] }
 0x19a   : > { %v986_v20 = vld.sshfl [vmem:[#allocation1] sm:$0xff pattern:$0x75316420]  ;;  %1293 = vmatpush.bf16.msrb.mxu2 %v1788_v17 }
 0x19b   : > { %v984_v21 = vrot.slane %v980_v19, 4  ;;  %991 = vst [vmem:[#allocation1 + $0x20] ss:$2 sm:$0xff] %v980_v19  ;;  %996 = vrot.lane.b32.xlu0 %v986_v20, %s1822_s14  ;;  %v1789_v19 = vld [vmem:[%s2073_s12 + $0x20] sm:$0xff] }
 0x19c   : > { %v989_v22 = vld.sshfl [vmem:[#allocation1 + $0x10] sm:$0xff pattern:$0x75316420]  ;;  %1341 = vmatpush.bf16.msrb.mxu3 %v1789_v19 }
 0x19d   : > { %994 = vst [vmem:[#allocation1 + $0x30] ss:$2 sm:$0xff] %v984_v21 }
 0x1a2   : > { %v992_v23 = vld.sshfl [vmem:[#allocation1 + $0x20] sm:$0xff pattern:$0x75316420] }
 0x1a3   : > { %998 = vrot.lane.b32.xlu0 %v989_v22, %s1822_s14  ;;  %1000 = vrot.lane.b32.xlu1 %v992_v23, %s1822_s14 }
 0x1a4   : > { %v995_v24 = vld.sshfl [vmem:[#allocation1 + $0x30] sm:$0xff pattern:$0x75316420] }
 0x1ab   : > { %1002 = vrot.lane.b32.xlu1 %v995_v24, %s1822_s14 }
 0x20d   : > { %v997_v27 = vpop.permute.xlu0 %996 }
 0x20e   : > { %1009 = vst.msk [vmem:[%s1913_s18] sm:$0xf] %vm1008_vm3, %v997_v27  ;;  %v1790_v27 = vld [vmem:[%s2073_s12 + $0x28] sm:$0xff] }
 0x20f   : > { %1389 = vmatpush.bf16.msra.mxu0 %v1790_v27 }
 0x215   : > { %v1013_v33 = vld [vmem:[%s1913_s18] sm:$0xf]  ;;  %v999_v34 = vpop.permute.xlu0 %998  ;;  %v1001_v35 = vpop.permute.xlu1 %1000 }
 0x216   : > { %v1023_v36 = vmul.f32 %v1809_v31, %v1013_v33  ;;  %1010 = vst.msk [vmem:[%s1913_s18 + $0x4] sm:$0xf] %vm1008_vm3, %v999_v34 }
 0x217   : > { %1011 = vst.msk [vmem:[%s1913_s18 + $0x8] sm:$0xf] %vm1008_vm3, %v1001_v35  ;;  %v1791_v35 = vld [vmem:[%s2073_s12 + $0x30] sm:$0xff] }
 0x218   : > { %v1033_v37 = vadd.f32 %v1810_v32, %v1023_v36  ;;  %v1792_v36 = vld [vmem:[%s2073_s12 + $0x38] sm:$0xff]  ;;  %1437 = vmatpush.bf16.msra.mxu1 %v1791_v35 }
 0x21a   : > { %v1037_v38 = vmax.f32 %v1033_v37, 0.0 }
 0x21c   : > { %1045 = vst [vmem:[#allocation1] ss:$2 sm:$0xff] %v1037_v38 }
 0x21d   : > { %v1014_v41 = vld [vmem:[%s1913_s18 + $0x4] sm:$0xf]  ;;  %v1003_v42 = vpop.permute.xlu1 %1002 }
 0x21e   : > { %v1024_v43 = vmul.f32 %v1021_v39, %v1014_v41  ;;  %v1015_v44 = vld [vmem:[%s1913_s18 + $0x8] sm:$0xf]  ;;  %1012 = vst.msk [vmem:[%s1913_s18 + $0xc] sm:$0xf] %vm1008_vm3, %v1003_v42 }
 0x21f   : > { %v1025_v45 = vmul.f32 %v1809_v31, %v1015_v44  ;;  %v1793_v44 = vld [vmem:[%s2073_s12 + $0x40] sm:$0xff] }
 0x220   : > { %v1034_v46 = vadd.f32 %v1031_v40, %v1024_v43 }
 0x221   : > { %v1035_v47 = vadd.f32 %v1810_v32, %v1025_v45 }
 0x222   : > { %v1038_v48 = vmax.f32 %v1034_v46, 0.0 }
 0x223   : > { %v1039_v49 = vmax.f32 %v1035_v47, 0.0 }
 0x224   : > { %1047 = vst [vmem:[#allocation1 + $0x1] ss:$2 sm:$0xff] %v1038_v48 }
 0x225   : > { %1049 = vst [vmem:[#allocation1 + $0x10] ss:$2 sm:$0xff] %v1039_v49  ;;  %v1016_v50 = vld [vmem:[%s1913_s18 + $0xc] sm:$0xf] }
 0x226   : > { %v1026_v51 = vmul.f32 %v1021_v39, %v1016_v50 }
 0x228   : > { %v1036_v52 = vadd.f32 %v1031_v40, %v1026_v51 }
 0x22a   : > { %v1040_v54 = vmax.f32 %v1036_v52, 0.0 }
 0x22b   : > { %v1052_v55 = vld.sshfl [vmem:[#allocation1] sm:$0xff pattern:$0x75316420] }
 0x22c   : > { %1051 = vst [vmem:[#allocation1 + $0x11] ss:$2 sm:$0xff] %v1040_v54 }
 0x22d   : > { %1123 = vst [vmem:[#allocation1] ss:$2 sm:$0xff] %v1115_v53 }
 0x233   : > { %v1053_v56 = vld.sshfl [vmem:[#allocation1 + $0x10] sm:$0xff pattern:$0x75316420] }
 0x234   : > { %v1056_v57 = vpack.c.bf16 %v1053_v56, %v1052_v55 }
 0x236   : > { %1708 = vmatmul.msk.bf16.vlgmr.msra.gmra.mxu2 %vm1069_vm5, %v1056_v57 }
 0x237   : > { %1485 = vmatpush.bf16.msra.mxu2 %v1792_v36 }
 0x2b9   : > { %v1086_v60 = vpop.f32.mrf.mxu2 }
 0x2ba   : > { %v1095_v62 = vmul.f32 %v1811_v58, %v1086_v60 }
 0x2bc   : > { %v1101_v63 = vadd.f32 %v1812_v59, %v1095_v62 }
 0x2be   : > { %v1103_v0 = vmax.f32 %v1101_v63, 0.0 }
 0x2c0   : > { %v1107_v1 = vrot.slane %v1103_v0, 4  ;;  %1111 = vst.msk [vmem:[#allocation2 + $0x9] sm:$0xf] %vm453_vm1, %v1103_v0 }
 0x2c1   : > { %v1088_v2 = vpop.f32.mrf.mxu2 }
 0x2c2   : > { %1112 = vst.msk [vmem:[#allocation2 + $0x11] sm:$0xf] %vm453_vm1, %v1107_v1  ;;  %v1096_v3 = vmul.f32 %v1811_v58, %v1088_v2  ;;  %v1449_v2 = vld [vmem:[#allocation2 + $0x29] sm:$0xf] }
 0x2c4   : > { %v1102_v5 = vadd.f32 %v1812_v59, %v1096_v3  ;;  %v1401_v59 = vld [vmem:[#allocation2 + $0x28] sm:$0xf] }
 0x2c6   : > { %v1104_v7 = vmax.f32 %v1102_v5, 0.0 }
 0x2c7   : > { %v1116_v6 = vld [vmem:[#allocation2 + $0x8] sm:$0xf] }
 0x2c8   : > { %1125 = vst [vmem:[#allocation1 + $0x1] ss:$2 sm:$0xff] %v1116_v6  ;;  %v1108_v9 = vrot.slane %v1104_v7, 4  ;;  %v1138_v13 = vld [vmem:[#allocation2 + $0x9] sm:$0xf] }
 0x2c9   : > { %v1117_v8 = vld [vmem:[#allocation2 + $0x10] sm:$0xf]  ;;  %1113 = vst.msk [vmem:[#allocation2 + $0x19] sm:$0xf] %vm453_vm1, %v1104_v7  ;;  %v1207_v18 = vld [vmem:[#allocation2 + $0xa] sm:$0xf] }
 0x2ca   : > { %1127 = vst [vmem:[#allocation1 + $0x10] ss:$2 sm:$0xff] %v1117_v8  ;;  %v1139_v20 = vld [vmem:[#allocation2 + $0x11] sm:$0xf]  ;;  %v1254_v22 = vld [vmem:[#allocation2 + $0x8] sm:$0xf] }
 0x2cb   : > { %1114 = vst.msk [vmem:[#allocation2 + $0x21] sm:$0xf] %vm453_vm1, %v1108_v9  ;;  %v1255_v26 = vld [vmem:[#allocation2 + $0x10] sm:$0xf]  ;;  %v1302_v30 = vld [vmem:[#allocation2 + $0x9] sm:$0xf] }
 0x2cc   : > { %v1208_v28 = vld [vmem:[#allocation2 + $0x12] sm:$0xf]  ;;  %v1350_v39 = vld [vmem:[#allocation2 + $0xa] sm:$0xf] }
 0x2cd   : > { %v1303_v34 = vld [vmem:[#allocation2 + $0x11] sm:$0xf]  ;;  %v1497_v6 = vld [vmem:[#allocation2 + $0x2a] sm:$0xf] }
 0x2ce   : > { %v1351_v43 = vld [vmem:[#allocation2 + $0x12] sm:$0xf] }
 0x2cf   : > { %v1130_v12 = vld.sshfl [vmem:[#allocation1] sm:$0xff pattern:$0x75316420]  ;;  %v1398_v47 = vld [vmem:[#allocation2 + $0x10] sm:$0xf] }
 0x2d0   : > { %1145 = vst [vmem:[#allocation1] ss:$2 sm:$0xff] %v1137_v11  ;;  %v1118_v14 = vld [vmem:[#allocation2 + $0x18] sm:$0xf]  ;;  %v1446_v54 = vld [vmem:[#allocation2 + $0x11] sm:$0xf] }
 0x2d1   : > { %1147 = vst [vmem:[#allocation1 + $0x1] ss:$2 sm:$0xff] %v1138_v13  ;;  %v1140_v23 = vld [vmem:[#allocation2 + $0x19] sm:$0xf]  ;;  %v1494_v62 = vld [vmem:[#allocation2 + $0x12] sm:$0xf] }
 0x2d2   : > { %1129 = vst [vmem:[#allocation1 + $0x11] ss:$2 sm:$0xff] %v1118_v14  ;;  %v1209_v31 = vld [vmem:[#allocation2 + $0x1a] sm:$0xf]  ;;  %v1257_v40 = vld [vmem:[#allocation2 + $0x20] sm:$0xf] }
 0x2d3   : > { %v1256_v37 = vld [vmem:[#allocation2 + $0x18] sm:$0xf]  ;;  %v1305_v48 = vld [vmem:[#allocation2 + $0x21] sm:$0xf] }
 0x2d4   : > { %v1304_v45 = vld [vmem:[#allocation2 + $0x19] sm:$0xf]  ;;  %v1353_v55 = vld [vmem:[#allocation2 + $0x22] sm:$0xf] }
 0x2d5   : > { %v1399_v51 = vld [vmem:[#allocation2 + $0x18] sm:$0xf]  ;;  %v1400_v60 = vld [vmem:[#allocation2 + $0x20] sm:$0xf] }
 0x2d6   : > { %v1352_v52 = vld [vmem:[#allocation2 + $0x1a] sm:$0xf]  ;;  %v1448_v3 = vld [vmem:[#allocation2 + $0x21] sm:$0xf] }
 0x2d7   : > { %v1447_v58 = vld [vmem:[#allocation2 + $0x19] sm:$0xf]  ;;  %v1496_v7 = vld [vmem:[#allocation2 + $0x22] sm:$0xf] }
 0x2d8   : > { %v1152_v16 = vld.sshfl [vmem:[#allocation1] sm:$0xff pattern:$0x75316420] }
 0x2d9   : > { %1214 = vst [vmem:[#allocation1] ss:$2 sm:$0xff] %v1206_v15  ;;  %v1131_v21 = vld.sshfl [vmem:[#allocation1 + $0x10] sm:$0xff pattern:$0x75316420] }
 0x2da   : > { %1216 = vst [vmem:[#allocation1 + $0x1] ss:$2 sm:$0xff] %v1207_v18  ;;  %v1134_v24 = vpack.c.bf16 %v1131_v21, %v1130_v12  ;;  %v1495_v1 = vld [vmem:[#allocation2 + $0x1a] sm:$0xf] }
 0x2db   : > { %1149 = vst [vmem:[#allocation1 + $0x10] ss:$2 sm:$0xff] %v1139_v20 }
 0x2dc   : > { %1151 = vst [vmem:[#allocation1 + $0x11] ss:$2 sm:$0xff] %v1140_v23  ;;  %1720 = vmatmul.msk.bf16.vlgmr.msrb.gmra.mxu0 %vm510_vm2, %v1134_v24 }
 0x2e1   : > { %v1221_v25 = vld.sshfl [vmem:[#allocation1] sm:$0xff pattern:$0x75316420] }
 0x2e2   : > { %1262 = vst [vmem:[#allocation1] ss:$2 sm:$0xff] %v1254_v22 }
 0x2e3   : > { %1264 = vst [vmem:[#allocation1 + $0x1] ss:$2 sm:$0xff] %v1255_v26  ;;  %v1153_v29 = vld.sshfl [vmem:[#allocation1 + $0x10] sm:$0xff pattern:$0x75316420] }
 0x2e4   : > { %v1156_v32 = vpack.c.bf16 %v1153_v29, %v1152_v16  ;;  %1218 = vst [vmem:[#allocation1 + $0x10] ss:$2 sm:$0xff] %v1208_v28 }
 0x2e5   : > { %1220 = vst [vmem:[#allocation1 + $0x11] ss:$2 sm:$0xff] %v1209_v31 }
 0x2e6   : > { %1715 = vmatmul.msk.bf16.vlgmr.msra.gmra.mxu3 %vm510_vm2, %v1156_v32 }
 0x2e7   : > { %1533 = vmatpush.bf16.msra.mxu3 %v1793_v44 }
 0x2ea   : > { %v1269_v33 = vld.sshfl [vmem:[#allocation1] sm:$0xff pattern:$0x75316420] }
 0x2eb   : > { %1310 = vst [vmem:[#allocation1] ss:$2 sm:$0xff] %v1302_v30 }
 0x2ec   : > { %1312 = vst [vmem:[#allocation1 + $0x1] ss:$2 sm:$0xff] %v1303_v34  ;;  %v1222_v38 = vld.sshfl [vmem:[#allocation1 + $0x10] sm:$0xff pattern:$0x75316420] }
 0x2ed   : > { %v1225_v41 = vpack.c.bf16 %v1222_v38, %v1221_v25  ;;  %1266 = vst [vmem:[#allocation1 + $0x10] ss:$2 sm:$0xff] %v1256_v37 }
 0x2ee   : > { %1268 = vst [vmem:[#allocation1 + $0x11] ss:$2 sm:$0xff] %v1257_v40 }
 0x2ef   : > { %1727 = vmatmul.msk.bf16.vlgmr.msrb.gmra.mxu1 %vm510_vm2, %v1225_v41 }
 0x2f3   : > { %v1317_v42 = vld.sshfl [vmem:[#allocation1] sm:$0xff pattern:$0x75316420] }
 0x2f4   : > { %1358 = vst [vmem:[#allocation1] ss:$2 sm:$0xff] %v1350_v39 }
 0x2f5   : > { %1360 = vst [vmem:[#allocation1 + $0x1] ss:$2 sm:$0xff] %v1351_v43  ;;  %v1270_v46 = vld.sshfl [vmem:[#allocation1 + $0x10] sm:$0xff pattern:$0x75316420] }
 0x2f6   : > { %v1273_v49 = vpack.c.bf16 %v1270_v46, %v1269_v33  ;;  %1314 = vst [vmem:[#allocation1 + $0x10] ss:$2 sm:$0xff] %v1304_v45 }
 0x2f7   : > { %1316 = vst [vmem:[#allocation1 + $0x11] ss:$2 sm:$0xff] %v1305_v48 }
 0x2f8   : > { %1734 = vmatmul.msk.bf16.vlgmr.msrb.gmra.mxu2 %vm510_vm2, %v1273_v49 }
 0x2fc   : > { %v1365_v50 = vld.sshfl [vmem:[#allocation1] sm:$0xff pattern:$0x75316420] }
 0x2fd   : > { %1406 = vst [vmem:[#allocation1] ss:$2 sm:$0xff] %v1398_v47 }
 0x2fe   : > { %1408 = vst [vmem:[#allocation1 + $0x1] ss:$2 sm:$0xff] %v1399_v51  ;;  %v1318_v53 = vld.sshfl [vmem:[#allocation1 + $0x10] sm:$0xff pattern:$0x75316420] }
 0x2ff   : > { %v1321_v56 = vpack.c.bf16 %v1318_v53, %v1317_v42  ;;  %1362 = vst [vmem:[#allocation1 + $0x10] ss:$2 sm:$0xff] %v1352_v52 }
 0x300   : > { %1364 = vst [vmem:[#allocation1 + $0x11] ss:$2 sm:$0xff] %v1353_v55 }
 0x301   : > { %1741 = vmatmul.msk.bf16.vlgmr.msrb.gmra.mxu3 %vm510_vm2, %v1321_v56 }
 0x305   : > { %v1413_v57 = vld.sshfl [vmem:[#allocation1] sm:$0xff pattern:$0x75316420] }
 0x306   : > { %1454 = vst [vmem:[#allocation1] ss:$2 sm:$0xff] %v1446_v54 }
 0x307   : > { %1456 = vst [vmem:[#allocation1 + $0x1] ss:$2 sm:$0xff] %v1447_v58  ;;  %v1366_v61 = vld.sshfl [vmem:[#allocation1 + $0x10] sm:$0xff pattern:$0x75316420] }
 0x308   : > { %v1369_v63 = vpack.c.bf16 %v1366_v61, %v1365_v50  ;;  %1410 = vst [vmem:[#allocation1 + $0x10] ss:$2 sm:$0xff] %v1400_v60 }
 0x309   : > { %1412 = vst [vmem:[#allocation1 + $0x11] ss:$2 sm:$0xff] %v1401_v59 }
 0x30a   : > { %1748 = vmatmul.msk.bf16.vlgmr.msra.gmra.mxu0 %vm510_vm2, %v1369_v63 }
 0x30e   : > { %v1461_v0 = vld.sshfl [vmem:[#allocation1] sm:$0xff pattern:$0x75316420] }
 0x30f   : > { %1502 = vst [vmem:[#allocation1] ss:$2 sm:$0xff] %v1494_v62 }
 0x310   : > { %1504 = vst [vmem:[#allocation1 + $0x1] ss:$2 sm:$0xff] %v1495_v1  ;;  %v1414_v4 = vld.sshfl [vmem:[#allocation1 + $0x10] sm:$0xff pattern:$0x75316420] }
 0x311   : > { %v1417_v5 = vpack.c.bf16 %v1414_v4, %v1413_v57  ;;  %1458 = vst [vmem:[#allocation1 + $0x10] ss:$2 sm:$0xff] %v1448_v3 }
 0x312   : > { %1460 = vst [vmem:[#allocation1 + $0x11] ss:$2 sm:$0xff] %v1449_v2 }
 0x313   : > { %1755 = vmatmul.msk.bf16.vlgmr.msra.gmra.mxu1 %vm510_vm2, %v1417_v5 }
 0x317   : > { %v1509_v10 = vld.sshfl [vmem:[#allocation1] sm:$0xff pattern:$0x75316420] }
 0x319   : > { %v1462_v8 = vld.sshfl [vmem:[#allocation1 + $0x10] sm:$0xff pattern:$0x75316420] }
 0x31a   : > { %v1465_v9 = vpack.c.bf16 %v1462_v8, %v1461_v0  ;;  %1506 = vst [vmem:[#allocation1 + $0x10] ss:$2 sm:$0xff] %v1496_v7 }
 0x31b   : > { %1508 = vst [vmem:[#allocation1 + $0x11] ss:$2 sm:$0xff] %v1497_v6 }
 0x31c   : > { %1762 = vmatmul.msk.bf16.vlgmr.msra.gmra.mxu2 %vm510_vm2, %v1465_v9 }
 0x322   : > { %v1510_v11 = vld.sshfl [vmem:[#allocation1 + $0x10] sm:$0xff pattern:$0x75316420] }
 0x323   : > { %v1513_v12 = vpack.c.bf16 %v1510_v11, %v1509_v10 }
 0x325   : > { %1769 = vmatmul.msk.bf16.vlgmr.msra.gmra.mxu3 %vm510_vm2, %v1513_v12 }
 0x359   : > { %v1201_v14 = vpop.f32.mrf.mxu0 }
 0x361   : > { %v1203_v18 = vpop.f32.mrf.mxu0 }
 0x369   : > { %v1178_v13 = vpop.f32.mrf.mxu3 }
 0x36a   : > { %v1202_v20 = vadd.f32 %v1201_v14, %v1178_v13 }
 0x36c   : > { %v1247_v15 = vpop.f32.mrf.mxu1 }
 0x36d   : > { %v1252_v23 = vadd.f32 %v1247_v15, %v1202_v20 }
 0x371   : > { %v1180_v16 = vpop.f32.mrf.mxu3 }
 0x372   : > { %v1204_v26 = vadd.f32 %v1203_v18, %v1180_v16 }
 0x374   : > { %v1249_v21 = vpop.f32.mrf.mxu1 }
 0x375   : > { %v1253_v31 = vadd.f32 %v1249_v21, %v1204_v26 }
 0x37b   : > { %v1295_v17 = vpop.f32.mrf.mxu2 }
 0x37c   : > { %v1300_v24 = vadd.f32 %v1295_v17, %v1252_v23 }
 0x383   : > { %v1297_v22 = vpop.f32.mrf.mxu2 }
 0x384   : > { %v1343_v19 = vpop.f32.mrf.mxu3  ;;  %v1301_v33 = vadd.f32 %v1297_v22, %v1253_v31 }
 0x385   : > { %v1348_v27 = vadd.f32 %v1343_v19, %v1300_v24 }
 0x387   : > { %v1391_v25 = vpop.f32.mrf.mxu0 }
 0x388   : > { %v1396_v32 = vadd.f32 %v1391_v25, %v1348_v27 }
 0x38c   : > { %v1345_v28 = vpop.f32.mrf.mxu3 }
 0x38d   : > { %v1349_v35 = vadd.f32 %v1345_v28, %v1301_v33 }
 0x38f   : > { %v1393_v37 = vpop.f32.mrf.mxu0 }
 0x390   : > { %v1439_v29 = vpop.f32.mrf.mxu1  ;;  %v1397_v41 = vadd.f32 %v1393_v37, %v1349_v35 }
 0x391   : > { %v1444_v34 = vadd.f32 %v1439_v29, %v1396_v32 }
 0x398   : > { %v1441_v40 = vpop.f32.mrf.mxu1 }
 0x399   : > { %v1445_v44 = vadd.f32 %v1441_v40, %v1397_v41 }
 0x39f   : > { %v1487_v30 = vpop.f32.mrf.mxu2 }
 0x3a0   : > { %v1492_v36 = vadd.f32 %v1487_v30, %v1444_v34 }
 0x3a7   : > { %v1489_v43 = vpop.f32.mrf.mxu2 }
 0x3a8   : > { %v1535_v38 = vpop.f32.mrf.mxu3  ;;  %v1493_v45 = vadd.f32 %v1489_v43, %v1445_v44 }
 0x3a9   : > { %v1540_v39 = vadd.f32 %v1535_v38, %v1492_v36 }
 0x3ab   : > { %v1544_v42 = vrot.slane %v1540_v39, 4  ;;  %1546 = vst [vmem:[#allocation1] ss:$2 sm:$0xff] %v1540_v39 }
 0x3ad   : > { %1549 = vst [vmem:[#allocation1 + $0x10] ss:$2 sm:$0xff] %v1544_v42 }
 0x3b0   : > { %v1537_v46 = vpop.f32.mrf.mxu3 }
 0x3b1   : > { %v1541_v47 = vadd.f32 %v1537_v46, %v1493_v45 }
 0x3b2   : > { %v1547_v48 = vld.sshfl [vmem:[#allocation1] sm:$0xff pattern:$0x75316420] }
 0x3b3   : > { %v1545_v49 = vrot.slane %v1541_v47, 4  ;;  %1552 = vst [vmem:[#allocation1 + $0x20] ss:$2 sm:$0xff] %v1541_v47  ;;  %1557 = vrot.lane.b32.xlu2 %v1547_v48, %s1823_s15 }
 0x3b4   : > { %v1550_v50 = vld.sshfl [vmem:[#allocation1 + $0x10] sm:$0xff pattern:$0x75316420] }
 0x3b5   : > { %1555 = vst [vmem:[#allocation1 + $0x30] ss:$2 sm:$0xff] %v1545_v49 }
 0x3ba   : > { %v1553_v51 = vld.sshfl [vmem:[#allocation1 + $0x20] sm:$0xff pattern:$0x75316420] }
 0x3bb   : > { %1559 = vrot.lane.b32.xlu2 %v1550_v50, %s1823_s15  ;;  %1561 = vrot.lane.b32.xlu0 %v1553_v51, %s1823_s15 }
 0x3bc   : > { %v1556_v52 = vld.sshfl [vmem:[#allocation1 + $0x30] sm:$0xff pattern:$0x75316420] }
 0x3bd   : > { %1563 = vrot.lane.b32.xlu1 %v1556_v52, %s1823_s15 }
 0x40d   : > { %v1558_v53 = vpop.permute.xlu2 %1557 }
 0x40e   : > { %1570 = vst.msk [vmem:[%s1913_s18] sm:$0xf] %vm1569_vm6, %v1558_v53 }
 0x415   : > { %v1560_v54 = vpop.permute.xlu2 %1559 }
 0x416   : > { %1571 = vst.msk [vmem:[%s1913_s18 + $0x4] sm:$0xf] %vm1569_vm6, %v1560_v54 }
 0x42d   : > { %v1562_v55 = vpop.permute.xlu0 %1561 }
 0x42e   : > { %1572 = vst.msk [vmem:[%s1913_s18 + $0x8] sm:$0xf] %vm1569_vm6, %v1562_v55 }
 0x42f   : > { %v1564_v56 = vpop.permute.xlu1 %1563 }
 0x430   : > { %1573 = vst.msk [vmem:[%s1913_s18 + $0xc] sm:$0xf] %vm1569_vm6, %v1564_v56 }
 0x431 PF: > { %s23_s25 = sadd.s32 1, %s1819_s25  }
 0x432   : > { %p20_p4 = scmp.ge.s32.totalorder %s23_s25, 4  }
 0x434   :  { %22 = sbr.rel (!%p20_p4) target bundleno = 1 (0x1), region = 186 }

// kernel: backbone_forward.14
= control target key start
LH: loop header
LB: loop body
LE: loop exit
PB: predicated region body
PF: predicated region fallthrough
CT: control target
= control target key end

     0   :  { %s1895_s25 = smov 0   ;;  %s2064_s0 = inlined_call_operand.vmem [shape: f32[2,4,4,16], index: 0, kind: input, shape index: {}]   ;;  %s2065_s1 = inlined_call_operand.vmem [shape: f32[1,16], index: 1, kind: input, shape index: {}]   ;;  %s2066_s2 = inlined_call_operand.vmem [shape: f32[1,16], index: 2, kind: input, shape index: {}]   ;;  %s2067_s3 = inlined_call_operand.vmem [shape: bf16[16,16], index: 3, kind: input, shape index: {}]   ;;  %s2068_s4 = inlined_call_operand.vmem [shape: f32[1,16], index: 4, kind: input, shape index: {}]   ;;  %s2069_s5 = inlined_call_operand.vmem [shape: f32[1,16], index: 5, kind: input, shape index: {}]   ;;  %s2070_s6 = inlined_call_operand.vmem [shape: bf16[9,16,8], index: 6, kind: input, shape index: {}]   ;;  %s2071_s7 = inlined_call_operand.vmem [shape: f32[1,24], index: 7, kind: input, shape index: {}]   ;;  %s2072_s8 = inlined_call_operand.vmem [shape: f32[1,24], index: 8, kind: input, shape index: {}]   ;;  %s2073_s9 = inlined_call_operand.vmem [shape: bf16[24,16], index: 9, kind: input, shape index: {}]   ;;  %s2074_s10 = inlined_call_operand.vmem [shape: f32[1,16], index: 10, kind: input, shape index: {}]   ;;  %s2075_s11 = inlined_call_operand.vmem [shape: f32[1,16], index: 11, kind: input, shape index: {}]   ;;  %s2076_s12 = inlined_call_operand.vmem [shape: bf16[9,16,8], index: 12, kind: input, shape index: {}]   ;;  %s2077_s13 = inlined_call_operand.vmem [shape: f32[2,4,4,32], index: 13, kind: output, shape index: {}]  }
   0x1 LB: > { %s1630_s26 = sadd.s32 4294967295, %s1820_s25   ;;  %p1634_p0 = scmp.ge.s32.totalorder %s1820_s25, 1  ;;  %s1820_s25 = sphi %s1895_s25, %s23_s25  }
   0x2   : > { %p387_p1 = scmp.lt.s32.totalorder %s1820_s25, 3 }
   0x4   : > { %p388_p2 = pnand %p1634_p0, %p387_p1 }
   0x5   : > { %p431_p3 = scmp.lt.s32.totalorder (!%p388_p2), %s1630_s26, 1  ;;  %s1823_s14 = smov (!%p388_p2), 16  }
   0x6   : > { %391 = sbr.rel (%p388_p2) target bundleno = 1055 (0x41f), region = 72 }
   0xb   : > { %v1775_v0 = vld [vmem:[%s2067_s3] sm:$0xff]  ;;  %vm442_vm0 = vcmask 130048   ;;  %s2079_s26 = smov (!%p431_p3, %s1630_s26), 1  ;;  %vm455_vm1 = vcmask 125952   ;;  %v1822_v1 = vmov 0.0   ;;  %v1777_v54 = vld [vmem:[%s2070_s6 + $0x8] sm:$0xff] }
   0xc   : > { %522 = vmatpush.bf16.msra.mxu0 %v1775_v0  ;;  %443 = vst.msk [vmem:[#allocation2] sm:$0xff] %vm442_vm0, %v1822_v1  ;;  %s1773_s29 = sshll.u32 %s2079_s26, 4  ;;  %v1806_v6 = vld [vmem:[%s2065_s1] ss:$0 sm:$0xff]  ;;  %v1778_v57 = vld [vmem:[%s2070_s6 + $0x10] sm:$0xff]  ;;  %615 = vmatpush.bf16.msra.mxu1 %v1777_v54  ;;  %v1779_v0 = vld [vmem:[%s2070_s6 + $0x18] sm:$0xff] }
   0xd   : > { %444 = vst.msk [vmem:[#allocation2 + $0x8] sm:$0xff] %vm442_vm0, %v1822_v1  ;;  %s435_s15 = scalar_lea.vmem %s2064_s0, %s1773_s29  ;;  %s1914_s18 = scalar_lea.vmem %s2077_s13, %s1773_s29  ;;  %v1807_v7 = vld [vmem:[%s2066_s2] ss:$0 sm:$0xff]  ;;  %v468_v8 = vrot.slane %v1806_v6, 4  ;;  %684 = vmatpush.bf16.msra.mxu3 %v1778_v57  ;;  %vm1009_vm2 = vcmask 191616   ;;  %vm1074_vm3 = vcmask 1043456  }
   0xe   : > { %445 = vst.msk [vmem:[#allocation2 + $0x10] sm:$0xff] %vm442_vm0, %v1822_v1  ;;  %v451_v2 = vld [vmem:[%s435_s15] sm:$0xf]  ;;  %v452_v3 = vld [vmem:[%s435_s15 + $0x4] sm:$0xf]  ;;  %v478_v10 = vrot.slane %v1807_v7, 4 }
   0xf   : > { %v453_v4 = vld [vmem:[%s435_s15 + $0x8] sm:$0xf]  ;;  %v454_v5 = vld [vmem:[%s435_s15 + $0xc] sm:$0xf]  ;;  %456 = vst.msk [vmem:[%s1914_s18] sm:$0xf] %vm455_vm1, %v451_v2 }
  0x10   : > { %457 = vst.msk [vmem:[%s1914_s18 + $0x4] sm:$0xf] %vm455_vm1, %v452_v3  ;;  %v1808_v37 = vld [vmem:[%s2068_s4] ss:$0 sm:$0xff]  ;;  %732 = vmatpush.bf16.msrb.mxu0 %v1779_v0  ;;  %vm1070_vm4 = vcmask 195584   ;;  %s1824_s15 = smov 24  }
  0x11   : > { %458 = vst.msk [vmem:[%s1914_s18 + $0x8] sm:$0xf] %vm455_vm1, %v453_v4  ;;  %v1809_v38 = vld [vmem:[%s2069_s5] ss:$0 sm:$0xff]  ;;  %vm1570_vm5 = vcmask 257216  }
  0x12   : > { %459 = vst.msk [vmem:[%s1914_s18 + $0xc] sm:$0xf] %vm455_vm1, %v454_v5  ;;  %v1776_v44 = vld [vmem:[%s2070_s6] sm:$0xff] }
  0x13   : > { %446 = vst.msk [vmem:[#allocation2 + $0x18] sm:$0xff] %vm442_vm0, %v1822_v1  ;;  %v554_v29 = vld [vmem:[#allocation2] sm:$0xf]  ;;  %v645_v34 = vld [vmem:[#allocation2 + $0x4] sm:$0xf]  ;;  %638 = vmatpush.bf16.msra.mxu2 %v1776_v44 }
  0x14   : > { %449 = vst.msk [vmem:[#allocation2 + $0x30] sm:$0xff] %vm442_vm0, %v1822_v1  ;;  %v555_v30 = vld [vmem:[#allocation2 + $0x8] sm:$0xf]  ;;  %v576_v31 = vld [vmem:[#allocation2 + $0x2] sm:$0xf] }
  0x15   : > { %450 = vst.msk [vmem:[#allocation2 + $0x38] sm:$0xff] %vm442_vm0, %v1822_v1  ;;  %v577_v32 = vld [vmem:[#allocation2 + $0xa] sm:$0xf] }
  0x16   : > { %v460_v9 = vld [vmem:[%s1914_s18] sm:$0xf]  ;;  %447 = vst.msk [vmem:[#allocation2 + $0x20] sm:$0xff] %vm442_vm0, %v1822_v1  ;;  %v646_v35 = vld [vmem:[#allocation2 + $0xc] sm:$0xf] }
  0x17   : > { %v461_v11 = vld [vmem:[%s1914_s18 + $0x4] sm:$0xf]  ;;  %v470_v12 = vmul.f32 %v1806_v6, %v460_v9  ;;  %448 = vst.msk [vmem:[#allocation2 + $0x28] sm:$0xff] %vm442_vm0, %v1822_v1 }
  0x18   : > { %v462_v13 = vld [vmem:[%s1914_s18 + $0x8] sm:$0xf]  ;;  %v471_v14 = vmul.f32 %v468_v8, %v461_v11 }
  0x19   : > { %v463_v15 = vld [vmem:[%s1914_s18 + $0xc] sm:$0xf]  ;;  %v472_v16 = vmul.f32 %v1806_v6, %v462_v13  ;;  %v480_v17 = vadd.f32 %v1807_v7, %v470_v12 }
  0x1a   : > { %v473_v18 = vmul.f32 %v468_v8, %v463_v15  ;;  %v481_v19 = vadd.f32 %v478_v10, %v471_v14  ;;  %v1780_v8 = vld [vmem:[%s2070_s6 + $0x20] sm:$0xff] }
  0x1b   : > { %v482_v20 = vadd.f32 %v1807_v7, %v472_v16  ;;  %v484_v21 = vmax.f32 %v480_v17, 0.0  ;;  %780 = vmatpush.bf16.msrb.mxu1 %v1780_v8  ;;  %v1781_v16 = vld [vmem:[%s2070_s6 + $0x28] sm:$0xff] }
  0x1c   : > { %v483_v22 = vadd.f32 %v478_v10, %v473_v18  ;;  %v485_v23 = vmax.f32 %v481_v19, 0.0  ;;  %828 = vmatpush.bf16.msrb.mxu2 %v1781_v16 }
  0x1d   : > { %v486_v24 = vmax.f32 %v482_v20, 0.0  ;;  %492 = vst [vmem:[#allocation1] ss:$2 sm:$0xff] %v484_v21 }
  0x1e   : > { %v487_v25 = vmax.f32 %v483_v22, 0.0  ;;  %494 = vst [vmem:[#allocation1 + $0x1] ss:$2 sm:$0xff] %v485_v23 }
  0x1f   : > { %496 = vst [vmem:[#allocation1 + $0x10] ss:$2 sm:$0xff] %v486_v24  ;;  %v1782_v24 = vld [vmem:[%s2070_s6 + $0x30] sm:$0xff] }
  0x20   : > { %498 = vst [vmem:[#allocation1 + $0x11] ss:$2 sm:$0xff] %v487_v25  ;;  %v1783_v25 = vld [vmem:[%s2070_s6 + $0x38] sm:$0xff]  ;;  %877 = vmatpush.bf16.msrb.mxu3 %v1782_v24 }
  0x25   : > { %v499_v26 = vld.sshfl [vmem:[#allocation1] sm:$0xff pattern:$0x75316420] }
  0x26   : > { %562 = vst [vmem:[#allocation1] ss:$2 sm:$0xff] %v554_v29 }
  0x27   : > { %v500_v27 = vld.sshfl [vmem:[#allocation1 + $0x10] sm:$0xff pattern:$0x75316420]  ;;  %564 = vst [vmem:[#allocation1 + $0x1] ss:$2 sm:$0xff] %v555_v30 }
  0x28   : > { %v503_v28 = vpack.c.bf16 %v500_v27, %v499_v26  ;;  %v1784_v26 = vld [vmem:[%s2070_s6 + $0x40] sm:$0xff] }
  0x2a   : > { %1643 = vmatmul.msk.bf16.vlgmr.msra.gmra.mxu0 %vm442_vm0, %v503_v28 }
  0x2b   : > { %925 = vmatpush.bf16.msra.mxu0 %v1783_v25  ;;  %v1060_v25 = vld [vmem:[%s2073_s9 + $0x8] sm:$0xf] }
  0x2e   : > { %v569_v33 = vld.sshfl [vmem:[#allocation1] sm:$0xff pattern:$0x75316420] }
  0x2f   : > { %584 = vst [vmem:[#allocation1] ss:$2 sm:$0xff] %v576_v31 }
  0x30   : > { %586 = vst [vmem:[#allocation1 + $0x1] ss:$2 sm:$0xff] %v577_v32 }
  0x37   : > { %v591_v36 = vld.sshfl [vmem:[#allocation1] sm:$0xff pattern:$0x75316420] }
  0x38   : > { %653 = vst [vmem:[#allocation1] ss:$2 sm:$0xff] %v645_v34  ;;  %v840_v34 = vld [vmem:[#allocation2 + $0x30] sm:$0xf] }
  0x39   : > { %655 = vst [vmem:[#allocation1 + $0x1] ss:$2 sm:$0xff] %v646_v35  ;;  %v841_v35 = vld [vmem:[#allocation2 + $0x38] sm:$0xf] }
  0x40   : > { %v660_v47 = vld.sshfl [vmem:[#allocation1] sm:$0xff pattern:$0x75316420] }
  0xa7   : > { %v524_v39 = vpop.f32.mrf.mxu0 }
  0xa8   : > { %v533_v40 = vmul.f32 %v1808_v37, %v524_v39  ;;  %v889_v39 = vld [vmem:[#allocation2 + $0x3a] sm:$0xf] }
  0xaa   : > { %v539_v41 = vadd.f32 %v1809_v38, %v533_v40 }
  0xac   : > { %v541_v42 = vmax.f32 %v539_v41, 0.0 }
  0xae   : > { %v545_v43 = vrot.slane %v541_v42, 4  ;;  %550 = vst.msk [vmem:[#allocation2 + $0x12] sm:$0xf] %vm455_vm1, %v541_v42  ;;  %v936_v42 = vld [vmem:[#allocation2 + $0x34] sm:$0xf] }
  0xaf   : > { %v526_v45 = vpop.f32.mrf.mxu0 }
  0xb0   : > { %551 = vst.msk [vmem:[#allocation2 + $0x1a] sm:$0xf] %vm455_vm1, %v545_v43  ;;  %v534_v49 = vmul.f32 %v1808_v37, %v526_v45  ;;  %v937_v43 = vld [vmem:[#allocation2 + $0x3c] sm:$0xf] }
  0xb2   : > { %v540_v52 = vadd.f32 %v1809_v38, %v534_v49  ;;  %v888_v38 = vld [vmem:[#allocation2 + $0x32] sm:$0xf] }
  0xb4   : > { %v542_v53 = vmax.f32 %v540_v52, 0.0 }
  0xb5   : > { %v556_v46 = vld [vmem:[#allocation2 + $0x10] sm:$0xf]  ;;  %v647_v2 = vld [vmem:[#allocation2 + $0x14] sm:$0xf] }
  0xb6   : > { %566 = vst [vmem:[#allocation1 + $0x10] ss:$2 sm:$0xff] %v556_v46  ;;  %v693_v48 = vld [vmem:[#allocation2 + $0x10] sm:$0xf]  ;;  %v546_v62 = vrot.slane %v542_v53, 4 }
  0xb7   : > { %v557_v50 = vld [vmem:[#allocation2 + $0x18] sm:$0xf]  ;;  %701 = vst [vmem:[#allocation1] ss:$2 sm:$0xff] %v693_v48  ;;  %v578_v56 = vld [vmem:[#allocation2 + $0x12] sm:$0xf] }
  0xb8   : > { %568 = vst [vmem:[#allocation1 + $0x11] ss:$2 sm:$0xff] %v557_v50  ;;  %v694_v51 = vld [vmem:[#allocation2 + $0x18] sm:$0xf]  ;;  %v741_v59 = vld [vmem:[#allocation2 + $0x12] sm:$0xf] }
  0xb9   : > { %703 = vst [vmem:[#allocation1 + $0x1] ss:$2 sm:$0xff] %v694_v51  ;;  %v579_v58 = vld [vmem:[#allocation2 + $0x1a] sm:$0xf]  ;;  %v789_v4 = vld [vmem:[#allocation2 + $0x14] sm:$0xf] }
  0xba   : > { %v742_v63 = vld [vmem:[#allocation2 + $0x1a] sm:$0xf]  ;;  %552 = vst.msk [vmem:[#allocation2 + $0x22] sm:$0xf] %vm455_vm1, %v542_v53 }
  0xbb   : > { %553 = vst.msk [vmem:[#allocation2 + $0x2a] sm:$0xf] %vm455_vm1, %v546_v62  ;;  %v648_v3 = vld [vmem:[#allocation2 + $0x1c] sm:$0xf] }
  0xbc   : > { %v790_v7 = vld [vmem:[#allocation2 + $0x1c] sm:$0xf] }
  0xbf   : > { %v570_v55 = vld.sshfl [vmem:[#allocation1 + $0x10] sm:$0xff pattern:$0x75316420] }
  0xc0   : > { %588 = vst [vmem:[#allocation1 + $0x10] ss:$2 sm:$0xff] %v578_v56  ;;  %v573_v60 = vpack.c.bf16 %v570_v55, %v569_v33  ;;  %v708_v61 = vld.sshfl [vmem:[#allocation1] sm:$0xff pattern:$0x75316420] }
  0xc1   : > { %590 = vst [vmem:[#allocation1 + $0x11] ss:$2 sm:$0xff] %v579_v58  ;;  %v695_v10 = vld [vmem:[#allocation2 + $0x20] sm:$0xf]  ;;  %v791_v28 = vld [vmem:[#allocation2 + $0x24] sm:$0xf] }
  0xc2   : > { %749 = vst [vmem:[#allocation1] ss:$2 sm:$0xff] %v741_v59  ;;  %1655 = vmatmul.msk.bf16.vlgmr.msra.gmra.mxu2 %vm442_vm0, %v573_v60  ;;  %v696_v11 = vld [vmem:[#allocation2 + $0x28] sm:$0xf]  ;;  %v838_v12 = vld [vmem:[#allocation2 + $0x20] sm:$0xf] }
  0xc3   : > { %751 = vst [vmem:[#allocation1 + $0x1] ss:$2 sm:$0xff] %v742_v63  ;;  %v839_v15 = vld [vmem:[#allocation2 + $0x28] sm:$0xf]  ;;  %v743_v18 = vld [vmem:[#allocation2 + $0x22] sm:$0xf] }
  0xc4   : > { %v744_v19 = vld [vmem:[#allocation2 + $0x2a] sm:$0xf]  ;;  %v886_v20 = vld [vmem:[#allocation2 + $0x22] sm:$0xf] }
  0xc5   : > { %v887_v23 = vld [vmem:[#allocation2 + $0x2a] sm:$0xf]  ;;  %v934_v30 = vld [vmem:[#allocation2 + $0x24] sm:$0xf] }
  0xc6   : > { %v792_v29 = vld [vmem:[#allocation2 + $0x2c] sm:$0xf] }
  0xc7   : > { %v935_v33 = vld [vmem:[#allocation2 + $0x2c] sm:$0xf] }
  0xc8   : > { %v592_v1 = vld.sshfl [vmem:[#allocation1 + $0x10] sm:$0xff pattern:$0x75316420] }
  0xc9   : > { %657 = vst [vmem:[#allocation1 + $0x10] ss:$2 sm:$0xff] %v647_v2  ;;  %v595_v5 = vpack.c.bf16 %v592_v1, %v591_v36 }
  0xca   : > { %659 = vst [vmem:[#allocation1 + $0x11] ss:$2 sm:$0xff] %v648_v3  ;;  %v756_v6 = vld.sshfl [vmem:[#allocation1] sm:$0xff pattern:$0x75316420] }
  0xcb   : > { %797 = vst [vmem:[#allocation1] ss:$2 sm:$0xff] %v789_v4  ;;  %1650 = vmatmul.msk.bf16.vlgmr.msra.gmra.mxu1 %vm442_vm0, %v595_v5 }
  0xcc   : > { %799 = vst [vmem:[#allocation1 + $0x1] ss:$2 sm:$0xff] %v790_v7  ;;  %973 = vmatpush.bf16.msra.mxu1 %v1784_v26 }
  0xd1   : > { %v661_v9 = vld.sshfl [vmem:[#allocation1 + $0x10] sm:$0xff pattern:$0x75316420] }
  0xd2   : > { %705 = vst [vmem:[#allocation1 + $0x10] ss:$2 sm:$0xff] %v695_v10  ;;  %v664_v13 = vpack.c.bf16 %v661_v9, %v660_v47 }
  0xd3   : > { %v804_v14 = vld.sshfl [vmem:[#allocation1] sm:$0xff pattern:$0x75316420]  ;;  %707 = vst [vmem:[#allocation1 + $0x11] ss:$2 sm:$0xff] %v696_v11 }
  0xd4   : > { %846 = vst [vmem:[#allocation1] ss:$2 sm:$0xff] %v838_v12  ;;  %1662 = vmatmul.msk.bf16.vlgmr.msra.gmra.mxu3 %vm442_vm0, %v664_v13 }
  0xd5   : > { %848 = vst [vmem:[#allocation1 + $0x1] ss:$2 sm:$0xff] %v839_v15 }
  0xda   : > { %v709_v17 = vld.sshfl [vmem:[#allocation1 + $0x10] sm:$0xff pattern:$0x75316420] }
  0xdb   : > { %753 = vst [vmem:[#allocation1 + $0x10] ss:$2 sm:$0xff] %v743_v18  ;;  %v712_v21 = vpack.c.bf16 %v709_v17, %v708_v61 }
  0xdc   : > { %755 = vst [vmem:[#allocation1 + $0x11] ss:$2 sm:$0xff] %v744_v19  ;;  %v853_v22 = vld.sshfl [vmem:[#allocation1] sm:$0xff pattern:$0x75316420] }
  0xdd   : > { %894 = vst [vmem:[#allocation1] ss:$2 sm:$0xff] %v886_v20  ;;  %1669 = vmatmul.msk.bf16.vlgmr.msrb.gmra.mxu0 %vm442_vm0, %v712_v21 }
  0xde   : > { %896 = vst [vmem:[#allocation1 + $0x1] ss:$2 sm:$0xff] %v887_v23 }
  0xe3   : > { %v757_v27 = vld.sshfl [vmem:[#allocation1 + $0x10] sm:$0xff pattern:$0x75316420] }
  0xe4   : > { %801 = vst [vmem:[#allocation1 + $0x10] ss:$2 sm:$0xff] %v791_v28  ;;  %v760_v31 = vpack.c.bf16 %v757_v27, %v756_v6  ;;  %v1066_v27 = vunpack.c.l.b16 %v1060_v25 }
  0xe5   : > { %803 = vst [vmem:[#allocation1 + $0x11] ss:$2 sm:$0xff] %v792_v29  ;;  %v901_v32 = vld.sshfl [vmem:[#allocation1] sm:$0xff pattern:$0x75316420] }
  0xe6   : > { %942 = vst [vmem:[#allocation1] ss:$2 sm:$0xff] %v934_v30  ;;  %1676 = vmatmul.msk.bf16.vlgmr.msrb.gmra.mxu1 %vm442_vm0, %v760_v31  ;;  %v1068_v28 = vpack.c.b16 %v1066_v27, %v1066_v27  ;;  %v1810_v30 = vld [vmem:[%s2071_s7] ss:$0 sm:$0xff] }
  0xe7   : > { %944 = vst [vmem:[#allocation1 + $0x1] ss:$2 sm:$0xff] %v935_v33  ;;  %v1785_v31 = vld [vmem:[%s2073_s9] sm:$0xff] }
  0xe8   : > { %v1076_v29 = vsel %vm1074_vm3, %v1068_v28, 0  ;;  %v1790_v27 = vld [vmem:[%s2076_s12 + $0x20] sm:$0xff] }
  0xe9   : > { %1084 = vmatpush.bf16.msra.mxu2 %v1076_v29 }
  0xec   : > { %v805_v36 = vld.sshfl [vmem:[#allocation1 + $0x10] sm:$0xff pattern:$0x75316420] }
  0xed   : > { %850 = vst [vmem:[#allocation1 + $0x10] ss:$2 sm:$0xff] %v840_v34  ;;  %v808_v37 = vpack.c.bf16 %v805_v36, %v804_v14  ;;  %1085 = vmatpush.bf16.msra.mxu2 %v1785_v31 }
  0xee   : > { %852 = vst [vmem:[#allocation1 + $0x11] ss:$2 sm:$0xff] %v841_v35  ;;  %v949_v46 = vld.sshfl [vmem:[#allocation1] sm:$0xff pattern:$0x75316420] }
  0xef   : > { %1683 = vmatmul.msk.bf16.vlgmr.msrb.gmra.mxu2 %vm442_vm0, %v808_v37 }
  0xf5   : > { %v854_v40 = vld.sshfl [vmem:[#allocation1 + $0x10] sm:$0xff pattern:$0x75316420] }
  0xf6   : > { %898 = vst [vmem:[#allocation1 + $0x10] ss:$2 sm:$0xff] %v888_v38  ;;  %v857_v41 = vpack.c.bf16 %v854_v40, %v853_v22 }
  0xf7   : > { %900 = vst [vmem:[#allocation1 + $0x11] ss:$2 sm:$0xff] %v889_v39  ;;  %v1022_v39 = vrot.slane %v1810_v30, 4 }
  0xf8   : > { %1690 = vmatmul.msk.bf16.vlgmr.msrb.gmra.mxu3 %vm442_vm0, %v857_v41 }
  0xfe   : > { %v902_v44 = vld.sshfl [vmem:[#allocation1 + $0x10] sm:$0xff pattern:$0x75316420] }
  0xff   : > { %946 = vst [vmem:[#allocation1 + $0x10] ss:$2 sm:$0xff] %v936_v42  ;;  %v905_v45 = vpack.c.bf16 %v902_v44, %v901_v32  ;;  %v1811_v32 = vld [vmem:[%s2072_s8] ss:$0 sm:$0xff] }
 0x100   : > { %948 = vst [vmem:[#allocation1 + $0x11] ss:$2 sm:$0xff] %v937_v43  ;;  %v1032_v40 = vrot.slane %v1811_v32, 4 }
 0x101   : > { %1697 = vmatmul.msk.bf16.vlgmr.msra.gmra.mxu0 %vm442_vm0, %v905_v45 }
 0x107   : > { %v950_v47 = vld.sshfl [vmem:[#allocation1 + $0x10] sm:$0xff pattern:$0x75316420] }
 0x108   : > { %v953_v48 = vpack.c.bf16 %v950_v47, %v949_v46 }
 0x10a   : > { %1704 = vmatmul.msk.bf16.vlgmr.msra.gmra.mxu1 %vm442_vm0, %v953_v48 }
 0x145   : > { %v640_v50 = vpop.f32.mrf.mxu2 }
 0x148   : > { %v617_v49 = vpop.f32.mrf.mxu1 }
 0x149   : > { %v641_v57 = vadd.f32 %v640_v50, %v617_v49 }
 0x14d   : > { %v642_v54 = vpop.f32.mrf.mxu2 }
 0x150   : > { %v619_v52 = vpop.f32.mrf.mxu1 }
 0x151   : > { %v643_v63 = vadd.f32 %v642_v54, %v619_v52 }
 0x157   : > { %v686_v51 = vpop.f32.mrf.mxu3 }
 0x158   : > { %v691_v58 = vadd.f32 %v686_v51, %v641_v57 }
 0x15a   : > { %v734_v53 = vpop.f32.mrf.mxu0 }
 0x15b   : > { %v739_v61 = vadd.f32 %v734_v53, %v691_v58  ;;  %v1116_v53 = vld [vmem:[#allocation2] sm:$0xf] }
 0x15f   : > { %v688_v55 = vpop.f32.mrf.mxu3 }
 0x160   : > { %v692_v2 = vadd.f32 %v688_v55, %v643_v63  ;;  %v1117_v55 = vld [vmem:[#allocation2 + $0x8] sm:$0xf]  ;;  %v1208_v63 = vld [vmem:[#allocation2 + $0xc] sm:$0xf] }
 0x162   : > { %v736_v59 = vpop.f32.mrf.mxu0 }
 0x163   : > { %v782_v56 = vpop.f32.mrf.mxu1  ;;  %v740_v6 = vadd.f32 %v736_v59, %v692_v2  ;;  %v1138_v59 = vld [vmem:[#allocation2 + $0x2] sm:$0xf]  ;;  %v1786_v2 = vld [vmem:[%s2076_s12] sm:$0xff] }
 0x164   : > { %v787_v0 = vadd.f32 %v782_v56, %v739_v61  ;;  %1200 = vmatpush.bf16.msrb.mxu0 %v1786_v2  ;;  %v1449_v2 = vld [vmem:[#allocation2 + $0x32] sm:$0xf] }
 0x16b   : > { %v784_v1 = vpop.f32.mrf.mxu1 }
 0x16c   : > { %v788_v8 = vadd.f32 %v784_v1, %v740_v6  ;;  %v1812_v1 = vld [vmem:[%s2074_s10] ss:$0 sm:$0xff] }
 0x172   : > { %v830_v60 = vpop.f32.mrf.mxu2 }
 0x173   : > { %v835_v3 = vadd.f32 %v830_v60, %v787_v0  ;;  %v1139_v60 = vld [vmem:[#allocation2 + $0xa] sm:$0xf] }
 0x17a   : > { %v832_v7 = vpop.f32.mrf.mxu2 }
 0x17b   : > { %v879_v62 = vpop.f32.mrf.mxu3  ;;  %v836_v12 = vadd.f32 %v832_v7, %v788_v8 }
 0x17c   : > { %v884_v5 = vadd.f32 %v879_v62, %v835_v3  ;;  %v1207_v62 = vld [vmem:[#allocation2 + $0x4] sm:$0xf]  ;;  %v1813_v3 = vld [vmem:[%s2075_s11] ss:$0 sm:$0xff] }
 0x17e   : > { %v927_v4 = vpop.f32.mrf.mxu0 }
 0x17f   : > { %v932_v9 = vadd.f32 %v927_v4, %v884_v5  ;;  %v1787_v4 = vld [vmem:[%s2076_s12 + $0x8] sm:$0xff] }
 0x180   : > { %1177 = vmatpush.bf16.msra.mxu3 %v1787_v4 }
 0x183   : > { %v881_v10 = vpop.f32.mrf.mxu3 }
 0x184   : > { %v885_v14 = vadd.f32 %v881_v10, %v836_v12  ;;  %v1788_v12 = vld [vmem:[%s2076_s12 + $0x10] sm:$0xff]  ;;  %1342 = vmatpush.bf16.msrb.mxu3 %v1790_v27 }
 0x185   : > { %1246 = vmatpush.bf16.msrb.mxu1 %v1788_v12 }
 0x186   : > { %v929_v16 = vpop.f32.mrf.mxu0 }
 0x187   : > { %v975_v11 = vpop.f32.mrf.mxu1  ;;  %v933_v17 = vadd.f32 %v929_v16, %v885_v14 }
 0x188   : > { %v980_v13 = vadd.f32 %v975_v11, %v932_v9 }
 0x18a   : > { %v984_v15 = vrot.slane %v980_v13, 4  ;;  %986 = vst [vmem:[#allocation1] ss:$2 sm:$0xff] %v980_v13 }
 0x18c   : > { %989 = vst [vmem:[#allocation1 + $0x10] ss:$2 sm:$0xff] %v984_v15 }
 0x18f   : > { %v977_v18 = vpop.f32.mrf.mxu1 }
 0x190   : > { %v981_v19 = vadd.f32 %v977_v18, %v933_v17 }
 0x191   : > { %v987_v20 = vld.sshfl [vmem:[#allocation1] sm:$0xff pattern:$0x75316420] }
 0x192   : > { %v985_v21 = vrot.slane %v981_v19, 4  ;;  %992 = vst [vmem:[#allocation1 + $0x20] ss:$2 sm:$0xff] %v981_v19  ;;  %997 = vrot.lane.b32.xlu0 %v987_v20, %s1823_s14  ;;  %v1789_v20 = vld [vmem:[%s2076_s12 + $0x18] sm:$0xff] }
 0x193   : > { %v990_v22 = vld.sshfl [vmem:[#allocation1 + $0x10] sm:$0xff pattern:$0x75316420]  ;;  %1294 = vmatpush.bf16.msrb.mxu2 %v1789_v20 }
 0x194   : > { %995 = vst [vmem:[#allocation1 + $0x30] ss:$2 sm:$0xff] %v985_v21 }
 0x199   : > { %v993_v23 = vld.sshfl [vmem:[#allocation1 + $0x20] sm:$0xff pattern:$0x75316420] }
 0x19a   : > { %999 = vrot.lane.b32.xlu0 %v990_v22, %s1823_s14  ;;  %1001 = vrot.lane.b32.xlu1 %v993_v23, %s1823_s14 }
 0x19b   : > { %v996_v24 = vld.sshfl [vmem:[#allocation1 + $0x30] sm:$0xff pattern:$0x75316420] }
 0x1a2   : > { %1003 = vrot.lane.b32.xlu1 %v996_v24, %s1823_s14 }
 0x204   : > { %v998_v26 = vpop.permute.xlu0 %997 }
 0x205   : > { %1010 = vst.msk [vmem:[%s1914_s18] sm:$0xf] %vm1009_vm2, %v998_v26 }
 0x20c   : > { %v1014_v33 = vld [vmem:[%s1914_s18] sm:$0xf]  ;;  %v1000_v34 = vpop.permute.xlu0 %999  ;;  %v1002_v35 = vpop.permute.xlu1 %1001 }
 0x20d   : > { %v1024_v36 = vmul.f32 %v1810_v30, %v1014_v33  ;;  %1011 = vst.msk [vmem:[%s1914_s18 + $0x4] sm:$0xf] %vm1009_vm2, %v1000_v34 }
 0x20e   : > { %1012 = vst.msk [vmem:[%s1914_s18 + $0x8] sm:$0xf] %vm1009_vm2, %v1002_v35 }
 0x20f   : > { %v1034_v37 = vadd.f32 %v1811_v32, %v1024_v36 }
 0x211   : > { %v1038_v38 = vmax.f32 %v1034_v37, 0.0 }
 0x213   : > { %1046 = vst [vmem:[#allocation1] ss:$2 sm:$0xff] %v1038_v38  ;;  %v1792_v38 = vld [vmem:[%s2076_s12 + $0x30] sm:$0xff] }
 0x214   : > { %v1015_v41 = vld [vmem:[%s1914_s18 + $0x4] sm:$0xf]  ;;  %v1004_v42 = vpop.permute.xlu1 %1003  ;;  %1438 = vmatpush.bf16.msra.mxu1 %v1792_v38 }
 0x215   : > { %v1025_v43 = vmul.f32 %v1022_v39, %v1015_v41  ;;  %v1016_v44 = vld [vmem:[%s1914_s18 + $0x8] sm:$0xf]  ;;  %1013 = vst.msk [vmem:[%s1914_s18 + $0xc] sm:$0xf] %vm1009_vm2, %v1004_v42 }
 0x216   : > { %v1026_v45 = vmul.f32 %v1810_v30, %v1016_v44  ;;  %v1791_v30 = vld [vmem:[%s2076_s12 + $0x28] sm:$0xff] }
 0x217   : > { %v1035_v46 = vadd.f32 %v1032_v40, %v1025_v43  ;;  %1390 = vmatpush.bf16.msra.mxu0 %v1791_v30 }
 0x218   : > { %v1036_v47 = vadd.f32 %v1811_v32, %v1026_v45 }
 0x219   : > { %v1039_v48 = vmax.f32 %v1035_v46, 0.0 }
 0x21a   : > { %v1040_v49 = vmax.f32 %v1036_v47, 0.0  ;;  %v1794_v47 = vld [vmem:[%s2076_s12 + $0x40] sm:$0xff] }
 0x21b   : > { %1048 = vst [vmem:[#allocation1 + $0x1] ss:$2 sm:$0xff] %v1039_v48 }
 0x21c   : > { %1050 = vst [vmem:[#allocation1 + $0x10] ss:$2 sm:$0xff] %v1040_v49  ;;  %v1017_v50 = vld [vmem:[%s1914_s18 + $0xc] sm:$0xf] }
 0x21d   : > { %v1027_v51 = vmul.f32 %v1022_v39, %v1017_v50  ;;  %v1793_v39 = vld [vmem:[%s2076_s12 + $0x38] sm:$0xff] }
 0x21f   : > { %v1037_v52 = vadd.f32 %v1032_v40, %v1027_v51 }
 0x221   : > { %v1041_v54 = vmax.f32 %v1037_v52, 0.0 }
 0x222   : > { %v1053_v56 = vld.sshfl [vmem:[#allocation1] sm:$0xff pattern:$0x75316420] }
 0x223   : > { %1052 = vst [vmem:[#allocation1 + $0x11] ss:$2 sm:$0xff] %v1041_v54 }
 0x224   : > { %1124 = vst [vmem:[#allocation1] ss:$2 sm:$0xff] %v1116_v53 }
 0x225   : > { %1126 = vst [vmem:[#allocation1 + $0x1] ss:$2 sm:$0xff] %v1117_v55 }
 0x22a   : > { %v1054_v57 = vld.sshfl [vmem:[#allocation1 + $0x10] sm:$0xff pattern:$0x75316420] }
 0x22b   : > { %v1057_v58 = vpack.c.bf16 %v1054_v57, %v1053_v56 }
 0x22c   : > { %v1131_v61 = vld.sshfl [vmem:[#allocation1] sm:$0xff pattern:$0x75316420] }
 0x22d   : > { %1709 = vmatmul.msk.bf16.vlgmr.msra.gmra.mxu2 %vm1070_vm4, %v1057_v58  ;;  %1146 = vst [vmem:[#allocation1] ss:$2 sm:$0xff] %v1138_v59 }
 0x22e   : > { %1148 = vst [vmem:[#allocation1 + $0x1] ss:$2 sm:$0xff] %v1139_v60  ;;  %1486 = vmatpush.bf16.msra.mxu2 %v1793_v39 }
 0x235   : > { %v1153_v0 = vld.sshfl [vmem:[#allocation1] sm:$0xff pattern:$0x75316420] }
 0x236   : > { %1215 = vst [vmem:[#allocation1] ss:$2 sm:$0xff] %v1207_v62  ;;  %v1401_v62 = vld [vmem:[#allocation2 + $0x30] sm:$0xf] }
 0x237   : > { %1217 = vst [vmem:[#allocation1 + $0x1] ss:$2 sm:$0xff] %v1208_v63  ;;  %v1402_v63 = vld [vmem:[#allocation2 + $0x38] sm:$0xf] }
 0x23e   : > { %v1222_v17 = vld.sshfl [vmem:[#allocation1] sm:$0xff pattern:$0x75316420] }
 0x2b0   : > { %v1087_v5 = vpop.f32.mrf.mxu2 }
 0x2b1   : > { %v1096_v6 = vmul.f32 %v1812_v1, %v1087_v5 }
 0x2b3   : > { %v1102_v7 = vadd.f32 %v1813_v3, %v1096_v6  ;;  %v1497_v6 = vld [vmem:[#allocation2 + $0x34] sm:$0xf] }
 0x2b5   : > { %v1104_v8 = vmax.f32 %v1102_v7, 0.0  ;;  %v1498_v7 = vld [vmem:[#allocation2 + $0x3c] sm:$0xf] }
 0x2b7   : > { %v1108_v9 = vrot.slane %v1104_v8, 4  ;;  %1112 = vst.msk [vmem:[#allocation2 + $0x12] sm:$0xf] %vm455_vm1, %v1104_v8 }
 0x2b8   : > { %v1089_v10 = vpop.f32.mrf.mxu2 }
 0x2b9   : > { %1113 = vst.msk [vmem:[#allocation2 + $0x1a] sm:$0xf] %vm455_vm1, %v1108_v9  ;;  %v1097_v11 = vmul.f32 %v1812_v1, %v1089_v10 }
 0x2bb   : > { %v1103_v13 = vadd.f32 %v1813_v3, %v1097_v11  ;;  %v1450_v3 = vld [vmem:[#allocation2 + $0x3a] sm:$0xf] }
 0x2bd   : > { %v1105_v15 = vmax.f32 %v1103_v13, 0.0 }
 0x2be   : > { %v1118_v14 = vld [vmem:[#allocation2 + $0x10] sm:$0xf]  ;;  %v1209_v31 = vld [vmem:[#allocation2 + $0x14] sm:$0xf] }
 0x2bf   : > { %1128 = vst [vmem:[#allocation1 + $0x10] ss:$2 sm:$0xff] %v1118_v14  ;;  %v1255_v18 = vld [vmem:[#allocation2 + $0x10] sm:$0xf]  ;;  %v1109_v19 = vrot.slane %v1105_v15, 4 }
 0x2c0   : > { %v1119_v16 = vld [vmem:[#allocation2 + $0x18] sm:$0xf]  ;;  %1114 = vst.msk [vmem:[#allocation2 + $0x22] sm:$0xf] %vm455_vm1, %v1105_v15  ;;  %v1140_v24 = vld [vmem:[#allocation2 + $0x12] sm:$0xf] }
 0x2c1   : > { %1130 = vst [vmem:[#allocation1 + $0x11] ss:$2 sm:$0xff] %v1119_v16  ;;  %v1256_v21 = vld [vmem:[#allocation2 + $0x18] sm:$0xf]  ;;  %v1303_v28 = vld [vmem:[#allocation2 + $0x12] sm:$0xf] }
 0x2c2   : > { %1115 = vst.msk [vmem:[#allocation2 + $0x2a] sm:$0xf] %vm455_vm1, %v1109_v19  ;;  %v1141_v25 = vld [vmem:[#allocation2 + $0x1a] sm:$0xf]  ;;  %v1351_v34 = vld [vmem:[#allocation2 + $0x14] sm:$0xf] }
 0x2c3   : > { %1263 = vst [vmem:[#allocation1] ss:$2 sm:$0xff] %v1255_v18  ;;  %v1304_v29 = vld [vmem:[#allocation2 + $0x1a] sm:$0xf] }
 0x2c4   : > { %1265 = vst [vmem:[#allocation1 + $0x1] ss:$2 sm:$0xff] %v1256_v21  ;;  %v1210_v33 = vld [vmem:[#allocation2 + $0x1c] sm:$0xf] }
 0x2c5   : > { %v1352_v37 = vld [vmem:[#allocation2 + $0x1c] sm:$0xf] }
 0x2c7   : > { %v1257_v40 = vld [vmem:[#allocation2 + $0x20] sm:$0xf]  ;;  %v1353_v55 = vld [vmem:[#allocation2 + $0x24] sm:$0xf] }
 0x2c8   : > { %v1132_v22 = vld.sshfl [vmem:[#allocation1 + $0x10] sm:$0xff pattern:$0x75316420]  ;;  %v1399_v43 = vld [vmem:[#allocation2 + $0x20] sm:$0xf] }
 0x2c9   : > { %v1135_v23 = vpack.c.bf16 %v1132_v22, %v1131_v61  ;;  %1150 = vst [vmem:[#allocation1 + $0x10] ss:$2 sm:$0xff] %v1140_v24  ;;  %v1258_v42 = vld [vmem:[#allocation2 + $0x28] sm:$0xf]  ;;  %v1305_v48 = vld [vmem:[#allocation2 + $0x22] sm:$0xf] }
 0x2ca   : > { %1152 = vst [vmem:[#allocation1 + $0x11] ss:$2 sm:$0xff] %v1141_v25  ;;  %v1400_v46 = vld [vmem:[#allocation2 + $0x28] sm:$0xf]  ;;  %v1447_v51 = vld [vmem:[#allocation2 + $0x22] sm:$0xf] }
 0x2cb   : > { %1721 = vmatmul.msk.bf16.vlgmr.msrb.gmra.mxu0 %vm442_vm0, %v1135_v23  ;;  %v1270_v26 = vld.sshfl [vmem:[#allocation1] sm:$0xff pattern:$0x75316420]  ;;  %v1306_v50 = vld [vmem:[#allocation2 + $0x2a] sm:$0xf] }
 0x2cc   : > { %1311 = vst [vmem:[#allocation1] ss:$2 sm:$0xff] %v1303_v28  ;;  %v1448_v54 = vld [vmem:[#allocation2 + $0x2a] sm:$0xf]  ;;  %v1495_v58 = vld [vmem:[#allocation2 + $0x24] sm:$0xf] }
 0x2cd   : > { %1313 = vst [vmem:[#allocation1 + $0x1] ss:$2 sm:$0xff] %v1304_v29  ;;  %v1354_v57 = vld [vmem:[#allocation2 + $0x2c] sm:$0xf] }
 0x2ce   : > { %v1496_v61 = vld [vmem:[#allocation2 + $0x2c] sm:$0xf] }
 0x2d1   : > { %v1154_v32 = vld.sshfl [vmem:[#allocation1 + $0x10] sm:$0xff pattern:$0x75316420] }
 0x2d2   : > { %v1157_v35 = vpack.c.bf16 %v1154_v32, %v1153_v0  ;;  %1219 = vst [vmem:[#allocation1 + $0x10] ss:$2 sm:$0xff] %v1209_v31 }
 0x2d3   : > { %1221 = vst [vmem:[#allocation1 + $0x11] ss:$2 sm:$0xff] %v1210_v33 }
 0x2d4   : > { %v1318_v36 = vld.sshfl [vmem:[#allocation1] sm:$0xff pattern:$0x75316420]  ;;  %1716 = vmatmul.msk.bf16.vlgmr.msra.gmra.mxu3 %vm442_vm0, %v1157_v35 }
 0x2d5   : > { %1359 = vst [vmem:[#allocation1] ss:$2 sm:$0xff] %v1351_v34  ;;  %1534 = vmatpush.bf16.msra.mxu3 %v1794_v47 }
 0x2d6   : > { %1361 = vst [vmem:[#allocation1 + $0x1] ss:$2 sm:$0xff] %v1352_v37 }
 0x2da   : > { %v1223_v41 = vld.sshfl [vmem:[#allocation1 + $0x10] sm:$0xff pattern:$0x75316420] }
 0x2db   : > { %v1226_v44 = vpack.c.bf16 %v1223_v41, %v1222_v17  ;;  %1267 = vst [vmem:[#allocation1 + $0x10] ss:$2 sm:$0xff] %v1257_v40 }
 0x2dc   : > { %1269 = vst [vmem:[#allocation1 + $0x11] ss:$2 sm:$0xff] %v1258_v42 }
 0x2dd   : > { %v1366_v45 = vld.sshfl [vmem:[#allocation1] sm:$0xff pattern:$0x75316420]  ;;  %1728 = vmatmul.msk.bf16.vlgmr.msrb.gmra.mxu1 %vm442_vm0, %v1226_v44 }
 0x2de   : > { %1407 = vst [vmem:[#allocation1] ss:$2 sm:$0xff] %v1399_v43 }
 0x2df   : > { %1409 = vst [vmem:[#allocation1 + $0x1] ss:$2 sm:$0xff] %v1400_v46 }
 0x2e3   : > { %v1271_v49 = vld.sshfl [vmem:[#allocation1 + $0x10] sm:$0xff pattern:$0x75316420] }
 0x2e4   : > { %v1274_v52 = vpack.c.bf16 %v1271_v49, %v1270_v26  ;;  %1315 = vst [vmem:[#allocation1 + $0x10] ss:$2 sm:$0xff] %v1305_v48 }
 0x2e5   : > { %1317 = vst [vmem:[#allocation1 + $0x11] ss:$2 sm:$0xff] %v1306_v50 }
 0x2e6   : > { %v1414_v53 = vld.sshfl [vmem:[#allocation1] sm:$0xff pattern:$0x75316420]  ;;  %1735 = vmatmul.msk.bf16.vlgmr.msrb.gmra.mxu2 %vm442_vm0, %v1274_v52 }
 0x2e7   : > { %1455 = vst [vmem:[#allocation1] ss:$2 sm:$0xff] %v1447_v51 }
 0x2e8   : > { %1457 = vst [vmem:[#allocation1 + $0x1] ss:$2 sm:$0xff] %v1448_v54 }
 0x2ec   : > { %v1319_v56 = vld.sshfl [vmem:[#allocation1 + $0x10] sm:$0xff pattern:$0x75316420] }
 0x2ed   : > { %v1322_v59 = vpack.c.bf16 %v1319_v56, %v1318_v36  ;;  %1363 = vst [vmem:[#allocation1 + $0x10] ss:$2 sm:$0xff] %v1353_v55 }
 0x2ee   : > { %1365 = vst [vmem:[#allocation1 + $0x11] ss:$2 sm:$0xff] %v1354_v57 }
 0x2ef   : > { %v1462_v60 = vld.sshfl [vmem:[#allocation1] sm:$0xff pattern:$0x75316420]  ;;  %1742 = vmatmul.msk.bf16.vlgmr.msrb.gmra.mxu3 %vm442_vm0, %v1322_v59 }
 0x2f0   : > { %1503 = vst [vmem:[#allocation1] ss:$2 sm:$0xff] %v1495_v58 }
 0x2f1   : > { %1505 = vst [vmem:[#allocation1 + $0x1] ss:$2 sm:$0xff] %v1496_v61 }
 0x2f5   : > { %v1367_v0 = vld.sshfl [vmem:[#allocation1 + $0x10] sm:$0xff pattern:$0x75316420] }
 0x2f6   : > { %v1370_v1 = vpack.c.bf16 %v1367_v0, %v1366_v45  ;;  %1411 = vst [vmem:[#allocation1 + $0x10] ss:$2 sm:$0xff] %v1401_v62 }
 0x2f7   : > { %1413 = vst [vmem:[#allocation1 + $0x11] ss:$2 sm:$0xff] %v1402_v63 }
 0x2f8   : > { %1749 = vmatmul.msk.bf16.vlgmr.msra.gmra.mxu0 %vm442_vm0, %v1370_v1  ;;  %v1510_v10 = vld.sshfl [vmem:[#allocation1] sm:$0xff pattern:$0x75316420] }
 0x2fe   : > { %v1415_v4 = vld.sshfl [vmem:[#allocation1 + $0x10] sm:$0xff pattern:$0x75316420] }
 0x2ff   : > { %v1418_v5 = vpack.c.bf16 %v1415_v4, %v1414_v53  ;;  %1459 = vst [vmem:[#allocation1 + $0x10] ss:$2 sm:$0xff] %v1449_v2 }
 0x300   : > { %1461 = vst [vmem:[#allocation1 + $0x11] ss:$2 sm:$0xff] %v1450_v3 }
 0x301   : > { %1756 = vmatmul.msk.bf16.vlgmr.msra.gmra.mxu1 %vm442_vm0, %v1418_v5 }
 0x307   : > { %v1463_v8 = vld.sshfl [vmem:[#allocation1 + $0x10] sm:$0xff pattern:$0x75316420] }
 0x308   : > { %v1466_v9 = vpack.c.bf16 %v1463_v8, %v1462_v60  ;;  %1507 = vst [vmem:[#allocation1 + $0x10] ss:$2 sm:$0xff] %v1497_v6 }
 0x309   : > { %1509 = vst [vmem:[#allocation1 + $0x11] ss:$2 sm:$0xff] %v1498_v7 }
 0x30a   : > { %1763 = vmatmul.msk.bf16.vlgmr.msra.gmra.mxu2 %vm442_vm0, %v1466_v9 }
 0x310   : > { %v1511_v11 = vld.sshfl [vmem:[#allocation1 + $0x10] sm:$0xff pattern:$0x75316420] }
 0x311   : > { %v1514_v12 = vpack.c.bf16 %v1511_v11, %v1510_v10 }
 0x313   : > { %1770 = vmatmul.msk.bf16.vlgmr.msra.gmra.mxu3 %vm442_vm0, %v1514_v12 }
 0x348   : > { %v1202_v14 = vpop.f32.mrf.mxu0 }
 0x350   : > { %v1204_v18 = vpop.f32.mrf.mxu0 }
 0x357   : > { %v1179_v13 = vpop.f32.mrf.mxu3 }
 0x358   : > { %v1203_v20 = vadd.f32 %v1202_v14, %v1179_v13 }
 0x35a   : > { %v1248_v15 = vpop.f32.mrf.mxu1 }
 0x35b   : > { %v1253_v23 = vadd.f32 %v1248_v15, %v1203_v20 }
 0x35f   : > { %v1181_v16 = vpop.f32.mrf.mxu3 }
 0x360   : > { %v1205_v26 = vadd.f32 %v1204_v18, %v1181_v16 }
 0x362   : > { %v1250_v21 = vpop.f32.mrf.mxu1 }
 0x363   : > { %v1254_v31 = vadd.f32 %v1250_v21, %v1205_v26 }
 0x369   : > { %v1296_v17 = vpop.f32.mrf.mxu2 }
 0x36a   : > { %v1301_v24 = vadd.f32 %v1296_v17, %v1253_v23 }
 0x371   : > { %v1298_v22 = vpop.f32.mrf.mxu2 }
 0x372   : > { %v1344_v19 = vpop.f32.mrf.mxu3  ;;  %v1302_v33 = vadd.f32 %v1298_v22, %v1254_v31 }
 0x373   : > { %v1349_v27 = vadd.f32 %v1344_v19, %v1301_v24 }
 0x375   : > { %v1392_v25 = vpop.f32.mrf.mxu0 }
 0x376   : > { %v1397_v32 = vadd.f32 %v1392_v25, %v1349_v27 }
 0x37a   : > { %v1346_v28 = vpop.f32.mrf.mxu3 }
 0x37b   : > { %v1350_v35 = vadd.f32 %v1346_v28, %v1302_v33 }
 0x37d   : > { %v1394_v37 = vpop.f32.mrf.mxu0 }
 0x37e   : > { %v1440_v29 = vpop.f32.mrf.mxu1  ;;  %v1398_v41 = vadd.f32 %v1394_v37, %v1350_v35 }
 0x37f   : > { %v1445_v34 = vadd.f32 %v1440_v29, %v1397_v32 }
 0x386   : > { %v1442_v40 = vpop.f32.mrf.mxu1 }
 0x387   : > { %v1446_v44 = vadd.f32 %v1442_v40, %v1398_v41 }
 0x38d   : > { %v1488_v30 = vpop.f32.mrf.mxu2 }
 0x38e   : > { %v1493_v36 = vadd.f32 %v1488_v30, %v1445_v34 }
 0x395   : > { %v1490_v43 = vpop.f32.mrf.mxu2 }
 0x396   : > { %v1536_v38 = vpop.f32.mrf.mxu3  ;;  %v1494_v45 = vadd.f32 %v1490_v43, %v1446_v44 }
 0x397   : > { %v1541_v39 = vadd.f32 %v1536_v38, %v1493_v36 }
 0x399   : > { %v1545_v42 = vrot.slane %v1541_v39, 4  ;;  %1547 = vst [vmem:[#allocation1] ss:$2 sm:$0xff] %v1541_v39 }
 0x39b   : > { %1550 = vst [vmem:[#allocation1 + $0x10] ss:$2 sm:$0xff] %v1545_v42 }
 0x39e   : > { %v1538_v46 = vpop.f32.mrf.mxu3 }
 0x39f   : > { %v1542_v47 = vadd.f32 %v1538_v46, %v1494_v45 }
 0x3a0   : > { %v1548_v48 = vld.sshfl [vmem:[#allocation1] sm:$0xff pattern:$0x75316420] }
 0x3a1   : > { %v1546_v49 = vrot.slane %v1542_v47, 4  ;;  %1553 = vst [vmem:[#allocation1 + $0x20] ss:$2 sm:$0xff] %v1542_v47  ;;  %1558 = vrot.lane.b32.xlu2 %v1548_v48, %s1824_s15 }
 0x3a2   : > { %v1551_v50 = vld.sshfl [vmem:[#allocation1 + $0x10] sm:$0xff pattern:$0x75316420] }
 0x3a3   : > { %1556 = vst [vmem:[#allocation1 + $0x30] ss:$2 sm:$0xff] %v1546_v49 }
 0x3a8   : > { %v1554_v51 = vld.sshfl [vmem:[#allocation1 + $0x20] sm:$0xff pattern:$0x75316420] }
 0x3a9   : > { %1560 = vrot.lane.b32.xlu2 %v1551_v50, %s1824_s15  ;;  %1562 = vrot.lane.b32.xlu0 %v1554_v51, %s1824_s15 }
 0x3aa   : > { %v1557_v52 = vld.sshfl [vmem:[#allocation1 + $0x30] sm:$0xff pattern:$0x75316420] }
 0x3ab   : > { %1564 = vrot.lane.b32.xlu1 %v1557_v52, %s1824_s15 }
 0x3fb   : > { %v1559_v53 = vpop.permute.xlu2 %1558 }
 0x3fc   : > { %1571 = vst.msk [vmem:[%s1914_s18] sm:$0xf] %vm1570_vm5, %v1559_v53 }
 0x403   : > { %v1561_v54 = vpop.permute.xlu2 %1560 }
 0x404   : > { %1572 = vst.msk [vmem:[%s1914_s18 + $0x4] sm:$0xf] %vm1570_vm5, %v1561_v54 }
 0x41b   : > { %v1563_v55 = vpop.permute.xlu0 %1562 }
 0x41c   : > { %1573 = vst.msk [vmem:[%s1914_s18 + $0x8] sm:$0xf] %vm1570_vm5, %v1563_v55 }
 0x41d   : > { %v1565_v56 = vpop.permute.xlu1 %1564 }
 0x41e   : > { %1574 = vst.msk [vmem:[%s1914_s18 + $0xc] sm:$0xf] %vm1570_vm5, %v1565_v56 }
 0x41f PF: > { %s23_s25 = sadd.s32 1, %s1820_s25  }
 0x420   : > { %p20_p4 = scmp.ge.s32.totalorder %s23_s25, 4  }
 0x422   :  { %22 = sbr.rel (!%p20_p4) target bundleno = 1 (0x1), region = 186 }

// kernel: backbone_forward.16
= control target key start
LH: loop header
LB: loop body
LE: loop exit
PB: predicated region body
PF: predicated region fallthrough
CT: control target
= control target key end

     0   :  { %s1911_s25 = smov 0   ;;  %s2120_s0 = inlined_call_operand.vmem [shape: f32[2,4,4,16], index: 0, kind: input, shape index: {}]   ;;  %s2121_s1 = inlined_call_operand.vmem [shape: f32[1,16], index: 1, kind: input, shape index: {}]   ;;  %s2122_s2 = inlined_call_operand.vmem [shape: f32[1,16], index: 2, kind: input, shape index: {}]   ;;  %s2123_s3 = inlined_call_operand.vmem [shape: bf16[16,16], index: 3, kind: input, shape index: {}]   ;;  %s2124_s4 = inlined_call_operand.vmem [shape: f32[1,16], index: 4, kind: input, shape index: {}]   ;;  %s2125_s5 = inlined_call_operand.vmem [shape: f32[1,16], index: 5, kind: input, shape index: {}]   ;;  %s2126_s6 = inlined_call_operand.vmem [shape: bf16[9,16,8], index: 6, kind: input, shape index: {}]   ;;  %s2127_s7 = inlined_call_operand.vmem [shape: f32[1,24], index: 7, kind: input, shape index: {}]   ;;  %s2128_s8 = inlined_call_operand.vmem [shape: f32[1,24], index: 8, kind: input, shape index: {}]   ;;  %s2129_s9 = inlined_call_operand.vmem [shape: bf16[24,16], index: 9, kind: input, shape index: {}]   ;;  %s2130_s10 = inlined_call_operand.vmem [shape: f32[1,16], index: 10, kind: input, shape index: {}]   ;;  %s2131_s11 = inlined_call_operand.vmem [shape: f32[1,16], index: 11, kind: input, shape index: {}]   ;;  %s2132_s12 = inlined_call_operand.vmem [shape: bf16[9,16,8], index: 12, kind: input, shape index: {}]   ;;  %s2133_s13 = inlined_call_operand.vmem [shape: f32[2,4,4,32], index: 13, kind: output, shape index: {}]  }
   0x1 LB: > { %s1646_s26 = sadd.s32 4294967295, %s1836_s25   ;;  %p1650_p0 = scmp.ge.s32.totalorder %s1836_s25, 1  ;;  %s1836_s25 = sphi %s1911_s25, %s23_s25  }
   0x2   : > { %p387_p1 = scmp.lt.s32.totalorder %s1836_s25, 3 }
   0x4   : > { %p388_p2 = pnand %p1650_p0, %p387_p1 }
   0x5   : > { %p431_p3 = scmp.lt.s32.totalorder (!%p388_p2), %s1646_s26, 1  ;;  %s1839_s14 = smov (!%p388_p2), 16  }
   0x6   : > { %391 = sbr.rel (%p388_p2) target bundleno = 1002 (0x3ea), region = 72 }
   0xb   : > { %v1791_v0 = vld [vmem:[%s2123_s3] sm:$0xff]  ;;  %vm442_vm0 = vcmask 130048   ;;  %s2135_s26 = smov (!%p431_p3, %s1646_s26), 1  ;;  %vm444_vm1 = vcmask 125952   ;;  %v1838_v1 = vmov 0.0   ;;  %v1793_v51 = vld [vmem:[%s2126_s6 + $0x8] sm:$0xff] }
   0xc   : > { %538 = vmatpush.bf16.msra.mxu0 %v1791_v0  ;;  %443 = vst.msk [vmem:[#allocation2] sm:$0xff] %vm442_vm0, %v1838_v1  ;;  %s1789_s29 = sshll.u32 %s2135_s26, 4  ;;  %v1822_v6 = vld [vmem:[%s2121_s1] ss:$0 sm:$0xff]  ;;  %631 = vmatpush.bf16.msra.mxu1 %v1793_v51  ;;  %v1794_v54 = vld [vmem:[%s2126_s6 + $0x10] sm:$0xff]  ;;  %v1795_v61 = vld [vmem:[%s2126_s6 + $0x18] sm:$0xff] }
   0xd   : > { %445 = vst.msk [vmem:[#allocation2 + $0x8] sm:$0xf] %vm444_vm1, %v1838_v1  ;;  %s435_s15 = scalar_lea.vmem %s2120_s0, %s1789_s29  ;;  %s1932_s18 = scalar_lea.vmem %s2133_s13, %s1789_s29  ;;  %v1823_v7 = vld [vmem:[%s2122_s2] ss:$0 sm:$0xff]  ;;  %v484_v8 = vrot.slane %v1822_v6, 4  ;;  %700 = vmatpush.bf16.msra.mxu3 %v1794_v54  ;;  %vm1025_vm2 = vcmask 191616  }
   0xe   : > { %446 = vst.msk [vmem:[#allocation2 + $0x10] sm:$0xff] %vm442_vm0, %v1838_v1  ;;  %v468_v2 = vld [vmem:[%s435_s15] sm:$0xf]  ;;  %v469_v3 = vld [vmem:[%s435_s15 + $0x4] sm:$0xf]  ;;  %v494_v10 = vrot.slane %v1823_v7, 4 }
   0xf   : > { %v470_v4 = vld [vmem:[%s435_s15 + $0x8] sm:$0xf]  ;;  %v471_v5 = vld [vmem:[%s435_s15 + $0xc] sm:$0xf]  ;;  %472 = vst.msk [vmem:[%s1932_s18] sm:$0xf] %vm444_vm1, %v468_v2 }
  0x10   : > { %473 = vst.msk [vmem:[%s1932_s18 + $0x4] sm:$0xf] %vm444_vm1, %v469_v3  ;;  %v1792_v52 = vld [vmem:[%s2126_s6] sm:$0xff]  ;;  %748 = vmatpush.bf16.msrb.mxu0 %v1795_v61  ;;  %vm1090_vm3 = vcmask 1043456   ;;  %vm1086_vm4 = vcmask 195584   ;;  %s1840_s15 = smov 24  }
  0x11   : > { %474 = vst.msk [vmem:[%s1932_s18 + $0x8] sm:$0xf] %vm444_vm1, %v470_v4  ;;  %654 = vmatpush.bf16.msra.mxu2 %v1792_v52  ;;  %v1824_v57 = vld [vmem:[%s2124_s4] ss:$0 sm:$0xff]  ;;  %vm1586_vm5 = vcmask 257216  }
  0x12   : > { %475 = vst.msk [vmem:[%s1932_s18 + $0xc] sm:$0xf] %vm444_vm1, %v471_v5  ;;  %v1825_v58 = vld [vmem:[%s2125_s5] ss:$0 sm:$0xff] }
  0x13   : > { %447 = vst.msk [vmem:[#allocation2 + $0x18] sm:$0xf] %vm444_vm1, %v1838_v1  ;;  %v570_v29 = vld [vmem:[#allocation2] sm:$0xf]  ;;  %v592_v31 = vld [vmem:[#allocation2 + $0x4] sm:$0xf] }
  0x14   : > { %452 = vst.msk [vmem:[#allocation2 + $0x40] sm:$0xff] %vm442_vm0, %v1838_v1  ;;  %v661_v36 = vld [vmem:[#allocation2 + $0x8] sm:$0xf]  ;;  %v1796_v3 = vld [vmem:[%s2126_s6 + $0x20] sm:$0xff] }
  0x15   : > { %453 = vst.msk [vmem:[#allocation2 + $0x48] sm:$0xf] %vm444_vm1, %v1838_v1  ;;  %v571_v30 = vld [vmem:[#allocation2 + $0x10] sm:$0xf]  ;;  %v593_v32 = vld [vmem:[#allocation2 + $0x14] sm:$0xf]  ;;  %796 = vmatpush.bf16.msrb.mxu1 %v1796_v3 }
  0x16   : > { %v476_v9 = vld [vmem:[%s1932_s18] sm:$0xf]  ;;  %454 = vst.msk [vmem:[#allocation2 + $0x50] sm:$0xff] %vm442_vm0, %v1838_v1 }
  0x17   : > { %v477_v11 = vld [vmem:[%s1932_s18 + $0x4] sm:$0xf]  ;;  %v486_v12 = vmul.f32 %v1822_v6, %v476_v9  ;;  %455 = vst.msk [vmem:[#allocation2 + $0x58] sm:$0xf] %vm444_vm1, %v1838_v1  ;;  %v1797_v9 = vld [vmem:[%s2126_s6 + $0x28] sm:$0xff] }
  0x18   : > { %v478_v13 = vld [vmem:[%s1932_s18 + $0x8] sm:$0xf]  ;;  %v487_v14 = vmul.f32 %v484_v8, %v477_v11  ;;  %460 = vst.msk [vmem:[#allocation2 + $0x80] sm:$0xff] %vm442_vm0, %v1838_v1  ;;  %844 = vmatpush.bf16.msrb.mxu2 %v1797_v9 }
  0x19   : > { %v479_v15 = vld [vmem:[%s1932_s18 + $0xc] sm:$0xf]  ;;  %v488_v16 = vmul.f32 %v1822_v6, %v478_v13  ;;  %v496_v17 = vadd.f32 %v1823_v7, %v486_v12  ;;  %461 = vst.msk [vmem:[#allocation2 + $0x88] sm:$0xf] %vm444_vm1, %v1838_v1 }
  0x1a   : > { %v489_v18 = vmul.f32 %v484_v8, %v479_v15  ;;  %v497_v19 = vadd.f32 %v494_v10, %v487_v14  ;;  %462 = vst.msk [vmem:[#allocation2 + $0x90] sm:$0xff] %vm442_vm0, %v1838_v1  ;;  %v662_v37 = vld [vmem:[#allocation2 + $0x18] sm:$0xf] }
  0x1b   : > { %v498_v20 = vadd.f32 %v1823_v7, %v488_v16  ;;  %v500_v21 = vmax.f32 %v496_v17, 0.0  ;;  %463 = vst.msk [vmem:[#allocation2 + $0x98] sm:$0xf] %vm444_vm1, %v1838_v1  ;;  %v709_v42 = vld [vmem:[#allocation2 + $0x40] sm:$0xf]  ;;  %v1798_v16 = vld [vmem:[%s2126_s6 + $0x30] sm:$0xff] }
  0x1c   : > { %v499_v22 = vadd.f32 %v494_v10, %v489_v18  ;;  %v501_v23 = vmax.f32 %v497_v19, 0.0  ;;  %448 = vst.msk [vmem:[#allocation2 + $0x20] sm:$0xff] %vm442_vm0, %v1838_v1  ;;  %v805_v13 = vld [vmem:[#allocation2 + $0x48] sm:$0xf]  ;;  %893 = vmatpush.bf16.msrb.mxu3 %v1798_v16  ;;  %v1799_v19 = vld [vmem:[%s2126_s6 + $0x38] sm:$0xff] }
  0x1d   : > { %v502_v24 = vmax.f32 %v498_v20, 0.0  ;;  %508 = vst [vmem:[#allocation1] ss:$2 sm:$0xff] %v500_v21  ;;  %v710_v43 = vld [vmem:[#allocation2 + $0x50] sm:$0xf] }
  0x1e   : > { %v503_v25 = vmax.f32 %v499_v22, 0.0  ;;  %510 = vst [vmem:[#allocation1 + $0x1] ss:$2 sm:$0xff] %v501_v23  ;;  %v806_v14 = vld [vmem:[#allocation2 + $0x58] sm:$0xf] }
  0x1f   : > { %512 = vst [vmem:[#allocation1 + $0x10] ss:$2 sm:$0xff] %v502_v24  ;;  %v854_v20 = vld [vmem:[#allocation2 + $0x80] sm:$0xf]  ;;  %v1800_v24 = vld [vmem:[%s2126_s6 + $0x40] sm:$0xff] }
  0x20   : > { %514 = vst [vmem:[#allocation1 + $0x11] ss:$2 sm:$0xff] %v503_v25 }
  0x21   : > { %449 = vst.msk [vmem:[#allocation2 + $0x28] sm:$0xf] %vm444_vm1, %v1838_v1  ;;  %v855_v21 = vld [vmem:[#allocation2 + $0x90] sm:$0xf] }
  0x22   : > { %450 = vst.msk [vmem:[#allocation2 + $0x30] sm:$0xff] %vm442_vm0, %v1838_v1 }
  0x23   : > { %451 = vst.msk [vmem:[#allocation2 + $0x38] sm:$0xf] %vm444_vm1, %v1838_v1  ;;  %v572_v34 = vld [vmem:[#allocation2 + $0x20] sm:$0xf]  ;;  %v594_v39 = vld [vmem:[#allocation2 + $0x24] sm:$0xf] }
  0x24   : > { %456 = vst.msk [vmem:[#allocation2 + $0x60] sm:$0xff] %vm442_vm0, %v1838_v1 }
  0x25   : > { %v515_v26 = vld.sshfl [vmem:[#allocation1] sm:$0xff pattern:$0x75316420]  ;;  %457 = vst.msk [vmem:[#allocation2 + $0x68] sm:$0xf] %vm444_vm1, %v1838_v1 }
  0x26   : > { %458 = vst.msk [vmem:[#allocation2 + $0x70] sm:$0xff] %vm442_vm0, %v1838_v1 }
  0x27   : > { %v516_v27 = vld.sshfl [vmem:[#allocation1 + $0x10] sm:$0xff pattern:$0x75316420]  ;;  %459 = vst.msk [vmem:[#allocation2 + $0x78] sm:$0xf] %vm444_vm1, %v1838_v1 }
  0x28   : > { %v519_v28 = vpack.c.bf16 %v516_v27, %v515_v26  ;;  %464 = vst.msk [vmem:[#allocation2 + $0xa0] sm:$0xff] %vm442_vm0, %v1838_v1  ;;  %v663_v45 = vld [vmem:[#allocation2 + $0x28] sm:$0xf] }
  0x29   : > { %465 = vst.msk [vmem:[#allocation2 + $0xa8] sm:$0xf] %vm444_vm1, %v1838_v1  ;;  %v573_v35 = vld [vmem:[#allocation2 + $0x30] sm:$0xf]  ;;  %v595_v40 = vld [vmem:[#allocation2 + $0x34] sm:$0xf] }
  0x2a   : > { %1659 = vmatmul.msk.bf16.vlgmr.msra.gmra.mxu0 %vm442_vm0, %v519_v28  ;;  %466 = vst.msk [vmem:[#allocation2 + $0xb0] sm:$0xff] %vm442_vm0, %v1838_v1  ;;  %v664_v46 = vld [vmem:[#allocation2 + $0x38] sm:$0xf]  ;;  %v902_v28 = vld [vmem:[#allocation2 + $0x84] sm:$0xf] }
  0x2b   : > { %467 = vst.msk [vmem:[#allocation2 + $0xb8] sm:$0xf] %vm444_vm1, %v1838_v1  ;;  %v711_v48 = vld [vmem:[#allocation2 + $0x60] sm:$0xf]  ;;  %941 = vmatpush.bf16.msra.mxu0 %v1799_v19 }
  0x2c   : > { %578 = vst [vmem:[#allocation1] ss:$2 sm:$0xff] %v570_v29  ;;  %v807_v23 = vld [vmem:[#allocation2 + $0x68] sm:$0xf]  ;;  %v903_v29 = vld [vmem:[#allocation2 + $0x94] sm:$0xf] }
  0x2d   : > { %580 = vst [vmem:[#allocation1 + $0x1] ss:$2 sm:$0xff] %v571_v30  ;;  %v712_v49 = vld [vmem:[#allocation2 + $0x70] sm:$0xf] }
  0x2e   : > { %582 = vst [vmem:[#allocation1 + $0x10] ss:$2 sm:$0xff] %v572_v34  ;;  %v808_v25 = vld [vmem:[#allocation2 + $0x78] sm:$0xf] }
  0x2f   : > { %584 = vst [vmem:[#allocation1 + $0x11] ss:$2 sm:$0xff] %v573_v35  ;;  %v950_v35 = vld [vmem:[#allocation2 + $0x88] sm:$0xf] }
  0x34   : > { %v585_v33 = vld.sshfl [vmem:[#allocation1] sm:$0xff pattern:$0x75316420] }
  0x35   : > { %600 = vst [vmem:[#allocation1] ss:$2 sm:$0xff] %v592_v31  ;;  %v856_v31 = vld [vmem:[#allocation2 + $0xa0] sm:$0xf] }
  0x36   : > { %602 = vst [vmem:[#allocation1 + $0x1] ss:$2 sm:$0xff] %v593_v32  ;;  %v586_v41 = vld.sshfl [vmem:[#allocation1 + $0x10] sm:$0xff pattern:$0x75316420] }
  0x37   : > { %604 = vst [vmem:[#allocation1 + $0x10] ss:$2 sm:$0xff] %v594_v39  ;;  %v589_v55 = vpack.c.bf16 %v586_v41, %v585_v33  ;;  %v857_v32 = vld [vmem:[#allocation2 + $0xb0] sm:$0xf]  ;;  %v905_v39 = vld [vmem:[#allocation2 + $0xb4] sm:$0xf] }
  0x38   : > { %606 = vst [vmem:[#allocation1 + $0x11] ss:$2 sm:$0xff] %v595_v40 }
  0x39   : > { %1671 = vmatmul.msk.bf16.vlgmr.msra.gmra.mxu2 %vm442_vm0, %v589_v55 }
  0x3d   : > { %v607_v38 = vld.sshfl [vmem:[#allocation1] sm:$0xff pattern:$0x75316420] }
  0x3e   : > { %669 = vst [vmem:[#allocation1] ss:$2 sm:$0xff] %v661_v36  ;;  %v951_v36 = vld [vmem:[#allocation2 + $0x98] sm:$0xf] }
  0x3f   : > { %671 = vst [vmem:[#allocation1 + $0x1] ss:$2 sm:$0xff] %v662_v37  ;;  %v608_v47 = vld.sshfl [vmem:[#allocation1 + $0x10] sm:$0xff pattern:$0x75316420] }
  0x40   : > { %673 = vst [vmem:[#allocation1 + $0x10] ss:$2 sm:$0xff] %v663_v45  ;;  %v611_v53 = vpack.c.bf16 %v608_v47, %v607_v38  ;;  %v904_v38 = vld [vmem:[#allocation2 + $0xa4] sm:$0xf] }
  0x41   : > { %675 = vst [vmem:[#allocation1 + $0x11] ss:$2 sm:$0xff] %v664_v46 }
  0x42   : > { %1666 = vmatmul.msk.bf16.vlgmr.msra.gmra.mxu1 %vm442_vm0, %v611_v53 }
  0x43   : > { %989 = vmatpush.bf16.msra.mxu1 %v1800_v24 }
  0x46   : > { %v676_v44 = vld.sshfl [vmem:[#allocation1] sm:$0xff pattern:$0x75316420] }
  0x47   : > { %717 = vst [vmem:[#allocation1] ss:$2 sm:$0xff] %v709_v42  ;;  %v952_v42 = vld [vmem:[#allocation2 + $0xa8] sm:$0xf] }
  0x48   : > { %719 = vst [vmem:[#allocation1 + $0x1] ss:$2 sm:$0xff] %v710_v43  ;;  %v677_v50 = vld.sshfl [vmem:[#allocation1 + $0x10] sm:$0xff pattern:$0x75316420] }
  0x49   : > { %721 = vst [vmem:[#allocation1 + $0x10] ss:$2 sm:$0xff] %v711_v48  ;;  %v680_v56 = vpack.c.bf16 %v677_v50, %v676_v44  ;;  %v953_v43 = vld [vmem:[#allocation2 + $0xb8] sm:$0xf] }
  0x4a   : > { %723 = vst [vmem:[#allocation1 + $0x11] ss:$2 sm:$0xff] %v712_v49 }
  0x4b   : > { %1678 = vmatmul.msk.bf16.vlgmr.msra.gmra.mxu3 %vm442_vm0, %v680_v56 }
  0x4f   : > { %v724_v63 = vld.sshfl [vmem:[#allocation1] sm:$0xff pattern:$0x75316420] }
  0x51   : > { %v725_v0 = vld.sshfl [vmem:[#allocation1 + $0x10] sm:$0xff pattern:$0x75316420] }
  0x52   : > { %v728_v1 = vpack.c.bf16 %v725_v0, %v724_v63 }
  0x54   : > { %1685 = vmatmul.msk.bf16.vlgmr.msrb.gmra.mxu0 %vm442_vm0, %v728_v1 }
  0xa7   : > { %v540_v59 = vpop.f32.mrf.mxu0 }
  0xa8   : > { %v549_v60 = vmul.f32 %v1824_v57, %v540_v59 }
  0xaa   : > { %v555_v62 = vadd.f32 %v1825_v58, %v549_v60 }
  0xac   : > { %v557_v2 = vmax.f32 %v555_v62, 0.0 }
  0xae   : > { %v561_v4 = vrot.slane %v557_v2, 4  ;;  %566 = vst.msk [vmem:[#allocation2 + $0x44] sm:$0xf] %vm444_vm1, %v557_v2 }
  0xaf   : > { %v542_v5 = vpop.f32.mrf.mxu0 }
  0xb0   : > { %567 = vst.msk [vmem:[#allocation2 + $0x54] sm:$0xf] %vm444_vm1, %v561_v4  ;;  %v550_v6 = vmul.f32 %v1824_v57, %v542_v5 }
  0xb2   : > { %v556_v7 = vadd.f32 %v1825_v58, %v550_v6 }
  0xb4   : > { %v558_v8 = vmax.f32 %v556_v7, 0.0 }
  0xb5   : > { %v757_v10 = vld [vmem:[#allocation2 + $0x44] sm:$0xf] }
  0xb6   : > { %765 = vst [vmem:[#allocation1] ss:$2 sm:$0xff] %v757_v10  ;;  %v562_v11 = vrot.slane %v558_v8, 4 }
  0xb7   : > { %v758_v12 = vld [vmem:[#allocation2 + $0x54] sm:$0xf]  ;;  %568 = vst.msk [vmem:[#allocation2 + $0x64] sm:$0xf] %vm444_vm1, %v558_v8 }
  0xb8   : > { %767 = vst [vmem:[#allocation1 + $0x1] ss:$2 sm:$0xff] %v758_v12 }
  0xb9   : > { %569 = vst.msk [vmem:[#allocation2 + $0x74] sm:$0xf] %vm444_vm1, %v562_v11 }
  0xbc   : > { %v656_v50 = vpop.f32.mrf.mxu2 }
  0xbe   : > { %v759_v17 = vld [vmem:[#allocation2 + $0x64] sm:$0xf] }
  0xbf   : > { %v772_v15 = vld.sshfl [vmem:[#allocation1] sm:$0xff pattern:$0x75316420]  ;;  %769 = vst [vmem:[#allocation1 + $0x10] ss:$2 sm:$0xff] %v759_v17  ;;  %v633_v49 = vpop.f32.mrf.mxu1 }
  0xc0   : > { %813 = vst [vmem:[#allocation1] ss:$2 sm:$0xff] %v805_v13  ;;  %v760_v18 = vld [vmem:[#allocation2 + $0x74] sm:$0xf]  ;;  %v657_v54 = vadd.f32 %v656_v50, %v633_v49 }
  0xc1   : > { %815 = vst [vmem:[#allocation1 + $0x1] ss:$2 sm:$0xff] %v806_v14 }
  0xc2   : > { %771 = vst [vmem:[#allocation1 + $0x11] ss:$2 sm:$0xff] %v760_v18 }
  0xc4   : > { %v658_v55 = vpop.f32.mrf.mxu2 }
  0xc7   : > { %v635_v51 = vpop.f32.mrf.mxu1 }
  0xc8   : > { %v820_v22 = vld.sshfl [vmem:[#allocation1] sm:$0xff pattern:$0x75316420]  ;;  %v659_v62 = vadd.f32 %v658_v55, %v635_v51  ;;  %v1133_v55 = vld [vmem:[#allocation2 + $0x10] sm:$0xf] }
  0xc9   : > { %862 = vst [vmem:[#allocation1] ss:$2 sm:$0xff] %v854_v20  ;;  %v773_v26 = vld.sshfl [vmem:[#allocation1 + $0x10] sm:$0xff pattern:$0x75316420] }
  0xca   : > { %864 = vst [vmem:[#allocation1 + $0x1] ss:$2 sm:$0xff] %v855_v21  ;;  %v776_v27 = vpack.c.bf16 %v773_v26, %v772_v15 }
  0xcb   : > { %817 = vst [vmem:[#allocation1 + $0x10] ss:$2 sm:$0xff] %v807_v23 }
  0xcc   : > { %819 = vst [vmem:[#allocation1 + $0x11] ss:$2 sm:$0xff] %v808_v25  ;;  %1692 = vmatmul.msk.bf16.vlgmr.msrb.gmra.mxu1 %vm442_vm0, %v776_v27  ;;  %v1076_v25 = vld [vmem:[%s2129_s9 + $0x8] sm:$0xf] }
  0xcd   : > { %v1082_v26 = vunpack.c.l.b16 %v1076_v25 }
  0xce   : > { %v702_v52 = vpop.f32.mrf.mxu3 }
  0xcf   : > { %v707_v58 = vadd.f32 %v702_v52, %v657_v54 }
  0xd1   : > { %v869_v30 = vld.sshfl [vmem:[#allocation1] sm:$0xff pattern:$0x75316420]  ;;  %v750_v53 = vpop.f32.mrf.mxu0 }
  0xd2   : > { %910 = vst [vmem:[#allocation1] ss:$2 sm:$0xff] %v902_v28  ;;  %v755_v60 = vadd.f32 %v750_v53, %v707_v58  ;;  %v1084_v28 = vpack.c.b16 %v1082_v26, %v1082_v26  ;;  %v1132_v53 = vld [vmem:[#allocation2] sm:$0xf]  ;;  %v1135_v58 = vld [vmem:[#allocation2 + $0x30] sm:$0xf] }
  0xd3   : > { %912 = vst [vmem:[#allocation1 + $0x1] ss:$2 sm:$0xff] %v903_v29  ;;  %v821_v33 = vld.sshfl [vmem:[#allocation1 + $0x10] sm:$0xff pattern:$0x75316420] }
  0xd4   : > { %866 = vst [vmem:[#allocation1 + $0x10] ss:$2 sm:$0xff] %v856_v31  ;;  %v824_v34 = vpack.c.bf16 %v821_v33, %v820_v22  ;;  %v1092_v29 = vsel %vm1090_vm3, %v1084_v28, 0  ;;  %v1826_v31 = vld [vmem:[%s2127_s7] ss:$0 sm:$0xff] }
  0xd5   : > { %868 = vst [vmem:[#allocation1 + $0x11] ss:$2 sm:$0xff] %v857_v32  ;;  %1100 = vmatpush.bf16.msra.mxu2 %v1092_v29  ;;  %v1827_v32 = vld [vmem:[%s2128_s8] ss:$0 sm:$0xff] }
  0xd6   : > { %1699 = vmatmul.msk.bf16.vlgmr.msrb.gmra.mxu2 %vm442_vm0, %v824_v34  ;;  %v704_v57 = vpop.f32.mrf.mxu3  ;;  %v1828_v26 = vld [vmem:[%s2130_s10] ss:$0 sm:$0xff] }
  0xd7   : > { %v708_v2 = vadd.f32 %v704_v57, %v659_v62  ;;  %v1134_v57 = vld [vmem:[#allocation2 + $0x20] sm:$0xf]  ;;  %v1155_v62 = vld [vmem:[#allocation2 + $0x14] sm:$0xf] }
  0xd9   : > { %v752_v59 = vpop.f32.mrf.mxu0 }
  0xda   : > { %v917_v37 = vld.sshfl [vmem:[#allocation1] sm:$0xff pattern:$0x75316420]  ;;  %v756_v6 = vadd.f32 %v752_v59, %v708_v2 }
  0xdb   : > { %958 = vst [vmem:[#allocation1] ss:$2 sm:$0xff] %v950_v35 }
  0xdc   : > { %960 = vst [vmem:[#allocation1 + $0x1] ss:$2 sm:$0xff] %v951_v36  ;;  %v870_v40 = vld.sshfl [vmem:[#allocation1 + $0x10] sm:$0xff pattern:$0x75316420] }
  0xdd   : > { %914 = vst [vmem:[#allocation1 + $0x10] ss:$2 sm:$0xff] %v904_v38  ;;  %v873_v41 = vpack.c.bf16 %v870_v40, %v869_v30  ;;  %v1801_v30 = vld [vmem:[%s2129_s9] sm:$0xff]  ;;  %v1048_v40 = vrot.slane %v1827_v32, 4 }
  0xde   : > { %916 = vst [vmem:[#allocation1 + $0x11] ss:$2 sm:$0xff] %v905_v39  ;;  %1101 = vmatpush.bf16.msra.mxu2 %v1801_v30  ;;  %v1038_v39 = vrot.slane %v1826_v31, 4 }
  0xdf   : > { %1706 = vmatmul.msk.bf16.vlgmr.msrb.gmra.mxu3 %vm442_vm0, %v873_v41 }
  0xe3   : > { %v965_v46 = vld.sshfl [vmem:[#allocation1] sm:$0xff pattern:$0x75316420] }
  0xe5   : > { %v918_v44 = vld.sshfl [vmem:[#allocation1 + $0x10] sm:$0xff pattern:$0x75316420] }
  0xe6   : > { %962 = vst [vmem:[#allocation1 + $0x10] ss:$2 sm:$0xff] %v952_v42  ;;  %v921_v45 = vpack.c.bf16 %v918_v44, %v917_v37 }
  0xe7   : > { %964 = vst [vmem:[#allocation1 + $0x11] ss:$2 sm:$0xff] %v953_v43 }
  0xe8   : > { %1713 = vmatmul.msk.bf16.vlgmr.msra.gmra.mxu0 %vm442_vm0, %v921_v45 }
  0xee   : > { %v966_v47 = vld.sshfl [vmem:[#allocation1 + $0x10] sm:$0xff pattern:$0x75316420] }
  0xef   : > { %v969_v48 = vpack.c.bf16 %v966_v47, %v965_v46 }
  0xf1   : > { %1720 = vmatmul.msk.bf16.vlgmr.msra.gmra.mxu1 %vm442_vm0, %v969_v48 }
 0x149   : > { %v798_v56 = vpop.f32.mrf.mxu1 }
 0x14a   : > { %v803_v0 = vadd.f32 %v798_v56, %v755_v60 }
 0x151   : > { %v800_v1 = vpop.f32.mrf.mxu1 }
 0x152   : > { %v804_v8 = vadd.f32 %v800_v1, %v756_v6  ;;  %v1157_v1 = vld [vmem:[#allocation2 + $0x34] sm:$0xf]  ;;  %v1225_v6 = vld [vmem:[#allocation2 + $0x28] sm:$0xf] }
 0x159   : > { %v846_v61 = vpop.f32.mrf.mxu2 }
 0x15a   : > { %v851_v3 = vadd.f32 %v846_v61, %v803_v0  ;;  %v1154_v61 = vld [vmem:[#allocation2 + $0x4] sm:$0xf] }
 0x15b   : > { %v1156_v0 = vld [vmem:[#allocation2 + $0x24] sm:$0xf] }
 0x161   : > { %v848_v7 = vpop.f32.mrf.mxu2 }
 0x162   : > { %v895_v63 = vpop.f32.mrf.mxu3  ;;  %v852_v12 = vadd.f32 %v848_v7, %v804_v8  ;;  %v1226_v7 = vld [vmem:[#allocation2 + $0x38] sm:$0xf] }
 0x163   : > { %v900_v5 = vadd.f32 %v895_v63, %v851_v3  ;;  %v1223_v3 = vld [vmem:[#allocation2 + $0x8] sm:$0xf] }
 0x165   : > { %v943_v4 = vpop.f32.mrf.mxu0 }
 0x166   : > { %v948_v9 = vadd.f32 %v943_v4, %v900_v5  ;;  %v1224_v4 = vld [vmem:[#allocation2 + $0x18] sm:$0xf] }
 0x16a   : > { %v897_v10 = vpop.f32.mrf.mxu3 }
 0x16b   : > { %v901_v14 = vadd.f32 %v897_v10, %v852_v12  ;;  %v1272_v10 = vld [vmem:[#allocation2 + $0x50] sm:$0xf]  ;;  %v1273_v12 = vld [vmem:[#allocation2 + $0x60] sm:$0xf] }
 0x16d   : > { %v945_v16 = vpop.f32.mrf.mxu0 }
 0x16e   : > { %v991_v11 = vpop.f32.mrf.mxu1  ;;  %v949_v17 = vadd.f32 %v945_v16, %v901_v14  ;;  %v1274_v14 = vld [vmem:[#allocation2 + $0x70] sm:$0xf] }
 0x16f   : > { %v996_v13 = vadd.f32 %v991_v11, %v948_v9  ;;  %v1271_v9 = vld [vmem:[#allocation2 + $0x40] sm:$0xf] }
 0x171   : > { %v1000_v15 = vrot.slane %v996_v13, 4  ;;  %1002 = vst [vmem:[#allocation1] ss:$2 sm:$0xff] %v996_v13  ;;  %v1803_v13 = vld [vmem:[%s2132_s12 + $0x8] sm:$0xff] }
 0x172   : > { %1193 = vmatpush.bf16.msra.mxu3 %v1803_v13 }
 0x173   : > { %1005 = vst [vmem:[#allocation1 + $0x10] ss:$2 sm:$0xff] %v1000_v15 }
 0x176   : > { %v993_v18 = vpop.f32.mrf.mxu1 }
 0x177   : > { %v997_v19 = vadd.f32 %v993_v18, %v949_v17  ;;  %v1802_v17 = vld [vmem:[%s2132_s12] sm:$0xff] }
 0x178   : > { %v1003_v20 = vld.sshfl [vmem:[#allocation1] sm:$0xff pattern:$0x75316420]  ;;  %1216 = vmatpush.bf16.msrb.mxu0 %v1802_v17 }
 0x179   : > { %v1001_v21 = vrot.slane %v997_v19, 4  ;;  %1008 = vst [vmem:[#allocation1 + $0x20] ss:$2 sm:$0xff] %v997_v19  ;;  %1013 = vrot.lane.b32.xlu0 %v1003_v20, %s1839_s14  ;;  %v1805_v19 = vld [vmem:[%s2132_s12 + $0x18] sm:$0xff]  ;;  %v1804_v20 = vld [vmem:[%s2132_s12 + $0x10] sm:$0xff] }
 0x17a   : > { %v1006_v22 = vld.sshfl [vmem:[#allocation1 + $0x10] sm:$0xff pattern:$0x75316420]  ;;  %1310 = vmatpush.bf16.msrb.mxu2 %v1805_v19  ;;  %1262 = vmatpush.bf16.msrb.mxu1 %v1804_v20 }
 0x17b   : > { %1011 = vst [vmem:[#allocation1 + $0x30] ss:$2 sm:$0xff] %v1001_v21  ;;  %v1806_v21 = vld [vmem:[%s2132_s12 + $0x20] sm:$0xff] }
 0x17c   : > { %1358 = vmatpush.bf16.msrb.mxu3 %v1806_v21 }
 0x180   : > { %v1009_v23 = vld.sshfl [vmem:[#allocation1 + $0x20] sm:$0xff pattern:$0x75316420] }
 0x181   : > { %1015 = vrot.lane.b32.xlu0 %v1006_v22, %s1839_s14  ;;  %1017 = vrot.lane.b32.xlu1 %v1009_v23, %s1839_s14 }
 0x182   : > { %v1012_v24 = vld.sshfl [vmem:[#allocation1 + $0x30] sm:$0xff pattern:$0x75316420] }
 0x189   : > { %1019 = vrot.lane.b32.xlu1 %v1012_v24, %s1839_s14 }
 0x1eb   : > { %v1014_v27 = vpop.permute.xlu0 %1013 }
 0x1ec   : > { %1026 = vst.msk [vmem:[%s1932_s18] sm:$0xf] %vm1025_vm2, %v1014_v27  ;;  %v1829_v27 = vld [vmem:[%s2131_s11] ss:$0 sm:$0xff] }
 0x1f3   : > { %v1030_v33 = vld [vmem:[%s1932_s18] sm:$0xf]  ;;  %v1016_v34 = vpop.permute.xlu0 %1015  ;;  %v1018_v35 = vpop.permute.xlu1 %1017 }
 0x1f4   : > { %v1040_v36 = vmul.f32 %v1826_v31, %v1030_v33  ;;  %1027 = vst.msk [vmem:[%s1932_s18 + $0x4] sm:$0xf] %vm1025_vm2, %v1016_v34 }
 0x1f5   : > { %1028 = vst.msk [vmem:[%s1932_s18 + $0x8] sm:$0xf] %vm1025_vm2, %v1018_v35 }
 0x1f6   : > { %v1050_v37 = vadd.f32 %v1827_v32, %v1040_v36 }
 0x1f8   : > { %v1054_v38 = vmax.f32 %v1050_v37, 0.0  ;;  %v1808_v37 = vld [vmem:[%s2132_s12 + $0x30] sm:$0xff] }
 0x1f9   : > { %1454 = vmatpush.bf16.msra.mxu1 %v1808_v37 }
 0x1fa   : > { %1062 = vst [vmem:[#allocation1] ss:$2 sm:$0xff] %v1054_v38  ;;  %v1809_v38 = vld [vmem:[%s2132_s12 + $0x38] sm:$0xff] }
 0x1fb   : > { %v1031_v41 = vld [vmem:[%s1932_s18 + $0x4] sm:$0xf]  ;;  %v1020_v42 = vpop.permute.xlu1 %1019 }
 0x1fc   : > { %v1041_v43 = vmul.f32 %v1038_v39, %v1031_v41  ;;  %v1032_v44 = vld [vmem:[%s1932_s18 + $0x8] sm:$0xf]  ;;  %1029 = vst.msk [vmem:[%s1932_s18 + $0xc] sm:$0xf] %vm1025_vm2, %v1020_v42 }
 0x1fd   : > { %v1042_v45 = vmul.f32 %v1826_v31, %v1032_v44  ;;  %v1807_v31 = vld [vmem:[%s2132_s12 + $0x28] sm:$0xff] }
 0x1fe   : > { %v1051_v46 = vadd.f32 %v1048_v40, %v1041_v43  ;;  %1406 = vmatpush.bf16.msra.mxu0 %v1807_v31  ;;  %v1810_v43 = vld [vmem:[%s2132_s12 + $0x40] sm:$0xff] }
 0x1ff   : > { %v1052_v47 = vadd.f32 %v1827_v32, %v1042_v45  ;;  %v1367_v45 = vld [vmem:[#allocation2 + $0x48] sm:$0xf] }
 0x200   : > { %v1055_v48 = vmax.f32 %v1051_v46, 0.0  ;;  %v1368_v46 = vld [vmem:[#allocation2 + $0x58] sm:$0xf] }
 0x201   : > { %v1056_v49 = vmax.f32 %v1052_v47, 0.0 }
 0x202   : > { %1064 = vst [vmem:[#allocation1 + $0x1] ss:$2 sm:$0xff] %v1055_v48 }
 0x203   : > { %1066 = vst [vmem:[#allocation1 + $0x10] ss:$2 sm:$0xff] %v1056_v49  ;;  %v1033_v50 = vld [vmem:[%s1932_s18 + $0xc] sm:$0xf]  ;;  %v1369_v49 = vld [vmem:[#allocation2 + $0x68] sm:$0xf] }
 0x204   : > { %v1043_v51 = vmul.f32 %v1038_v39, %v1033_v50  ;;  %v1370_v50 = vld [vmem:[#allocation2 + $0x78] sm:$0xf] }
 0x206   : > { %v1053_v52 = vadd.f32 %v1048_v40, %v1043_v51 }
 0x208   : > { %v1057_v54 = vmax.f32 %v1053_v52, 0.0  ;;  %v1415_v52 = vld [vmem:[#allocation2 + $0x80] sm:$0xf] }
 0x209   : > { %v1069_v56 = vld.sshfl [vmem:[#allocation1] sm:$0xff pattern:$0x75316420] }
 0x20a   : > { %1068 = vst [vmem:[#allocation1 + $0x11] ss:$2 sm:$0xff] %v1057_v54  ;;  %v1416_v54 = vld [vmem:[#allocation2 + $0x90] sm:$0xf] }
 0x20b   : > { %1140 = vst [vmem:[#allocation1] ss:$2 sm:$0xff] %v1132_v53 }
 0x20c   : > { %1142 = vst [vmem:[#allocation1 + $0x1] ss:$2 sm:$0xff] %v1133_v55 }
 0x211   : > { %v1070_v59 = vld.sshfl [vmem:[#allocation1 + $0x10] sm:$0xff pattern:$0x75316420] }
 0x212   : > { %v1073_v60 = vpack.c.bf16 %v1070_v59, %v1069_v56  ;;  %1144 = vst [vmem:[#allocation1 + $0x10] ss:$2 sm:$0xff] %v1134_v57  ;;  %v1417_v56 = vld [vmem:[#allocation2 + $0xa0] sm:$0xf]  ;;  %v1418_v57 = vld [vmem:[#allocation2 + $0xb0] sm:$0xf] }
 0x213   : > { %1146 = vst [vmem:[#allocation1 + $0x11] ss:$2 sm:$0xff] %v1135_v58  ;;  %v1147_v63 = vld.sshfl [vmem:[#allocation1] sm:$0xff pattern:$0x75316420] }
 0x214   : > { %1725 = vmatmul.msk.bf16.vlgmr.msra.gmra.mxu2 %vm1086_vm4, %v1073_v60  ;;  %1162 = vst [vmem:[#allocation1] ss:$2 sm:$0xff] %v1154_v61  ;;  %v1463_v59 = vld [vmem:[#allocation2 + $0x84] sm:$0xf]  ;;  %v1464_v61 = vld [vmem:[#allocation2 + $0x94] sm:$0xf] }
 0x215   : > { %1164 = vst [vmem:[#allocation1 + $0x1] ss:$2 sm:$0xff] %v1155_v62  ;;  %1502 = vmatpush.bf16.msra.mxu2 %v1809_v38 }
 0x21a   : > { %v1148_v2 = vld.sshfl [vmem:[#allocation1 + $0x10] sm:$0xff pattern:$0x75316420] }
 0x21b   : > { %1166 = vst [vmem:[#allocation1 + $0x10] ss:$2 sm:$0xff] %v1156_v0  ;;  %v1151_v18 = vpack.c.bf16 %v1148_v2, %v1147_v63  ;;  %v1465_v63 = vld [vmem:[#allocation2 + $0xa4] sm:$0xf]  ;;  %v1466_v0 = vld [vmem:[#allocation2 + $0xb4] sm:$0xf] }
 0x21c   : > { %1168 = vst [vmem:[#allocation1 + $0x11] ss:$2 sm:$0xff] %v1157_v1  ;;  %v1169_v5 = vld.sshfl [vmem:[#allocation1] sm:$0xff pattern:$0x75316420] }
 0x21d   : > { %1231 = vst [vmem:[#allocation1] ss:$2 sm:$0xff] %v1223_v3  ;;  %1737 = vmatmul.msk.bf16.vlgmr.msrb.gmra.mxu0 %vm442_vm0, %v1151_v18  ;;  %v1511_v2 = vld [vmem:[#allocation2 + $0x88] sm:$0xf] }
 0x21e   : > { %1233 = vst [vmem:[#allocation1 + $0x1] ss:$2 sm:$0xff] %v1224_v4  ;;  %v1512_v4 = vld [vmem:[#allocation2 + $0x98] sm:$0xf] }
 0x223   : > { %v1170_v8 = vld.sshfl [vmem:[#allocation1 + $0x10] sm:$0xff pattern:$0x75316420] }
 0x224   : > { %1235 = vst [vmem:[#allocation1 + $0x10] ss:$2 sm:$0xff] %v1225_v6  ;;  %v1173_v16 = vpack.c.bf16 %v1170_v8, %v1169_v5  ;;  %v1513_v6 = vld [vmem:[#allocation2 + $0xa8] sm:$0xf] }
 0x225   : > { %1237 = vst [vmem:[#allocation1 + $0x11] ss:$2 sm:$0xff] %v1226_v7  ;;  %v1238_v11 = vld.sshfl [vmem:[#allocation1] sm:$0xff pattern:$0x75316420] }
 0x226   : > { %1279 = vst [vmem:[#allocation1] ss:$2 sm:$0xff] %v1271_v9  ;;  %1732 = vmatmul.msk.bf16.vlgmr.msra.gmra.mxu3 %vm442_vm0, %v1173_v16  ;;  %v1514_v7 = vld [vmem:[#allocation2 + $0xb8] sm:$0xf] }
 0x227   : > { %1281 = vst [vmem:[#allocation1 + $0x1] ss:$2 sm:$0xff] %v1272_v10  ;;  %1550 = vmatpush.bf16.msra.mxu3 %v1810_v43 }
 0x22c   : > { %v1239_v15 = vld.sshfl [vmem:[#allocation1 + $0x10] sm:$0xff pattern:$0x75316420] }
 0x22d   : > { %1283 = vst [vmem:[#allocation1 + $0x10] ss:$2 sm:$0xff] %v1273_v12  ;;  %v1242_v24 = vpack.c.bf16 %v1239_v15, %v1238_v11 }
 0x22e   : > { %1285 = vst [vmem:[#allocation1 + $0x11] ss:$2 sm:$0xff] %v1274_v14  ;;  %v1286_v22 = vld.sshfl [vmem:[#allocation1] sm:$0xff pattern:$0x75316420] }
 0x22f   : > { %1744 = vmatmul.msk.bf16.vlgmr.msrb.gmra.mxu1 %vm442_vm0, %v1242_v24 }
 0x235   : > { %v1287_v23 = vld.sshfl [vmem:[#allocation1 + $0x10] sm:$0xff pattern:$0x75316420] }
 0x236   : > { %v1290_v25 = vpack.c.bf16 %v1287_v23, %v1286_v22 }
 0x238   : > { %1751 = vmatmul.msk.bf16.vlgmr.msrb.gmra.mxu2 %vm442_vm0, %v1290_v25 }
 0x297   : > { %v1103_v28 = vpop.f32.mrf.mxu2 }
 0x298   : > { %v1112_v29 = vmul.f32 %v1828_v26, %v1103_v28 }
 0x29a   : > { %v1118_v30 = vadd.f32 %v1829_v27, %v1112_v29  ;;  %v1218_v14 = vpop.f32.mrf.mxu0 }
 0x29c   : > { %v1120_v32 = vmax.f32 %v1118_v30, 0.0 }
 0x29e   : > { %v1124_v33 = vrot.slane %v1120_v32, 4  ;;  %1128 = vst.msk [vmem:[#allocation2 + $0x44] sm:$0xf] %vm444_vm1, %v1120_v32 }
 0x29f   : > { %v1105_v34 = vpop.f32.mrf.mxu2 }
 0x2a0   : > { %1129 = vst.msk [vmem:[#allocation2 + $0x54] sm:$0xf] %vm444_vm1, %v1124_v33  ;;  %v1113_v35 = vmul.f32 %v1828_v26, %v1105_v34 }
 0x2a2   : > { %v1119_v36 = vadd.f32 %v1829_v27, %v1113_v35  ;;  %v1220_v19 = vpop.f32.mrf.mxu0 }
 0x2a4   : > { %v1121_v39 = vmax.f32 %v1119_v36, 0.0 }
 0x2a5   : > { %v1319_v40 = vld [vmem:[#allocation2 + $0x44] sm:$0xf] }
 0x2a6   : > { %v1125_v41 = vrot.slane %v1121_v39, 4  ;;  %1130 = vst.msk [vmem:[#allocation2 + $0x64] sm:$0xf] %vm444_vm1, %v1121_v39 }
 0x2a7   : > { %v1320_v42 = vld [vmem:[#allocation2 + $0x54] sm:$0xf]  ;;  %1327 = vst [vmem:[#allocation1] ss:$2 sm:$0xff] %v1319_v40 }
 0x2a8   : > { %1131 = vst.msk [vmem:[#allocation2 + $0x74] sm:$0xf] %vm444_vm1, %v1125_v41 }
 0x2a9   : > { %1329 = vst [vmem:[#allocation1 + $0x1] ss:$2 sm:$0xff] %v1320_v42  ;;  %v1195_v13 = vpop.f32.mrf.mxu3 }
 0x2aa   : > { %v1219_v18 = vadd.f32 %v1218_v14, %v1195_v13 }
 0x2ac   : > { %v1264_v16 = vpop.f32.mrf.mxu1 }
 0x2ad   : > { %v1321_v44 = vld [vmem:[#allocation2 + $0x64] sm:$0xf]  ;;  %v1269_v22 = vadd.f32 %v1264_v16, %v1219_v18 }
 0x2ae   : > { %1331 = vst [vmem:[#allocation1 + $0x10] ss:$2 sm:$0xff] %v1321_v44 }
 0x2af   : > { %v1322_v47 = vld [vmem:[#allocation2 + $0x74] sm:$0xf] }
 0x2b0   : > { %1333 = vst [vmem:[#allocation1 + $0x11] ss:$2 sm:$0xff] %v1322_v47  ;;  %v1334_v48 = vld.sshfl [vmem:[#allocation1] sm:$0xff pattern:$0x75316420] }
 0x2b1   : > { %1375 = vst [vmem:[#allocation1] ss:$2 sm:$0xff] %v1367_v45  ;;  %v1197_v15 = vpop.f32.mrf.mxu3 }
 0x2b2   : > { %1377 = vst [vmem:[#allocation1 + $0x1] ss:$2 sm:$0xff] %v1368_v46  ;;  %v1221_v25 = vadd.f32 %v1220_v19, %v1197_v15 }
 0x2b4   : > { %v1266_v21 = vpop.f32.mrf.mxu1 }
 0x2b5   : > { %v1270_v30 = vadd.f32 %v1266_v21, %v1221_v25 }
 0x2b7   : > { %v1335_v51 = vld.sshfl [vmem:[#allocation1 + $0x10] sm:$0xff pattern:$0x75316420] }
 0x2b8   : > { %v1338_v53 = vpack.c.bf16 %v1335_v51, %v1334_v48  ;;  %1379 = vst [vmem:[#allocation1 + $0x10] ss:$2 sm:$0xff] %v1369_v49 }
 0x2b9   : > { %1381 = vst [vmem:[#allocation1 + $0x11] ss:$2 sm:$0xff] %v1370_v50  ;;  %v1382_v55 = vld.sshfl [vmem:[#allocation1] sm:$0xff pattern:$0x75316420] }
 0x2ba   : > { %1758 = vmatmul.msk.bf16.vlgmr.msrb.gmra.mxu3 %vm442_vm0, %v1338_v53  ;;  %1423 = vst [vmem:[#allocation1] ss:$2 sm:$0xff] %v1415_v52 }
 0x2bb   : > { %1425 = vst [vmem:[#allocation1 + $0x1] ss:$2 sm:$0xff] %v1416_v54  ;;  %v1312_v17 = vpop.f32.mrf.mxu2 }
 0x2bc   : > { %v1317_v24 = vadd.f32 %v1312_v17, %v1269_v22 }
 0x2c0   : > { %v1383_v58 = vld.sshfl [vmem:[#allocation1 + $0x10] sm:$0xff pattern:$0x75316420] }
 0x2c1   : > { %v1386_v60 = vpack.c.bf16 %v1383_v58, %v1382_v55  ;;  %1427 = vst [vmem:[#allocation1 + $0x10] ss:$2 sm:$0xff] %v1417_v56 }
 0x2c2   : > { %1429 = vst [vmem:[#allocation1 + $0x11] ss:$2 sm:$0xff] %v1418_v57  ;;  %v1430_v62 = vld.sshfl [vmem:[#allocation1] sm:$0xff pattern:$0x75316420] }
 0x2c3   : > { %1765 = vmatmul.msk.bf16.vlgmr.msra.gmra.mxu0 %vm442_vm0, %v1386_v60  ;;  %1471 = vst [vmem:[#allocation1] ss:$2 sm:$0xff] %v1463_v59  ;;  %v1314_v23 = vpop.f32.mrf.mxu2 }
 0x2c4   : > { %1473 = vst [vmem:[#allocation1 + $0x1] ss:$2 sm:$0xff] %v1464_v61  ;;  %v1318_v33 = vadd.f32 %v1314_v23, %v1270_v30 }
 0x2c9   : > { %v1431_v1 = vld.sshfl [vmem:[#allocation1 + $0x10] sm:$0xff pattern:$0x75316420] }
 0x2ca   : > { %v1434_v3 = vpack.c.bf16 %v1431_v1, %v1430_v62  ;;  %1475 = vst [vmem:[#allocation1 + $0x10] ss:$2 sm:$0xff] %v1465_v63 }
 0x2cb   : > { %1477 = vst [vmem:[#allocation1 + $0x11] ss:$2 sm:$0xff] %v1466_v0  ;;  %v1478_v5 = vld.sshfl [vmem:[#allocation1] sm:$0xff pattern:$0x75316420] }
 0x2cc   : > { %1772 = vmatmul.msk.bf16.vlgmr.msra.gmra.mxu1 %vm442_vm0, %v1434_v3  ;;  %1519 = vst [vmem:[#allocation1] ss:$2 sm:$0xff] %v1511_v2 }
 0x2cd   : > { %1521 = vst [vmem:[#allocation1 + $0x1] ss:$2 sm:$0xff] %v1512_v4 }
 0x2d2   : > { %v1479_v8 = vld.sshfl [vmem:[#allocation1 + $0x10] sm:$0xff pattern:$0x75316420] }
 0x2d3   : > { %v1482_v9 = vpack.c.bf16 %v1479_v8, %v1478_v5  ;;  %1523 = vst [vmem:[#allocation1 + $0x10] ss:$2 sm:$0xff] %v1513_v6 }
 0x2d4   : > { %1525 = vst [vmem:[#allocation1 + $0x11] ss:$2 sm:$0xff] %v1514_v7  ;;  %v1526_v10 = vld.sshfl [vmem:[#allocation1] sm:$0xff pattern:$0x75316420] }
 0x2d5   : > { %1779 = vmatmul.msk.bf16.vlgmr.msra.gmra.mxu2 %vm442_vm0, %v1482_v9 }
 0x2db   : > { %v1527_v11 = vld.sshfl [vmem:[#allocation1 + $0x10] sm:$0xff pattern:$0x75316420] }
 0x2dc   : > { %v1530_v12 = vpack.c.bf16 %v1527_v11, %v1526_v10 }
 0x2de   : > { %1786 = vmatmul.msk.bf16.vlgmr.msra.gmra.mxu3 %vm442_vm0, %v1530_v12 }
 0x33d   : > { %v1360_v20 = vpop.f32.mrf.mxu3 }
 0x33e   : > { %v1365_v27 = vadd.f32 %v1360_v20, %v1317_v24 }
 0x340   : > { %v1408_v26 = vpop.f32.mrf.mxu0 }
 0x341   : > { %v1413_v32 = vadd.f32 %v1408_v26, %v1365_v27 }
 0x345   : > { %v1362_v28 = vpop.f32.mrf.mxu3 }
 0x346   : > { %v1366_v35 = vadd.f32 %v1362_v28, %v1318_v33 }
 0x348   : > { %v1410_v37 = vpop.f32.mrf.mxu0 }
 0x349   : > { %v1456_v29 = vpop.f32.mrf.mxu1  ;;  %v1414_v41 = vadd.f32 %v1410_v37, %v1366_v35 }
 0x34a   : > { %v1461_v34 = vadd.f32 %v1456_v29, %v1413_v32 }
 0x351   : > { %v1458_v40 = vpop.f32.mrf.mxu1 }
 0x352   : > { %v1462_v44 = vadd.f32 %v1458_v40, %v1414_v41 }
 0x358   : > { %v1504_v31 = vpop.f32.mrf.mxu2 }
 0x359   : > { %v1509_v36 = vadd.f32 %v1504_v31, %v1461_v34 }
 0x360   : > { %v1506_v43 = vpop.f32.mrf.mxu2 }
 0x361   : > { %v1552_v38 = vpop.f32.mrf.mxu3  ;;  %v1510_v45 = vadd.f32 %v1506_v43, %v1462_v44 }
 0x362   : > { %v1557_v39 = vadd.f32 %v1552_v38, %v1509_v36 }
 0x364   : > { %v1561_v42 = vrot.slane %v1557_v39, 4  ;;  %1563 = vst [vmem:[#allocation1] ss:$2 sm:$0xff] %v1557_v39 }
 0x366   : > { %1566 = vst [vmem:[#allocation1 + $0x10] ss:$2 sm:$0xff] %v1561_v42 }
 0x369   : > { %v1554_v46 = vpop.f32.mrf.mxu3 }
 0x36a   : > { %v1558_v47 = vadd.f32 %v1554_v46, %v1510_v45 }
 0x36b   : > { %v1564_v48 = vld.sshfl [vmem:[#allocation1] sm:$0xff pattern:$0x75316420] }
 0x36c   : > { %v1562_v49 = vrot.slane %v1558_v47, 4  ;;  %1569 = vst [vmem:[#allocation1 + $0x20] ss:$2 sm:$0xff] %v1558_v47  ;;  %1574 = vrot.lane.b32.xlu2 %v1564_v48, %s1840_s15 }
 0x36d   : > { %v1567_v50 = vld.sshfl [vmem:[#allocation1 + $0x10] sm:$0xff pattern:$0x75316420] }
 0x36e   : > { %1572 = vst [vmem:[#allocation1 + $0x30] ss:$2 sm:$0xff] %v1562_v49 }
 0x373   : > { %v1570_v51 = vld.sshfl [vmem:[#allocation1 + $0x20] sm:$0xff pattern:$0x75316420] }
 0x374   : > { %1576 = vrot.lane.b32.xlu2 %v1567_v50, %s1840_s15  ;;  %1578 = vrot.lane.b32.xlu0 %v1570_v51, %s1840_s15 }
 0x375   : > { %v1573_v52 = vld.sshfl [vmem:[#allocation1 + $0x30] sm:$0xff pattern:$0x75316420] }
 0x376   : > { %1580 = vrot.lane.b32.xlu1 %v1573_v52, %s1840_s15 }
 0x3c6   : > { %v1575_v53 = vpop.permute.xlu2 %1574 }
 0x3c7   : > { %1587 = vst.msk [vmem:[%s1932_s18] sm:$0xf] %vm1586_vm5, %v1575_v53 }
 0x3ce   : > { %v1577_v54 = vpop.permute.xlu2 %1576 }
 0x3cf   : > { %1588 = vst.msk [vmem:[%s1932_s18 + $0x4] sm:$0xf] %vm1586_vm5, %v1577_v54 }
 0x3e6   : > { %v1579_v55 = vpop.permute.xlu0 %1578 }
 0x3e7   : > { %1589 = vst.msk [vmem:[%s1932_s18 + $0x8] sm:$0xf] %vm1586_vm5, %v1579_v55 }
 0x3e8   : > { %v1581_v56 = vpop.permute.xlu1 %1580 }
 0x3e9   : > { %1590 = vst.msk [vmem:[%s1932_s18 + $0xc] sm:$0xf] %vm1586_vm5, %v1581_v56 }
 0x3ea PF: > { %s23_s25 = sadd.s32 1, %s1836_s25  }
 0x3eb   : > { %p20_p4 = scmp.ge.s32.totalorder %s23_s25, 4  }
 0x3ed   :  { %22 = sbr.rel (!%p20_p4) target bundleno = 1 (0x1), region = 186 }

// kernel: backbone_forward.17
= control target key start
LH: loop header
LB: loop body
LE: loop exit
PB: predicated region body
PF: predicated region fallthrough
CT: control target
= control target key end

     0   :  { %8 = vsyncpa [#allocation3], 0  ;;  %s494_s0 = inlined_call_operand.vmem [shape: f32[32,32], index: 0, kind: input, shape index: {}]   ;;  %s495_s1 = inlined_call_operand.vmem [shape: f32[1,32], index: 1, kind: input, shape index: {}]   ;;  %s496_s2 = inlined_call_operand.vmem [shape: f32[1,32], index: 2, kind: input, shape index: {}]   ;;  %s497_s3 = inlined_call_operand.hbm [shape: f32[32,32], index: 3, kind: output, shape index: {}]  }
   0x1   :  { %10 = vsyncpa [#allocation3 + $0x1], 0  ;;  %s409_s12 = smov 0   ;;  %s411_s13 = smov 0  }
   0x2   :  { %s413_s14 = smov 0   ;;  %s415_s15 = smov 0  }
   0x3 LB: > { %s266_s16 = sadd.s32 4294967295, %s385_s15   ;;  %s267_s17 = sadd.s32 4294967294, %s385_s15   ;;  %s385_s15 = sphi %s415_s15, %s503_s15   ;;  %s381_s14 = sphi %s413_s14, %s502_s14   ;;  %s377_s13 = sphi %s411_s13, %s501_s13   ;;  %s373_s12 = sphi %s409_s12, %s500_s12  }
   0x4   : > { %s432_s18 = sadd.s32 1, %s385_s15   ;;  %s91_s19 = sadd.s32 1, %s381_s14 }
   0x5   : > { %s88_s20 = ssub.s32 %s385_s15, %s432_s18  ;;  %p101_p0 = scmp.ne.s32.totalorder %s381_s14, %s377_s13 }
   0x6   : > { %p89_p1 = scmp.eq.s32.totalorder %s88_s20, 0  ;;  %p102_p2 = scmp.eq.s32.totalorder %s266_s16, 1 }
   0x7   : > { %p107_p3 = scmp.ne.s32.totalorder %s377_s13, %s373_s12  ;;  %p108_p4 = scmp.eq.s32.totalorder %s267_s17, 1 }
   0x8   : > { %s442_s21 = scalar_select %p89_p1, %s381_s14, %s91_s19  }
   0x9   : > { %p444_p5 = por %p102_p2, %p101_p0  ;;  %p448_p6 = por %p108_p4, %p107_p3 }
   0xa   : > { %p270_p7 = scmp.ge.s32.totalorder %s385_s15, 1  ;;  %p141_p8 = scmp.lt.s32.totalorder %s385_s15, 3 }
   0xc   : > { %p142_p9 = pnand %p270_p7, %p141_p8 }
   0xd   : > { %s162_s24 = sand.u32 (!%p142_p9), 1, %s377_s13   ;;  %s272_s25 = sshll.u32 (!%p142_p9), %s266_s16, 1 }
   0xe   : > { %145 = sbr.rel (%p142_p9) target bundleno = 33 (0x21), region = 32  ;;  %s271_s26 = sshll.u32 (!%p142_p9), %s162_s24, 4 }
   0xf   : > { %p166_p10 = scmp.lt.s32.totalorder (!%p142_p9), %s272_s25, 3  ;;  %s279_s29 = sshll.u32 (!%p142_p9), %s266_s16, 4 }
  0x10   : > { %s201_s11 = scalar_lea.hbm (!%p142_p9), %s497_s3, %s279_s29  ;;  %s164_s17 = scalar_lea.vmem (!%p142_p9), [#allocation2], %s271_s26 }
  0x11   : > { %s202_s19 = sshll.u32 (!%p142_p9), %s164_s17, 4  ;;  %s204_s16 = sshll.u32 (!%p142_p9), %s201_s11, 4  ;;  %s203_s19 = int_to_ptr.vmem [resolvable:$true] %s202_s19  ;;  %s205_s16 = int_to_ptr.hbm [resolvable:$true] %s204_s16 }
  0x12   : > { %s190_s20 = scalar_lea.sflag (!%p142_p9), [#allocation3], %s162_s24  ;;  %s343_s29 = scalar_lea.hbm (!%p142_p9), %s497_s3, 32 }
  0x13   : > { %s505_s25 = smov (!%p166_p10, %s272_s25), 3  ;;  %v321_v0 = vld [vmem:[%s495_s1] ss:$0 sm:$0xff]  ;;  %vm186_vm0 = vcmask 261120  }
  0x14   : > { %s273_s30 = sshll.u32 %s505_s25, 3  ;;  %v322_v1 = vld [vmem:[%s496_s2] ss:$0 sm:$0xff]  ;;  %s337_s25 = sshra.s32 %s205_s16, 4  ;;  %s338_s25 = int_to_ptr.hbm [resolvable:$true] %s337_s25 }
  0x15   : > { %s169_s6 = scalar_lea.vmem %s494_s0, %s273_s30  ;;  %s339_s27 = scalar_lea.hbm %s338_s25, 16 }
  0x16   : > { %v172_v2 = vld [vmem:[%s169_s6] sm:$0xff]  ;;  %v173_v3 = vld [vmem:[%s169_s6 + $0x8] sm:$0xff]  ;;  %p340_p11 = scmp.ne.s32.totalorder %s338_s25, %s339_s27  ;;  %p344_p0 = scmp.lt.s32.totalorder %s338_s25, %s497_s3 }
  0x17   : > { %v178_v4 = vmul.f32 %v321_v0, %v172_v2  ;;  %v179_v5 = vmul.f32 %v321_v0, %v173_v3  ;;  %p345_p1 = scmp.lt.s32.totalorder %s343_s29, %s339_s27 }
  0x18   : > { %p341_p12 = pnand %p340_p11, %p444_p5 }
  0x19   : > { %v184_v6 = vadd.f32 %v322_v1, %v178_v4  ;;  %v185_v7 = vadd.f32 %v322_v1, %v179_v5  ;;  %p346_p2 = por %p345_p1, %p344_p0 }
  0x1a   : > { %p342_p13 = pneg %p341_p12 }
  0x1b   : > { %187 = vst.msk [vmem:[%s164_s17] sm:$0xff] %vm186_vm0, %v184_v6 }
  0x1c   : > { %188 = vst.msk [vmem:[%s164_s17 + $0x8] sm:$0xff] %vm186_vm0, %v185_v7  ;;  %p347_p3 = pnand %p346_p2, %p342_p13 }
  0x1e   : > { %350 = shalt.err (!%p347_p3)
}
  0x1f   : > { %s387_s24 = smov 128   ;;  %s388_s5 = smov 8  }
  0x20   : > { %280 = dma.vmem_to_hbm [thread:$0]  (%p444_p5), %s203_s19, 256, %s205_s16, %s190_s20, %s387_s24, %s387_s24, %s388_s5  }
  0x21 PF: > { %p286_p4 = scmp.ge.s32.totalorder %s385_s15, 2  ;;  %s219_s6 = sand.u32 1, %s373_s12  }
  0x22   : > { %s220_s7 = scalar_lea.sflag [#allocation3], %s219_s6 }
  0x23   : > { %p283_p7 = pnand %p286_p4, %p448_p6 }
  0x25   : > { %p284_p8 = pneg %p283_p7 }
  0x27   : > { %368 = dma.done.wait (%p284_p8), %s220_s7, 256  }
  0x28   : > { %370 = vsyncadd (%p284_p8), %s220_s7, 4294967040  ;;  %p13_p9 = scmp.ge.s32.totalorder %s432_s18, 4   ;;  %s500_s12 = smov %s377_s13 }
  0x29   : > { %s501_s13 = smov %s381_s14  ;;  %s502_s14 = smov %s442_s21 }
  0x2a   : > { %s503_s15 = smov %s432_s18  ;;  %15 = sbr.rel (!%p13_p9) target bundleno = 3 (0x3), region = 67 }
  0x2f   :  { %226 = vsyncpa [#allocation3], 1 }
  0x30   :  { %228 = vsyncpa [#allocation3 + $0x1], 1 }

</bundles_post_ra>
